<compile_context>
chip_gen: v7x
topology: tpu7x:2x2x1
jax: 0.10.0
libtpu: 0.0.40
codegen_flags: <defaults>
</compile_context>

<pallas_src>
import math

import numpy as np
import jax
import jax.numpy as jnp
from jax import lax
from jax.experimental import pallas as pl
from jax.experimental.pallas import tpu as pltpu

# ---------------- synthetic config (consistent with the module) ---------------
CHANNEL_N   = 16        # model.channel_n
HIDDEN      = 64        # model.hidden_size
INPUT_CH    = 2         # model.input_channels
OUTPUT_CH   = 1         # model.output_channels
KERNEL_SIZE = 3         # model.kernel_size
FIRE_RATE   = 0.5       # model.fire_rate
OCTREE_RES  = [(16, 16), (8, 8)]   # model.octree.res_and_steps (finest -> coarsest)
INFER_STEPS = [4, 4]
BN_EPS      = 1e-5


# ------------------------------ small helpers ---------------------------------
def _mod_const(v, m):
    if m & (m - 1) == 0:
        return jnp.bitwise_and(v, m - 1)
    return v % m


def _div_const(v, m):
    if m & (m - 1) == 0:
        return jnp.right_shift(v, int(math.log2(m)))
    return v // m


# ----------------------- fully fused octree Pallas kernel ---------------------
def _make_fused_kernel(level_dims, steps_list):
    """level_dims: [(B, H, W), ...] in EXECUTION order (coarsest -> finest).

    Ref layout (flat, in execution order), all lane-dense:
      per level: orig (C, N) f32 (rows >= INPUT_CH zero), mask (steps, N) f32,
                 pw (C, 9) f32, pb (C, 1) f32, w0 (HIDDEN, 2C) bf16,
                 gamma (HIDDEN, 1) f32, beta (HIDDEN, 1) f32, w1 (C, HIDDEN) bf16
      between levels: U (N_coarse, N_fine) f32 nearest-upsample 0/1 operator
      last ref: out (C, N_finest) f32
    """
    n_levels = len(level_dims)
    kk = KERNEL_SIZE * KERNEL_SIZE

    def kernel(*refs):
        out_ref = refs[-1]
        refs = refs[:-1]
        pin_rows = lax.broadcasted_iota(jnp.int32, (CHANNEL_N, 1), 0) < INPUT_CH

        x = None
        idx = 0
        for e in range(n_levels):
            (orig_ref, mask_ref, pw_ref, pb_ref, w0_ref,
             gamma_ref, beta_ref, w1_ref) = refs[idx:idx + 8]
            idx += 8
            B, H, W = level_dims[e]
            N = B * H * W
            steps = steps_list[e]

            # level entry: init at coarsest, re-inject input channels otherwise
            orig = orig_ref[...]                              # (C, N)
            x = orig if x is None else jnp.where(pin_rows, orig, x)

            # ---- loop-invariant tensors, hoisted out of the step loop -------
            n_idx = lax.broadcasted_iota(jnp.int32, (1, N), 1)
            col = _mod_const(n_idx, W)
            row = _mod_const(_div_const(n_idx, W), H)
            col0, colW = col == 0, col == W - 1
            row0, rowH = row == 0, row == H - 1

            pw = pw_ref[...]                                  # (C, 9)
            pw_full = [jnp.broadcast_to(pw[:, k:k + 1], (CHANNEL_N, N))
                       for k in range(kk)]
            pb_full = jnp.broadcast_to(pb_ref[...], (CHANNEL_N, N))
            w0 = w0_ref[...]
            w1 = w1_ref[...]
            gamma = gamma_ref[...]
            beta = beta_ref[...]

            for s in range(steps):                            # static unroll
                # ---- perceive: depthwise 3x3 reflect conv -------------------
                # shared shifted copies (8 shifts per step instead of 16)
                xl = jnp.roll(x, -1, axis=1)                  # x[:, n+1]
                xr = jnp.roll(x, 1, axis=1)                   # x[:, n-1]
                t_m1 = jnp.where(col0, xl, xr)                # dw = -1 (reflect)
                t_p1 = jnp.where(colW, xr, xl)                # dw = +1 (reflect)
                acc = pb_full
                for wi, t in enumerate((t_m1, x, t_p1)):
                    tu = jnp.roll(t, W, axis=1)               # row i-1
                    td = jnp.roll(t, -W, axis=1)              # row i+1
                    tap_hm = jnp.where(row0, td, tu)          # dh = -1 (reflect)
                    tap_hp = jnp.where(rowH, tu, td)          # dh = +1 (reflect)
                    for hi, tap in enumerate((tap_hm, t, tap_hp)):
                        acc = acc + tap * pw_full[hi * 3 + wi]   # k=(dh+1)*3+(dw+1)
                y = acc                                       # conv(x), (C, N) f32

                # ---- fc0 on concat([x, conv(x)]) (bf16 MXU, f32 accumulate) --
                # (fc0 bias omitted: cancels exactly under batch-stat BN)
                xy = jnp.concatenate(
                    [x.astype(jnp.bfloat16), y.astype(jnp.bfloat16)], axis=0)
                act = jnp.dot(w0, xy, preferred_element_type=jnp.float32)

                # ---- BatchNorm (batch stats over B*H*W) folded + ReLU --------
                mean = jnp.mean(act, axis=1, keepdims=True)
                cent = act - mean
                var = jnp.mean(cent * cent, axis=1, keepdims=True)
                sc = gamma * lax.rsqrt(var + BN_EPS)
                tb = beta - mean * sc
                hn = jnp.maximum(act * sc + tb, 0.0)

                # ---- fc1 (no bias); rows < INPUT_CH of w1 are zeroed on the
                # host, so dx of the input channels is exactly 0 (pinning) ----
                dx = jnp.dot(w1, hn.astype(jnp.bfloat16),
                             preferred_element_type=jnp.float32)

                fire = mask_ref[s:s + 1, :]                   # (1, N), already 0/1
                x = x + dx * fire

            if e < n_levels - 1:
                up_ref = refs[idx]
                idx += 1
                # nearest x2 upsample as an exact 0/1 permutation matmul (MXU)
                x = jnp.dot(x, up_ref[...], preferred_element_type=jnp.float32)

        out_ref[...] = x

    return kernel


# ------------------------------- host wrappers ---------------------------------
def _flatten_to_cn(x_bchw):
    """(B, C, H, W) -> (C, B*H*W), pixels lane-dense, flat order (b, i, j)."""
    B, C, H, W = x_bchw.shape
    return jnp.transpose(x_bchw, (1, 0, 2, 3)).reshape(C, B * H * W)


def _orig_slab(x_nchw, res):
    """Nearest-downscaled input channels, zero-padded to CHANNEL_N rows: (C, N)."""
    B, IC, H0, W0 = x_nchw.shape
    th, tw = res
    ds = x_nchw[:, :, ::H0 // th, ::W0 // tw]      # F.interpolate(mode='nearest')
    slab = _flatten_to_cn(ds)
    pad = jnp.zeros((CHANNEL_N - IC, slab.shape[1]), slab.dtype)
    return jnp.concatenate([slab, pad], axis=0)


def _upsample_matrix(B, h, w, H, W):
    """(B*h*w, B*H*W) 0/1 operator: nearest x(H//h, W//w) upsample in flat layout."""
    fh, fw = H // h, W // w
    U = np.zeros((B * h * w, B * H * W), np.float32)
    for b in range(B):
        for i in range(H):
            for j in range(W):
                U[(b * h + i // fh) * w + j // fw, (b * H + i) * W + j] = 1.0
    return jnp.asarray(U)


@jax.jit
def octree_nca_forward_eval(x_nchw, params_per_level, rng_key):
    """Reproduces OctreeNCA2DPatch2.forward in eval mode (patch_sizes = None)."""
    B, IC, H0, W0 = x_nchw.shape
    assert (H0, W0) == OCTREE_RES[0] and IC == INPUT_CH

    n_levels = len(OCTREE_RES)
    exec_levels = list(range(n_levels - 1, -1, -1))           # coarsest -> finest
    level_dims = tuple((B, *OCTREE_RES[l]) for l in exec_levels)
    steps_list = tuple(INFER_STEPS[l] for l in exec_levels)

    keys = jax.random.split(rng_key, n_levels)

    args = []
    flops = 0
    transcendentals = 0
    for e, l in enumerate(exec_levels):
        Bl, Hl, Wl = level_dims[e]
        N = Bl * Hl * Wl
        steps = steps_list[e]
        p = params_per_level[l]

        orig = _orig_slab(x_nchw, (Hl, Wl)).astype(jnp.float32)
        u = jax.random.uniform(keys[e], (steps, N), jnp.float32)
        fire = (u > FIRE_RATE).astype(jnp.float32)            # torch: rand > fire_rate

        # exact input-channel pinning: zero the fc1 rows of the input channels
        w1 = jnp.asarray(p["w1"], jnp.float32).at[:INPUT_CH, :].set(0.0)

        args += [orig, fire,
                 jnp.asarray(p["pw"], jnp.float32),
                 jnp.asarray(p["pb"], jnp.float32),
                 jnp.asarray(p["w0"], jnp.bfloat16),
                 jnp.asarray(p["gamma"], jnp.float32),
                 jnp.asarray(p["beta"], jnp.float32),
                 w1.astype(jnp.bfloat16)]

        flops += steps * (2 * 9 * CHANNEL_N * N               # depthwise conv
                          + 2 * HIDDEN * 2 * CHANNEL_N * N    # fc0
                          + 2 * CHANNEL_N * HIDDEN * N        # fc1
                          + 8 * HIDDEN * N)                   # BN + ReLU + residual
        transcendentals += steps * HIDDEN

        if e < n_levels - 1:
            nB, nH, nW = level_dims[e + 1]
            args.append(_upsample_matrix(Bl, Hl, Wl, nH, nW))
            flops += 2 * CHANNEL_N * N * (nB * nH * nW)       # upsample matmul

    out_N = B * H0 * W0
    bytes_accessed = sum(a.size * a.dtype.itemsize for a in args)
    bytes_accessed += CHANNEL_N * out_N * 4

    kernel = _make_fused_kernel(level_dims, steps_list)
    vmem = pl.BlockSpec(memory_space=pltpu.MemorySpace.VMEM)

    out_cn = pl.pallas_call(
        kernel,
        out_shape=jax.ShapeDtypeStruct((CHANNEL_N, out_N), jnp.float32),
        in_specs=[vmem] * len(args),
        out_specs=vmem,
        cost_estimate=pl.CostEstimate(flops=flops,
                                      transcendentals=transcendentals,
                                      bytes_accessed=bytes_accessed),
    )(*args)

    state = jnp.transpose(out_cn.reshape(CHANNEL_N, B, H0, W0), (1, 2, 3, 0))  # BHWC
    logits = state[..., INPUT_CH:INPUT_CH + OUTPUT_CH]
    hidden = state[..., INPUT_CH + OUTPUT_CH:]
    return {"logits": logits, "hidden_channels": hidden}      # apply_nonlin is None


# --------------------------------- main -----------------------------------------
if __name__ == "__main__":
    key = jax.random.PRNGKey(0)
    kx, kp, kfire = jax.random.split(key, 3)

    B = 2
    H0, W0 = OCTREE_RES[0]
    x = jax.random.normal(kx, (B, INPUT_CH, H0, W0), dtype=jnp.float32)   # NCHW input

    # deterministic synthetic parameters, one backbone per octree level
    # (fc0 bias omitted: with batch-statistics BatchNorm it cancels exactly)
    params_per_level = []
    for _ in range(len(OCTREE_RES)):
        kp, k1, k2, k3 = jax.random.split(kp, 4)
        params_per_level.append(dict(
            pw=0.1 * jax.random.normal(k1, (CHANNEL_N, KERNEL_SIZE * KERNEL_SIZE),
                                       jnp.float32),
            pb=jnp.zeros((CHANNEL_N, 1), jnp.float32),
            w0=0.1 * jax.random.normal(k2, (HIDDEN, 2 * CHANNEL_N), jnp.float32),
            gamma=jnp.ones((HIDDEN, 1), jnp.float32),
            beta=jnp.zeros((HIDDEN, 1), jnp.float32),
            w1=0.1 * jax.random.normal(k3, (CHANNEL_N, HIDDEN), jnp.float32),
        ))

    out = octree_nca_forward_eval(x, params_per_level, kfire)
    out = jax.block_until_ready(out)

    assert out["logits"].shape == (B, H0, W0, OUTPUT_CH)
    assert out["hidden_channels"].shape == (B, H0, W0,
                                            CHANNEL_N - INPUT_CH - OUTPUT_CH)
    assert bool(jnp.all(jnp.isfinite(out["logits"])))
    assert bool(jnp.all(jnp.isfinite(out["hidden_channels"])))
    print("KERNEL_OK")
</pallas_src>

<mosaic_0001>
module attributes {stable_mosaic.version = 11 : i64} {
  func.func @kernel(%arg0: memref<16x128xf32, #tpu.memory_space<vmem>>, %arg1: memref<4x128xf32, #tpu.memory_space<vmem>>, %arg2: memref<16x9xf32, #tpu.memory_space<vmem>>, %arg3: memref<16x1xf32, #tpu.memory_space<vmem>>, %arg4: memref<64x32xbf16, #tpu.memory_space<vmem>>, %arg5: memref<64x1xf32, #tpu.memory_space<vmem>>, %arg6: memref<64x1xf32, #tpu.memory_space<vmem>>, %arg7: memref<16x64xbf16, #tpu.memory_space<vmem>>, %arg8: memref<128x512xf32, #tpu.memory_space<vmem>>, %arg9: memref<16x512xf32, #tpu.memory_space<vmem>>, %arg10: memref<4x512xf32, #tpu.memory_space<vmem>>, %arg11: memref<16x9xf32, #tpu.memory_space<vmem>>, %arg12: memref<16x1xf32, #tpu.memory_space<vmem>>, %arg13: memref<64x32xbf16, #tpu.memory_space<vmem>>, %arg14: memref<64x1xf32, #tpu.memory_space<vmem>>, %arg15: memref<64x1xf32, #tpu.memory_space<vmem>>, %arg16: memref<16x64xbf16, #tpu.memory_space<vmem>>, %arg17: memref<16x512xf32, #tpu.memory_space<vmem>>) attributes {dimension_semantics = [], scalar_prefetch = 0 : i64, scratch_operands = 0 : i64, tpu.core_type = #tpu.core_type<tc>} {
    %0 = tpu.iota {dimensions = array<i32: 0>} : vector<16x1xi32>
    %c2_i32 = arith.constant 2 : i32
    %1 = vector.broadcast %c2_i32 : i32 to vector<16x1xi32>
    %2 = arith.cmpi slt, %0, %1 : vector<16x1xi32>
    %c0 = arith.constant 0 : index
    %c0_0 = arith.constant 0 : index
    %3 = vector.load %arg0[%c0, %c0_0] : memref<16x128xf32, #tpu.memory_space<vmem>>, vector<16x128xf32>
    %4 = tpu.iota {dimensions = array<i32: 1>} : vector<1x128xi32>
    %c7_i32 = arith.constant 7 : i32
    %5 = vector.broadcast %c7_i32 : i32 to vector<1x128xi32>
    %6 = arith.andi %4, %5 : vector<1x128xi32>
    %c3_i32 = arith.constant 3 : i32
    %7 = vector.broadcast %c3_i32 : i32 to vector<1x128xi32>
    %8 = arith.shrsi %4, %7 : vector<1x128xi32>
    %c7_i32_1 = arith.constant 7 : i32
    %9 = vector.broadcast %c7_i32_1 : i32 to vector<1x128xi32>
    %10 = arith.andi %8, %9 : vector<1x128xi32>
    %c0_i32 = arith.constant 0 : i32
    %11 = vector.broadcast %c0_i32 : i32 to vector<1x128xi32>
    %12 = arith.cmpi eq, %6, %11 : vector<1x128xi32>
    %c7_i32_2 = arith.constant 7 : i32
    %13 = vector.broadcast %c7_i32_2 : i32 to vector<1x128xi32>
    %14 = arith.cmpi eq, %6, %13 : vector<1x128xi32>
    %c0_i32_3 = arith.constant 0 : i32
    %15 = vector.broadcast %c0_i32_3 : i32 to vector<1x128xi32>
    %16 = arith.cmpi eq, %10, %15 : vector<1x128xi32>
    %c7_i32_4 = arith.constant 7 : i32
    %17 = vector.broadcast %c7_i32_4 : i32 to vector<1x128xi32>
    %18 = arith.cmpi eq, %10, %17 : vector<1x128xi32>
    %c0_5 = arith.constant 0 : index
    %c0_6 = arith.constant 0 : index
    %19 = vector.load %arg2[%c0_5, %c0_6] : memref<16x9xf32, #tpu.memory_space<vmem>>, vector<16x9xf32>
    %20 = vector.extract_strided_slice %19 {offsets = [0, 0], sizes = [16, 1], strides = [1, 1]} : vector<16x9xf32> to vector<16x1xf32>
    %21 = vector.shape_cast %20 : vector<16x1xf32> to vector<16x1xf32>
    %22 = vector.broadcast %21 : vector<16x1xf32> to vector<16x128xf32>
    %23 = vector.extract_strided_slice %19 {offsets = [0, 1], sizes = [16, 1], strides = [1, 1]} : vector<16x9xf32> to vector<16x1xf32>
    %24 = vector.shape_cast %23 : vector<16x1xf32> to vector<16x1xf32>
    %25 = vector.broadcast %24 : vector<16x1xf32> to vector<16x128xf32>
    %26 = vector.extract_strided_slice %19 {offsets = [0, 2], sizes = [16, 1], strides = [1, 1]} : vector<16x9xf32> to vector<16x1xf32>
    %27 = vector.shape_cast %26 : vector<16x1xf32> to vector<16x1xf32>
    %28 = vector.broadcast %27 : vector<16x1xf32> to vector<16x128xf32>
    %29 = vector.extract_strided_slice %19 {offsets = [0, 3], sizes = [16, 1], strides = [1, 1]} : vector<16x9xf32> to vector<16x1xf32>
    %30 = vector.shape_cast %29 : vector<16x1xf32> to vector<16x1xf32>
    %31 = vector.broadcast %30 : vector<16x1xf32> to vector<16x128xf32>
    %32 = vector.extract_strided_slice %19 {offsets = [0, 4], sizes = [16, 1], strides = [1, 1]} : vector<16x9xf32> to vector<16x1xf32>
    %33 = vector.shape_cast %32 : vector<16x1xf32> to vector<16x1xf32>
    %34 = vector.broadcast %33 : vector<16x1xf32> to vector<16x128xf32>
    %35 = vector.extract_strided_slice %19 {offsets = [0, 5], sizes = [16, 1], strides = [1, 1]} : vector<16x9xf32> to vector<16x1xf32>
    %36 = vector.shape_cast %35 : vector<16x1xf32> to vector<16x1xf32>
    %37 = vector.broadcast %36 : vector<16x1xf32> to vector<16x128xf32>
    %38 = vector.extract_strided_slice %19 {offsets = [0, 6], sizes = [16, 1], strides = [1, 1]} : vector<16x9xf32> to vector<16x1xf32>
    %39 = vector.shape_cast %38 : vector<16x1xf32> to vector<16x1xf32>
    %40 = vector.broadcast %39 : vector<16x1xf32> to vector<16x128xf32>
    %41 = vector.extract_strided_slice %19 {offsets = [0, 7], sizes = [16, 1], strides = [1, 1]} : vector<16x9xf32> to vector<16x1xf32>
    %42 = vector.shape_cast %41 : vector<16x1xf32> to vector<16x1xf32>
    %43 = vector.broadcast %42 : vector<16x1xf32> to vector<16x128xf32>
    %44 = vector.extract_strided_slice %19 {offsets = [0, 8], sizes = [16, 1], strides = [1, 1]} : vector<16x9xf32> to vector<16x1xf32>
    %45 = vector.shape_cast %44 : vector<16x1xf32> to vector<16x1xf32>
    %46 = vector.broadcast %45 : vector<16x1xf32> to vector<16x128xf32>
    %c0_7 = arith.constant 0 : index
    %c0_8 = arith.constant 0 : index
    %47 = vector.load %arg3[%c0_7, %c0_8] : memref<16x1xf32, #tpu.memory_space<vmem>>, vector<16x1xf32>
    %48 = vector.shape_cast %47 : vector<16x1xf32> to vector<16x1xf32>
    %49 = vector.broadcast %48 : vector<16x1xf32> to vector<16x128xf32>
    %c0_9 = arith.constant 0 : index
    %c0_10 = arith.constant 0 : index
    %50 = vector.load %arg4[%c0_9, %c0_10] : memref<64x32xbf16, #tpu.memory_space<vmem>>, vector<64x32xbf16>
    %c0_11 = arith.constant 0 : index
    %c0_12 = arith.constant 0 : index
    %51 = vector.load %arg7[%c0_11, %c0_12] : memref<16x64xbf16, #tpu.memory_space<vmem>>, vector<16x64xbf16>
    %c0_13 = arith.constant 0 : index
    %c0_14 = arith.constant 0 : index
    %52 = vector.load %arg5[%c0_13, %c0_14] : memref<64x1xf32, #tpu.memory_space<vmem>>, vector<64x1xf32>
    %c0_15 = arith.constant 0 : index
    %c0_16 = arith.constant 0 : index
    %53 = vector.load %arg6[%c0_15, %c0_16] : memref<64x1xf32, #tpu.memory_space<vmem>>, vector<64x1xf32>
    %54 = vector.extract_strided_slice %3 {offsets = [0, 1], sizes = [16, 127], strides = [1, 1]} : vector<16x128xf32> to vector<16x127xf32>
    %55 = vector.extract_strided_slice %3 {offsets = [0, 0], sizes = [16, 1], strides = [1, 1]} : vector<16x128xf32> to vector<16x1xf32>
    %56 = tpu.concatenate %54, %55 in 1 : vector<16x127xf32>, vector<16x1xf32> -> vector<16x128xf32>
    %57 = vector.extract_strided_slice %3 {offsets = [0, 127], sizes = [16, 1], strides = [1, 1]} : vector<16x128xf32> to vector<16x1xf32>
    %58 = vector.extract_strided_slice %3 {offsets = [0, 0], sizes = [16, 127], strides = [1, 1]} : vector<16x128xf32> to vector<16x127xf32>
    %59 = tpu.concatenate %57, %58 in 1 : vector<16x1xf32>, vector<16x127xf32> -> vector<16x128xf32>
    %60 = vector.shape_cast %12 : vector<1x128xi1> to vector<1x128xi1>
    %61 = vector.broadcast %60 : vector<1x128xi1> to vector<16x128xi1>
    %62 = arith.select %61, %56, %59 : vector<16x128xi1>, vector<16x128xf32>
    %63 = vector.shape_cast %14 : vector<1x128xi1> to vector<1x128xi1>
    %64 = vector.broadcast %63 : vector<1x128xi1> to vector<16x128xi1>
    %65 = arith.select %64, %59, %56 : vector<16x128xi1>, vector<16x128xf32>
    %66 = vector.extract_strided_slice %62 {offsets = [0, 120], sizes = [16, 8], strides = [1, 1]} : vector<16x128xf32> to vector<16x8xf32>
    %67 = vector.extract_strided_slice %62 {offsets = [0, 0], sizes = [16, 120], strides = [1, 1]} : vector<16x128xf32> to vector<16x120xf32>
    %68 = tpu.concatenate %66, %67 in 1 : vector<16x8xf32>, vector<16x120xf32> -> vector<16x128xf32>
    %69 = vector.extract_strided_slice %62 {offsets = [0, 8], sizes = [16, 120], strides = [1, 1]} : vector<16x128xf32> to vector<16x120xf32>
    %70 = vector.extract_strided_slice %62 {offsets = [0, 0], sizes = [16, 8], strides = [1, 1]} : vector<16x128xf32> to vector<16x8xf32>
    %71 = tpu.concatenate %69, %70 in 1 : vector<16x120xf32>, vector<16x8xf32> -> vector<16x128xf32>
    %72 = vector.shape_cast %16 : vector<1x128xi1> to vector<1x128xi1>
    %73 = vector.broadcast %72 : vector<1x128xi1> to vector<16x128xi1>
    %74 = arith.select %73, %71, %68 : vector<16x128xi1>, vector<16x128xf32>
    %75 = vector.shape_cast %18 : vector<1x128xi1> to vector<1x128xi1>
    %76 = vector.broadcast %75 : vector<1x128xi1> to vector<16x128xi1>
    %77 = arith.select %76, %68, %71 : vector<16x128xi1>, vector<16x128xf32>
    %78 = arith.mulf %74, %22 : vector<16x128xf32>
    %79 = arith.addf %49, %78 : vector<16x128xf32>
    %80 = arith.mulf %62, %31 : vector<16x128xf32>
    %81 = arith.addf %79, %80 : vector<16x128xf32>
    %82 = arith.mulf %77, %40 : vector<16x128xf32>
    %83 = arith.addf %81, %82 : vector<16x128xf32>
    %84 = vector.extract_strided_slice %3 {offsets = [0, 120], sizes = [16, 8], strides = [1, 1]} : vector<16x128xf32> to vector<16x8xf32>
    %85 = vector.extract_strided_slice %3 {offsets = [0, 0], sizes = [16, 120], strides = [1, 1]} : vector<16x128xf32> to vector<16x120xf32>
    %86 = tpu.concatenate %84, %85 in 1 : vector<16x8xf32>, vector<16x120xf32> -> vector<16x128xf32>
    %87 = vector.extract_strided_slice %3 {offsets = [0, 8], sizes = [16, 120], strides = [1, 1]} : vector<16x128xf32> to vector<16x120xf32>
    %88 = vector.extract_strided_slice %3 {offsets = [0, 0], sizes = [16, 8], strides = [1, 1]} : vector<16x128xf32> to vector<16x8xf32>
    %89 = tpu.concatenate %87, %88 in 1 : vector<16x120xf32>, vector<16x8xf32> -> vector<16x128xf32>
    %90 = vector.shape_cast %16 : vector<1x128xi1> to vector<1x128xi1>
    %91 = vector.broadcast %90 : vector<1x128xi1> to vector<16x128xi1>
    %92 = arith.select %91, %89, %86 : vector<16x128xi1>, vector<16x128xf32>
    %93 = vector.shape_cast %18 : vector<1x128xi1> to vector<1x128xi1>
    %94 = vector.broadcast %93 : vector<1x128xi1> to vector<16x128xi1>
    %95 = arith.select %94, %86, %89 : vector<16x128xi1>, vector<16x128xf32>
    %96 = arith.mulf %92, %25 : vector<16x128xf32>
    %97 = arith.addf %83, %96 : vector<16x128xf32>
    %98 = arith.mulf %3, %34 : vector<16x128xf32>
    %99 = arith.addf %97, %98 : vector<16x128xf32>
    %100 = arith.mulf %95, %43 : vector<16x128xf32>
    %101 = arith.addf %99, %100 : vector<16x128xf32>
    %102 = vector.extract_strided_slice %65 {offsets = [0, 120], sizes = [16, 8], strides = [1, 1]} : vector<16x128xf32> to vector<16x8xf32>
    %103 = vector.extract_strided_slice %65 {offsets = [0, 0], sizes = [16, 120], strides = [1, 1]} : vector<16x128xf32> to vector<16x120xf32>
    %104 = tpu.concatenate %102, %103 in 1 : vector<16x8xf32>, vector<16x120xf32> -> vector<16x128xf32>
    %105 = vector.extract_strided_slice %65 {offsets = [0, 8], sizes = [16, 120], strides = [1, 1]} : vector<16x128xf32> to vector<16x120xf32>
    %106 = vector.extract_strided_slice %65 {offsets = [0, 0], sizes = [16, 8], strides = [1, 1]} : vector<16x128xf32> to vector<16x8xf32>
    %107 = tpu.concatenate %105, %106 in 1 : vector<16x120xf32>, vector<16x8xf32> -> vector<16x128xf32>
    %108 = vector.shape_cast %16 : vector<1x128xi1> to vector<1x128xi1>
    %109 = vector.broadcast %108 : vector<1x128xi1> to vector<16x128xi1>
    %110 = arith.select %109, %107, %104 : vector<16x128xi1>, vector<16x128xf32>
    %111 = vector.shape_cast %18 : vector<1x128xi1> to vector<1x128xi1>
    %112 = vector.broadcast %111 : vector<1x128xi1> to vector<16x128xi1>
    %113 = arith.select %112, %104, %107 : vector<16x128xi1>, vector<16x128xf32>
    %114 = arith.mulf %110, %28 : vector<16x128xf32>
    %115 = arith.addf %101, %114 : vector<16x128xf32>
    %116 = arith.mulf %65, %37 : vector<16x128xf32>
    %117 = arith.addf %115, %116 : vector<16x128xf32>
    %118 = arith.mulf %113, %46 : vector<16x128xf32>
    %119 = arith.addf %117, %118 : vector<16x128xf32>
    %120 = arith.truncf %3 : vector<16x128xf32> to vector<16x128xbf16>
    %121 = arith.truncf %119 : vector<16x128xf32> to vector<16x128xbf16>
    %122 = tpu.concatenate %120, %121 in 0 : vector<16x128xbf16>, vector<16x128xbf16> -> vector<32x128xbf16>
    %cst = arith.constant dense<0.000000e+00> : vector<64x128xf32>
    %123 = tpu.matmul %50, %122, %cst {dimension_numbers = #tpu.dot_dimension_numbers<[1], [0], [0], [1], [0, 0, 1, 1], [], []>} : vector<64x32xbf16>, vector<32x128xbf16>, vector<64x128xf32> -> vector<64x128xf32>
    %cst_17 = arith.constant dense<0.000000e+00> : vector<64xf32>
    %124 = vector.multi_reduction <add>, %123, %cst_17 [1] : vector<64x128xf32> to vector<64xf32>
    %125 = vector.shape_cast %124 : vector<64xf32> to vector<64x1xf32>
    %cst_18 = arith.constant 1.280000e+02 : f32
    %126 = vector.broadcast %cst_18 : f32 to vector<64x1xf32>
    %127 = arith.divf %125, %126 : vector<64x1xf32>
    %128 = vector.broadcast %127 : vector<64x1xf32> to vector<64x128xf32>
    %129 = arith.subf %123, %128 : vector<64x128xf32>
    %130 = arith.mulf %129, %129 : vector<64x128xf32>
    %cst_19 = arith.constant dense<0.000000e+00> : vector<64xf32>
    %131 = vector.multi_reduction <add>, %130, %cst_19 [1] : vector<64x128xf32> to vector<64xf32>
    %132 = vector.shape_cast %131 : vector<64xf32> to vector<64x1xf32>
    %cst_20 = arith.constant 1.280000e+02 : f32
    %133 = vector.broadcast %cst_20 : f32 to vector<64x1xf32>
    %134 = arith.divf %132, %133 : vector<64x1xf32>
    %cst_21 = arith.constant 9.99999974E-6 : f32
    %135 = vector.broadcast %cst_21 : f32 to vector<64x1xf32>
    %136 = arith.addf %134, %135 : vector<64x1xf32>
    %137 = math.rsqrt %136 : vector<64x1xf32>
    %138 = arith.mulf %52, %137 : vector<64x1xf32>
    %139 = arith.mulf %127, %138 : vector<64x1xf32>
    %140 = arith.subf %53, %139 : vector<64x1xf32>
    %141 = vector.broadcast %138 : vector<64x1xf32> to vector<64x128xf32>
    %142 = arith.mulf %123, %141 : vector<64x128xf32>
    %143 = vector.broadcast %140 : vector<64x1xf32> to vector<64x128xf32>
    %144 = arith.addf %142, %143 : vector<64x128xf32>
    %cst_22 = arith.constant 0.000000e+00 : f32
    %145 = vector.broadcast %cst_22 : f32 to vector<64x128xf32>
    %146 = arith.maximumf %144, %145 : vector<64x128xf32>
    %147 = arith.truncf %146 : vector<64x128xf32> to vector<64x128xbf16>
    %cst_23 = arith.constant dense<0.000000e+00> : vector<16x128xf32>
    %148 = tpu.matmul %51, %147, %cst_23 {dimension_numbers = #tpu.dot_dimension_numbers<[1], [0], [0], [1], [0, 0, 1, 1], [], []>} : vector<16x64xbf16>, vector<64x128xbf16>, vector<16x128xf32> -> vector<16x128xf32>
    %c0_24 = arith.constant 0 : index
    %c0_25 = arith.constant 0 : index
    %149 = vector.load %arg1[%c0_24, %c0_25] : memref<4x128xf32, #tpu.memory_space<vmem>>, vector<1x128xf32>
    %150 = vector.broadcast %149 : vector<1x128xf32> to vector<16x128xf32>
    %151 = arith.mulf %148, %150 : vector<16x128xf32>
    %152 = arith.addf %3, %151 : vector<16x128xf32>
    %153 = vector.extract_strided_slice %152 {offsets = [0, 1], sizes = [16, 127], strides = [1, 1]} : vector<16x128xf32> to vector<16x127xf32>
    %154 = vector.extract_strided_slice %152 {offsets = [0, 0], sizes = [16, 1], strides = [1, 1]} : vector<16x128xf32> to vector<16x1xf32>
    %155 = tpu.concatenate %153, %154 in 1 : vector<16x127xf32>, vector<16x1xf32> -> vector<16x128xf32>
    %156 = vector.extract_strided_slice %152 {offsets = [0, 127], sizes = [16, 1], strides = [1, 1]} : vector<16x128xf32> to vector<16x1xf32>
    %157 = vector.extract_strided_slice %152 {offsets = [0, 0], sizes = [16, 127], strides = [1, 1]} : vector<16x128xf32> to vector<16x127xf32>
    %158 = tpu.concatenate %156, %157 in 1 : vector<16x1xf32>, vector<16x127xf32> -> vector<16x128xf32>
    %159 = vector.shape_cast %12 : vector<1x128xi1> to vector<1x128xi1>
    %160 = vector.broadcast %159 : vector<1x128xi1> to vector<16x128xi1>
    %161 = arith.select %160, %155, %158 : vector<16x128xi1>, vector<16x128xf32>
    %162 = vector.shape_cast %14 : vector<1x128xi1> to vector<1x128xi1>
    %163 = vector.broadcast %162 : vector<1x128xi1> to vector<16x128xi1>
    %164 = arith.select %163, %158, %155 : vector<16x128xi1>, vector<16x128xf32>
    %165 = vector.extract_strided_slice %161 {offsets = [0, 120], sizes = [16, 8], strides = [1, 1]} : vector<16x128xf32> to vector<16x8xf32>
    %166 = vector.extract_strided_slice %161 {offsets = [0, 0], sizes = [16, 120], strides = [1, 1]} : vector<16x128xf32> to vector<16x120xf32>
    %167 = tpu.concatenate %165, %166 in 1 : vector<16x8xf32>, vector<16x120xf32> -> vector<16x128xf32>
    %168 = vector.extract_strided_slice %161 {offsets = [0, 8], sizes = [16, 120], strides = [1, 1]} : vector<16x128xf32> to vector<16x120xf32>
    %169 = vector.extract_strided_slice %161 {offsets = [0, 0], sizes = [16, 8], strides = [1, 1]} : vector<16x128xf32> to vector<16x8xf32>
    %170 = tpu.concatenate %168, %169 in 1 : vector<16x120xf32>, vector<16x8xf32> -> vector<16x128xf32>
    %171 = vector.shape_cast %16 : vector<1x128xi1> to vector<1x128xi1>
    %172 = vector.broadcast %171 : vector<1x128xi1> to vector<16x128xi1>
    %173 = arith.select %172, %170, %167 : vector<16x128xi1>, vector<16x128xf32>
    %174 = vector.shape_cast %18 : vector<1x128xi1> to vector<1x128xi1>
    %175 = vector.broadcast %174 : vector<1x128xi1> to vector<16x128xi1>
    %176 = arith.select %175, %167, %170 : vector<16x128xi1>, vector<16x128xf32>
    %177 = arith.mulf %173, %22 : vector<16x128xf32>
    %178 = arith.addf %49, %177 : vector<16x128xf32>
    %179 = arith.mulf %161, %31 : vector<16x128xf32>
    %180 = arith.addf %178, %179 : vector<16x128xf32>
    %181 = arith.mulf %176, %40 : vector<16x128xf32>
    %182 = arith.addf %180, %181 : vector<16x128xf32>
    %183 = vector.extract_strided_slice %152 {offsets = [0, 120], sizes = [16, 8], strides = [1, 1]} : vector<16x128xf32> to vector<16x8xf32>
    %184 = vector.extract_strided_slice %152 {offsets = [0, 0], sizes = [16, 120], strides = [1, 1]} : vector<16x128xf32> to vector<16x120xf32>
    %185 = tpu.concatenate %183, %184 in 1 : vector<16x8xf32>, vector<16x120xf32> -> vector<16x128xf32>
    %186 = vector.extract_strided_slice %152 {offsets = [0, 8], sizes = [16, 120], strides = [1, 1]} : vector<16x128xf32> to vector<16x120xf32>
    %187 = vector.extract_strided_slice %152 {offsets = [0, 0], sizes = [16, 8], strides = [1, 1]} : vector<16x128xf32> to vector<16x8xf32>
    %188 = tpu.concatenate %186, %187 in 1 : vector<16x120xf32>, vector<16x8xf32> -> vector<16x128xf32>
    %189 = vector.shape_cast %16 : vector<1x128xi1> to vector<1x128xi1>
    %190 = vector.broadcast %189 : vector<1x128xi1> to vector<16x128xi1>
    %191 = arith.select %190, %188, %185 : vector<16x128xi1>, vector<16x128xf32>
    %192 = vector.shape_cast %18 : vector<1x128xi1> to vector<1x128xi1>
    %193 = vector.broadcast %192 : vector<1x128xi1> to vector<16x128xi1>
    %194 = arith.select %193, %185, %188 : vector<16x128xi1>, vector<16x128xf32>
    %195 = arith.mulf %191, %25 : vector<16x128xf32>
    %196 = arith.addf %182, %195 : vector<16x128xf32>
    %197 = arith.mulf %152, %34 : vector<16x128xf32>
    %198 = arith.addf %196, %197 : vector<16x128xf32>
    %199 = arith.mulf %194, %43 : vector<16x128xf32>
    %200 = arith.addf %198, %199 : vector<16x128xf32>
    %201 = vector.extract_strided_slice %164 {offsets = [0, 120], sizes = [16, 8], strides = [1, 1]} : vector<16x128xf32> to vector<16x8xf32>
    %202 = vector.extract_strided_slice %164 {offsets = [0, 0], sizes = [16, 120], strides = [1, 1]} : vector<16x128xf32> to vector<16x120xf32>
    %203 = tpu.concatenate %201, %202 in 1 : vector<16x8xf32>, vector<16x120xf32> -> vector<16x128xf32>
    %204 = vector.extract_strided_slice %164 {offsets = [0, 8], sizes = [16, 120], strides = [1, 1]} : vector<16x128xf32> to vector<16x120xf32>
    %205 = vector.extract_strided_slice %164 {offsets = [0, 0], sizes = [16, 8], strides = [1, 1]} : vector<16x128xf32> to vector<16x8xf32>
    %206 = tpu.concatenate %204, %205 in 1 : vector<16x120xf32>, vector<16x8xf32> -> vector<16x128xf32>
    %207 = vector.shape_cast %16 : vector<1x128xi1> to vector<1x128xi1>
    %208 = vector.broadcast %207 : vector<1x128xi1> to vector<16x128xi1>
    %209 = arith.select %208, %206, %203 : vector<16x128xi1>, vector<16x128xf32>
    %210 = vector.shape_cast %18 : vector<1x128xi1> to vector<1x128xi1>
    %211 = vector.broadcast %210 : vector<1x128xi1> to vector<16x128xi1>
    %212 = arith.select %211, %203, %206 : vector<16x128xi1>, vector<16x128xf32>
    %213 = arith.mulf %209, %28 : vector<16x128xf32>
    %214 = arith.addf %200, %213 : vector<16x128xf32>
    %215 = arith.mulf %164, %37 : vector<16x128xf32>
    %216 = arith.addf %214, %215 : vector<16x128xf32>
    %217 = arith.mulf %212, %46 : vector<16x128xf32>
    %218 = arith.addf %216, %217 : vector<16x128xf32>
    %219 = arith.truncf %152 : vector<16x128xf32> to vector<16x128xbf16>
    %220 = arith.truncf %218 : vector<16x128xf32> to vector<16x128xbf16>
    %221 = tpu.concatenate %219, %220 in 0 : vector<16x128xbf16>, vector<16x128xbf16> -> vector<32x128xbf16>
    %cst_26 = arith.constant dense<0.000000e+00> : vector<64x128xf32>
    %222 = tpu.matmul %50, %221, %cst_26 {dimension_numbers = #tpu.dot_dimension_numbers<[1], [0], [0], [1], [0, 0, 1, 1], [], []>} : vector<64x32xbf16>, vector<32x128xbf16>, vector<64x128xf32> -> vector<64x128xf32>
    %cst_27 = arith.constant dense<0.000000e+00> : vector<64xf32>
    %223 = vector.multi_reduction <add>, %222, %cst_27 [1] : vector<64x128xf32> to vector<64xf32>
    %224 = vector.shape_cast %223 : vector<64xf32> to vector<64x1xf32>
    %cst_28 = arith.constant 1.280000e+02 : f32
    %225 = vector.broadcast %cst_28 : f32 to vector<64x1xf32>
    %226 = arith.divf %224, %225 : vector<64x1xf32>
    %227 = vector.broadcast %226 : vector<64x1xf32> to vector<64x128xf32>
    %228 = arith.subf %222, %227 : vector<64x128xf32>
    %229 = arith.mulf %228, %228 : vector<64x128xf32>
    %cst_29 = arith.constant dense<0.000000e+00> : vector<64xf32>
    %230 = vector.multi_reduction <add>, %229, %cst_29 [1] : vector<64x128xf32> to vector<64xf32>
    %231 = vector.shape_cast %230 : vector<64xf32> to vector<64x1xf32>
    %cst_30 = arith.constant 1.280000e+02 : f32
    %232 = vector.broadcast %cst_30 : f32 to vector<64x1xf32>
    %233 = arith.divf %231, %232 : vector<64x1xf32>
    %cst_31 = arith.constant 9.99999974E-6 : f32
    %234 = vector.broadcast %cst_31 : f32 to vector<64x1xf32>
    %235 = arith.addf %233, %234 : vector<64x1xf32>
    %236 = math.rsqrt %235 : vector<64x1xf32>
    %237 = arith.mulf %52, %236 : vector<64x1xf32>
    %238 = arith.mulf %226, %237 : vector<64x1xf32>
    %239 = arith.subf %53, %238 : vector<64x1xf32>
    %240 = vector.broadcast %237 : vector<64x1xf32> to vector<64x128xf32>
    %241 = arith.mulf %222, %240 : vector<64x128xf32>
    %242 = vector.broadcast %239 : vector<64x1xf32> to vector<64x128xf32>
    %243 = arith.addf %241, %242 : vector<64x128xf32>
    %cst_32 = arith.constant 0.000000e+00 : f32
    %244 = vector.broadcast %cst_32 : f32 to vector<64x128xf32>
    %245 = arith.maximumf %243, %244 : vector<64x128xf32>
    %246 = arith.truncf %245 : vector<64x128xf32> to vector<64x128xbf16>
    %cst_33 = arith.constant dense<0.000000e+00> : vector<16x128xf32>
    %247 = tpu.matmul %51, %246, %cst_33 {dimension_numbers = #tpu.dot_dimension_numbers<[1], [0], [0], [1], [0, 0, 1, 1], [], []>} : vector<16x64xbf16>, vector<64x128xbf16>, vector<16x128xf32> -> vector<16x128xf32>
    %c1 = arith.constant 1 : index
    %c0_34 = arith.constant 0 : index
    %248 = vector.load %arg1[%c1, %c0_34] : memref<4x128xf32, #tpu.memory_space<vmem>>, vector<1x128xf32>
    %249 = vector.broadcast %248 : vector<1x128xf32> to vector<16x128xf32>
    %250 = arith.mulf %247, %249 : vector<16x128xf32>
    %251 = arith.addf %152, %250 : vector<16x128xf32>
    %252 = vector.extract_strided_slice %251 {offsets = [0, 1], sizes = [16, 127], strides = [1, 1]} : vector<16x128xf32> to vector<16x127xf32>
    %253 = vector.extract_strided_slice %251 {offsets = [0, 0], sizes = [16, 1], strides = [1, 1]} : vector<16x128xf32> to vector<16x1xf32>
    %254 = tpu.concatenate %252, %253 in 1 : vector<16x127xf32>, vector<16x1xf32> -> vector<16x128xf32>
    %255 = vector.extract_strided_slice %251 {offsets = [0, 127], sizes = [16, 1], strides = [1, 1]} : vector<16x128xf32> to vector<16x1xf32>
    %256 = vector.extract_strided_slice %251 {offsets = [0, 0], sizes = [16, 127], strides = [1, 1]} : vector<16x128xf32> to vector<16x127xf32>
    %257 = tpu.concatenate %255, %256 in 1 : vector<16x1xf32>, vector<16x127xf32> -> vector<16x128xf32>
    %258 = vector.shape_cast %12 : vector<1x128xi1> to vector<1x128xi1>
    %259 = vector.broadcast %258 : vector<1x128xi1> to vector<16x128xi1>
    %260 = arith.select %259, %254, %257 : vector<16x128xi1>, vector<16x128xf32>
    %261 = vector.shape_cast %14 : vector<1x128xi1> to vector<1x128xi1>
    %262 = vector.broadcast %261 : vector<1x128xi1> to vector<16x128xi1>
    %263 = arith.select %262, %257, %254 : vector<16x128xi1>, vector<16x128xf32>
    %264 = vector.extract_strided_slice %260 {offsets = [0, 120], sizes = [16, 8], strides = [1, 1]} : vector<16x128xf32> to vector<16x8xf32>
    %265 = vector.extract_strided_slice %260 {offsets = [0, 0], sizes = [16, 120], strides = [1, 1]} : vector<16x128xf32> to vector<16x120xf32>
    %266 = tpu.concatenate %264, %265 in 1 : vector<16x8xf32>, vector<16x120xf32> -> vector<16x128xf32>
    %267 = vector.extract_strided_slice %260 {offsets = [0, 8], sizes = [16, 120], strides = [1, 1]} : vector<16x128xf32> to vector<16x120xf32>
    %268 = vector.extract_strided_slice %260 {offsets = [0, 0], sizes = [16, 8], strides = [1, 1]} : vector<16x128xf32> to vector<16x8xf32>
    %269 = tpu.concatenate %267, %268 in 1 : vector<16x120xf32>, vector<16x8xf32> -> vector<16x128xf32>
    %270 = vector.shape_cast %16 : vector<1x128xi1> to vector<1x128xi1>
    %271 = vector.broadcast %270 : vector<1x128xi1> to vector<16x128xi1>
    %272 = arith.select %271, %269, %266 : vector<16x128xi1>, vector<16x128xf32>
    %273 = vector.shape_cast %18 : vector<1x128xi1> to vector<1x128xi1>
    %274 = vector.broadcast %273 : vector<1x128xi1> to vector<16x128xi1>
    %275 = arith.select %274, %266, %269 : vector<16x128xi1>, vector<16x128xf32>
    %276 = arith.mulf %272, %22 : vector<16x128xf32>
    %277 = arith.addf %49, %276 : vector<16x128xf32>
    %278 = arith.mulf %260, %31 : vector<16x128xf32>
    %279 = arith.addf %277, %278 : vector<16x128xf32>
    %280 = arith.mulf %275, %40 : vector<16x128xf32>
    %281 = arith.addf %279, %280 : vector<16x128xf32>
    %282 = vector.extract_strided_slice %251 {offsets = [0, 120], sizes = [16, 8], strides = [1, 1]} : vector<16x128xf32> to vector<16x8xf32>
    %283 = vector.extract_strided_slice %251 {offsets = [0, 0], sizes = [16, 120], strides = [1, 1]} : vector<16x128xf32> to vector<16x120xf32>
    %284 = tpu.concatenate %282, %283 in 1 : vector<16x8xf32>, vector<16x120xf32> -> vector<16x128xf32>
    %285 = vector.extract_strided_slice %251 {offsets = [0, 8], sizes = [16, 120], strides = [1, 1]} : vector<16x128xf32> to vector<16x120xf32>
    %286 = vector.extract_strided_slice %251 {offsets = [0, 0], sizes = [16, 8], strides = [1, 1]} : vector<16x128xf32> to vector<16x8xf32>
    %287 = tpu.concatenate %285, %286 in 1 : vector<16x120xf32>, vector<16x8xf32> -> vector<16x128xf32>
    %288 = vector.shape_cast %16 : vector<1x128xi1> to vector<1x128xi1>
    %289 = vector.broadcast %288 : vector<1x128xi1> to vector<16x128xi1>
    %290 = arith.select %289, %287, %284 : vector<16x128xi1>, vector<16x128xf32>
    %291 = vector.shape_cast %18 : vector<1x128xi1> to vector<1x128xi1>
    %292 = vector.broadcast %291 : vector<1x128xi1> to vector<16x128xi1>
    %293 = arith.select %292, %284, %287 : vector<16x128xi1>, vector<16x128xf32>
    %294 = arith.mulf %290, %25 : vector<16x128xf32>
    %295 = arith.addf %281, %294 : vector<16x128xf32>
    %296 = arith.mulf %251, %34 : vector<16x128xf32>
    %297 = arith.addf %295, %296 : vector<16x128xf32>
    %298 = arith.mulf %293, %43 : vector<16x128xf32>
    %299 = arith.addf %297, %298 : vector<16x128xf32>
    %300 = vector.extract_strided_slice %263 {offsets = [0, 120], sizes = [16, 8], strides = [1, 1]} : vector<16x128xf32> to vector<16x8xf32>
    %301 = vector.extract_strided_slice %263 {offsets = [0, 0], sizes = [16, 120], strides = [1, 1]} : vector<16x128xf32> to vector<16x120xf32>
    %302 = tpu.concatenate %300, %301 in 1 : vector<16x8xf32>, vector<16x120xf32> -> vector<16x128xf32>
    %303 = vector.extract_strided_slice %263 {offsets = [0, 8], sizes = [16, 120], strides = [1, 1]} : vector<16x128xf32> to vector<16x120xf32>
    %304 = vector.extract_strided_slice %263 {offsets = [0, 0], sizes = [16, 8], strides = [1, 1]} : vector<16x128xf32> to vector<16x8xf32>
    %305 = tpu.concatenate %303, %304 in 1 : vector<16x120xf32>, vector<16x8xf32> -> vector<16x128xf32>
    %306 = vector.shape_cast %16 : vector<1x128xi1> to vector<1x128xi1>
    %307 = vector.broadcast %306 : vector<1x128xi1> to vector<16x128xi1>
    %308 = arith.select %307, %305, %302 : vector<16x128xi1>, vector<16x128xf32>
    %309 = vector.shape_cast %18 : vector<1x128xi1> to vector<1x128xi1>
    %310 = vector.broadcast %309 : vector<1x128xi1> to vector<16x128xi1>
    %311 = arith.select %310, %302, %305 : vector<16x128xi1>, vector<16x128xf32>
    %312 = arith.mulf %308, %28 : vector<16x128xf32>
    %313 = arith.addf %299, %312 : vector<16x128xf32>
    %314 = arith.mulf %263, %37 : vector<16x128xf32>
    %315 = arith.addf %313, %314 : vector<16x128xf32>
    %316 = arith.mulf %311, %46 : vector<16x128xf32>
    %317 = arith.addf %315, %316 : vector<16x128xf32>
    %318 = arith.truncf %251 : vector<16x128xf32> to vector<16x128xbf16>
    %319 = arith.truncf %317 : vector<16x128xf32> to vector<16x128xbf16>
    %320 = tpu.concatenate %318, %319 in 0 : vector<16x128xbf16>, vector<16x128xbf16> -> vector<32x128xbf16>
    %cst_35 = arith.constant dense<0.000000e+00> : vector<64x128xf32>
    %321 = tpu.matmul %50, %320, %cst_35 {dimension_numbers = #tpu.dot_dimension_numbers<[1], [0], [0], [1], [0, 0, 1, 1], [], []>} : vector<64x32xbf16>, vector<32x128xbf16>, vector<64x128xf32> -> vector<64x128xf32>
    %cst_36 = arith.constant dense<0.000000e+00> : vector<64xf32>
    %322 = vector.multi_reduction <add>, %321, %cst_36 [1] : vector<64x128xf32> to vector<64xf32>
    %323 = vector.shape_cast %322 : vector<64xf32> to vector<64x1xf32>
    %cst_37 = arith.constant 1.280000e+02 : f32
    %324 = vector.broadcast %cst_37 : f32 to vector<64x1xf32>
    %325 = arith.divf %323, %324 : vector<64x1xf32>
    %326 = vector.broadcast %325 : vector<64x1xf32> to vector<64x128xf32>
    %327 = arith.subf %321, %326 : vector<64x128xf32>
    %328 = arith.mulf %327, %327 : vector<64x128xf32>
    %cst_38 = arith.constant dense<0.000000e+00> : vector<64xf32>
    %329 = vector.multi_reduction <add>, %328, %cst_38 [1] : vector<64x128xf32> to vector<64xf32>
    %330 = vector.shape_cast %329 : vector<64xf32> to vector<64x1xf32>
    %cst_39 = arith.constant 1.280000e+02 : f32
    %331 = vector.broadcast %cst_39 : f32 to vector<64x1xf32>
    %332 = arith.divf %330, %331 : vector<64x1xf32>
    %cst_40 = arith.constant 9.99999974E-6 : f32
    %333 = vector.broadcast %cst_40 : f32 to vector<64x1xf32>
    %334 = arith.addf %332, %333 : vector<64x1xf32>
    %335 = math.rsqrt %334 : vector<64x1xf32>
    %336 = arith.mulf %52, %335 : vector<64x1xf32>
    %337 = arith.mulf %325, %336 : vector<64x1xf32>
    %338 = arith.subf %53, %337 : vector<64x1xf32>
    %339 = vector.broadcast %336 : vector<64x1xf32> to vector<64x128xf32>
    %340 = arith.mulf %321, %339 : vector<64x128xf32>
    %341 = vector.broadcast %338 : vector<64x1xf32> to vector<64x128xf32>
    %342 = arith.addf %340, %341 : vector<64x128xf32>
    %cst_41 = arith.constant 0.000000e+00 : f32
    %343 = vector.broadcast %cst_41 : f32 to vector<64x128xf32>
    %344 = arith.maximumf %342, %343 : vector<64x128xf32>
    %345 = arith.truncf %344 : vector<64x128xf32> to vector<64x128xbf16>
    %cst_42 = arith.constant dense<0.000000e+00> : vector<16x128xf32>
    %346 = tpu.matmul %51, %345, %cst_42 {dimension_numbers = #tpu.dot_dimension_numbers<[1], [0], [0], [1], [0, 0, 1, 1], [], []>} : vector<16x64xbf16>, vector<64x128xbf16>, vector<16x128xf32> -> vector<16x128xf32>
    %c2 = arith.constant 2 : index
    %c0_43 = arith.constant 0 : index
    %347 = vector.load %arg1[%c2, %c0_43] : memref<4x128xf32, #tpu.memory_space<vmem>>, vector<1x128xf32>
    %348 = vector.broadcast %347 : vector<1x128xf32> to vector<16x128xf32>
    %349 = arith.mulf %346, %348 : vector<16x128xf32>
    %350 = arith.addf %251, %349 : vector<16x128xf32>
    %351 = vector.extract_strided_slice %350 {offsets = [0, 1], sizes = [16, 127], strides = [1, 1]} : vector<16x128xf32> to vector<16x127xf32>
    %352 = vector.extract_strided_slice %350 {offsets = [0, 0], sizes = [16, 1], strides = [1, 1]} : vector<16x128xf32> to vector<16x1xf32>
    %353 = tpu.concatenate %351, %352 in 1 : vector<16x127xf32>, vector<16x1xf32> -> vector<16x128xf32>
    %354 = vector.extract_strided_slice %350 {offsets = [0, 127], sizes = [16, 1], strides = [1, 1]} : vector<16x128xf32> to vector<16x1xf32>
    %355 = vector.extract_strided_slice %350 {offsets = [0, 0], sizes = [16, 127], strides = [1, 1]} : vector<16x128xf32> to vector<16x127xf32>
    %356 = tpu.concatenate %354, %355 in 1 : vector<16x1xf32>, vector<16x127xf32> -> vector<16x128xf32>
    %357 = vector.shape_cast %12 : vector<1x128xi1> to vector<1x128xi1>
    %358 = vector.broadcast %357 : vector<1x128xi1> to vector<16x128xi1>
    %359 = arith.select %358, %353, %356 : vector<16x128xi1>, vector<16x128xf32>
    %360 = vector.shape_cast %14 : vector<1x128xi1> to vector<1x128xi1>
    %361 = vector.broadcast %360 : vector<1x128xi1> to vector<16x128xi1>
    %362 = arith.select %361, %356, %353 : vector<16x128xi1>, vector<16x128xf32>
    %363 = vector.extract_strided_slice %359 {offsets = [0, 120], sizes = [16, 8], strides = [1, 1]} : vector<16x128xf32> to vector<16x8xf32>
    %364 = vector.extract_strided_slice %359 {offsets = [0, 0], sizes = [16, 120], strides = [1, 1]} : vector<16x128xf32> to vector<16x120xf32>
    %365 = tpu.concatenate %363, %364 in 1 : vector<16x8xf32>, vector<16x120xf32> -> vector<16x128xf32>
    %366 = vector.extract_strided_slice %359 {offsets = [0, 8], sizes = [16, 120], strides = [1, 1]} : vector<16x128xf32> to vector<16x120xf32>
    %367 = vector.extract_strided_slice %359 {offsets = [0, 0], sizes = [16, 8], strides = [1, 1]} : vector<16x128xf32> to vector<16x8xf32>
    %368 = tpu.concatenate %366, %367 in 1 : vector<16x120xf32>, vector<16x8xf32> -> vector<16x128xf32>
    %369 = vector.shape_cast %16 : vector<1x128xi1> to vector<1x128xi1>
    %370 = vector.broadcast %369 : vector<1x128xi1> to vector<16x128xi1>
    %371 = arith.select %370, %368, %365 : vector<16x128xi1>, vector<16x128xf32>
    %372 = vector.shape_cast %18 : vector<1x128xi1> to vector<1x128xi1>
    %373 = vector.broadcast %372 : vector<1x128xi1> to vector<16x128xi1>
    %374 = arith.select %373, %365, %368 : vector<16x128xi1>, vector<16x128xf32>
    %375 = arith.mulf %371, %22 : vector<16x128xf32>
    %376 = arith.addf %49, %375 : vector<16x128xf32>
    %377 = arith.mulf %359, %31 : vector<16x128xf32>
    %378 = arith.addf %376, %377 : vector<16x128xf32>
    %379 = arith.mulf %374, %40 : vector<16x128xf32>
    %380 = arith.addf %378, %379 : vector<16x128xf32>
    %381 = vector.extract_strided_slice %350 {offsets = [0, 120], sizes = [16, 8], strides = [1, 1]} : vector<16x128xf32> to vector<16x8xf32>
    %382 = vector.extract_strided_slice %350 {offsets = [0, 0], sizes = [16, 120], strides = [1, 1]} : vector<16x128xf32> to vector<16x120xf32>
    %383 = tpu.concatenate %381, %382 in 1 : vector<16x8xf32>, vector<16x120xf32> -> vector<16x128xf32>
    %384 = vector.extract_strided_slice %350 {offsets = [0, 8], sizes = [16, 120], strides = [1, 1]} : vector<16x128xf32> to vector<16x120xf32>
    %385 = vector.extract_strided_slice %350 {offsets = [0, 0], sizes = [16, 8], strides = [1, 1]} : vector<16x128xf32> to vector<16x8xf32>
    %386 = tpu.concatenate %384, %385 in 1 : vector<16x120xf32>, vector<16x8xf32> -> vector<16x128xf32>
    %387 = vector.shape_cast %16 : vector<1x128xi1> to vector<1x128xi1>
    %388 = vector.broadcast %387 : vector<1x128xi1> to vector<16x128xi1>
    %389 = arith.select %388, %386, %383 : vector<16x128xi1>, vector<16x128xf32>
    %390 = vector.shape_cast %18 : vector<1x128xi1> to vector<1x128xi1>
    %391 = vector.broadcast %390 : vector<1x128xi1> to vector<16x128xi1>
    %392 = arith.select %391, %383, %386 : vector<16x128xi1>, vector<16x128xf32>
    %393 = arith.mulf %389, %25 : vector<16x128xf32>
    %394 = arith.addf %380, %393 : vector<16x128xf32>
    %395 = arith.mulf %350, %34 : vector<16x128xf32>
    %396 = arith.addf %394, %395 : vector<16x128xf32>
    %397 = arith.mulf %392, %43 : vector<16x128xf32>
    %398 = arith.addf %396, %397 : vector<16x128xf32>
    %399 = vector.extract_strided_slice %362 {offsets = [0, 120], sizes = [16, 8], strides = [1, 1]} : vector<16x128xf32> to vector<16x8xf32>
    %400 = vector.extract_strided_slice %362 {offsets = [0, 0], sizes = [16, 120], strides = [1, 1]} : vector<16x128xf32> to vector<16x120xf32>
    %401 = tpu.concatenate %399, %400 in 1 : vector<16x8xf32>, vector<16x120xf32> -> vector<16x128xf32>
    %402 = vector.extract_strided_slice %362 {offsets = [0, 8], sizes = [16, 120], strides = [1, 1]} : vector<16x128xf32> to vector<16x120xf32>
    %403 = vector.extract_strided_slice %362 {offsets = [0, 0], sizes = [16, 8], strides = [1, 1]} : vector<16x128xf32> to vector<16x8xf32>
    %404 = tpu.concatenate %402, %403 in 1 : vector<16x120xf32>, vector<16x8xf32> -> vector<16x128xf32>
    %405 = vector.shape_cast %16 : vector<1x128xi1> to vector<1x128xi1>
    %406 = vector.broadcast %405 : vector<1x128xi1> to vector<16x128xi1>
    %407 = arith.select %406, %404, %401 : vector<16x128xi1>, vector<16x128xf32>
    %408 = vector.shape_cast %18 : vector<1x128xi1> to vector<1x128xi1>
    %409 = vector.broadcast %408 : vector<1x128xi1> to vector<16x128xi1>
    %410 = arith.select %409, %401, %404 : vector<16x128xi1>, vector<16x128xf32>
    %411 = arith.mulf %407, %28 : vector<16x128xf32>
    %412 = arith.addf %398, %411 : vector<16x128xf32>
    %413 = arith.mulf %362, %37 : vector<16x128xf32>
    %414 = arith.addf %412, %413 : vector<16x128xf32>
    %415 = arith.mulf %410, %46 : vector<16x128xf32>
    %416 = arith.addf %414, %415 : vector<16x128xf32>
    %417 = arith.truncf %350 : vector<16x128xf32> to vector<16x128xbf16>
    %418 = arith.truncf %416 : vector<16x128xf32> to vector<16x128xbf16>
    %419 = tpu.concatenate %417, %418 in 0 : vector<16x128xbf16>, vector<16x128xbf16> -> vector<32x128xbf16>
    %cst_44 = arith.constant dense<0.000000e+00> : vector<64x128xf32>
    %420 = tpu.matmul %50, %419, %cst_44 {dimension_numbers = #tpu.dot_dimension_numbers<[1], [0], [0], [1], [0, 0, 1, 1], [], []>} : vector<64x32xbf16>, vector<32x128xbf16>, vector<64x128xf32> -> vector<64x128xf32>
    %cst_45 = arith.constant dense<0.000000e+00> : vector<64xf32>
    %421 = vector.multi_reduction <add>, %420, %cst_45 [1] : vector<64x128xf32> to vector<64xf32>
    %422 = vector.shape_cast %421 : vector<64xf32> to vector<64x1xf32>
    %cst_46 = arith.constant 1.280000e+02 : f32
    %423 = vector.broadcast %cst_46 : f32 to vector<64x1xf32>
    %424 = arith.divf %422, %423 : vector<64x1xf32>
    %425 = vector.broadcast %424 : vector<64x1xf32> to vector<64x128xf32>
    %426 = arith.subf %420, %425 : vector<64x128xf32>
    %427 = arith.mulf %426, %426 : vector<64x128xf32>
    %cst_47 = arith.constant dense<0.000000e+00> : vector<64xf32>
    %428 = vector.multi_reduction <add>, %427, %cst_47 [1] : vector<64x128xf32> to vector<64xf32>
    %429 = vector.shape_cast %428 : vector<64xf32> to vector<64x1xf32>
    %cst_48 = arith.constant 1.280000e+02 : f32
    %430 = vector.broadcast %cst_48 : f32 to vector<64x1xf32>
    %431 = arith.divf %429, %430 : vector<64x1xf32>
    %cst_49 = arith.constant 9.99999974E-6 : f32
    %432 = vector.broadcast %cst_49 : f32 to vector<64x1xf32>
    %433 = arith.addf %431, %432 : vector<64x1xf32>
    %434 = math.rsqrt %433 : vector<64x1xf32>
    %435 = arith.mulf %52, %434 : vector<64x1xf32>
    %436 = arith.mulf %424, %435 : vector<64x1xf32>
    %437 = arith.subf %53, %436 : vector<64x1xf32>
    %438 = vector.broadcast %435 : vector<64x1xf32> to vector<64x128xf32>
    %439 = arith.mulf %420, %438 : vector<64x128xf32>
    %440 = vector.broadcast %437 : vector<64x1xf32> to vector<64x128xf32>
    %441 = arith.addf %439, %440 : vector<64x128xf32>
    %cst_50 = arith.constant 0.000000e+00 : f32
    %442 = vector.broadcast %cst_50 : f32 to vector<64x128xf32>
    %443 = arith.maximumf %441, %442 : vector<64x128xf32>
    %444 = arith.truncf %443 : vector<64x128xf32> to vector<64x128xbf16>
    %cst_51 = arith.constant dense<0.000000e+00> : vector<16x128xf32>
    %445 = tpu.matmul %51, %444, %cst_51 {dimension_numbers = #tpu.dot_dimension_numbers<[1], [0], [0], [1], [0, 0, 1, 1], [], []>} : vector<16x64xbf16>, vector<64x128xbf16>, vector<16x128xf32> -> vector<16x128xf32>
    %c3 = arith.constant 3 : index
    %c0_52 = arith.constant 0 : index
    %446 = vector.load %arg1[%c3, %c0_52] : memref<4x128xf32, #tpu.memory_space<vmem>>, vector<1x128xf32>
    %447 = vector.broadcast %446 : vector<1x128xf32> to vector<16x128xf32>
    %448 = arith.mulf %445, %447 : vector<16x128xf32>
    %449 = arith.addf %350, %448 : vector<16x128xf32>
    %c0_53 = arith.constant 0 : index
    %c0_54 = arith.constant 0 : index
    %450 = vector.load %arg8[%c0_53, %c0_54] : memref<128x512xf32, #tpu.memory_space<vmem>>, vector<128x512xf32>
    %cst_55 = arith.constant dense<0.000000e+00> : vector<16x512xf32>
    %451 = tpu.matmul %449, %450, %cst_55 {dimension_numbers = #tpu.dot_dimension_numbers<[1], [0], [0], [1], [0, 0, 1, 1], [], []>} : vector<16x128xf32>, vector<128x512xf32>, vector<16x512xf32> -> vector<16x512xf32>
    %c0_56 = arith.constant 0 : index
    %c0_57 = arith.constant 0 : index
    %452 = vector.load %arg9[%c0_56, %c0_57] : memref<16x512xf32, #tpu.memory_space<vmem>>, vector<16x512xf32>
    %453 = vector.shape_cast %2 : vector<16x1xi1> to vector<16x1xi1>
    %454 = vector.broadcast %453 : vector<16x1xi1> to vector<16x512xi1>
    %455 = arith.select %454, %452, %451 : vector<16x512xi1>, vector<16x512xf32>
    %456 = tpu.iota {dimensions = array<i32: 1>} : vector<1x512xi32>
    %c15_i32 = arith.constant 15 : i32
    %457 = vector.broadcast %c15_i32 : i32 to vector<1x512xi32>
    %458 = arith.andi %456, %457 : vector<1x512xi32>
    %c4_i32 = arith.constant 4 : i32
    %459 = vector.broadcast %c4_i32 : i32 to vector<1x512xi32>
    %460 = arith.shrsi %456, %459 : vector<1x512xi32>
    %c15_i32_58 = arith.constant 15 : i32
    %461 = vector.broadcast %c15_i32_58 : i32 to vector<1x512xi32>
    %462 = arith.andi %460, %461 : vector<1x512xi32>
    %c0_i32_59 = arith.constant 0 : i32
    %463 = vector.broadcast %c0_i32_59 : i32 to vector<1x512xi32>
    %464 = arith.cmpi eq, %458, %463 : vector<1x512xi32>
    %c15_i32_60 = arith.constant 15 : i32
    %465 = vector.broadcast %c15_i32_60 : i32 to vector<1x512xi32>
    %466 = arith.cmpi eq, %458, %465 : vector<1x512xi32>
    %c0_i32_61 = arith.constant 0 : i32
    %467 = vector.broadcast %c0_i32_61 : i32 to vector<1x512xi32>
    %468 = arith.cmpi eq, %462, %467 : vector<1x512xi32>
    %c15_i32_62 = arith.constant 15 : i32
    %469 = vector.broadcast %c15_i32_62 : i32 to vector<1x512xi32>
    %470 = arith.cmpi eq, %462, %469 : vector<1x512xi32>
    %c0_63 = arith.constant 0 : index
    %c0_64 = arith.constant 0 : index
    %471 = vector.load %arg11[%c0_63, %c0_64] : memref<16x9xf32, #tpu.memory_space<vmem>>, vector<16x9xf32>
    %472 = vector.extract_strided_slice %471 {offsets = [0, 0], sizes = [16, 1], strides = [1, 1]} : vector<16x9xf32> to vector<16x1xf32>
    %473 = vector.shape_cast %472 : vector<16x1xf32> to vector<16x1xf32>
    %474 = vector.broadcast %473 : vector<16x1xf32> to vector<16x512xf32>
    %475 = vector.extract_strided_slice %471 {offsets = [0, 1], sizes = [16, 1], strides = [1, 1]} : vector<16x9xf32> to vector<16x1xf32>
    %476 = vector.shape_cast %475 : vector<16x1xf32> to vector<16x1xf32>
    %477 = vector.broadcast %476 : vector<16x1xf32> to vector<16x512xf32>
    %478 = vector.extract_strided_slice %471 {offsets = [0, 2], sizes = [16, 1], strides = [1, 1]} : vector<16x9xf32> to vector<16x1xf32>
    %479 = vector.shape_cast %478 : vector<16x1xf32> to vector<16x1xf32>
    %480 = vector.broadcast %479 : vector<16x1xf32> to vector<16x512xf32>
    %481 = vector.extract_strided_slice %471 {offsets = [0, 3], sizes = [16, 1], strides = [1, 1]} : vector<16x9xf32> to vector<16x1xf32>
    %482 = vector.shape_cast %481 : vector<16x1xf32> to vector<16x1xf32>
    %483 = vector.broadcast %482 : vector<16x1xf32> to vector<16x512xf32>
    %484 = vector.extract_strided_slice %471 {offsets = [0, 4], sizes = [16, 1], strides = [1, 1]} : vector<16x9xf32> to vector<16x1xf32>
    %485 = vector.shape_cast %484 : vector<16x1xf32> to vector<16x1xf32>
    %486 = vector.broadcast %485 : vector<16x1xf32> to vector<16x512xf32>
    %487 = vector.extract_strided_slice %471 {offsets = [0, 5], sizes = [16, 1], strides = [1, 1]} : vector<16x9xf32> to vector<16x1xf32>
    %488 = vector.shape_cast %487 : vector<16x1xf32> to vector<16x1xf32>
    %489 = vector.broadcast %488 : vector<16x1xf32> to vector<16x512xf32>
    %490 = vector.extract_strided_slice %471 {offsets = [0, 6], sizes = [16, 1], strides = [1, 1]} : vector<16x9xf32> to vector<16x1xf32>
    %491 = vector.shape_cast %490 : vector<16x1xf32> to vector<16x1xf32>
    %492 = vector.broadcast %491 : vector<16x1xf32> to vector<16x512xf32>
    %493 = vector.extract_strided_slice %471 {offsets = [0, 7], sizes = [16, 1], strides = [1, 1]} : vector<16x9xf32> to vector<16x1xf32>
    %494 = vector.shape_cast %493 : vector<16x1xf32> to vector<16x1xf32>
    %495 = vector.broadcast %494 : vector<16x1xf32> to vector<16x512xf32>
    %496 = vector.extract_strided_slice %471 {offsets = [0, 8], sizes = [16, 1], strides = [1, 1]} : vector<16x9xf32> to vector<16x1xf32>
    %497 = vector.shape_cast %496 : vector<16x1xf32> to vector<16x1xf32>
    %498 = vector.broadcast %497 : vector<16x1xf32> to vector<16x512xf32>
    %c0_65 = arith.constant 0 : index
    %c0_66 = arith.constant 0 : index
    %499 = vector.load %arg12[%c0_65, %c0_66] : memref<16x1xf32, #tpu.memory_space<vmem>>, vector<16x1xf32>
    %500 = vector.shape_cast %499 : vector<16x1xf32> to vector<16x1xf32>
    %501 = vector.broadcast %500 : vector<16x1xf32> to vector<16x512xf32>
    %c0_67 = arith.constant 0 : index
    %c0_68 = arith.constant 0 : index
    %502 = vector.load %arg13[%c0_67, %c0_68] : memref<64x32xbf16, #tpu.memory_space<vmem>>, vector<64x32xbf16>
    %c0_69 = arith.constant 0 : index
    %c0_70 = arith.constant 0 : index
    %503 = vector.load %arg16[%c0_69, %c0_70] : memref<16x64xbf16, #tpu.memory_space<vmem>>, vector<16x64xbf16>
    %c0_71 = arith.constant 0 : index
    %c0_72 = arith.constant 0 : index
    %504 = vector.load %arg14[%c0_71, %c0_72] : memref<64x1xf32, #tpu.memory_space<vmem>>, vector<64x1xf32>
    %c0_73 = arith.constant 0 : index
    %c0_74 = arith.constant 0 : index
    %505 = vector.load %arg15[%c0_73, %c0_74] : memref<64x1xf32, #tpu.memory_space<vmem>>, vector<64x1xf32>
    %506 = vector.extract_strided_slice %455 {offsets = [0, 1], sizes = [16, 511], strides = [1, 1]} : vector<16x512xf32> to vector<16x511xf32>
    %507 = vector.extract_strided_slice %455 {offsets = [0, 0], sizes = [16, 1], strides = [1, 1]} : vector<16x512xf32> to vector<16x1xf32>
    %508 = tpu.concatenate %506, %507 in 1 : vector<16x511xf32>, vector<16x1xf32> -> vector<16x512xf32>
    %509 = vector.extract_strided_slice %455 {offsets = [0, 511], sizes = [16, 1], strides = [1, 1]} : vector<16x512xf32> to vector<16x1xf32>
    %510 = vector.extract_strided_slice %455 {offsets = [0, 0], sizes = [16, 511], strides = [1, 1]} : vector<16x512xf32> to vector<16x511xf32>
    %511 = tpu.concatenate %509, %510 in 1 : vector<16x1xf32>, vector<16x511xf32> -> vector<16x512xf32>
    %512 = vector.shape_cast %464 : vector<1x512xi1> to vector<1x512xi1>
    %513 = vector.broadcast %512 : vector<1x512xi1> to vector<16x512xi1>
    %514 = arith.select %513, %508, %511 : vector<16x512xi1>, vector<16x512xf32>
    %515 = vector.shape_cast %466 : vector<1x512xi1> to vector<1x512xi1>
    %516 = vector.broadcast %515 : vector<1x512xi1> to vector<16x512xi1>
    %517 = arith.select %516, %511, %508 : vector<16x512xi1>, vector<16x512xf32>
    %518 = vector.extract_strided_slice %514 {offsets = [0, 496], sizes = [16, 16], strides = [1, 1]} : vector<16x512xf32> to vector<16x16xf32>
    %519 = vector.extract_strided_slice %514 {offsets = [0, 0], sizes = [16, 496], strides = [1, 1]} : vector<16x512xf32> to vector<16x496xf32>
    %520 = tpu.concatenate %518, %519 in 1 : vector<16x16xf32>, vector<16x496xf32> -> vector<16x512xf32>
    %521 = vector.extract_strided_slice %514 {offsets = [0, 16], sizes = [16, 496], strides = [1, 1]} : vector<16x512xf32> to vector<16x496xf32>
    %522 = vector.extract_strided_slice %514 {offsets = [0, 0], sizes = [16, 16], strides = [1, 1]} : vector<16x512xf32> to vector<16x16xf32>
    %523 = tpu.concatenate %521, %522 in 1 : vector<16x496xf32>, vector<16x16xf32> -> vector<16x512xf32>
    %524 = vector.shape_cast %468 : vector<1x512xi1> to vector<1x512xi1>
    %525 = vector.broadcast %524 : vector<1x512xi1> to vector<16x512xi1>
    %526 = arith.select %525, %523, %520 : vector<16x512xi1>, vector<16x512xf32>
    %527 = vector.shape_cast %470 : vector<1x512xi1> to vector<1x512xi1>
    %528 = vector.broadcast %527 : vector<1x512xi1> to vector<16x512xi1>
    %529 = arith.select %528, %520, %523 : vector<16x512xi1>, vector<16x512xf32>
    %530 = arith.mulf %526, %474 : vector<16x512xf32>
    %531 = arith.addf %501, %530 : vector<16x512xf32>
    %532 = arith.mulf %514, %483 : vector<16x512xf32>
    %533 = arith.addf %531, %532 : vector<16x512xf32>
    %534 = arith.mulf %529, %492 : vector<16x512xf32>
    %535 = arith.addf %533, %534 : vector<16x512xf32>
    %536 = vector.extract_strided_slice %455 {offsets = [0, 496], sizes = [16, 16], strides = [1, 1]} : vector<16x512xf32> to vector<16x16xf32>
    %537 = vector.extract_strided_slice %455 {offsets = [0, 0], sizes = [16, 496], strides = [1, 1]} : vector<16x512xf32> to vector<16x496xf32>
    %538 = tpu.concatenate %536, %537 in 1 : vector<16x16xf32>, vector<16x496xf32> -> vector<16x512xf32>
    %539 = vector.extract_strided_slice %455 {offsets = [0, 16], sizes = [16, 496], strides = [1, 1]} : vector<16x512xf32> to vector<16x496xf32>
    %540 = vector.extract_strided_slice %455 {offsets = [0, 0], sizes = [16, 16], strides = [1, 1]} : vector<16x512xf32> to vector<16x16xf32>
    %541 = tpu.concatenate %539, %540 in 1 : vector<16x496xf32>, vector<16x16xf32> -> vector<16x512xf32>
    %542 = vector.shape_cast %468 : vector<1x512xi1> to vector<1x512xi1>
    %543 = vector.broadcast %542 : vector<1x512xi1> to vector<16x512xi1>
    %544 = arith.select %543, %541, %538 : vector<16x512xi1>, vector<16x512xf32>
    %545 = vector.shape_cast %470 : vector<1x512xi1> to vector<1x512xi1>
    %546 = vector.broadcast %545 : vector<1x512xi1> to vector<16x512xi1>
    %547 = arith.select %546, %538, %541 : vector<16x512xi1>, vector<16x512xf32>
    %548 = arith.mulf %544, %477 : vector<16x512xf32>
    %549 = arith.addf %535, %548 : vector<16x512xf32>
    %550 = arith.mulf %455, %486 : vector<16x512xf32>
    %551 = arith.addf %549, %550 : vector<16x512xf32>
    %552 = arith.mulf %547, %495 : vector<16x512xf32>
    %553 = arith.addf %551, %552 : vector<16x512xf32>
    %554 = vector.extract_strided_slice %517 {offsets = [0, 496], sizes = [16, 16], strides = [1, 1]} : vector<16x512xf32> to vector<16x16xf32>
    %555 = vector.extract_strided_slice %517 {offsets = [0, 0], sizes = [16, 496], strides = [1, 1]} : vector<16x512xf32> to vector<16x496xf32>
    %556 = tpu.concatenate %554, %555 in 1 : vector<16x16xf32>, vector<16x496xf32> -> vector<16x512xf32>
    %557 = vector.extract_strided_slice %517 {offsets = [0, 16], sizes = [16, 496], strides = [1, 1]} : vector<16x512xf32> to vector<16x496xf32>
    %558 = vector.extract_strided_slice %517 {offsets = [0, 0], sizes = [16, 16], strides = [1, 1]} : vector<16x512xf32> to vector<16x16xf32>
    %559 = tpu.concatenate %557, %558 in 1 : vector<16x496xf32>, vector<16x16xf32> -> vector<16x512xf32>
    %560 = vector.shape_cast %468 : vector<1x512xi1> to vector<1x512xi1>
    %561 = vector.broadcast %560 : vector<1x512xi1> to vector<16x512xi1>
    %562 = arith.select %561, %559, %556 : vector<16x512xi1>, vector<16x512xf32>
    %563 = vector.shape_cast %470 : vector<1x512xi1> to vector<1x512xi1>
    %564 = vector.broadcast %563 : vector<1x512xi1> to vector<16x512xi1>
    %565 = arith.select %564, %556, %559 : vector<16x512xi1>, vector<16x512xf32>
    %566 = arith.mulf %562, %480 : vector<16x512xf32>
    %567 = arith.addf %553, %566 : vector<16x512xf32>
    %568 = arith.mulf %517, %489 : vector<16x512xf32>
    %569 = arith.addf %567, %568 : vector<16x512xf32>
    %570 = arith.mulf %565, %498 : vector<16x512xf32>
    %571 = arith.addf %569, %570 : vector<16x512xf32>
    %572 = arith.truncf %455 : vector<16x512xf32> to vector<16x512xbf16>
    %573 = arith.truncf %571 : vector<16x512xf32> to vector<16x512xbf16>
    %574 = tpu.concatenate %572, %573 in 0 : vector<16x512xbf16>, vector<16x512xbf16> -> vector<32x512xbf16>
    %cst_75 = arith.constant dense<0.000000e+00> : vector<64x512xf32>
    %575 = tpu.matmul %502, %574, %cst_75 {dimension_numbers = #tpu.dot_dimension_numbers<[1], [0], [0], [1], [0, 0, 1, 1], [], []>} : vector<64x32xbf16>, vector<32x512xbf16>, vector<64x512xf32> -> vector<64x512xf32>
    %cst_76 = arith.constant dense<0.000000e+00> : vector<64xf32>
    %576 = vector.multi_reduction <add>, %575, %cst_76 [1] : vector<64x512xf32> to vector<64xf32>
    %577 = vector.shape_cast %576 : vector<64xf32> to vector<64x1xf32>
    %cst_77 = arith.constant 5.120000e+02 : f32
    %578 = vector.broadcast %cst_77 : f32 to vector<64x1xf32>
    %579 = arith.divf %577, %578 : vector<64x1xf32>
    %580 = vector.broadcast %579 : vector<64x1xf32> to vector<64x512xf32>
    %581 = arith.subf %575, %580 : vector<64x512xf32>
    %582 = arith.mulf %581, %581 : vector<64x512xf32>
    %cst_78 = arith.constant dense<0.000000e+00> : vector<64xf32>
    %583 = vector.multi_reduction <add>, %582, %cst_78 [1] : vector<64x512xf32> to vector<64xf32>
    %584 = vector.shape_cast %583 : vector<64xf32> to vector<64x1xf32>
    %cst_79 = arith.constant 5.120000e+02 : f32
    %585 = vector.broadcast %cst_79 : f32 to vector<64x1xf32>
    %586 = arith.divf %584, %585 : vector<64x1xf32>
    %cst_80 = arith.constant 9.99999974E-6 : f32
    %587 = vector.broadcast %cst_80 : f32 to vector<64x1xf32>
    %588 = arith.addf %586, %587 : vector<64x1xf32>
    %589 = math.rsqrt %588 : vector<64x1xf32>
    %590 = arith.mulf %504, %589 : vector<64x1xf32>
    %591 = arith.mulf %579, %590 : vector<64x1xf32>
    %592 = arith.subf %505, %591 : vector<64x1xf32>
    %593 = vector.broadcast %590 : vector<64x1xf32> to vector<64x512xf32>
    %594 = arith.mulf %575, %593 : vector<64x512xf32>
    %595 = vector.broadcast %592 : vector<64x1xf32> to vector<64x512xf32>
    %596 = arith.addf %594, %595 : vector<64x512xf32>
    %cst_81 = arith.constant 0.000000e+00 : f32
    %597 = vector.broadcast %cst_81 : f32 to vector<64x512xf32>
    %598 = arith.maximumf %596, %597 : vector<64x512xf32>
    %599 = arith.truncf %598 : vector<64x512xf32> to vector<64x512xbf16>
    %cst_82 = arith.constant dense<0.000000e+00> : vector<16x512xf32>
    %600 = tpu.matmul %503, %599, %cst_82 {dimension_numbers = #tpu.dot_dimension_numbers<[1], [0], [0], [1], [0, 0, 1, 1], [], []>} : vector<16x64xbf16>, vector<64x512xbf16>, vector<16x512xf32> -> vector<16x512xf32>
    %c0_83 = arith.constant 0 : index
    %c0_84 = arith.constant 0 : index
    %601 = vector.load %arg10[%c0_83, %c0_84] : memref<4x512xf32, #tpu.memory_space<vmem>>, vector<1x512xf32>
    %602 = vector.broadcast %601 : vector<1x512xf32> to vector<16x512xf32>
    %603 = arith.mulf %600, %602 : vector<16x512xf32>
    %604 = arith.addf %455, %603 : vector<16x512xf32>
    %605 = vector.extract_strided_slice %604 {offsets = [0, 1], sizes = [16, 511], strides = [1, 1]} : vector<16x512xf32> to vector<16x511xf32>
    %606 = vector.extract_strided_slice %604 {offsets = [0, 0], sizes = [16, 1], strides = [1, 1]} : vector<16x512xf32> to vector<16x1xf32>
    %607 = tpu.concatenate %605, %606 in 1 : vector<16x511xf32>, vector<16x1xf32> -> vector<16x512xf32>
    %608 = vector.extract_strided_slice %604 {offsets = [0, 511], sizes = [16, 1], strides = [1, 1]} : vector<16x512xf32> to vector<16x1xf32>
    %609 = vector.extract_strided_slice %604 {offsets = [0, 0], sizes = [16, 511], strides = [1, 1]} : vector<16x512xf32> to vector<16x511xf32>
    %610 = tpu.concatenate %608, %609 in 1 : vector<16x1xf32>, vector<16x511xf32> -> vector<16x512xf32>
    %611 = vector.shape_cast %464 : vector<1x512xi1> to vector<1x512xi1>
    %612 = vector.broadcast %611 : vector<1x512xi1> to vector<16x512xi1>
    %613 = arith.select %612, %607, %610 : vector<16x512xi1>, vector<16x512xf32>
    %614 = vector.shape_cast %466 : vector<1x512xi1> to vector<1x512xi1>
    %615 = vector.broadcast %614 : vector<1x512xi1> to vector<16x512xi1>
    %616 = arith.select %615, %610, %607 : vector<16x512xi1>, vector<16x512xf32>
    %617 = vector.extract_strided_slice %613 {offsets = [0, 496], sizes = [16, 16], strides = [1, 1]} : vector<16x512xf32> to vector<16x16xf32>
    %618 = vector.extract_strided_slice %613 {offsets = [0, 0], sizes = [16, 496], strides = [1, 1]} : vector<16x512xf32> to vector<16x496xf32>
    %619 = tpu.concatenate %617, %618 in 1 : vector<16x16xf32>, vector<16x496xf32> -> vector<16x512xf32>
    %620 = vector.extract_strided_slice %613 {offsets = [0, 16], sizes = [16, 496], strides = [1, 1]} : vector<16x512xf32> to vector<16x496xf32>
    %621 = vector.extract_strided_slice %613 {offsets = [0, 0], sizes = [16, 16], strides = [1, 1]} : vector<16x512xf32> to vector<16x16xf32>
    %622 = tpu.concatenate %620, %621 in 1 : vector<16x496xf32>, vector<16x16xf32> -> vector<16x512xf32>
    %623 = vector.shape_cast %468 : vector<1x512xi1> to vector<1x512xi1>
    %624 = vector.broadcast %623 : vector<1x512xi1> to vector<16x512xi1>
    %625 = arith.select %624, %622, %619 : vector<16x512xi1>, vector<16x512xf32>
    %626 = vector.shape_cast %470 : vector<1x512xi1> to vector<1x512xi1>
    %627 = vector.broadcast %626 : vector<1x512xi1> to vector<16x512xi1>
    %628 = arith.select %627, %619, %622 : vector<16x512xi1>, vector<16x512xf32>
    %629 = arith.mulf %625, %474 : vector<16x512xf32>
    %630 = arith.addf %501, %629 : vector<16x512xf32>
    %631 = arith.mulf %613, %483 : vector<16x512xf32>
    %632 = arith.addf %630, %631 : vector<16x512xf32>
    %633 = arith.mulf %628, %492 : vector<16x512xf32>
    %634 = arith.addf %632, %633 : vector<16x512xf32>
    %635 = vector.extract_strided_slice %604 {offsets = [0, 496], sizes = [16, 16], strides = [1, 1]} : vector<16x512xf32> to vector<16x16xf32>
    %636 = vector.extract_strided_slice %604 {offsets = [0, 0], sizes = [16, 496], strides = [1, 1]} : vector<16x512xf32> to vector<16x496xf32>
    %637 = tpu.concatenate %635, %636 in 1 : vector<16x16xf32>, vector<16x496xf32> -> vector<16x512xf32>
    %638 = vector.extract_strided_slice %604 {offsets = [0, 16], sizes = [16, 496], strides = [1, 1]} : vector<16x512xf32> to vector<16x496xf32>
    %639 = vector.extract_strided_slice %604 {offsets = [0, 0], sizes = [16, 16], strides = [1, 1]} : vector<16x512xf32> to vector<16x16xf32>
    %640 = tpu.concatenate %638, %639 in 1 : vector<16x496xf32>, vector<16x16xf32> -> vector<16x512xf32>
    %641 = vector.shape_cast %468 : vector<1x512xi1> to vector<1x512xi1>
    %642 = vector.broadcast %641 : vector<1x512xi1> to vector<16x512xi1>
    %643 = arith.select %642, %640, %637 : vector<16x512xi1>, vector<16x512xf32>
    %644 = vector.shape_cast %470 : vector<1x512xi1> to vector<1x512xi1>
    %645 = vector.broadcast %644 : vector<1x512xi1> to vector<16x512xi1>
    %646 = arith.select %645, %637, %640 : vector<16x512xi1>, vector<16x512xf32>
    %647 = arith.mulf %643, %477 : vector<16x512xf32>
    %648 = arith.addf %634, %647 : vector<16x512xf32>
    %649 = arith.mulf %604, %486 : vector<16x512xf32>
    %650 = arith.addf %648, %649 : vector<16x512xf32>
    %651 = arith.mulf %646, %495 : vector<16x512xf32>
    %652 = arith.addf %650, %651 : vector<16x512xf32>
    %653 = vector.extract_strided_slice %616 {offsets = [0, 496], sizes = [16, 16], strides = [1, 1]} : vector<16x512xf32> to vector<16x16xf32>
    %654 = vector.extract_strided_slice %616 {offsets = [0, 0], sizes = [16, 496], strides = [1, 1]} : vector<16x512xf32> to vector<16x496xf32>
    %655 = tpu.concatenate %653, %654 in 1 : vector<16x16xf32>, vector<16x496xf32> -> vector<16x512xf32>
    %656 = vector.extract_strided_slice %616 {offsets = [0, 16], sizes = [16, 496], strides = [1, 1]} : vector<16x512xf32> to vector<16x496xf32>
    %657 = vector.extract_strided_slice %616 {offsets = [0, 0], sizes = [16, 16], strides = [1, 1]} : vector<16x512xf32> to vector<16x16xf32>
    %658 = tpu.concatenate %656, %657 in 1 : vector<16x496xf32>, vector<16x16xf32> -> vector<16x512xf32>
    %659 = vector.shape_cast %468 : vector<1x512xi1> to vector<1x512xi1>
    %660 = vector.broadcast %659 : vector<1x512xi1> to vector<16x512xi1>
    %661 = arith.select %660, %658, %655 : vector<16x512xi1>, vector<16x512xf32>
    %662 = vector.shape_cast %470 : vector<1x512xi1> to vector<1x512xi1>
    %663 = vector.broadcast %662 : vector<1x512xi1> to vector<16x512xi1>
    %664 = arith.select %663, %655, %658 : vector<16x512xi1>, vector<16x512xf32>
    %665 = arith.mulf %661, %480 : vector<16x512xf32>
    %666 = arith.addf %652, %665 : vector<16x512xf32>
    %667 = arith.mulf %616, %489 : vector<16x512xf32>
    %668 = arith.addf %666, %667 : vector<16x512xf32>
    %669 = arith.mulf %664, %498 : vector<16x512xf32>
    %670 = arith.addf %668, %669 : vector<16x512xf32>
    %671 = arith.truncf %604 : vector<16x512xf32> to vector<16x512xbf16>
    %672 = arith.truncf %670 : vector<16x512xf32> to vector<16x512xbf16>
    %673 = tpu.concatenate %671, %672 in 0 : vector<16x512xbf16>, vector<16x512xbf16> -> vector<32x512xbf16>
    %cst_85 = arith.constant dense<0.000000e+00> : vector<64x512xf32>
    %674 = tpu.matmul %502, %673, %cst_85 {dimension_numbers = #tpu.dot_dimension_numbers<[1], [0], [0], [1], [0, 0, 1, 1], [], []>} : vector<64x32xbf16>, vector<32x512xbf16>, vector<64x512xf32> -> vector<64x512xf32>
    %cst_86 = arith.constant dense<0.000000e+00> : vector<64xf32>
    %675 = vector.multi_reduction <add>, %674, %cst_86 [1] : vector<64x512xf32> to vector<64xf32>
    %676 = vector.shape_cast %675 : vector<64xf32> to vector<64x1xf32>
    %cst_87 = arith.constant 5.120000e+02 : f32
    %677 = vector.broadcast %cst_87 : f32 to vector<64x1xf32>
    %678 = arith.divf %676, %677 : vector<64x1xf32>
    %679 = vector.broadcast %678 : vector<64x1xf32> to vector<64x512xf32>
    %680 = arith.subf %674, %679 : vector<64x512xf32>
    %681 = arith.mulf %680, %680 : vector<64x512xf32>
    %cst_88 = arith.constant dense<0.000000e+00> : vector<64xf32>
    %682 = vector.multi_reduction <add>, %681, %cst_88 [1] : vector<64x512xf32> to vector<64xf32>
    %683 = vector.shape_cast %682 : vector<64xf32> to vector<64x1xf32>
    %cst_89 = arith.constant 5.120000e+02 : f32
    %684 = vector.broadcast %cst_89 : f32 to vector<64x1xf32>
    %685 = arith.divf %683, %684 : vector<64x1xf32>
    %cst_90 = arith.constant 9.99999974E-6 : f32
    %686 = vector.broadcast %cst_90 : f32 to vector<64x1xf32>
    %687 = arith.addf %685, %686 : vector<64x1xf32>
    %688 = math.rsqrt %687 : vector<64x1xf32>
    %689 = arith.mulf %504, %688 : vector<64x1xf32>
    %690 = arith.mulf %678, %689 : vector<64x1xf32>
    %691 = arith.subf %505, %690 : vector<64x1xf32>
    %692 = vector.broadcast %689 : vector<64x1xf32> to vector<64x512xf32>
    %693 = arith.mulf %674, %692 : vector<64x512xf32>
    %694 = vector.broadcast %691 : vector<64x1xf32> to vector<64x512xf32>
    %695 = arith.addf %693, %694 : vector<64x512xf32>
    %cst_91 = arith.constant 0.000000e+00 : f32
    %696 = vector.broadcast %cst_91 : f32 to vector<64x512xf32>
    %697 = arith.maximumf %695, %696 : vector<64x512xf32>
    %698 = arith.truncf %697 : vector<64x512xf32> to vector<64x512xbf16>
    %cst_92 = arith.constant dense<0.000000e+00> : vector<16x512xf32>
    %699 = tpu.matmul %503, %698, %cst_92 {dimension_numbers = #tpu.dot_dimension_numbers<[1], [0], [0], [1], [0, 0, 1, 1], [], []>} : vector<16x64xbf16>, vector<64x512xbf16>, vector<16x512xf32> -> vector<16x512xf32>
    %c1_93 = arith.constant 1 : index
    %c0_94 = arith.constant 0 : index
    %700 = vector.load %arg10[%c1_93, %c0_94] : memref<4x512xf32, #tpu.memory_space<vmem>>, vector<1x512xf32>
    %701 = vector.broadcast %700 : vector<1x512xf32> to vector<16x512xf32>
    %702 = arith.mulf %699, %701 : vector<16x512xf32>
    %703 = arith.addf %604, %702 : vector<16x512xf32>
    %704 = vector.extract_strided_slice %703 {offsets = [0, 1], sizes = [16, 511], strides = [1, 1]} : vector<16x512xf32> to vector<16x511xf32>
    %705 = vector.extract_strided_slice %703 {offsets = [0, 0], sizes = [16, 1], strides = [1, 1]} : vector<16x512xf32> to vector<16x1xf32>
    %706 = tpu.concatenate %704, %705 in 1 : vector<16x511xf32>, vector<16x1xf32> -> vector<16x512xf32>
    %707 = vector.extract_strided_slice %703 {offsets = [0, 511], sizes = [16, 1], strides = [1, 1]} : vector<16x512xf32> to vector<16x1xf32>
    %708 = vector.extract_strided_slice %703 {offsets = [0, 0], sizes = [16, 511], strides = [1, 1]} : vector<16x512xf32> to vector<16x511xf32>
    %709 = tpu.concatenate %707, %708 in 1 : vector<16x1xf32>, vector<16x511xf32> -> vector<16x512xf32>
    %710 = vector.shape_cast %464 : vector<1x512xi1> to vector<1x512xi1>
    %711 = vector.broadcast %710 : vector<1x512xi1> to vector<16x512xi1>
    %712 = arith.select %711, %706, %709 : vector<16x512xi1>, vector<16x512xf32>
    %713 = vector.shape_cast %466 : vector<1x512xi1> to vector<1x512xi1>
    %714 = vector.broadcast %713 : vector<1x512xi1> to vector<16x512xi1>
    %715 = arith.select %714, %709, %706 : vector<16x512xi1>, vector<16x512xf32>
    %716 = vector.extract_strided_slice %712 {offsets = [0, 496], sizes = [16, 16], strides = [1, 1]} : vector<16x512xf32> to vector<16x16xf32>
    %717 = vector.extract_strided_slice %712 {offsets = [0, 0], sizes = [16, 496], strides = [1, 1]} : vector<16x512xf32> to vector<16x496xf32>
    %718 = tpu.concatenate %716, %717 in 1 : vector<16x16xf32>, vector<16x496xf32> -> vector<16x512xf32>
    %719 = vector.extract_strided_slice %712 {offsets = [0, 16], sizes = [16, 496], strides = [1, 1]} : vector<16x512xf32> to vector<16x496xf32>
    %720 = vector.extract_strided_slice %712 {offsets = [0, 0], sizes = [16, 16], strides = [1, 1]} : vector<16x512xf32> to vector<16x16xf32>
    %721 = tpu.concatenate %719, %720 in 1 : vector<16x496xf32>, vector<16x16xf32> -> vector<16x512xf32>
    %722 = vector.shape_cast %468 : vector<1x512xi1> to vector<1x512xi1>
    %723 = vector.broadcast %722 : vector<1x512xi1> to vector<16x512xi1>
    %724 = arith.select %723, %721, %718 : vector<16x512xi1>, vector<16x512xf32>
    %725 = vector.shape_cast %470 : vector<1x512xi1> to vector<1x512xi1>
    %726 = vector.broadcast %725 : vector<1x512xi1> to vector<16x512xi1>
    %727 = arith.select %726, %718, %721 : vector<16x512xi1>, vector<16x512xf32>
    %728 = arith.mulf %724, %474 : vector<16x512xf32>
    %729 = arith.addf %501, %728 : vector<16x512xf32>
    %730 = arith.mulf %712, %483 : vector<16x512xf32>
    %731 = arith.addf %729, %730 : vector<16x512xf32>
    %732 = arith.mulf %727, %492 : vector<16x512xf32>
    %733 = arith.addf %731, %732 : vector<16x512xf32>
    %734 = vector.extract_strided_slice %703 {offsets = [0, 496], sizes = [16, 16], strides = [1, 1]} : vector<16x512xf32> to vector<16x16xf32>
    %735 = vector.extract_strided_slice %703 {offsets = [0, 0], sizes = [16, 496], strides = [1, 1]} : vector<16x512xf32> to vector<16x496xf32>
    %736 = tpu.concatenate %734, %735 in 1 : vector<16x16xf32>, vector<16x496xf32> -> vector<16x512xf32>
    %737 = vector.extract_strided_slice %703 {offsets = [0, 16], sizes = [16, 496], strides = [1, 1]} : vector<16x512xf32> to vector<16x496xf32>
    %738 = vector.extract_strided_slice %703 {offsets = [0, 0], sizes = [16, 16], strides = [1, 1]} : vector<16x512xf32> to vector<16x16xf32>
    %739 = tpu.concatenate %737, %738 in 1 : vector<16x496xf32>, vector<16x16xf32> -> vector<16x512xf32>
    %740 = vector.shape_cast %468 : vector<1x512xi1> to vector<1x512xi1>
    %741 = vector.broadcast %740 : vector<1x512xi1> to vector<16x512xi1>
    %742 = arith.select %741, %739, %736 : vector<16x512xi1>, vector<16x512xf32>
    %743 = vector.shape_cast %470 : vector<1x512xi1> to vector<1x512xi1>
    %744 = vector.broadcast %743 : vector<1x512xi1> to vector<16x512xi1>
    %745 = arith.select %744, %736, %739 : vector<16x512xi1>, vector<16x512xf32>
    %746 = arith.mulf %742, %477 : vector<16x512xf32>
    %747 = arith.addf %733, %746 : vector<16x512xf32>
    %748 = arith.mulf %703, %486 : vector<16x512xf32>
    %749 = arith.addf %747, %748 : vector<16x512xf32>
    %750 = arith.mulf %745, %495 : vector<16x512xf32>
    %751 = arith.addf %749, %750 : vector<16x512xf32>
    %752 = vector.extract_strided_slice %715 {offsets = [0, 496], sizes = [16, 16], strides = [1, 1]} : vector<16x512xf32> to vector<16x16xf32>
    %753 = vector.extract_strided_slice %715 {offsets = [0, 0], sizes = [16, 496], strides = [1, 1]} : vector<16x512xf32> to vector<16x496xf32>
    %754 = tpu.concatenate %752, %753 in 1 : vector<16x16xf32>, vector<16x496xf32> -> vector<16x512xf32>
    %755 = vector.extract_strided_slice %715 {offsets = [0, 16], sizes = [16, 496], strides = [1, 1]} : vector<16x512xf32> to vector<16x496xf32>
    %756 = vector.extract_strided_slice %715 {offsets = [0, 0], sizes = [16, 16], strides = [1, 1]} : vector<16x512xf32> to vector<16x16xf32>
    %757 = tpu.concatenate %755, %756 in 1 : vector<16x496xf32>, vector<16x16xf32> -> vector<16x512xf32>
    %758 = vector.shape_cast %468 : vector<1x512xi1> to vector<1x512xi1>
    %759 = vector.broadcast %758 : vector<1x512xi1> to vector<16x512xi1>
    %760 = arith.select %759, %757, %754 : vector<16x512xi1>, vector<16x512xf32>
    %761 = vector.shape_cast %470 : vector<1x512xi1> to vector<1x512xi1>
    %762 = vector.broadcast %761 : vector<1x512xi1> to vector<16x512xi1>
    %763 = arith.select %762, %754, %757 : vector<16x512xi1>, vector<16x512xf32>
    %764 = arith.mulf %760, %480 : vector<16x512xf32>
    %765 = arith.addf %751, %764 : vector<16x512xf32>
    %766 = arith.mulf %715, %489 : vector<16x512xf32>
    %767 = arith.addf %765, %766 : vector<16x512xf32>
    %768 = arith.mulf %763, %498 : vector<16x512xf32>
    %769 = arith.addf %767, %768 : vector<16x512xf32>
    %770 = arith.truncf %703 : vector<16x512xf32> to vector<16x512xbf16>
    %771 = arith.truncf %769 : vector<16x512xf32> to vector<16x512xbf16>
    %772 = tpu.concatenate %770, %771 in 0 : vector<16x512xbf16>, vector<16x512xbf16> -> vector<32x512xbf16>
    %cst_95 = arith.constant dense<0.000000e+00> : vector<64x512xf32>
    %773 = tpu.matmul %502, %772, %cst_95 {dimension_numbers = #tpu.dot_dimension_numbers<[1], [0], [0], [1], [0, 0, 1, 1], [], []>} : vector<64x32xbf16>, vector<32x512xbf16>, vector<64x512xf32> -> vector<64x512xf32>
    %cst_96 = arith.constant dense<0.000000e+00> : vector<64xf32>
    %774 = vector.multi_reduction <add>, %773, %cst_96 [1] : vector<64x512xf32> to vector<64xf32>
    %775 = vector.shape_cast %774 : vector<64xf32> to vector<64x1xf32>
    %cst_97 = arith.constant 5.120000e+02 : f32
    %776 = vector.broadcast %cst_97 : f32 to vector<64x1xf32>
    %777 = arith.divf %775, %776 : vector<64x1xf32>
    %778 = vector.broadcast %777 : vector<64x1xf32> to vector<64x512xf32>
    %779 = arith.subf %773, %778 : vector<64x512xf32>
    %780 = arith.mulf %779, %779 : vector<64x512xf32>
    %cst_98 = arith.constant dense<0.000000e+00> : vector<64xf32>
    %781 = vector.multi_reduction <add>, %780, %cst_98 [1] : vector<64x512xf32> to vector<64xf32>
    %782 = vector.shape_cast %781 : vector<64xf32> to vector<64x1xf32>
    %cst_99 = arith.constant 5.120000e+02 : f32
    %783 = vector.broadcast %cst_99 : f32 to vector<64x1xf32>
    %784 = arith.divf %782, %783 : vector<64x1xf32>
    %cst_100 = arith.constant 9.99999974E-6 : f32
    %785 = vector.broadcast %cst_100 : f32 to vector<64x1xf32>
    %786 = arith.addf %784, %785 : vector<64x1xf32>
    %787 = math.rsqrt %786 : vector<64x1xf32>
    %788 = arith.mulf %504, %787 : vector<64x1xf32>
    %789 = arith.mulf %777, %788 : vector<64x1xf32>
    %790 = arith.subf %505, %789 : vector<64x1xf32>
    %791 = vector.broadcast %788 : vector<64x1xf32> to vector<64x512xf32>
    %792 = arith.mulf %773, %791 : vector<64x512xf32>
    %793 = vector.broadcast %790 : vector<64x1xf32> to vector<64x512xf32>
    %794 = arith.addf %792, %793 : vector<64x512xf32>
    %cst_101 = arith.constant 0.000000e+00 : f32
    %795 = vector.broadcast %cst_101 : f32 to vector<64x512xf32>
    %796 = arith.maximumf %794, %795 : vector<64x512xf32>
    %797 = arith.truncf %796 : vector<64x512xf32> to vector<64x512xbf16>
    %cst_102 = arith.constant dense<0.000000e+00> : vector<16x512xf32>
    %798 = tpu.matmul %503, %797, %cst_102 {dimension_numbers = #tpu.dot_dimension_numbers<[1], [0], [0], [1], [0, 0, 1, 1], [], []>} : vector<16x64xbf16>, vector<64x512xbf16>, vector<16x512xf32> -> vector<16x512xf32>
    %c2_103 = arith.constant 2 : index
    %c0_104 = arith.constant 0 : index
    %799 = vector.load %arg10[%c2_103, %c0_104] : memref<4x512xf32, #tpu.memory_space<vmem>>, vector<1x512xf32>
    %800 = vector.broadcast %799 : vector<1x512xf32> to vector<16x512xf32>
    %801 = arith.mulf %798, %800 : vector<16x512xf32>
    %802 = arith.addf %703, %801 : vector<16x512xf32>
    %803 = vector.extract_strided_slice %802 {offsets = [0, 1], sizes = [16, 511], strides = [1, 1]} : vector<16x512xf32> to vector<16x511xf32>
    %804 = vector.extract_strided_slice %802 {offsets = [0, 0], sizes = [16, 1], strides = [1, 1]} : vector<16x512xf32> to vector<16x1xf32>
    %805 = tpu.concatenate %803, %804 in 1 : vector<16x511xf32>, vector<16x1xf32> -> vector<16x512xf32>
    %806 = vector.extract_strided_slice %802 {offsets = [0, 511], sizes = [16, 1], strides = [1, 1]} : vector<16x512xf32> to vector<16x1xf32>
    %807 = vector.extract_strided_slice %802 {offsets = [0, 0], sizes = [16, 511], strides = [1, 1]} : vector<16x512xf32> to vector<16x511xf32>
    %808 = tpu.concatenate %806, %807 in 1 : vector<16x1xf32>, vector<16x511xf32> -> vector<16x512xf32>
    %809 = vector.shape_cast %464 : vector<1x512xi1> to vector<1x512xi1>
    %810 = vector.broadcast %809 : vector<1x512xi1> to vector<16x512xi1>
    %811 = arith.select %810, %805, %808 : vector<16x512xi1>, vector<16x512xf32>
    %812 = vector.shape_cast %466 : vector<1x512xi1> to vector<1x512xi1>
    %813 = vector.broadcast %812 : vector<1x512xi1> to vector<16x512xi1>
    %814 = arith.select %813, %808, %805 : vector<16x512xi1>, vector<16x512xf32>
    %815 = vector.extract_strided_slice %811 {offsets = [0, 496], sizes = [16, 16], strides = [1, 1]} : vector<16x512xf32> to vector<16x16xf32>
    %816 = vector.extract_strided_slice %811 {offsets = [0, 0], sizes = [16, 496], strides = [1, 1]} : vector<16x512xf32> to vector<16x496xf32>
    %817 = tpu.concatenate %815, %816 in 1 : vector<16x16xf32>, vector<16x496xf32> -> vector<16x512xf32>
    %818 = vector.extract_strided_slice %811 {offsets = [0, 16], sizes = [16, 496], strides = [1, 1]} : vector<16x512xf32> to vector<16x496xf32>
    %819 = vector.extract_strided_slice %811 {offsets = [0, 0], sizes = [16, 16], strides = [1, 1]} : vector<16x512xf32> to vector<16x16xf32>
    %820 = tpu.concatenate %818, %819 in 1 : vector<16x496xf32>, vector<16x16xf32> -> vector<16x512xf32>
    %821 = vector.shape_cast %468 : vector<1x512xi1> to vector<1x512xi1>
    %822 = vector.broadcast %821 : vector<1x512xi1> to vector<16x512xi1>
    %823 = arith.select %822, %820, %817 : vector<16x512xi1>, vector<16x512xf32>
    %824 = vector.shape_cast %470 : vector<1x512xi1> to vector<1x512xi1>
    %825 = vector.broadcast %824 : vector<1x512xi1> to vector<16x512xi1>
    %826 = arith.select %825, %817, %820 : vector<16x512xi1>, vector<16x512xf32>
    %827 = arith.mulf %823, %474 : vector<16x512xf32>
    %828 = arith.addf %501, %827 : vector<16x512xf32>
    %829 = arith.mulf %811, %483 : vector<16x512xf32>
    %830 = arith.addf %828, %829 : vector<16x512xf32>
    %831 = arith.mulf %826, %492 : vector<16x512xf32>
    %832 = arith.addf %830, %831 : vector<16x512xf32>
    %833 = vector.extract_strided_slice %802 {offsets = [0, 496], sizes = [16, 16], strides = [1, 1]} : vector<16x512xf32> to vector<16x16xf32>
    %834 = vector.extract_strided_slice %802 {offsets = [0, 0], sizes = [16, 496], strides = [1, 1]} : vector<16x512xf32> to vector<16x496xf32>
    %835 = tpu.concatenate %833, %834 in 1 : vector<16x16xf32>, vector<16x496xf32> -> vector<16x512xf32>
    %836 = vector.extract_strided_slice %802 {offsets = [0, 16], sizes = [16, 496], strides = [1, 1]} : vector<16x512xf32> to vector<16x496xf32>
    %837 = vector.extract_strided_slice %802 {offsets = [0, 0], sizes = [16, 16], strides = [1, 1]} : vector<16x512xf32> to vector<16x16xf32>
    %838 = tpu.concatenate %836, %837 in 1 : vector<16x496xf32>, vector<16x16xf32> -> vector<16x512xf32>
    %839 = vector.shape_cast %468 : vector<1x512xi1> to vector<1x512xi1>
    %840 = vector.broadcast %839 : vector<1x512xi1> to vector<16x512xi1>
    %841 = arith.select %840, %838, %835 : vector<16x512xi1>, vector<16x512xf32>
    %842 = vector.shape_cast %470 : vector<1x512xi1> to vector<1x512xi1>
    %843 = vector.broadcast %842 : vector<1x512xi1> to vector<16x512xi1>
    %844 = arith.select %843, %835, %838 : vector<16x512xi1>, vector<16x512xf32>
    %845 = arith.mulf %841, %477 : vector<16x512xf32>
    %846 = arith.addf %832, %845 : vector<16x512xf32>
    %847 = arith.mulf %802, %486 : vector<16x512xf32>
    %848 = arith.addf %846, %847 : vector<16x512xf32>
    %849 = arith.mulf %844, %495 : vector<16x512xf32>
    %850 = arith.addf %848, %849 : vector<16x512xf32>
    %851 = vector.extract_strided_slice %814 {offsets = [0, 496], sizes = [16, 16], strides = [1, 1]} : vector<16x512xf32> to vector<16x16xf32>
    %852 = vector.extract_strided_slice %814 {offsets = [0, 0], sizes = [16, 496], strides = [1, 1]} : vector<16x512xf32> to vector<16x496xf32>
    %853 = tpu.concatenate %851, %852 in 1 : vector<16x16xf32>, vector<16x496xf32> -> vector<16x512xf32>
    %854 = vector.extract_strided_slice %814 {offsets = [0, 16], sizes = [16, 496], strides = [1, 1]} : vector<16x512xf32> to vector<16x496xf32>
    %855 = vector.extract_strided_slice %814 {offsets = [0, 0], sizes = [16, 16], strides = [1, 1]} : vector<16x512xf32> to vector<16x16xf32>
    %856 = tpu.concatenate %854, %855 in 1 : vector<16x496xf32>, vector<16x16xf32> -> vector<16x512xf32>
    %857 = vector.shape_cast %468 : vector<1x512xi1> to vector<1x512xi1>
    %858 = vector.broadcast %857 : vector<1x512xi1> to vector<16x512xi1>
    %859 = arith.select %858, %856, %853 : vector<16x512xi1>, vector<16x512xf32>
    %860 = vector.shape_cast %470 : vector<1x512xi1> to vector<1x512xi1>
    %861 = vector.broadcast %860 : vector<1x512xi1> to vector<16x512xi1>
    %862 = arith.select %861, %853, %856 : vector<16x512xi1>, vector<16x512xf32>
    %863 = arith.mulf %859, %480 : vector<16x512xf32>
    %864 = arith.addf %850, %863 : vector<16x512xf32>
    %865 = arith.mulf %814, %489 : vector<16x512xf32>
    %866 = arith.addf %864, %865 : vector<16x512xf32>
    %867 = arith.mulf %862, %498 : vector<16x512xf32>
    %868 = arith.addf %866, %867 : vector<16x512xf32>
    %869 = arith.truncf %802 : vector<16x512xf32> to vector<16x512xbf16>
    %870 = arith.truncf %868 : vector<16x512xf32> to vector<16x512xbf16>
    %871 = tpu.concatenate %869, %870 in 0 : vector<16x512xbf16>, vector<16x512xbf16> -> vector<32x512xbf16>
    %cst_105 = arith.constant dense<0.000000e+00> : vector<64x512xf32>
    %872 = tpu.matmul %502, %871, %cst_105 {dimension_numbers = #tpu.dot_dimension_numbers<[1], [0], [0], [1], [0, 0, 1, 1], [], []>} : vector<64x32xbf16>, vector<32x512xbf16>, vector<64x512xf32> -> vector<64x512xf32>
    %cst_106 = arith.constant dense<0.000000e+00> : vector<64xf32>
    %873 = vector.multi_reduction <add>, %872, %cst_106 [1] : vector<64x512xf32> to vector<64xf32>
    %874 = vector.shape_cast %873 : vector<64xf32> to vector<64x1xf32>
    %cst_107 = arith.constant 5.120000e+02 : f32
    %875 = vector.broadcast %cst_107 : f32 to vector<64x1xf32>
    %876 = arith.divf %874, %875 : vector<64x1xf32>
    %877 = vector.broadcast %876 : vector<64x1xf32> to vector<64x512xf32>
    %878 = arith.subf %872, %877 : vector<64x512xf32>
    %879 = arith.mulf %878, %878 : vector<64x512xf32>
    %cst_108 = arith.constant dense<0.000000e+00> : vector<64xf32>
    %880 = vector.multi_reduction <add>, %879, %cst_108 [1] : vector<64x512xf32> to vector<64xf32>
    %881 = vector.shape_cast %880 : vector<64xf32> to vector<64x1xf32>
    %cst_109 = arith.constant 5.120000e+02 : f32
    %882 = vector.broadcast %cst_109 : f32 to vector<64x1xf32>
    %883 = arith.divf %881, %882 : vector<64x1xf32>
    %cst_110 = arith.constant 9.99999974E-6 : f32
    %884 = vector.broadcast %cst_110 : f32 to vector<64x1xf32>
    %885 = arith.addf %883, %884 : vector<64x1xf32>
    %886 = math.rsqrt %885 : vector<64x1xf32>
    %887 = arith.mulf %504, %886 : vector<64x1xf32>
    %888 = arith.mulf %876, %887 : vector<64x1xf32>
    %889 = arith.subf %505, %888 : vector<64x1xf32>
    %890 = vector.broadcast %887 : vector<64x1xf32> to vector<64x512xf32>
    %891 = arith.mulf %872, %890 : vector<64x512xf32>
    %892 = vector.broadcast %889 : vector<64x1xf32> to vector<64x512xf32>
    %893 = arith.addf %891, %892 : vector<64x512xf32>
    %cst_111 = arith.constant 0.000000e+00 : f32
    %894 = vector.broadcast %cst_111 : f32 to vector<64x512xf32>
    %895 = arith.maximumf %893, %894 : vector<64x512xf32>
    %896 = arith.truncf %895 : vector<64x512xf32> to vector<64x512xbf16>
    %cst_112 = arith.constant dense<0.000000e+00> : vector<16x512xf32>
    %897 = tpu.matmul %503, %896, %cst_112 {dimension_numbers = #tpu.dot_dimension_numbers<[1], [0], [0], [1], [0, 0, 1, 1], [], []>} : vector<16x64xbf16>, vector<64x512xbf16>, vector<16x512xf32> -> vector<16x512xf32>
    %c3_113 = arith.constant 3 : index
    %c0_114 = arith.constant 0 : index
    %898 = vector.load %arg10[%c3_113, %c0_114] : memref<4x512xf32, #tpu.memory_space<vmem>>, vector<1x512xf32>
    %899 = vector.broadcast %898 : vector<1x512xf32> to vector<16x512xf32>
    %900 = arith.mulf %897, %899 : vector<16x512xf32>
    %901 = arith.addf %802, %900 : vector<16x512xf32>
    %c0_115 = arith.constant 0 : index
    %c0_116 = arith.constant 0 : index
    %902 = vector.load %arg17[%c0_115, %c0_116] : memref<16x512xf32, #tpu.memory_space<vmem>>, vector<16x512xf32>
    tpu.vector_store %arg17[%c0_115, %c0_116], %901 {strides = array<i32>} : memref<16x512xf32, #tpu.memory_space<vmem>>, vector<16x512xf32>,
    return
  }
}

</mosaic_0001>

<bundles_post_ra>
// kernel: octree_nca_forward_eval.3
= control target key start
LH: loop header
LB: loop body
LE: loop exit
PB: predicated region body
PF: predicated region fallthrough
CT: control target
= control target key end

     0   :  { %v13245_v1 = vmov 0   ;;  %s7708_s27 = smov 1   ;;  %s7709_s28 = smov 127   ;;  %v13247_v5 = vmov 3   ;;  %v13242_v7 = vmov 6   ;;  %v13243_v9 = vmov 1   ;;  %s13211_s0 = inlined_call_operand.vmem [shape: f32[16,128], index: 0, kind: input, shape index: {}]   ;;  %s13212_s2 = inlined_call_operand.vmem [shape: f32[16,9], index: 2, kind: input, shape index: {}]   ;;  %s13213_s3 = inlined_call_operand.vmem [shape: f32[16,1], index: 3, kind: input, shape index: {}]   ;;  %s13214_s4 = inlined_call_operand.vmem [shape: bf16[64,32], index: 4, kind: input, shape index: {}]   ;;  %s13215_s5 = inlined_call_operand.vmem [shape: f32[64,1], index: 5, kind: input, shape index: {}]   ;;  %s13216_s6 = inlined_call_operand.vmem [shape: f32[64,1], index: 6, kind: input, shape index: {}]   ;;  %s13217_s7 = inlined_call_operand.vmem [shape: bf16[16,64], index: 7, kind: input, shape index: {}]   ;;  %s13218_s1 = inlined_call_operand.vmem [shape: f32[4,128], index: 1, kind: input, shape index: {}]   ;;  %s13219_s11 = inlined_call_operand.vmem [shape: f32[16,9], index: 11, kind: input, shape index: {}]   ;;  %s13220_s8 = inlined_call_operand.vmem [shape: f32[128,512], index: 8, kind: input, shape index: {}]   ;;  %s13221_s12 = inlined_call_operand.vmem [shape: f32[16,1], index: 12, kind: input, shape index: {}]   ;;  %s13222_s9 = inlined_call_operand.vmem [shape: f32[16,512], index: 9, kind: input, shape index: {}]   ;;  %s13223_s13 = inlined_call_operand.vmem [shape: bf16[64,32], index: 13, kind: input, shape index: {}]   ;;  %s13224_s14 = inlined_call_operand.vmem [shape: f32[64,1], index: 14, kind: input, shape index: {}]   ;;  %s13225_s15 = inlined_call_operand.vmem [shape: f32[64,1], index: 15, kind: input, shape index: {}]   ;;  %s13226_s16 = inlined_call_operand.vmem [shape: bf16[16,64], index: 16, kind: input, shape index: {}]   ;;  %s13227_s10 = inlined_call_operand.vmem [shape: f32[4,512], index: 10, kind: input, shape index: {}]   ;;  %s13228_s17 = inlined_call_operand.vmem [shape: f32[16,512], index: 17, kind: output, shape index: {}]  }
   0x1   :  { %13504 = sst [smem:[#allocation65_spill]] %s13211_s0  ;;  %7448 = vset.pattern.permute.xlu1 %v13245_v1  ;;  %7447 = vset.pattern.permute.xlu0 %v13245_v1  ;;  %v149_v6 = vld [vmem:[%s13213_s3] sm:$0xff]  ;;  %v150_v8 = vld [vmem:[%s13213_s3 + $0x8] sm:$0xff]  ;;  %v13240_v10 = vmov 4   ;;  %v13238_v11 = vmov 7   ;;  %s7715_s3 = smov 8   ;;  %v13231_v15 = vlaneseq }
   0x2   :  { %13505 = sst [smem:[#allocation66_spill]] %s13212_s2  ;;  %s13506_s26 = sld [smem:[#allocation65_spill]]  ;;  %v13234_v12 = vmov 5   ;;  %v13236_v13 = vmov 2   ;;  %v13232_v14 = vmov 8   ;;  %vm13330_vm2 = vcmask 261120  }
   0x3   :  { %s13507_s19 = sld [smem:[#allocation66_spill]]  ;;  %s7717_s25 = smov 120   ;;  %v7882_v16 = vand.u32 127, %v13231_v15  ;;  %v7928_v29 = vld [vmem:[%s13214_s4] sm:$0xff]   ;;  %vm7721_vm5 = vmmov 0   ;;  %vm13329_vm6 = vcmask 523264  }
   0x4   :  { %7274 = vmatprep.mubr.msk.bf16.mxu0 %vm13330_vm2, %v7928_v29  ;;  %s7722_s23 = smov 16   ;;  %vm13311_vm8 = vcmask 1039360   ;;  %vm13310_vm9 = vcmask 7168  }
   0x5   :  { %13508 = vst [vmem:[#allocation2_spill] sm:$0xff] %v7882_v16  ;;  %v66_v17 = vand.u32 7, %v7882_v16  ;;  %v67_v51 = vshra.s32 %v7882_v16, 3 }
   0x7   :  { %vm7885_vm0 = vcmp.eq.s32.totalorder %v66_v17, 0  ;;  %vm7900_vm1 = vcmp.eq.s32.totalorder %v66_v17, 7  ;;  %v7969_v53 = vand.u32 7, %v67_v51 }
   0x8   :  { %v7817_v0 = vld [vmem:[%s13506_s26] sm:$0xff]  ;;  %v7828_v2 = vld [vmem:[%s13506_s26 + $0x8] sm:$0xff] }
   0x9   :  { %196 = vrot.lane.b32.xlu1 %v7817_v0, %s7708_s27  ;;  %189 = vrot.lane.b32.xlu0 %v7817_v0, %s7709_s28  ;;  %v7837_v3 = vld [vmem:[%s13507_s19 + $0x8] sm:$0xff]  ;;  %v73_v4 = vld [vmem:[%s13507_s19] sm:$0xff]  ;;  %v303_v27 = vpack.c.bf16 %v7828_v2, %v7817_v0  ;;  %vm71_vm3 = vcmp.eq.s32.totalorder %v7969_v53, 0  ;;  %vm72_vm4 = vcmp.eq.s32.totalorder %v7969_v53, 7 }
   0xb   :  { %7270 = vmatprep.subr.bf16.mxu0 %v303_v27 }
   0xc   :  { %7271 = vmatpush3.bf16.msra.mxu0 %v303_v27 }
   0xd   :  { %198 = vrot.lane.b32.xlu1 %v7828_v2, %s7708_s27  ;;  %191 = vrot.lane.b32.xlu0 %v7828_v2, %s7709_s28 }
  0x11   :  { %82 = vperm.xlu1 %7448, %v7837_v3   ;;  %77 = vperm.xlu0 %7447, %v73_v4  }
  0x15   :  { %7449 = vset.pattern.permute.xlu1 %v13247_v5  ;;  %7450 = vset.pattern.permute.xlu0 %v13247_v5 }
  0x16   :  { %102 = vperm.xlu1 %7449, %v73_v4   ;;  %106 = vperm.xlu0 %7450, %v7837_v3  }
  0x1a   :  { %7451 = vset.pattern.permute.xlu1 %v13245_v1  ;;  %7452 = vset.pattern.permute.xlu0 %v13242_v7 }
  0x1b   :  { %153 = vperm.xlu1 %7451, %v149_v6   ;;  %126 = vperm.xlu0 %7452, %v73_v4  }
  0x1f   :  { %158 = vperm.xlu1 %7451, %v150_v8   ;;  %7455 = vset.pattern.permute.xlu0 %v13243_v9 }
  0x20   :  { %90 = vperm.xlu0 %7455, %v7837_v3  }
  0x23   :  { %7453 = vset.pattern.permute.xlu1 %v13242_v7 }
  0x24   :  { %130 = vperm.xlu1 %7453, %v7837_v3   ;;  %7456 = vset.pattern.permute.xlu0 %v13240_v10 }
  0x25   :  { %110 = vperm.xlu0 %7456, %v73_v4  }
  0x28   :  { %7454 = vset.pattern.permute.xlu1 %v13243_v9 }
  0x29   :  { %86 = vperm.xlu1 %7454, %v73_v4   ;;  %7459 = vset.pattern.permute.xlu0 %v13238_v11 }
  0x2a   :  { %138 = vperm.xlu0 %7459, %v7837_v3  }
  0x2d   :  { %7457 = vset.pattern.permute.xlu1 %v13240_v10 }
  0x2e   :  { %114 = vperm.xlu1 %7457, %v7837_v3   ;;  %245 = vrot.lane.b32.xlu0 %v7817_v0, %s7715_s3 }
  0x2f   :  { %7461 = vset.pattern.permute.xlu0 %v13234_v12 }
  0x32   :  { %7458 = vset.pattern.permute.xlu1 %v13238_v11  ;;  %251 = vrot.lane.b32.xlu0 %v7817_v0, %s7717_s25 }
  0x33   :  { %134 = vperm.xlu1 %7458, %v73_v4  }
  0x36   :  { %118 = vperm.xlu0 %7461, %v73_v4  }
  0x37   :  { %7460 = vset.pattern.permute.xlu1 %v13236_v13 }
  0x38   :  { %94 = vperm.xlu1 %7460, %v73_v4  }
  0x3a   :  { %7464 = vset.pattern.permute.xlu0 %v13232_v14 }
  0x3c   :  { %98 = vperm.xlu1 %7460, %v7837_v3  }
  0x40   :  { %247 = vrot.lane.b32.xlu1 %v7828_v2, %s7715_s3 }
  0x41   :  { %7462 = vset.pattern.permute.xlu1 %v13234_v12 }
  0x44   :  { %253 = vrot.lane.b32.xlu1 %v7828_v2, %s7717_s25 }
  0x48   :  { %122 = vperm.xlu1 %7462, %v7837_v3  }
  0x4c   :  { %7463 = vset.pattern.permute.xlu1 %v13232_v14 }
  0x4d   :  { %142 = vperm.xlu1 %7463, %v73_v4  }
  0x51   :  { %7465 = vset.pattern.permute.xlu1 %v13245_v1 }
  0x7b   :  { %v197_v19 = vpop.permute.xlu1 %196  ;;  %v190_v20 = vpop.permute.xlu0 %189 }
  0x7c   :  { %v205_v21 = vsel %vm7885_vm0, %v190_v20, %v197_v19  ;;  %v7906_v26 = vsel %vm7900_vm1, %v197_v19, %v190_v20 }
  0x7d   :  { %219 = vrot.lane.b32.xlu0 %v205_v21, %s7717_s25  ;;  %213 = vrot.lane.b32.xlu1 %v205_v21, %s7715_s3 }
  0x7f   :  { %v199_v22 = vpop.permute.xlu1 %198  ;;  %v192_v23 = vpop.permute.xlu0 %191 }
  0x80   :  { %v7895_v24 = vsel %vm7885_vm0, %v192_v23, %v199_v22  ;;  %v7919_v28 = vsel %vm7900_vm1, %v199_v22, %v192_v23 }
  0x81   :  { %146 = vperm.xlu0 %7464, %v7837_v3   ;;  %215 = vrot.lane.b32.xlu1 %v7895_v24, %s7715_s3 }
  0x85   :  { %281 = vrot.lane.b32.xlu0 %v7906_v26, %s7717_s25  ;;  %221 = vrot.lane.b32.xlu1 %v7895_v24, %s7717_s25 }
  0x86   :  { %7466 = vset.pattern.permute.xlu0 %v13245_v1 }
  0x89   :  { %275 = vrot.lane.b32.xlu1 %v7906_v26, %s7715_s3 }
  0x8d   :  { %277 = vrot.lane.b32.xlu1 %v7919_v28, %s7715_s3 }
  0x90   :  { %v7932_v30 = vpop.permute.xlu1 %82  ;;  %v7944_v36 = vpop.permute.xlu0 %77 }
  0x91   :  { %283 = vrot.lane.b32.xlu1 %v7919_v28, %s7717_s25 }
  0x95   :  { %v7934_v31 = vpop.permute.xlu1 %102  ;;  %v7948_v38 = vpop.permute.xlu0 %106 }
  0x96   :  { %v237_v61 = vmul.f32 %v205_v21, %v7934_v31  ;;  %v238_v21 = vmul.f32 %v7895_v24, %v7948_v38 }
  0x9a   :  { %v7936_v32 = vpop.permute.xlu1 %153  ;;  %v7950_v39 = vpop.permute.xlu0 %126 }
  0x9e   :  { %v7938_v33 = vpop.permute.xlu1 %158 }
  0x9f   :  { %v7954_v41 = vpop.permute.xlu0 %90 }
  0xa3   :  { %v7940_v34 = vpop.permute.xlu1 %130 }
  0xa4   :  { %v7958_v43 = vpop.permute.xlu0 %110 }
  0xa8   :  { %v7942_v35 = vpop.permute.xlu1 %86 }
  0xa9   :  { %v7962_v45 = vpop.permute.xlu0 %138 }
  0xad   :  { %v7946_v37 = vpop.permute.xlu1 %114  ;;  %v246_v47 = vpop.permute.xlu0 %245 }
  0xb1   :  { %v252_v49 = vpop.permute.xlu0 %251 }
  0xb2   :  { %v7952_v40 = vpop.permute.xlu1 %134  ;;  %v257_v8 = vsel %vm71_vm3, %v252_v49, %v246_v47 }
  0xb3   :  { %v261_v27 = vmul.f32 %v257_v8, %v7942_v35 }
  0xb5   :  { %v7971_v54 = vpop.permute.xlu0 %118 }
  0xb7   :  { %v7956_v42 = vpop.permute.xlu1 %94 }
  0xbb   :  { %v7960_v44 = vpop.permute.xlu1 %98 }
  0xbf   :  { %v248_v46 = vpop.permute.xlu1 %247 }
  0xc3   :  { %v254_v48 = vpop.permute.xlu1 %253 }
  0xc4   :  { %v258_v51 = vsel %vm71_vm3, %v254_v48, %v248_v46  ;;  %v260_v24 = vsel %vm72_vm4, %v248_v46, %v254_v48 }
  0xc5   :  { %v270_v8 = vmul.f32 %v260_v24, %v7962_v45 }
  0xc7   :  { %v7964_v50 = vpop.permute.xlu1 %122 }
  0xcc   :  { %v7967_v52 = vpop.permute.xlu1 %142 }
  0xcd   :  { %13513 = vst [vmem:[#allocation3_spill] sm:$0xff] %v7967_v52 }
  0xef   :  { %v214_v55 = vpop.permute.xlu1 %213  ;;  %v220_v56 = vpop.permute.xlu0 %219 }
  0xf0   :  { %v227_v57 = vsel %vm71_vm3, %v220_v56, %v214_v55  ;;  %v231_v62 = vsel %vm72_vm4, %v214_v55, %v220_v56 }
  0xf1   :  { %v233_v58 = vmul.f32 %v227_v57, %v7944_v36  ;;  %v241_v4 = vmul.f32 %v231_v62, %v7950_v39 }
  0xf3   :  { %v235_v59 = vadd.f32 %v233_v58, %v7936_v32  ;;  %v216_v60 = vpop.permute.xlu1 %215  ;;  %v262_v58 = vmul.f32 %v258_v51, %v7954_v41 }
  0xf5   :  { %v239_v63 = vadd.f32 %v237_v61, %v235_v59 }
  0xf7   :  { %v222_v3 = vpop.permute.xlu1 %221  ;;  %v243_v19 = vadd.f32 %v241_v4, %v239_v63  ;;  %v266_v63 = vmul.f32 %v7946_v37, %v7828_v2 }
  0xf8   :  { %v228_v6 = vsel %vm71_vm3, %v222_v3, %v216_v60  ;;  %v232_v20 = vsel %vm72_vm4, %v216_v60, %v222_v3  ;;  %v265_v60 = vmul.f32 %v7958_v43, %v7817_v0  ;;  %v259_v3 = vsel %vm72_vm4, %v246_v47, %v252_v49 }
  0xf9   :  { %v234_v17 = vmul.f32 %v228_v6, %v7932_v30  ;;  %v242_v56 = vmul.f32 %v232_v20, %v7940_v34  ;;  %v263_v57 = vadd.f32 %v261_v27, %v243_v19  ;;  %v269_v20 = vmul.f32 %v259_v3, %v7952_v40 }
  0xfb   :  { %v236_v22 = vadd.f32 %v234_v17, %v7938_v33  ;;  %v276_v23 = vpop.permute.xlu1 %275  ;;  %v267_v6 = vadd.f32 %v265_v60, %v263_v57 }
  0xfd   :  { %v240_v55 = vadd.f32 %v238_v21, %v236_v22  ;;  %v271_v49 = vadd.f32 %v269_v20, %v267_v6 }
  0xff   :  { %v244_v59 = vadd.f32 %v242_v56, %v240_v55  ;;  %v278_v61 = vpop.permute.xlu1 %277  ;;  %v296_v55 = vmul.f32 %v7919_v28, %v7964_v50  ;;  %v8029_v28 = vld [vmem:[%s13214_s4 + $0x8] sm:$0xff]  }
 0x100   :  { %v8002_v62 = vpop.permute.xlu0 %146 }
 0x101   :  { %13514 = vst [vmem:[#allocation4_spill] sm:$0xff] %v8002_v62  ;;  %v264_v4 = vadd.f32 %v262_v58, %v244_v59  ;;  %v295_v58 = vmul.f32 %v7906_v26, %v7971_v54  ;;  %v8034_v26 = vld [vmem:[%s13214_s4 + $0x10] sm:$0xff]  }
 0x103   :  { %v284_v17 = vpop.permute.xlu1 %283  ;;  %v268_v19 = vadd.f32 %v266_v63, %v264_v4 }
 0x104   :  { %v288_v21 = vsel %vm71_vm3, %v284_v17, %v278_v61  ;;  %v282_v46 = vpop.permute.xlu0 %281  ;;  %v290_v47 = vsel %vm72_vm4, %v278_v61, %v284_v17 }
 0x105   :  { %v272_v48 = vadd.f32 %v270_v8, %v268_v19  ;;  %v292_v22 = vmul.f32 %v288_v21, %v7960_v44  ;;  %v287_v27 = vsel %vm71_vm3, %v282_v46, %v276_v23  ;;  %v289_v57 = vsel %vm72_vm4, %v276_v23, %v282_v46  ;;  %v8043_v23 = vld [vmem:[%s13214_s4 + $0x18] sm:$0xff]  }
 0x106   :  { %v291_v51 = vmul.f32 %v287_v27, %v7956_v42  ;;  %v300_v60 = vmul.f32 %v290_v47, %v8002_v62  ;;  %v299_v63 = vmul.f32 %v289_v57, %v7967_v52 }
 0x107   :  { %v294_v56 = vadd.f32 %v292_v22, %v272_v48 }
 0x108   :  { %v293_v59 = vadd.f32 %v291_v51, %v271_v49 }
 0x109   :  { %v298_v24 = vadd.f32 %v296_v55, %v294_v56 }
 0x10a   :  { %v297_v61 = vadd.f32 %v295_v58, %v293_v59 }
 0x10b   :  { %v302_v3 = vadd.f32 %v300_v60, %v298_v24 }
 0x10c   :  { %v301_v4 = vadd.f32 %v299_v63, %v297_v61 }
 0x10e   :  { %v304_v6 = vpack.c.bf16 %v302_v3, %v301_v4 }
 0x110   :  { %7272 = vmatprep.subr.bf16.mxu0 %v304_v6 }
 0x111   :  { %7273 = vmatpush3.bf16.msra.mxu0 %v304_v6 }
 0x114   :  { %7275 = vmatmul.mubr.msk.bf16.vlgmr.msra.gmra.mrb[0].mxu0 %vm13330_vm2, %v8029_v28 }
 0x115   :  { %7278 = vmatprep.mubr.msk.bf16.mxu0 %vm13330_vm2, %v8034_v26 }
 0x11c   :  { %7279 = vmatmul.mubr.msk.bf16.gmra.mrb[4].mxu0 %vm13330_vm2, %v8043_v23 }
 0x11d   :  { %7298 = vmatprep.mubr.msk.bf16.mxu0 %vm13330_vm2, %v7928_v29 }
 0x1e7   :  { %v8049_v8 = vpop.f32.mrb[0].mxu0 }
 0x1e8   :  { %v8051_v17 = vpop.f32.mrb[1].mxu0 }
 0x1e9   :  { %403 = vadd.xlane.f32.xlu0 %v8051_v17  ;;  %v8054_v19 = vpop.f32.mrb[2].mxu0 }
 0x1ea   :  { %v8056_v20 = vpop.f32.mrb[3].mxu0 }
 0x1eb   :  { %405 = vadd.xlane.f32.xlu1 %v8056_v20 }
 0x1ed   :  { %407 = vadd.xlane.f32.xlu0 %v8049_v8 }
 0x1ef   :  { %v8060_v21 = vpop.f32.mrb[4].mxu0 }
 0x1f0   :  { %v8062_v46 = vpop.f32.mrb[5].mxu0 }
 0x1f1   :  { %409 = vadd.xlane.f32.xlu0 %v8054_v19  ;;  %411 = vadd.xlane.f32.xlu1 %v8062_v46  ;;  %v8066_v48 = vpop.f32.mrb[6].mxu0 }
 0x1f2   :  { %v8068_v22 = vpop.f32.mrb[7].mxu0 }
 0x1f5   :  { %415 = vadd.xlane.f32.xlu1 %v8060_v21  ;;  %413 = vadd.xlane.f32.xlu0 %v8068_v22 }
 0x1f9   :  { %417 = vadd.xlane.f32.xlu0 %v8066_v48 }
 0x276   :  { %v404_v27 = vpop.xlane.xlu0 %403 }
 0x277   :  { %v8073_v47 = vmul.f32 0.0078125, %v404_v27 }
 0x278   :  { %v406_v49 = vpop.xlane.xlu1 %405 }
 0x279   :  { %v8075_v51 = vmul.f32 0.0078125, %v406_v49  ;;  %v428_v55 = vsub.f32 %v8051_v17, %v8073_v47 }
 0x27a   :  { %v408_v56 = vpop.xlane.xlu0 %407 }
 0x27b   :  { %v8079_v57 = vmul.f32 0.0078125, %v408_v56  ;;  %v436_v58 = vmul.f32 %v428_v55, %v428_v55  ;;  %v429_v59 = vsub.f32 %v8056_v20, %v8075_v51 }
 0x27d   :  { %444 = vadd.xlane.f32.xlu1 %v436_v58  ;;  %v437_v60 = vmul.f32 %v429_v59, %v429_v59  ;;  %v430_v24 = vsub.f32 %v8049_v8, %v8079_v57 }
 0x27e   :  { %v410_v63 = vpop.xlane.xlu0 %409  ;;  %v412_v61 = vpop.xlane.xlu1 %411 }
 0x27f   :  { %v8085_v3 = vmul.f32 0.0078125, %v410_v63  ;;  %v8087_v4 = vmul.f32 0.0078125, %v412_v61  ;;  %446 = vadd.xlane.f32.xlu0 %v437_v60  ;;  %v438_v6 = vmul.f32 %v430_v24, %v430_v24 }
 0x281   :  { %448 = vadd.xlane.f32.xlu1 %v438_v6  ;;  %v432_v27 = vsub.f32 %v8062_v46, %v8087_v4  ;;  %v431_v49 = vsub.f32 %v8054_v19, %v8085_v3 }
 0x282   :  { %v416_v55 = vpop.xlane.xlu1 %415  ;;  %v414_v56 = vpop.xlane.xlu0 %413 }
 0x283   :  { %v8093_v58 = vmul.f32 0.0078125, %v416_v55  ;;  %v8095_v59 = vmul.f32 0.0078125, %v414_v56  ;;  %v440_v15 = vmul.f32 %v432_v27, %v432_v27  ;;  %v439_v63 = vmul.f32 %v431_v49, %v431_v49 }
 0x285   :  { %452 = vadd.xlane.f32.xlu1 %v440_v15  ;;  %450 = vadd.xlane.f32.xlu0 %v439_v63  ;;  %v434_v60 = vsub.f32 %v8060_v21, %v8093_v58  ;;  %v433_v24 = vsub.f32 %v8068_v22, %v8095_v59 }
 0x286   :  { %v418_v61 = vpop.xlane.xlu0 %417 }
 0x287   :  { %v8101_v6 = vmul.f32 0.0078125, %v418_v61  ;;  %v442_v14 = vmul.f32 %v434_v60, %v434_v60  ;;  %v441_v12 = vmul.f32 %v433_v24, %v433_v24 }
 0x289   :  { %456 = vadd.xlane.f32.xlu1 %v442_v14  ;;  %454 = vadd.xlane.f32.xlu0 %v441_v12  ;;  %v435_v55 = vsub.f32 %v8066_v48, %v8101_v6 }
 0x28b   :  { %v443_v27 = vmul.f32 %v435_v55, %v435_v55 }
 0x28d   :  { %458 = vadd.xlane.f32.xlu0 %v443_v27 }
 0x30a   :  { %v445_v15 = vpop.xlane.xlu1 %444 }
 0x30b   :  { %v460_v49 = vmul.f32 0.0078125, %v445_v15  ;;  %v8108_v15 = vld [vmem:[%s13215_s5] sm:$0xff] }
 0x30c   :  { %v447_v56 = vpop.xlane.xlu0 %446 }
 0x30d   :  { %v468_v63 = vadd.f32 1e-05, %v460_v49  ;;  %v461_v13 = vmul.f32 0.0078125, %v447_v56 }
 0x30e   :  { %v449_v11 = vpop.xlane.xlu1 %448 }
 0x30f   :  { %7495 = vrsqrt.f32 %v468_v63  ;;  %v469_v10 = vadd.f32 1e-05, %v461_v13  ;;  %v462_v7 = vmul.f32 0.0078125, %v449_v11 }
 0x311   :  { %7497 = vrsqrt.f32 %v469_v10  ;;  %v470_v61 = vadd.f32 1e-05, %v462_v7  ;;  %v8113_v7 = vld [vmem:[%s13215_s5 + $0x8] sm:$0xff] }
 0x312   :  { %v453_v60 = vpop.xlane.xlu1 %452  ;;  %v451_v24 = vpop.xlane.xlu0 %450  ;;  %13515 = vst [vmem:[#allocation5_spill] sm:$0xff] %v8113_v7 }
 0x313   :  { %7499 = vrsqrt.f32 %v470_v61  ;;  %v464_v12 = vmul.f32 0.0078125, %v453_v60  ;;  %v463_v14 = vmul.f32 0.0078125, %v451_v24  ;;  %v8126_v60 = vld [vmem:[%s13215_s5 + $0x20] sm:$0xff]  ;;  %v8131_v24 = vld [vmem:[%s13215_s5 + $0x18] sm:$0xff] }
 0x314   :  { %13516 = vst [vmem:[#allocation6_spill] sm:$0xff] %v8126_v60  ;;  %13517 = vst [vmem:[#allocation7_spill] sm:$0xff] %v8131_v24 }
 0x315   :  { %v472_v9 = vadd.f32 1e-05, %v464_v12  ;;  %v471_v1 = vadd.f32 1e-05, %v463_v14 }
 0x316   :  { %v457_v55 = vpop.xlane.xlu1 %456  ;;  %v455_v63 = vpop.xlane.xlu0 %454 }
 0x317   :  { %7501 = vrsqrt.f32 %v472_v9  ;;  %v466_v27 = vmul.f32 0.0078125, %v457_v55  ;;  %v8119_v9 = vld [vmem:[%s13215_s5 + $0x10] sm:$0xff]  ;;  %v465_v16 = vmul.f32 0.0078125, %v455_v63  ;;  %v8158_v63 = vld [vmem:[%s13216_s6] sm:$0xff] }
 0x318   :  { %7503 = vrsqrt.f32 %v471_v1 }
 0x319   :  { %v7496_v13 = vpop.eup %7495  ;;  %v474_v11 = vadd.f32 1e-05, %v466_v27 }
 0x31a   :  { %v484_v10 = vmul.f32 %v7496_v13, %v8108_v15  ;;  %v459_v27 = vpop.xlane.xlu0 %458 }
 0x31b   :  { %v7498_v49 = vpop.eup %7497  ;;  %7505 = vrsqrt.f32 %v474_v11  ;;  %v8138_v11 = vld [vmem:[%s13215_s5 + $0x30] sm:$0xff] }
 0x31c   :  { %510 = vperm.xlu1 %7465, %v484_v10   ;;  %v485_v56 = vmul.f32 %v7498_v49, %v8113_v7  ;;  %13518 = vst [vmem:[#allocation8_spill] sm:$0xff] %v8138_v11  ;;  %v467_v7 = vmul.f32 0.0078125, %v459_v27 }
 0x31d   :  { %v7500_v1 = vpop.eup %7499 }
 0x31e   :  { %515 = vperm.xlu0 %7466, %v485_v56   ;;  %v486_v61 = vmul.f32 %v7500_v1, %v8119_v9  ;;  %v8144_v1 = vld [vmem:[%s13216_s6 + $0x10] sm:$0xff] }
 0x320   :  { %520 = vperm.xlu1 %7465, %v486_v61   ;;  %v494_v49 = vmul.f32 %v486_v61, %v8079_v57  ;;  %v492_v57 = vmul.f32 %v484_v10, %v8073_v47  ;;  %v473_v61 = vadd.f32 1e-05, %v465_v16  ;;  %v8172_v16 = vld [vmem:[%s13216_s6 + $0x18] sm:$0xff]  ;;  %v493_v10 = vmul.f32 %v485_v56, %v8075_v51  ;;  %v8191_v51 = vld [vmem:[%s13215_s5 + $0x28] sm:$0xff] }
 0x321   :  { %v7502_v12 = vpop.eup %7501  ;;  %13523 = vst [vmem:[#allocation13_spill] sm:$0xff] %v8191_v51  ;;  %v13256_v56 = vmov 0.0  }
 0x322   :  { %v7504_v14 = vpop.eup %7503  ;;  %v488_v55 = vmul.f32 %v7502_v12, %v8126_v60  ;;  %v502_v60 = vsub.f32 %v8144_v1, %v494_v49  ;;  %v500_v49 = vsub.f32 %v8158_v63, %v492_v57  ;;  %7507 = vrsqrt.f32 %v473_v61  ;;  %7282 = vmatprep.subr.bf16.mxu1 %v13256_v56  ;;  %7290 = vmatprep.mubr.msk.bf16.mxu1 %vm7721_vm5, %v13256_v56 }
 0x323   :  { %v487_v13 = vmul.f32 %v7504_v14, %v8131_v24  ;;  %v8152_v24 = vld [vmem:[%s13216_s6 + $0x20] sm:$0xff] }
 0x324   :  { %v496_v14 = vmul.f32 %v488_v55, %v8087_v4  ;;  %13519 = vst [vmem:[#allocation9_spill] sm:$0xff] %v8152_v24 }
 0x325   :  { %v7506_v5 = vpop.eup %7505  ;;  %525 = vperm.xlu1 %7465, %v487_v13   ;;  %v495_v47 = vmul.f32 %v487_v13, %v8085_v3  ;;  %v8180_v3 = vld [vmem:[%s13216_s6 + $0x8] sm:$0xff] }
 0x326   :  { %v490_v12 = vmul.f32 %v7506_v5, %v8138_v11  ;;  %v475_v5 = vadd.f32 1e-05, %v467_v7  ;;  %v504_v4 = vsub.f32 %v8152_v24, %v496_v14  ;;  %v8166_v11 = vld [vmem:[%s13216_s6 + $0x30] sm:$0xff]  ;;  %13521 = vst [vmem:[#allocation11_spill] sm:$0xff] %v8180_v3  ;;  %v8186_v14 = vld [vmem:[%s13215_s5 + $0x38] sm:$0xff] }
 0x327   :  { %13520 = vst [vmem:[#allocation10_spill] sm:$0xff] %v8166_v11  ;;  %v503_v7 = vsub.f32 %v8172_v16, %v495_v47  ;;  %13522 = vst [vmem:[#allocation12_spill] sm:$0xff] %v8186_v14 }
 0x328   :  { %540 = vperm.xlu0 %7466, %v490_v12   ;;  %v498_v27 = vmul.f32 %v490_v12, %v8093_v58  ;;  %7509 = vrsqrt.f32 %v475_v5 }
 0x329   :  { %568 = vperm.xlu1 %7465, %v502_v60   ;;  %v501_v60 = vsub.f32 %v8180_v3, %v493_v10 }
 0x32a   :  { %v506_v58 = vsub.f32 %v8166_v11, %v498_v27 }
 0x32c   :  { %578 = vperm.xlu0 %7466, %v504_v4   ;;  %v7508_v13 = vpop.eup %7507  ;;  %v8200_v4 = vld [vmem:[%s13216_s6 + $0x28] sm:$0xff] }
 0x32d   :  { %558 = vperm.xlu1 %7465, %v500_v49   ;;  %v489_v61 = vmul.f32 %v7508_v13, %v8191_v51  ;;  %13524 = vst [vmem:[#allocation14_spill] sm:$0xff] %v8200_v4  ;;  %v8207_v49 = vld [vmem:[%s13216_s6 + $0x38] sm:$0xff] }
 0x32e   :  { %13525 = vst [vmem:[#allocation15_spill] sm:$0xff] %v8207_v49 }
 0x32f   :  { %v497_v5 = vmul.f32 %v489_v61, %v8095_v59 }
 0x330   :  { %588 = vperm.xlu0 %7466, %v506_v58  }
 0x331   :  { %573 = vperm.xlu1 %7465, %v503_v7   ;;  %v505_v27 = vsub.f32 %v8200_v4, %v497_v5 }
 0x332   :  { %v7510_v12 = vpop.eup %7509 }
 0x333   :  { %v491_v57 = vmul.f32 %v7510_v12, %v8186_v14 }
 0x335   :  { %563 = vperm.xlu1 %7465, %v501_v60  }
 0x339   :  { %530 = vperm.xlu1 %7465, %v488_v55   ;;  %v499_v55 = vmul.f32 %v491_v57, %v8101_v6 }
 0x33b   :  { %v507_v47 = vsub.f32 %v8207_v49, %v499_v55 }
 0x33d   :  { %545 = vperm.xlu1 %7465, %v491_v57  }
 0x341   :  { %535 = vperm.xlu1 %7465, %v489_v61  }
 0x345   :  { %583 = vperm.xlu1 %7465, %v505_v27  }
 0x349   :  { %593 = vperm.xlu1 %7465, %v507_v47  }
 0x39b   :  { %v511_v59 = vpop.permute.xlu1 %510 }
 0x39c   :  { %v548_v5 = vmul.f32 %v511_v59, %v8051_v17 }
 0x39d   :  { %v516_v57 = vpop.permute.xlu0 %515 }
 0x39e   :  { %v549_v55 = vmul.f32 %v516_v57, %v8056_v20 }
 0x39f   :  { %v521_v58 = vpop.permute.xlu1 %520 }
 0x3a0   :  { %v550_v6 = vmul.f32 %v8049_v8, %v521_v58 }
 0x3a4   :  { %v526_v7 = vpop.permute.xlu1 %525 }
 0x3a5   :  { %v551_v13 = vmul.f32 %v8054_v19, %v526_v7  ;;  %v13526_v7 = vmov 0.0  }
 0x3a7   :  { %v541_v3 = vpop.permute.xlu0 %540 }
 0x3a8   :  { %v569_v10 = vpop.permute.xlu1 %568 }
 0x3a9   :  { %v598_v12 = vadd.f32 %v569_v10, %v550_v6 }
 0x3ab   :  { %v606_v47 = vmax.f32 %v598_v12, 0.0  ;;  %v579_v10 = vpop.permute.xlu0 %578 }
 0x3ac   :  { %v559_v60 = vpop.permute.xlu1 %558 }
 0x3ad   :  { %v596_v49 = vadd.f32 %v559_v60, %v548_v5 }
 0x3af   :  { %v604_v14 = vmax.f32 %v596_v49, 0.0 }
 0x3b0   :  { %v574_v61 = vpop.permute.xlu1 %573 }
 0x3b1   :  { %v599_v27 = vadd.f32 %v574_v61, %v551_v13 }
 0x3b3   :  { %v607_v56 = vmax.f32 %v599_v27, 0.0 }
 0x3b4   :  { %v564_v4 = vpop.permute.xlu1 %563 }
 0x3b5   :  { %v597_v11 = vadd.f32 %v564_v4, %v549_v55  ;;  %v613_v51 = vpack.c.bf16 %v607_v56, %v606_v47  ;;  %v589_v56 = vpop.permute.xlu0 %588 }
 0x3b7   :  { %v605_v24 = vmax.f32 %v597_v11, 0.0  ;;  %v554_v11 = vmul.f32 %v8060_v21, %v541_v3  ;;  %v7159_v21 = vld [vmem:[%s13218_s1] ss:$0 sm:$0xff] }
 0x3b8   :  { %v531_v8 = vpop.permute.xlu1 %530 }
 0x3b9   :  { %v612_v58 = vpack.c.bf16 %v605_v24, %v604_v14  ;;  %v552_v17 = vmul.f32 %v531_v8, %v8062_v46  ;;  %v602_v24 = vadd.f32 %v589_v56, %v554_v11 }
 0x3bb   :  { %7283 = vmatpush3.bf16.msra.mxu1 %v612_v58  ;;  %v600_v59 = vadd.f32 %v579_v10, %v552_v17 }
 0x3bc   :  { %v546_v19 = vpop.permute.xlu1 %545  ;;  %7284 = vmatprep.subr.bf16.mxu1 %v13526_v7 }
 0x3bd   :  { %v608_v14 = vmax.f32 %v600_v59, 0.0  ;;  %v555_v6 = vmul.f32 %v8066_v48, %v546_v19 }
 0x3bf   :  { %7285 = vmatpush3.bf16.msra.mxu1 %v613_v51  ;;  %v610_v51 = vmax.f32 %v602_v24, 0.0 }
 0x3c0   :  { %v536_v20 = vpop.permute.xlu1 %535  ;;  %7286 = vmatprep.subr.bf16.mxu1 %v13526_v7 }
 0x3c1   :  { %v553_v4 = vmul.f32 %v536_v20, %v8068_v22  ;;  %v8226_v22 = vld [vmem:[%s13217_s7] sm:$0xff]  }
 0x3c4   :  { %v584_v49 = vpop.permute.xlu1 %583 }
 0x3c5   :  { %v601_v60 = vadd.f32 %v584_v49, %v553_v4 }
 0x3c7   :  { %v609_v13 = vmax.f32 %v601_v60, 0.0 }
 0x3c8   :  { %v594_v12 = vpop.permute.xlu1 %593 }
 0x3c9   :  { %v603_v57 = vadd.f32 %v594_v12, %v555_v6  ;;  %v614_v46 = vpack.c.bf16 %v609_v13, %v608_v14 }
 0x3cb   :  { %v611_v61 = vmax.f32 %v603_v57, 0.0  ;;  %7287 = vmatpush3.bf16.msra.mxu1 %v614_v46 }
 0x3cc   :  { %7288 = vmatprep.subr.bf16.mxu1 %v13526_v7 }
 0x3cd   :  { %v615_v5 = vpack.c.bf16 %v611_v61, %v610_v51 }
 0x3cf   :  { %7289 = vmatpush3.bf16.msra.mxu1 %v615_v5 }
 0x3d0   :  { %7306 = vmatprep.subr.bf16.mxu1 %v13526_v7 }
 0x3d2   :  { %7291 = vmatmul.mubr.msk.bf16.vlgmr.msra.gmra.mrb[0].mxu1 %vm13329_vm6, %v8226_v22 }
 0x3d3   :  { %7314 = vmatprep.mubr.msk.bf16.mxu1 %vm7721_vm5, %v13526_v7 }
 0x4a5   :  { %v659_v48 = vpop.f32.mrb[0].mxu1 }
 0x4a6   :  { %v671_v3 = vmul.f32 %v7159_v21, %v659_v48  ;;  %v7292_v27 = vpop.f32.mrb[1].mxu1 }
 0x4a7   :  { %v662_v55 = vpop.f32.mrb[2].mxu1 }
 0x4a8   :  { %v8237_v47 = vadd.f32 %v671_v3, %v7817_v0  ;;  %v672_v8 = vmul.f32 %v7159_v21, %v662_v55  ;;  %v7293_v58 = vpop.f32.mrb[3].mxu1 }
 0x4aa   :  { %v8240_v19 = vadd.f32 %v672_v8, %v7828_v2  ;;  %677 = vrot.lane.b32.xlu0 %v8237_v47, %s7709_s28 }
 0x4ac   :  { %679 = vrot.lane.b32.xlu1 %v8240_v19, %s7709_s28  ;;  %v781_v10 = vpack.c.bf16 %v8240_v19, %v8237_v47 }
 0x4ae   :  { %683 = vrot.lane.b32.xlu0 %v8237_v47, %s7708_s27  ;;  %7294 = vmatprep.subr.bf16.mxu0 %v781_v10 }
 0x4af   :  { %7295 = vmatpush3.bf16.msra.mxu0 %v781_v10 }
 0x4b0   :  { %685 = vrot.lane.b32.xlu1 %v8240_v19, %s7708_s27 }
 0x4b2   :  { %723 = vrot.lane.b32.xlu0 %v8237_v47, %s7715_s3 }
 0x4b4   :  { %725 = vrot.lane.b32.xlu1 %v8240_v19, %s7715_s3 }
 0x51c   :  { %v678_v0 = vpop.permute.xlu0 %677 }
 0x51e   :  { %v680_v2 = vpop.permute.xlu1 %679 }
 0x520   :  { %v684_v17 = vpop.permute.xlu0 %683 }
 0x521   :  { %v689_v20 = vsel %vm7885_vm0, %v678_v0, %v684_v17  ;;  %v691_v56 = vsel %vm7900_vm1, %v684_v17, %v678_v0 }
 0x522   :  { %695 = vrot.lane.b32.xlu0 %v689_v20, %s7715_s3  ;;  %v686_v59 = vpop.permute.xlu1 %685  ;;  %v715_v61 = vmul.f32 %v689_v20, %v7934_v31 }
 0x523   :  { %v690_v4 = vsel %vm7885_vm0, %v680_v2, %v686_v59  ;;  %v692_v49 = vsel %vm7900_vm1, %v686_v59, %v680_v2 }
 0x524   :  { %697 = vrot.lane.b32.xlu1 %v690_v4, %s7715_s3  ;;  %v724_v11 = vpop.permute.xlu0 %723  ;;  %v716_v55 = vmul.f32 %v690_v4, %v7948_v38 }
 0x526   :  { %701 = vrot.lane.b32.xlu0 %v689_v20, %s7717_s25  ;;  %v726_v60 = vpop.permute.xlu1 %725 }
 0x528   :  { %703 = vrot.lane.b32.xlu1 %v690_v4, %s7717_s25 }
 0x52a   :  { %729 = vrot.lane.b32.xlu0 %v8237_v47, %s7717_s25 }
 0x52c   :  { %731 = vrot.lane.b32.xlu1 %v8240_v19, %s7717_s25 }
 0x52e   :  { %753 = vrot.lane.b32.xlu0 %v691_v56, %s7715_s3 }
 0x530   :  { %755 = vrot.lane.b32.xlu1 %v692_v49, %s7715_s3 }
 0x532   :  { %759 = vrot.lane.b32.xlu0 %v691_v56, %s7717_s25 }
 0x534   :  { %761 = vrot.lane.b32.xlu1 %v692_v49, %s7717_s25 }
 0x594   :  { %v696_v24 = vpop.permute.xlu0 %695 }
 0x596   :  { %v698_v14 = vpop.permute.xlu1 %697 }
 0x598   :  { %v702_v6 = vpop.permute.xlu0 %701 }
 0x599   :  { %v707_v13 = vsel %vm71_vm3, %v702_v6, %v696_v24  ;;  %v709_v46 = vsel %vm72_vm4, %v696_v24, %v702_v6 }
 0x59a   :  { %v711_v12 = vmul.f32 %v707_v13, %v7944_v36  ;;  %v704_v57 = vpop.permute.xlu1 %703  ;;  %v719_v58 = vmul.f32 %v709_v46, %v7950_v39 }
 0x59b   :  { %v708_v51 = vsel %vm71_vm3, %v704_v57, %v698_v14  ;;  %v710_v3 = vsel %vm72_vm4, %v698_v14, %v704_v57 }
 0x59c   :  { %v713_v5 = vadd.f32 %v711_v12, %v7936_v32  ;;  %v712_v21 = vmul.f32 %v708_v51, %v7932_v30  ;;  %v730_v48 = vpop.permute.xlu0 %729  ;;  %v720_v59 = vmul.f32 %v710_v3, %v7940_v34  ;;  %v743_v12 = vmul.f32 %v8237_v47, %v7958_v43 }
 0x59d   :  { %v735_v27 = vsel %vm71_vm3, %v730_v48, %v724_v11  ;;  %v737_v6 = vsel %vm72_vm4, %v724_v11, %v730_v48  ;;  %v744_v3 = vmul.f32 %v8240_v19, %v7946_v37 }
 0x59e   :  { %v717_v8 = vadd.f32 %v715_v61, %v713_v5  ;;  %v714_v10 = vadd.f32 %v712_v21, %v7938_v33  ;;  %v732_v0 = vpop.permute.xlu1 %731  ;;  %v739_v24 = vmul.f32 %v735_v27, %v7942_v35  ;;  %v747_v5 = vmul.f32 %v737_v6, %v7952_v40 }
 0x59f   :  { %v736_v2 = vsel %vm71_vm3, %v732_v0, %v726_v60  ;;  %v738_v51 = vsel %vm72_vm4, %v726_v60, %v732_v0  ;;  %v773_v0 = vmul.f32 %v691_v56, %v7971_v54  ;;  %v774_v6 = vmul.f32 %v692_v49, %v7964_v50 }
 0x5a0   :  { %v721_v17 = vadd.f32 %v719_v58, %v717_v8  ;;  %v718_v20 = vadd.f32 %v716_v55, %v714_v10  ;;  %v754_v14 = vpop.permute.xlu0 %753  ;;  %v740_v57 = vmul.f32 %v736_v2, %v7954_v41  ;;  %v748_v8 = vmul.f32 %v738_v51, %v7962_v45 }
 0x5a2   :  { %v722_v4 = vadd.f32 %v720_v59, %v718_v20  ;;  %v741_v13 = vadd.f32 %v739_v24, %v721_v17  ;;  %v756_v46 = vpop.permute.xlu1 %755 }
 0x5a4   :  { %v745_v61 = vadd.f32 %v743_v12, %v741_v13  ;;  %v742_v21 = vadd.f32 %v740_v57, %v722_v4  ;;  %v760_v27 = vpop.permute.xlu0 %759 }
 0x5a5   :  { %v765_v11 = vsel %vm71_vm3, %v760_v27, %v754_v14  ;;  %v767_v59 = vsel %vm72_vm4, %v754_v14, %v760_v27 }
 0x5a6   :  { %v749_v48 = vadd.f32 %v747_v5, %v745_v61  ;;  %v746_v55 = vadd.f32 %v744_v3, %v742_v21  ;;  %v769_v58 = vmul.f32 %v765_v11, %v7956_v42  ;;  %v762_v10 = vpop.permute.xlu1 %761  ;;  %v777_v12 = vmul.f32 %v767_v59, %v7967_v52 }
 0x5a7   :  { %v766_v60 = vsel %vm71_vm3, %v762_v10, %v756_v46  ;;  %v768_v24 = vsel %vm72_vm4, %v756_v46, %v762_v10 }
 0x5a8   :  { %v750_v2 = vadd.f32 %v748_v8, %v746_v55  ;;  %v771_v17 = vadd.f32 %v769_v58, %v749_v48  ;;  %v770_v20 = vmul.f32 %v766_v60, %v7960_v44  ;;  %v778_v57 = vmul.f32 %v768_v24, %v8002_v62 }
 0x5aa   :  { %v772_v4 = vadd.f32 %v770_v20, %v750_v2  ;;  %v775_v13 = vadd.f32 %v773_v0, %v771_v17 }
 0x5ac   :  { %v776_v51 = vadd.f32 %v774_v6, %v772_v4  ;;  %v779_v56 = vadd.f32 %v777_v12, %v775_v13 }
 0x5ae   :  { %v780_v61 = vadd.f32 %v778_v57, %v776_v51 }
 0x5b0   :  { %v782_v5 = vpack.c.bf16 %v780_v61, %v779_v56 }
 0x5b2   :  { %7296 = vmatprep.subr.bf16.mxu0 %v782_v5 }
 0x5b3   :  { %7297 = vmatpush3.bf16.msra.mxu0 %v782_v5 }
 0x5b6   :  { %7299 = vmatmul.mubr.msk.bf16.vlgmr.msra.gmra.mrb[8].mxu0 %vm13330_vm2, %v8029_v28 }
 0x5b7   :  { %7302 = vmatprep.mubr.msk.bf16.mxu0 %vm13330_vm2, %v8034_v26 }
 0x5be   :  { %7303 = vmatmul.mubr.msk.bf16.gmra.mrb[12].mxu0 %vm13330_vm2, %v8043_v23 }
 0x5bf   :  { %7322 = vmatprep.mubr.msk.bf16.mxu0 %vm13330_vm2, %v7928_v29 }
 0x689   :  { %v8330_v49 = vpop.f32.mrb[8].mxu0 }
 0x68a   :  { %v8332_v14 = vpop.f32.mrb[9].mxu0 }
 0x68b   :  { %848 = vadd.xlane.f32.xlu0 %v8332_v14  ;;  %v8335_v46 = vpop.f32.mrb[10].mxu0 }
 0x68c   :  { %v8337_v21 = vpop.f32.mrb[11].mxu0 }
 0x68d   :  { %850 = vadd.xlane.f32.xlu1 %v8337_v21 }
 0x68f   :  { %852 = vadd.xlane.f32.xlu0 %v8330_v49 }
 0x691   :  { %v8341_v28 = vpop.f32.mrb[12].mxu0 }
 0x692   :  { %v8343_v26 = vpop.f32.mrb[13].mxu0 }
 0x693   :  { %854 = vadd.xlane.f32.xlu0 %v8335_v46  ;;  %856 = vadd.xlane.f32.xlu1 %v8343_v26  ;;  %v8347_v29 = vpop.f32.mrb[14].mxu0 }
 0x694   :  { %v8349_v23 = vpop.f32.mrb[15].mxu0 }
 0x697   :  { %860 = vadd.xlane.f32.xlu1 %v8341_v28  ;;  %858 = vadd.xlane.f32.xlu0 %v8349_v23 }
 0x69b   :  { %862 = vadd.xlane.f32.xlu0 %v8347_v29 }
 0x718   :  { %v849_v3 = vpop.xlane.xlu0 %848 }
 0x719   :  { %v8354_v27 = vmul.f32 0.0078125, %v849_v3 }
 0x71a   :  { %v851_v11 = vpop.xlane.xlu1 %850 }
 0x71b   :  { %v872_v48 = vsub.f32 %v8332_v14, %v8354_v27  ;;  %v8358_v55 = vmul.f32 0.0078125, %v851_v11 }
 0x71c   :  { %v853_v8 = vpop.xlane.xlu0 %852 }
 0x71d   :  { %v8360_v58 = vmul.f32 0.0078125, %v853_v8  ;;  %v880_v10 = vmul.f32 %v872_v48, %v872_v48  ;;  %v873_v60 = vsub.f32 %v8337_v21, %v8358_v55 }
 0x71f   :  { %v874_v0 = vsub.f32 %v8330_v49, %v8360_v58  ;;  %888 = vadd.xlane.f32.xlu1 %v880_v10  ;;  %v881_v2 = vmul.f32 %v873_v60, %v873_v60 }
 0x720   :  { %v855_v17 = vpop.xlane.xlu0 %854  ;;  %v857_v20 = vpop.xlane.xlu1 %856 }
 0x721   :  { %v8366_v59 = vmul.f32 0.0078125, %v855_v17  ;;  %v8368_v24 = vmul.f32 0.0078125, %v857_v20  ;;  %890 = vadd.xlane.f32.xlu0 %v881_v2  ;;  %v882_v6 = vmul.f32 %v874_v0, %v874_v0 }
 0x723   :  { %v876_v4 = vsub.f32 %v8343_v26, %v8368_v24  ;;  %892 = vadd.xlane.f32.xlu1 %v882_v6  ;;  %v875_v13 = vsub.f32 %v8335_v46, %v8366_v59 }
 0x724   :  { %v861_v12 = vpop.xlane.xlu1 %860  ;;  %v859_v57 = vpop.xlane.xlu0 %858 }
 0x725   :  { %v8374_v51 = vmul.f32 0.0078125, %v861_v12  ;;  %v8376_v56 = vmul.f32 0.0078125, %v859_v57  ;;  %v884_v61 = vmul.f32 %v876_v4, %v876_v4  ;;  %v883_v5 = vmul.f32 %v875_v13, %v875_v13 }
 0x727   :  { %v878_v3 = vsub.f32 %v8341_v28, %v8374_v51  ;;  %896 = vadd.xlane.f32.xlu1 %v884_v61  ;;  %894 = vadd.xlane.f32.xlu0 %v883_v5  ;;  %v877_v11 = vsub.f32 %v8349_v23, %v8376_v56 }
 0x728   :  { %v863_v48 = vpop.xlane.xlu0 %862 }
 0x729   :  { %v8382_v8 = vmul.f32 0.0078125, %v863_v48  ;;  %v886_v10 = vmul.f32 %v878_v3, %v878_v3  ;;  %v885_v60 = vmul.f32 %v877_v11, %v877_v11 }
 0x72b   :  { %900 = vadd.xlane.f32.xlu1 %v886_v10  ;;  %898 = vadd.xlane.f32.xlu0 %v885_v60  ;;  %v879_v0 = vsub.f32 %v8347_v29, %v8382_v8 }
 0x72d   :  { %v887_v2 = vmul.f32 %v879_v0, %v879_v0 }
 0x72f   :  { %902 = vadd.xlane.f32.xlu0 %v887_v2 }
 0x7ac   :  { %v889_v17 = vpop.xlane.xlu1 %888 }
 0x7ad   :  { %v904_v20 = vmul.f32 0.0078125, %v889_v17 }
 0x7ae   :  { %v891_v6 = vpop.xlane.xlu0 %890 }
 0x7af   :  { %v912_v4 = vadd.f32 1e-05, %v904_v20  ;;  %v905_v13 = vmul.f32 0.0078125, %v891_v6 }
 0x7b0   :  { %v893_v12 = vpop.xlane.xlu1 %892 }
 0x7b1   :  { %7511 = vrsqrt.f32 %v912_v4  ;;  %v906_v57 = vmul.f32 0.0078125, %v893_v12  ;;  %v913_v61 = vadd.f32 1e-05, %v905_v13 }
 0x7b3   :  { %v914_v5 = vadd.f32 1e-05, %v906_v57 }
 0x7b4   :  { %v897_v48 = vpop.xlane.xlu1 %896  ;;  %v895_v3 = vpop.xlane.xlu0 %894 }
 0x7b5   :  { %7513 = vrsqrt.f32 %v914_v5  ;;  %v907_v11 = vmul.f32 0.0078125, %v895_v3  ;;  %v908_v10 = vmul.f32 0.0078125, %v897_v48 }
 0x7b6   :  { %7515 = vrsqrt.f32 %v913_v61 }
 0x7b7   :  { %v915_v60 = vadd.f32 1e-05, %v907_v11  ;;  %v916_v52 = vadd.f32 1e-05, %v908_v10  ;;  %v13527_v11 = vld [vmem:[#allocation5_spill] sm:$0xff] }
 0x7b8   :  { %v901_v62 = vpop.xlane.xlu1 %900  ;;  %v899_v0 = vpop.xlane.xlu0 %898 }
 0x7b9   :  { %v910_v2 = vmul.f32 0.0078125, %v901_v62  ;;  %7517 = vrsqrt.f32 %v915_v60  ;;  %v909_v12 = vmul.f32 0.0078125, %v899_v0 }
 0x7ba   :  { %7519 = vrsqrt.f32 %v916_v52 }
 0x7bb   :  { %v7512_v17 = vpop.eup %7511  ;;  %v918_v20 = vadd.f32 1e-05, %v910_v2  ;;  %v917_v48 = vadd.f32 1e-05, %v909_v12  ;;  %v13528_v2 = vld [vmem:[#allocation7_spill] sm:$0xff]  ;;  %v13530_v12 = vld [vmem:[#allocation6_spill] sm:$0xff] }
 0x7bc   :  { %v928_v6 = vmul.f32 %v7512_v17, %v8108_v15  ;;  %v903_v4 = vpop.xlane.xlu0 %902 }
 0x7bd   :  { %7521 = vrsqrt.f32 %v918_v20  ;;  %v911_v57 = vmul.f32 0.0078125, %v903_v4 }
 0x7be   :  { %954 = vperm.xlu1 %7465, %v928_v6   ;;  %v936_v52 = vmul.f32 %v928_v6, %v8354_v27  ;;  %7523 = vrsqrt.f32 %v917_v48 }
 0x7bf   :  { %v7514_v13 = vpop.eup %7513  ;;  %v919_v62 = vadd.f32 1e-05, %v911_v57 }
 0x7c0   :  { %v930_v5 = vmul.f32 %v7514_v13, %v8119_v9  ;;  %v7516_v61 = vpop.eup %7515  ;;  %v944_v20 = vsub.f32 %v8158_v63, %v936_v52  ;;  %v13529_v13 = vld [vmem:[#allocation8_spill] sm:$0xff] }
 0x7c1   :  { %v929_v10 = vmul.f32 %v7516_v61, %v13527_v11  ;;  %7525 = vrsqrt.f32 %v919_v62  ;;  %v13531_v61 = vld [vmem:[#allocation11_spill] sm:$0xff]  ;;  %v13533_v11 = vld [vmem:[#allocation12_spill] sm:$0xff] }
 0x7c2   :  { %964 = vperm.xlu0 %7466, %v930_v5   ;;  %v938_v60 = vmul.f32 %v930_v5, %v8360_v58 }
 0x7c3   :  { %v7518_v3 = vpop.eup %7517  ;;  %v937_v27 = vmul.f32 %v929_v10, %v8358_v55 }
 0x7c4   :  { %v931_v15 = vmul.f32 %v7518_v3, %v13528_v2  ;;  %v7520_v0 = vpop.eup %7519  ;;  %v946_v9 = vsub.f32 %v8144_v1, %v938_v60  ;;  %v13532_v3 = vld [vmem:[#allocation9_spill] sm:$0xff] }
 0x7c5   :  { %v932_v57 = vmul.f32 %v7520_v0, %v13530_v12  ;;  %v945_v48 = vsub.f32 %v13531_v61, %v937_v27  ;;  %v13534_v2 = vld [vmem:[#allocation13_spill] sm:$0xff] }
 0x7c6   :  { %959 = vperm.xlu0 %7466, %v929_v10   ;;  %969 = vperm.xlu1 %7465, %v931_v15   ;;  %v939_v4 = vmul.f32 %v931_v15, %v8366_v59  ;;  %v13536_v15 = vld [vmem:[#allocation14_spill] sm:$0xff] }
 0x7c7   :  { %v7522_v17 = vpop.eup %7521  ;;  %v940_v5 = vmul.f32 %v932_v57, %v8368_v24 }
 0x7c8   :  { %v934_v58 = vmul.f32 %v7522_v17, %v13529_v13  ;;  %v947_v6 = vsub.f32 %v8172_v16, %v939_v4  ;;  %v7524_v1 = vpop.eup %7523  ;;  %v13535_v16 = vld [vmem:[#allocation10_spill] sm:$0xff] }
 0x7c9   :  { %v948_v62 = vsub.f32 %v13532_v3, %v940_v5  ;;  %v933_v55 = vmul.f32 %v7524_v1, %v13534_v2 }
 0x7ca   :  { %1012 = vperm.xlu0 %7466, %v946_v9   ;;  %1002 = vperm.xlu1 %7465, %v944_v20   ;;  %v942_v59 = vmul.f32 %v934_v58, %v8374_v51  ;;  %v13537_v51 = vld [vmem:[#allocation15_spill] sm:$0xff] }
 0x7cb   :  { %v7526_v63 = vpop.eup %7525  ;;  %v941_v24 = vmul.f32 %v933_v55, %v8376_v56 }
 0x7cc   :  { %v935_v60 = vmul.f32 %v7526_v63, %v13533_v11  ;;  %v950_v10 = vsub.f32 %v13535_v16, %v942_v59 }
 0x7cd   :  { %v949_v52 = vsub.f32 %v13536_v15, %v941_v24 }
 0x7ce   :  { %984 = vperm.xlu0 %7466, %v934_v58   ;;  %1017 = vperm.xlu1 %7465, %v947_v6   ;;  %v943_v0 = vmul.f32 %v935_v60, %v8382_v8 }
 0x7d0   :  { %v951_v9 = vsub.f32 %v13537_v51, %v943_v0 }
 0x7d2   :  { %974 = vperm.xlu0 %7466, %v932_v57   ;;  %1007 = vperm.xlu1 %7465, %v945_v48  }
 0x7d6   :  { %1022 = vperm.xlu0 %7466, %v948_v62   ;;  %989 = vperm.xlu1 %7465, %v935_v60  }
 0x7da   :  { %1032 = vperm.xlu0 %7466, %v950_v10   ;;  %979 = vperm.xlu1 %7465, %v933_v55  }
 0x7de   :  { %1027 = vperm.xlu1 %7465, %v949_v52  }
 0x7e2   :  { %1037 = vperm.xlu1 %7465, %v951_v9  }
 0x83d   :  { %v955_v20 = vpop.permute.xlu1 %954 }
 0x83e   :  { %v992_v1 = vmul.f32 %v955_v20, %v8332_v14 }
 0x841   :  { %v965_v17 = vpop.permute.xlu0 %964 }
 0x842   :  { %v994_v57 = vmul.f32 %v8330_v49, %v965_v17 }
 0x845   :  { %v960_v4 = vpop.permute.xlu0 %959  ;;  %v970_v13 = vpop.permute.xlu1 %969 }
 0x846   :  { %v995_v56 = vmul.f32 %v8335_v46, %v970_v13  ;;  %v993_v61 = vmul.f32 %v960_v4, %v8337_v21 }
 0x849   :  { %v1013_v58 = vpop.permute.xlu0 %1012  ;;  %v1003_v12 = vpop.permute.xlu1 %1002 }
 0x84a   :  { %v1042_v27 = vadd.f32 %v1013_v58, %v994_v57  ;;  %v1040_v48 = vadd.f32 %v1003_v12, %v992_v1 }
 0x84c   :  { %v1050_v63 = vmax.f32 %v1042_v27, 0.0  ;;  %v1048_v2 = vmax.f32 %v1040_v48, 0.0 }
 0x84d   :  { %v985_v6 = vpop.permute.xlu0 %984  ;;  %v1018_v5 = vpop.permute.xlu1 %1017 }
 0x84e   :  { %v1043_v8 = vadd.f32 %v1018_v5, %v995_v56  ;;  %v998_v0 = vmul.f32 %v8341_v28, %v985_v6  ;;  %v7165_v28 = vld [vmem:[%s13218_s1 + $0x1] ss:$0 sm:$0xff] }
 0x850   :  { %v1051_v59 = vmax.f32 %v1043_v8, 0.0 }
 0x851   :  { %v1008_v3 = vpop.permute.xlu1 %1007  ;;  %v975_v62 = vpop.permute.xlu0 %974 }
 0x852   :  { %v1057_v11 = vpack.c.bf16 %v1051_v59, %v1050_v63  ;;  %v1041_v60 = vadd.f32 %v1008_v3, %v993_v61  ;;  %v996_v14 = vmul.f32 %v975_v62, %v8343_v26 }
 0x854   :  { %v1049_v55 = vmax.f32 %v1041_v60, 0.0 }
 0x855   :  { %v990_v49 = vpop.permute.xlu1 %989  ;;  %v1023_v46 = vpop.permute.xlu0 %1022 }
 0x856   :  { %v1056_v16 = vpack.c.bf16 %v1049_v55, %v1048_v2  ;;  %v1044_v24 = vadd.f32 %v1023_v46, %v996_v14  ;;  %v999_v9 = vmul.f32 %v8347_v29, %v990_v49 }
 0x858   :  { %7307 = vmatpush3.bf16.msra.mxu1 %v1056_v16  ;;  %v1052_v17 = vmax.f32 %v1044_v24, 0.0 }
 0x859   :  { %v980_v10 = vpop.permute.xlu1 %979  ;;  %7308 = vmatprep.subr.bf16.mxu1 %v13526_v7  ;;  %v1033_v15 = vpop.permute.xlu0 %1032 }
 0x85a   :  { %v997_v21 = vmul.f32 %v980_v10, %v8349_v23  ;;  %v1046_v20 = vadd.f32 %v1033_v15, %v998_v0 }
 0x85c   :  { %7309 = vmatpush3.bf16.msra.mxu1 %v1057_v11  ;;  %v1054_v26 = vmax.f32 %v1046_v20, 0.0 }
 0x85d   :  { %v1028_v52 = vpop.permute.xlu1 %1027  ;;  %7310 = vmatprep.subr.bf16.mxu1 %v13526_v7 }
 0x85e   :  { %v1045_v51 = vadd.f32 %v1028_v52, %v997_v21 }
 0x860   :  { %v1053_v4 = vmax.f32 %v1045_v51, 0.0 }
 0x861   :  { %v1038_v13 = vpop.permute.xlu1 %1037 }
 0x862   :  { %v1058_v58 = vpack.c.bf16 %v1053_v4, %v1052_v17  ;;  %v1047_v12 = vadd.f32 %v1038_v13, %v999_v9 }
 0x864   :  { %v1055_v57 = vmax.f32 %v1047_v12, 0.0  ;;  %7311 = vmatpush3.bf16.msra.mxu1 %v1058_v58 }
 0x865   :  { %7312 = vmatprep.subr.bf16.mxu1 %v13526_v7 }
 0x866   :  { %v1059_v23 = vpack.c.bf16 %v1055_v57, %v1054_v26 }
 0x868   :  { %7313 = vmatpush3.bf16.msra.mxu1 %v1059_v23 }
 0x869   :  { %7330 = vmatprep.subr.bf16.mxu1 %v13526_v7 }
 0x86b   :  { %7315 = vmatmul.mubr.msk.bf16.vlgmr.msra.gmra.mrb[4].mxu1 %vm13329_vm6, %v8226_v22 }
 0x86c   :  { %7338 = vmatprep.mubr.msk.bf16.mxu1 %vm7721_vm5, %v13526_v7 }
 0x93e   :  { %v1094_v29 = vpop.f32.mrb[4].mxu1 }
 0x93f   :  { %v1106_v56 = vmul.f32 %v7165_v28, %v1094_v29  ;;  %v7316_v27 = vpop.f32.mrb[5].mxu1 }
 0x940   :  { %v1097_v6 = vpop.f32.mrb[6].mxu1 }
 0x941   :  { %v8430_v5 = vadd.f32 %v1106_v56, %v8237_v47  ;;  %v1107_v1 = vmul.f32 %v7165_v28, %v1097_v6  ;;  %v7317_v8 = vpop.f32.mrb[7].mxu1 }
 0x943   :  { %v8433_v61 = vadd.f32 %v1107_v1, %v8240_v19  ;;  %1112 = vrot.lane.b32.xlu0 %v8430_v5, %s7709_s28  ;;  %v1178_v8 = vmul.f32 %v8430_v5, %v7958_v43 }
 0x945   :  { %1114 = vrot.lane.b32.xlu1 %v8433_v61, %s7709_s28  ;;  %v1216_v22 = vpack.c.bf16 %v8433_v61, %v8430_v5 }
 0x947   :  { %1118 = vrot.lane.b32.xlu0 %v8430_v5, %s7708_s27  ;;  %7318 = vmatprep.subr.bf16.mxu0 %v1216_v22 }
 0x948   :  { %7319 = vmatpush3.bf16.msra.mxu0 %v1216_v22 }
 0x949   :  { %1120 = vrot.lane.b32.xlu1 %v8433_v61, %s7708_s27 }
 0x94b   :  { %1158 = vrot.lane.b32.xlu0 %v8430_v5, %s7715_s3 }
 0x94d   :  { %1160 = vrot.lane.b32.xlu1 %v8433_v61, %s7715_s3 }
 0x9b5   :  { %v1113_v47 = vpop.permute.xlu0 %1112 }
 0x9b7   :  { %v1115_v19 = vpop.permute.xlu1 %1114 }
 0x9b9   :  { %v1119_v48 = vpop.permute.xlu0 %1118 }
 0x9ba   :  { %v1124_v63 = vsel %vm7885_vm0, %v1113_v47, %v1119_v48  ;;  %v1126_v62 = vsel %vm7900_vm1, %v1119_v48, %v1113_v47 }
 0x9bb   :  { %1130 = vrot.lane.b32.xlu0 %v1124_v63, %s7715_s3  ;;  %v1121_v59 = vpop.permute.xlu1 %1120  ;;  %v1150_v15 = vmul.f32 %v1124_v63, %v7934_v31 }
 0x9bc   :  { %v1125_v3 = vsel %vm7885_vm0, %v1115_v19, %v1121_v59  ;;  %v1127_v11 = vsel %vm7900_vm1, %v1121_v59, %v1115_v19 }
 0x9bd   :  { %1132 = vrot.lane.b32.xlu1 %v1125_v3, %s7715_s3  ;;  %v1159_v60 = vpop.permute.xlu0 %1158  ;;  %v1151_v20 = vmul.f32 %v1125_v3, %v7948_v38 }
 0x9bf   :  { %1136 = vrot.lane.b32.xlu0 %v1124_v63, %s7717_s25  ;;  %v1161_v2 = vpop.permute.xlu1 %1160 }
 0x9c1   :  { %1138 = vrot.lane.b32.xlu1 %v1125_v3, %s7717_s25  ;;  %v1179_v3 = vmul.f32 %v8433_v61, %v7946_v37 }
 0x9c3   :  { %1164 = vrot.lane.b32.xlu0 %v8430_v5, %s7717_s25 }
 0x9c5   :  { %1166 = vrot.lane.b32.xlu1 %v8433_v61, %s7717_s25 }
 0x9c7   :  { %1188 = vrot.lane.b32.xlu0 %v1126_v62, %s7715_s3 }
 0x9c9   :  { %1190 = vrot.lane.b32.xlu1 %v1127_v11, %s7715_s3 }
 0x9cb   :  { %1194 = vrot.lane.b32.xlu0 %v1126_v62, %s7717_s25 }
 0x9cd   :  { %1196 = vrot.lane.b32.xlu1 %v1127_v11, %s7717_s25 }
 0xa2d   :  { %v1131_v55 = vpop.permute.xlu0 %1130 }
 0xa2f   :  { %v1133_v49 = vpop.permute.xlu1 %1132 }
 0xa31   :  { %v1137_v16 = vpop.permute.xlu0 %1136 }
 0xa32   :  { %v1142_v46 = vsel %vm71_vm3, %v1137_v16, %v1131_v55  ;;  %v1144_v24 = vsel %vm72_vm4, %v1131_v55, %v1137_v16 }
 0xa33   :  { %v1146_v10 = vmul.f32 %v1142_v46, %v7944_v36  ;;  %v1139_v14 = vpop.permute.xlu1 %1138  ;;  %v1154_v13 = vmul.f32 %v1144_v24, %v7950_v39  ;;  %v1208_v24 = vmul.f32 %v1126_v62, %v7971_v54 }
 0xa34   :  { %v1143_v21 = vsel %vm71_vm3, %v1139_v14, %v1133_v49  ;;  %v1145_v9 = vsel %vm72_vm4, %v1133_v49, %v1139_v14 }
 0xa35   :  { %v1148_v52 = vadd.f32 %v1146_v10, %v7936_v32  ;;  %v1147_v0 = vmul.f32 %v1143_v21, %v7932_v30  ;;  %v1165_v51 = vpop.permute.xlu0 %1164  ;;  %v1155_v28 = vmul.f32 %v1145_v9, %v7940_v34  ;;  %v1209_v9 = vmul.f32 %v1127_v11, %v7964_v50  ;;  %v8525_v11 = vld [vmem:[%s13214_s4 + $0x10] sm:$0xff]  }
 0xa36   :  { %v1170_v17 = vsel %vm71_vm3, %v1165_v51, %v1159_v60  ;;  %v1172_v27 = vsel %vm72_vm4, %v1159_v60, %v1165_v51 }
 0xa37   :  { %v1152_v4 = vadd.f32 %v1150_v15, %v1148_v52  ;;  %v1149_v58 = vadd.f32 %v1147_v0, %v7938_v33  ;;  %v1167_v12 = vpop.permute.xlu1 %1166  ;;  %v1174_v29 = vmul.f32 %v1170_v17, %v7942_v35  ;;  %v1182_v63 = vmul.f32 %v1172_v27, %v7952_v40 }
 0xa38   :  { %v1171_v26 = vsel %vm71_vm3, %v1167_v12, %v1161_v2  ;;  %v1173_v19 = vsel %vm72_vm4, %v1161_v2, %v1167_v12 }
 0xa39   :  { %v1156_v57 = vadd.f32 %v1154_v13, %v1152_v4  ;;  %v1153_v23 = vadd.f32 %v1151_v20, %v1149_v58  ;;  %v1189_v56 = vpop.permute.xlu0 %1188  ;;  %v1175_v22 = vmul.f32 %v1171_v26, %v7954_v41  ;;  %v1183_v46 = vmul.f32 %v1173_v19, %v7962_v45  ;;  %v13538_v4 = vld [vmem:[#allocation3_spill] sm:$0xff]  ;;  %v13539_v58 = vld [vmem:[#allocation4_spill] sm:$0xff] }
 0xa3b   :  { %v1157_v6 = vadd.f32 %v1155_v28, %v1153_v23  ;;  %v1176_v1 = vadd.f32 %v1174_v29, %v1156_v57  ;;  %v1191_v47 = vpop.permute.xlu1 %1190  ;;  %v8518_v28 = vld [vmem:[%s13214_s4 + $0x8] sm:$0xff]   ;;  %v8532_v29 = vld [vmem:[%s13214_s4 + $0x18] sm:$0xff]  }
 0xa3d   :  { %v1180_v48 = vadd.f32 %v1178_v8, %v1176_v1  ;;  %v1177_v59 = vadd.f32 %v1175_v22, %v1157_v6  ;;  %v1195_v55 = vpop.permute.xlu0 %1194 }
 0xa3e   :  { %v1200_v60 = vsel %vm71_vm3, %v1195_v55, %v1189_v56  ;;  %v1202_v0 = vsel %vm72_vm4, %v1189_v56, %v1195_v55  ;;  %v7626_v56 = vld [vmem:[%s13214_s4] sm:$0xff]  }
 0xa3f   :  { %v1184_v49 = vadd.f32 %v1182_v63, %v1180_v48  ;;  %v1181_v16 = vadd.f32 %v1179_v3, %v1177_v59  ;;  %v1204_v10 = vmul.f32 %v1200_v60, %v7956_v42  ;;  %v1197_v14 = vpop.permute.xlu1 %1196  ;;  %v1212_v13 = vmul.f32 %v1202_v0, %v13538_v4 }
 0xa40   :  { %v1201_v2 = vsel %vm71_vm3, %v1197_v14, %v1191_v47  ;;  %v1203_v51 = vsel %vm72_vm4, %v1191_v47, %v1197_v14 }
 0xa41   :  { %v1185_v21 = vadd.f32 %v1183_v46, %v1181_v16  ;;  %v1206_v15 = vadd.f32 %v1204_v10, %v1184_v49  ;;  %v1205_v52 = vmul.f32 %v1201_v2, %v7960_v44  ;;  %v1213_v12 = vmul.f32 %v1203_v51, %v13539_v58 }
 0xa43   :  { %v1207_v17 = vadd.f32 %v1205_v52, %v1185_v21  ;;  %v1210_v20 = vadd.f32 %v1208_v24, %v1206_v15 }
 0xa45   :  { %v1211_v26 = vadd.f32 %v1209_v9, %v1207_v17  ;;  %v1214_v62 = vadd.f32 %v1212_v13, %v1210_v20 }
 0xa47   :  { %v1215_v57 = vadd.f32 %v1213_v12, %v1211_v26 }
 0xa49   :  { %v1217_v23 = vpack.c.bf16 %v1215_v57, %v1214_v62 }
 0xa4b   :  { %7320 = vmatprep.subr.bf16.mxu0 %v1217_v23 }
 0xa4c   :  { %7321 = vmatpush3.bf16.msra.mxu0 %v1217_v23 }
 0xa4f   :  { %7323 = vmatmul.mubr.msk.bf16.vlgmr.msra.gmra.mrb[16].mxu0 %vm13330_vm2, %v8518_v28 }
 0xa50   :  { %7326 = vmatprep.mubr.msk.bf16.mxu0 %vm13330_vm2, %v8525_v11 }
 0xa57   :  { %7327 = vmatmul.mubr.msk.bf16.gmra.mrb[20].mxu0 %vm13330_vm2, %v8532_v29 }
 0xa58   :  { %7346 = vmatprep.mubr.msk.bf16.mxu0 %vm13330_vm2, %v7626_v56 }
 0xb22   :  { %v8540_v27 = vpop.f32.mrb[16].mxu0 }
 0xb23   :  { %v8542_v6 = vpop.f32.mrb[17].mxu0 }
 0xb24   :  { %1283 = vadd.xlane.f32.xlu0 %v8542_v6  ;;  %v8545_v1 = vpop.f32.mrb[18].mxu0 }
 0xb25   :  { %v8547_v8 = vpop.f32.mrb[19].mxu0 }
 0xb26   :  { %1285 = vadd.xlane.f32.xlu1 %v8547_v8 }
 0xb28   :  { %1287 = vadd.xlane.f32.xlu0 %v8540_v27 }
 0xb2a   :  { %v8551_v22 = vpop.f32.mrb[20].mxu0 }
 0xb2b   :  { %v8553_v47 = vpop.f32.mrb[21].mxu0 }
 0xb2c   :  { %1289 = vadd.xlane.f32.xlu0 %v8545_v1  ;;  %1291 = vadd.xlane.f32.xlu1 %v8553_v47  ;;  %v8557_v19 = vpop.f32.mrb[22].mxu0 }
 0xb2d   :  { %v8559_v48 = vpop.f32.mrb[23].mxu0 }
 0xb30   :  { %1295 = vadd.xlane.f32.xlu1 %v8551_v22  ;;  %1293 = vadd.xlane.f32.xlu0 %v8559_v48 }
 0xb34   :  { %1297 = vadd.xlane.f32.xlu0 %v8557_v19 }
 0xbb1   :  { %v1284_v63 = vpop.xlane.xlu0 %1283 }
 0xbb2   :  { %v8564_v59 = vmul.f32 0.0078125, %v1284_v63 }
 0xbb3   :  { %v1286_v3 = vpop.xlane.xlu1 %1285 }
 0xbb4   :  { %v1307_v55 = vsub.f32 %v8542_v6, %v8564_v59  ;;  %v8568_v60 = vmul.f32 0.0078125, %v1286_v3 }
 0xbb5   :  { %v1288_v49 = vpop.xlane.xlu0 %1287 }
 0xbb6   :  { %v1308_v16 = vsub.f32 %v8547_v8, %v8568_v60  ;;  %v8572_v46 = vmul.f32 0.0078125, %v1288_v49  ;;  %v1315_v10 = vmul.f32 %v1307_v55, %v1307_v55 }
 0xbb8   :  { %v1309_v14 = vsub.f32 %v8540_v27, %v8572_v46  ;;  %1323 = vadd.xlane.f32.xlu1 %v1315_v10  ;;  %v1316_v2 = vmul.f32 %v1308_v16, %v1308_v16 }
 0xbb9   :  { %v1290_v24 = vpop.xlane.xlu0 %1289  ;;  %v1292_v21 = vpop.xlane.xlu1 %1291 }
 0xbba   :  { %v8576_v15 = vmul.f32 0.0078125, %v1290_v24  ;;  %v8578_v52 = vmul.f32 0.0078125, %v1292_v21  ;;  %1325 = vadd.xlane.f32.xlu0 %v1316_v2  ;;  %v1317_v0 = vmul.f32 %v1309_v14, %v1309_v14 }
 0xbbc   :  { %v1310_v51 = vsub.f32 %v8545_v1, %v8576_v15  ;;  %v1311_v9 = vsub.f32 %v8553_v47, %v8578_v52  ;;  %1327 = vadd.xlane.f32.xlu1 %v1317_v0 }
 0xbbd   :  { %v1296_v17 = vpop.xlane.xlu1 %1295  ;;  %v1294_v20 = vpop.xlane.xlu0 %1293 }
 0xbbe   :  { %v8584_v13 = vmul.f32 0.0078125, %v1296_v17  ;;  %v8586_v12 = vmul.f32 0.0078125, %v1294_v20  ;;  %v1319_v26 = vmul.f32 %v1311_v9, %v1311_v9  ;;  %v1318_v62 = vmul.f32 %v1310_v51, %v1310_v51 }
 0xbc0   :  { %v1313_v57 = vsub.f32 %v8551_v22, %v8584_v13  ;;  %v1312_v23 = vsub.f32 %v8559_v48, %v8586_v12  ;;  %1331 = vadd.xlane.f32.xlu1 %v1319_v26  ;;  %1329 = vadd.xlane.f32.xlu0 %v1318_v62 }
 0xbc1   :  { %v1298_v56 = vpop.xlane.xlu0 %1297 }
 0xbc2   :  { %v8592_v63 = vmul.f32 0.0078125, %v1298_v56  ;;  %v1321_v3 = vmul.f32 %v1313_v57, %v1313_v57  ;;  %v1320_v55 = vmul.f32 %v1312_v23, %v1312_v23 }
 0xbc4   :  { %v1314_v49 = vsub.f32 %v8557_v19, %v8592_v63  ;;  %1335 = vadd.xlane.f32.xlu1 %v1321_v3  ;;  %1333 = vadd.xlane.f32.xlu0 %v1320_v55 }
 0xbc6   :  { %v1322_v16 = vmul.f32 %v1314_v49, %v1314_v49 }
 0xbc8   :  { %1337 = vadd.xlane.f32.xlu0 %v1322_v16 }
 0xc45   :  { %v1324_v10 = vpop.xlane.xlu1 %1323 }
 0xc46   :  { %v1339_v14 = vmul.f32 0.0078125, %v1324_v10 }
 0xc47   :  { %v1326_v2 = vpop.xlane.xlu0 %1325 }
 0xc48   :  { %v1347_v24 = vadd.f32 1e-05, %v1339_v14  ;;  %v1340_v21 = vmul.f32 0.0078125, %v1326_v2  ;;  %v8599_v14 = vld [vmem:[%s13215_s5] sm:$0xff] }
 0xc49   :  { %v1328_v0 = vpop.xlane.xlu1 %1327 }
 0xc4a   :  { %7527 = vrsqrt.f32 %v1347_v24  ;;  %v1341_v51 = vmul.f32 0.0078125, %v1328_v0  ;;  %v1348_v9 = vadd.f32 1e-05, %v1340_v21 }
 0xc4c   :  { %v1349_v17 = vadd.f32 1e-05, %v1341_v51 }
 0xc4d   :  { %v1332_v20 = vpop.xlane.xlu1 %1331  ;;  %v1330_v26 = vpop.xlane.xlu0 %1329 }
 0xc4e   :  { %7529 = vrsqrt.f32 %v1349_v17  ;;  %v1342_v62 = vmul.f32 0.0078125, %v1330_v26  ;;  %v1343_v57 = vmul.f32 0.0078125, %v1332_v20 }
 0xc4f   :  { %7531 = vrsqrt.f32 %v1348_v9  ;;  %v8605_v9 = vld [vmem:[%s13215_s5 + $0x10] sm:$0xff] }
 0xc50   :  { %v1350_v23 = vadd.f32 1e-05, %v1342_v62  ;;  %v1351_v49 = vadd.f32 1e-05, %v1343_v57 }
 0xc51   :  { %v1336_v56 = vpop.xlane.xlu1 %1335  ;;  %v1334_v3 = vpop.xlane.xlu0 %1333 }
 0xc52   :  { %v1345_v55 = vmul.f32 0.0078125, %v1336_v56  ;;  %7533 = vrsqrt.f32 %v1350_v23  ;;  %v1344_v0 = vmul.f32 0.0078125, %v1334_v3  ;;  %v8611_v23 = vld [vmem:[%s13215_s5 + $0x8] sm:$0xff] }
 0xc53   :  { %7535 = vrsqrt.f32 %v1351_v49 }
 0xc54   :  { %v7528_v16 = vpop.eup %7527  ;;  %v1353_v10 = vadd.f32 1e-05, %v1345_v55  ;;  %v1352_v26 = vadd.f32 1e-05, %v1344_v0  ;;  %v8618_v55 = vld [vmem:[%s13215_s5 + $0x18] sm:$0xff]  ;;  %v8631_v0 = vld [vmem:[%s13216_s6] sm:$0xff] }
 0xc55   :  { %v1363_v2 = vmul.f32 %v8599_v14, %v7528_v16  ;;  %v1338_v24 = vpop.xlane.xlu0 %1337  ;;  %13541 = vst [vmem:[#allocation7_spill] sm:$0xff] %v8631_v0 }
 0xc56   :  { %7537 = vrsqrt.f32 %v1353_v10  ;;  %v1346_v51 = vmul.f32 0.0078125, %v1338_v24  ;;  %v8625_v24 = vld [vmem:[%s13216_s6 + $0x10] sm:$0xff] }
 0xc57   :  { %1389 = vperm.xlu1 %7465, %v1363_v2   ;;  %v1371_v16 = vmul.f32 %v1363_v2, %v8564_v59  ;;  %7539 = vrsqrt.f32 %v1352_v26  ;;  %13540 = vst [vmem:[#allocation5_spill] sm:$0xff] %v8625_v24 }
 0xc58   :  { %v7530_v21 = vpop.eup %7529  ;;  %v1354_v57 = vadd.f32 1e-05, %v1346_v51  ;;  %v8638_v51 = vld [vmem:[%s13215_s5 + $0x30] sm:$0xff] }
 0xc59   :  { %v1365_v17 = vmul.f32 %v8605_v9, %v7530_v21  ;;  %v7532_v20 = vpop.eup %7531  ;;  %v1379_v59 = vsub.f32 %v8631_v0, %v1371_v16  ;;  %13542 = vst [vmem:[#allocation8_spill] sm:$0xff] %v8638_v51  ;;  %v8658_v16 = vld [vmem:[%s13216_s6 + $0x8] sm:$0xff] }
 0xc5a   :  { %v1364_v56 = vmul.f32 %v8611_v23, %v7532_v20  ;;  %7541 = vrsqrt.f32 %v1354_v57  ;;  %v8644_v20 = vld [vmem:[%s13215_s5 + $0x20] sm:$0xff]  ;;  %13545 = vst [vmem:[#allocation9_spill] sm:$0xff] %v8658_v16 }
 0xc5b   :  { %1399 = vperm.xlu0 %7466, %v1365_v17   ;;  %v1373_v3 = vmul.f32 %v1365_v17, %v8572_v46  ;;  %13543 = vst [vmem:[#allocation6_spill] sm:$0xff] %v8644_v20 }
 0xc5c   :  { %v7534_v62 = vpop.eup %7533  ;;  %v1372_v57 = vmul.f32 %v1364_v56, %v8568_v60 }
 0xc5d   :  { %v1366_v49 = vmul.f32 %v8618_v55, %v7534_v62  ;;  %v7536_v10 = vpop.eup %7535  ;;  %v1381_v46 = vsub.f32 %v8625_v24, %v1373_v3 }
 0xc5e   :  { %v1367_v26 = vmul.f32 %v8644_v20, %v7536_v10  ;;  %v1380_v10 = vsub.f32 %v8658_v16, %v1372_v57  ;;  %v8690_v57 = vld [vmem:[%s13216_s6 + $0x28] sm:$0xff] }
 0xc5f   :  { %1394 = vperm.xlu0 %7466, %v1364_v56   ;;  %1404 = vperm.xlu1 %7465, %v1366_v49   ;;  %v1374_v2 = vmul.f32 %v1366_v49, %v8576_v15  ;;  %v8650_v15 = vld [vmem:[%s13216_s6 + $0x18] sm:$0xff]  ;;  %13550 = vst [vmem:[#allocation15_spill] sm:$0xff] %v8690_v57 }
 0xc60   :  { %v7538_v21 = vpop.eup %7537  ;;  %13544 = vst [vmem:[#allocation11_spill] sm:$0xff] %v8650_v15  ;;  %v1375_v3 = vmul.f32 %v1367_v26, %v8578_v52  ;;  %v8671_v56 = vld [vmem:[%s13215_s5 + $0x38] sm:$0xff] }
 0xc61   :  { %v1369_v17 = vmul.f32 %v8638_v51, %v7538_v21  ;;  %v1382_v62 = vsub.f32 %v8650_v15, %v1374_v2  ;;  %v7540_v49 = vpop.eup %7539  ;;  %v8664_v21 = vld [vmem:[%s13216_s6 + $0x20] sm:$0xff]  ;;  %13547 = vst [vmem:[#allocation13_spill] sm:$0xff] %v8671_v56  ;;  %v8677_v2 = vld [vmem:[%s13215_s5 + $0x28] sm:$0xff] }
 0xc62   :  { %13546 = vst [vmem:[#allocation12_spill] sm:$0xff] %v8664_v21  ;;  %v1383_v60 = vsub.f32 %v8664_v21, %v1375_v3  ;;  %13548 = vst [vmem:[#allocation10_spill] sm:$0xff] %v8677_v2 }
 0xc63   :  { %1447 = vperm.xlu0 %7466, %v1381_v46   ;;  %1437 = vperm.xlu1 %7465, %v1379_v59   ;;  %v1377_v52 = vmul.f32 %v1369_v17, %v8584_v13  ;;  %v8683_v13 = vld [vmem:[%s13216_s6 + $0x30] sm:$0xff] }
 0xc64   :  { %v7542_v46 = vpop.eup %7541  ;;  %13549 = vst [vmem:[#allocation14_spill] sm:$0xff] %v8683_v13 }
 0xc65   :  { %v1370_v59 = vmul.f32 %v8671_v56, %v7542_v46 }
 0xc67   :  { %1419 = vperm.xlu0 %7466, %v1369_v17   ;;  %1452 = vperm.xlu1 %7465, %v1382_v62   ;;  %v1385_v17 = vsub.f32 %v8683_v13, %v1377_v52 }
 0xc6b   :  { %1409 = vperm.xlu0 %7466, %v1367_v26   ;;  %1442 = vperm.xlu1 %7465, %v1380_v10   ;;  %v1368_v26 = vmul.f32 %v8677_v2, %v7540_v49  ;;  %v1378_v49 = vmul.f32 %v1370_v59, %v8592_v63  ;;  %v8697_v10 = vld [vmem:[%s13216_s6 + $0x38] sm:$0xff] }
 0xc6c   :  { %13551 = vst [vmem:[#allocation3_spill] sm:$0xff] %v8697_v10 }
 0xc6d   :  { %v1376_v62 = vmul.f32 %v1368_v26, %v8586_v12  ;;  %v1386_v46 = vsub.f32 %v8697_v10, %v1378_v49 }
 0xc6f   :  { %1457 = vperm.xlu0 %7466, %v1383_v60   ;;  %1424 = vperm.xlu1 %7465, %v1370_v59   ;;  %v1384_v3 = vsub.f32 %v8690_v57, %v1376_v62 }
 0xc73   :  { %1467 = vperm.xlu0 %7466, %v1385_v17   ;;  %1414 = vperm.xlu1 %7465, %v1368_v26  }
 0xc77   :  { %1462 = vperm.xlu1 %7465, %v1384_v3  }
 0xc7b   :  { %1472 = vperm.xlu1 %7465, %v1386_v46  }
 0xcd6   :  { %v1390_v60 = vpop.permute.xlu1 %1389 }
 0xcd7   :  { %v1427_v57 = vmul.f32 %v1390_v60, %v8542_v6 }
 0xcda   :  { %v1400_v12 = vpop.permute.xlu0 %1399 }
 0xcdb   :  { %v1429_v2 = vmul.f32 %v8540_v27, %v1400_v12 }
 0xcde   :  { %v1395_v52 = vpop.permute.xlu0 %1394  ;;  %v1405_v26 = vpop.permute.xlu1 %1404 }
 0xcdf   :  { %v1430_v62 = vmul.f32 %v8545_v1, %v1405_v26  ;;  %v1428_v21 = vmul.f32 %v1395_v52, %v8547_v8 }
 0xce2   :  { %v1448_v17 = vpop.permute.xlu0 %1447  ;;  %v1438_v13 = vpop.permute.xlu1 %1437 }
 0xce3   :  { %v1477_v63 = vadd.f32 %v1448_v17, %v1429_v2  ;;  %v1475_v49 = vadd.f32 %v1438_v13, %v1427_v57 }
 0xce5   :  { %v1485_v46 = vmax.f32 %v1477_v63, 0.0  ;;  %v1483_v0 = vmax.f32 %v1475_v49, 0.0 }
 0xce6   :  { %v1420_v59 = vpop.permute.xlu0 %1419  ;;  %v1453_v3 = vpop.permute.xlu1 %1452 }
 0xce7   :  { %v1478_v56 = vadd.f32 %v1453_v3, %v1430_v62 }
 0xce9   :  { %v1486_v10 = vmax.f32 %v1478_v56, 0.0 }
 0xcea   :  { %v1443_v16 = vpop.permute.xlu1 %1442  ;;  %v1410_v15 = vpop.permute.xlu0 %1409 }
 0xceb   :  { %v1492_v20 = vpack.c.bf16 %v1486_v10, %v1485_v46  ;;  %v1476_v51 = vadd.f32 %v1443_v16, %v1428_v21  ;;  %v1431_v6 = vmul.f32 %v1410_v15, %v8553_v47  ;;  %v1433_v16 = vmul.f32 %v8551_v22, %v1420_v59  ;;  %v8715_v22 = vld [vmem:[%s13217_s7] sm:$0xff]  }
 0xced   :  { %v1484_v24 = vmax.f32 %v1476_v51, 0.0 }
 0xcee   :  { %v1425_v27 = vpop.permute.xlu1 %1424  ;;  %v1458_v1 = vpop.permute.xlu0 %1457 }
 0xcef   :  { %v1491_v12 = vpack.c.bf16 %v1484_v24, %v1483_v0  ;;  %v1479_v60 = vadd.f32 %v1458_v1, %v1431_v6  ;;  %v1434_v24 = vmul.f32 %v8557_v19, %v1425_v27  ;;  %v7171_v19 = vld [vmem:[%s13218_s1 + $0x2] ss:$0 sm:$0xff] }
 0xcf1   :  { %7331 = vmatpush3.bf16.msra.mxu1 %v1491_v12  ;;  %v1487_v0 = vmax.f32 %v1479_v60, 0.0 }
 0xcf2   :  { %v1415_v2 = vpop.permute.xlu1 %1414  ;;  %7332 = vmatprep.subr.bf16.mxu1 %v13526_v7  ;;  %v1468_v56 = vpop.permute.xlu0 %1467 }
 0xcf3   :  { %v1432_v8 = vmul.f32 %v1415_v2, %v8559_v48  ;;  %v1481_v21 = vadd.f32 %v1468_v56, %v1433_v16 }
 0xcf5   :  { %7333 = vmatpush3.bf16.msra.mxu1 %v1492_v20  ;;  %v1489_v47 = vmax.f32 %v1481_v21, 0.0 }
 0xcf6   :  { %v1463_v13 = vpop.permute.xlu1 %1462  ;;  %7334 = vmatprep.subr.bf16.mxu1 %v13526_v7 }
 0xcf7   :  { %v1480_v51 = vadd.f32 %v1463_v13, %v1432_v8 }
 0xcf9   :  { %v1488_v57 = vmax.f32 %v1480_v51, 0.0 }
 0xcfa   :  { %v1473_v10 = vpop.permute.xlu1 %1472 }
 0xcfb   :  { %v1493_v52 = vpack.c.bf16 %v1488_v57, %v1487_v0  ;;  %v1482_v26 = vadd.f32 %v1473_v10, %v1434_v24 }
 0xcfd   :  { %v1490_v15 = vmax.f32 %v1482_v26, 0.0  ;;  %7335 = vmatpush3.bf16.msra.mxu1 %v1493_v52 }
 0xcfe   :  { %7336 = vmatprep.subr.bf16.mxu1 %v13526_v7 }
 0xcff   :  { %v1494_v48 = vpack.c.bf16 %v1490_v15, %v1489_v47 }
 0xd01   :  { %7337 = vmatpush3.bf16.msra.mxu1 %v1494_v48 }
 0xd02   :  { %7354 = vmatprep.subr.bf16.mxu1 %v13526_v7 }
 0xd04   :  { %7339 = vmatmul.mubr.msk.bf16.vlgmr.msra.gmra.mrb[8].mxu1 %vm13329_vm6, %v8715_v22 }
 0xd05   :  { %7362 = vmatprep.mubr.msk.bf16.mxu1 %vm7721_vm5, %v13526_v7 }
 0xdd7   :  { %v1529_v20 = vpop.f32.mrb[8].mxu1 }
 0xdd8   :  { %v1541_v17 = vmul.f32 %v7171_v19, %v1529_v20  ;;  %v7340_v62 = vpop.f32.mrb[9].mxu1 }
 0xdd9   :  { %v1532_v63 = vpop.f32.mrb[10].mxu1 }
 0xdda   :  { %v8725_v59 = vadd.f32 %v1541_v17, %v8430_v5  ;;  %v1542_v3 = vmul.f32 %v7171_v19, %v1532_v63  ;;  %v7341_v49 = vpop.f32.mrb[11].mxu1 }
 0xddc   :  { %v8728_v46 = vadd.f32 %v1542_v3, %v8433_v61  ;;  %1547 = vrot.lane.b32.xlu0 %v8725_v59, %s7709_s28 }
 0xdde   :  { %1549 = vrot.lane.b32.xlu1 %v8728_v46, %s7709_s28  ;;  %v1651_v27 = vpack.c.bf16 %v8728_v46, %v8725_v59 }
 0xde0   :  { %1553 = vrot.lane.b32.xlu0 %v8725_v59, %s7708_s27  ;;  %7342 = vmatprep.subr.bf16.mxu0 %v1651_v27 }
 0xde1   :  { %7343 = vmatpush3.bf16.msra.mxu0 %v1651_v27 }
 0xde2   :  { %1555 = vrot.lane.b32.xlu1 %v8728_v46, %s7708_s27 }
 0xde4   :  { %1593 = vrot.lane.b32.xlu0 %v8725_v59, %s7715_s3 }
 0xde6   :  { %1595 = vrot.lane.b32.xlu1 %v8728_v46, %s7715_s3 }
 0xe4e   :  { %v1548_v5 = vpop.permute.xlu0 %1547 }
 0xe50   :  { %v1550_v61 = vpop.permute.xlu1 %1549 }
 0xe52   :  { %v1554_v12 = vpop.permute.xlu0 %1553 }
 0xe53   :  { %v1559_v1 = vsel %vm7885_vm0, %v1548_v5, %v1554_v12  ;;  %v1561_v60 = vsel %vm7900_vm1, %v1554_v12, %v1548_v5 }
 0xe54   :  { %1565 = vrot.lane.b32.xlu0 %v1559_v1, %s7715_s3  ;;  %v1556_v2 = vpop.permute.xlu1 %1555  ;;  %v1585_v10 = vmul.f32 %v1559_v1, %v7934_v31 }
 0xe55   :  { %v1560_v6 = vsel %vm7885_vm0, %v1550_v61, %v1556_v2  ;;  %v1562_v18 = vsel %vm7900_vm1, %v1556_v2, %v1550_v61 }
 0xe56   :  { %1567 = vrot.lane.b32.xlu1 %v1560_v6, %s7715_s3  ;;  %v1594_v8 = vpop.permute.xlu0 %1593  ;;  %v1586_v48 = vmul.f32 %v1560_v6, %v7948_v38 }
 0xe58   :  { %1571 = vrot.lane.b32.xlu0 %v1559_v1, %s7717_s25  ;;  %v1596_v56 = vpop.permute.xlu1 %1595 }
 0xe5a   :  { %1573 = vrot.lane.b32.xlu1 %v1560_v6, %s7717_s25 }
 0xe5c   :  { %1599 = vrot.lane.b32.xlu0 %v8725_v59, %s7717_s25 }
 0xe5e   :  { %1601 = vrot.lane.b32.xlu1 %v8728_v46, %s7717_s25 }
 0xe60   :  { %1623 = vrot.lane.b32.xlu0 %v1561_v60, %s7715_s3 }
 0xe62   :  { %1625 = vrot.lane.b32.xlu1 %v1562_v18, %s7715_s3 }
 0xe64   :  { %1629 = vrot.lane.b32.xlu0 %v1561_v60, %s7717_s25 }
 0xe66   :  { %1631 = vrot.lane.b32.xlu1 %v1562_v18, %s7717_s25 }
 0xec6   :  { %v1566_v13 = vpop.permute.xlu0 %1565 }
 0xec8   :  { %v1568_v16 = vpop.permute.xlu1 %1567 }
 0xeca   :  { %v1572_v51 = vpop.permute.xlu0 %1571 }
 0xecb   :  { %v1577_v24 = vsel %vm71_vm3, %v1572_v51, %v1566_v13  ;;  %v1579_v25 = vsel %vm72_vm4, %v1566_v13, %v1572_v51 }
 0xecc   :  { %v1581_v0 = vmul.f32 %v1577_v24, %v7944_v36  ;;  %v1574_v21 = vpop.permute.xlu1 %1573  ;;  %v1589_v20 = vmul.f32 %v1579_v25, %v7950_v39  ;;  %v1613_v39 = vmul.f32 %v8725_v59, %v7958_v43 }
 0xecd   :  { %v1578_v57 = vsel %vm71_vm3, %v1574_v21, %v1568_v16  ;;  %v1580_v15 = vsel %vm72_vm4, %v1568_v16, %v1574_v21 }
 0xece   :  { %v1583_v52 = vadd.f32 %v1581_v0, %v7936_v32  ;;  %v1582_v26 = vmul.f32 %v1578_v57, %v7932_v30  ;;  %v1600_v47 = vpop.permute.xlu0 %1599  ;;  %v1590_v63 = vmul.f32 %v1580_v15, %v7940_v34 }
 0xecf   :  { %v1605_v36 = vsel %vm71_vm3, %v1600_v47, %v1594_v8  ;;  %v1607_v27 = vsel %vm72_vm4, %v1594_v8, %v1600_v47 }
 0xed0   :  { %v1587_v19 = vadd.f32 %v1585_v10, %v1583_v52  ;;  %v1584_v17 = vadd.f32 %v1582_v26, %v7938_v33  ;;  %v1602_v62 = vpop.permute.xlu1 %1601  ;;  %v1609_v3 = vmul.f32 %v1605_v36, %v7942_v35  ;;  %v1617_v34 = vmul.f32 %v1607_v27, %v7952_v40 }
 0xed1   :  { %v1606_v31 = vsel %vm71_vm3, %v1602_v62, %v1596_v56  ;;  %v1608_v12 = vsel %vm72_vm4, %v1596_v56, %v1602_v62  ;;  %v1614_v35 = vmul.f32 %v8728_v46, %v7946_v37  ;;  %v1643_v40 = vmul.f32 %v1561_v60, %v7971_v54 }
 0xed2   :  { %v1591_v32 = vadd.f32 %v1589_v20, %v1587_v19  ;;  %v1588_v30 = vadd.f32 %v1586_v48, %v1584_v17  ;;  %v1624_v49 = vpop.permute.xlu0 %1623  ;;  %v1610_v33 = vmul.f32 %v1606_v31, %v7954_v41  ;;  %v1618_v43 = vmul.f32 %v1608_v12, %v7962_v45 }
 0xed3   :  { %v1644_v45 = vmul.f32 %v1562_v18, %v7964_v50 }
 0xed4   :  { %v1592_v38 = vadd.f32 %v1590_v63, %v1588_v30  ;;  %v1611_v5 = vadd.f32 %v1609_v3, %v1591_v32  ;;  %v1626_v61 = vpop.permute.xlu1 %1625 }
 0xed6   :  { %v1615_v1 = vadd.f32 %v1613_v39, %v1611_v5  ;;  %v1612_v2 = vadd.f32 %v1610_v33, %v1592_v38  ;;  %v1630_v6 = vpop.permute.xlu0 %1629 }
 0xed7   :  { %v1635_v8 = vsel %vm71_vm3, %v1630_v6, %v1624_v49  ;;  %v1637_v21 = vsel %vm72_vm4, %v1624_v49, %v1630_v6 }
 0xed8   :  { %v1619_v13 = vadd.f32 %v1617_v34, %v1615_v1  ;;  %v1616_v16 = vadd.f32 %v1614_v35, %v1612_v2  ;;  %v1639_v41 = vmul.f32 %v1635_v8, %v7956_v42  ;;  %v1632_v51 = vpop.permute.xlu1 %1631  ;;  %v1647_v10 = vmul.f32 %v1637_v21, %v13538_v4 }
 0xed9   :  { %v1636_v56 = vsel %vm71_vm3, %v1632_v51, %v1626_v61  ;;  %v1638_v25 = vsel %vm72_vm4, %v1626_v61, %v1632_v51  ;;  %vm2530_vm3 = vcmask 916480   ;;  %vm2497_vm4 = vcmask 130048  }
 0xeda   :  { %v1620_v24 = vadd.f32 %v1618_v43, %v1616_v16  ;;  %v1641_v0 = vadd.f32 %v1639_v41, %v1619_v13  ;;  %v1640_v37 = vmul.f32 %v1636_v56, %v7960_v44  ;;  %v1648_v52 = vmul.f32 %v1638_v25, %v13539_v58 }
 0xedc   :  { %v1642_v57 = vadd.f32 %v1640_v37, %v1620_v24  ;;  %v1645_v42 = vadd.f32 %v1643_v40, %v1641_v0 }
 0xede   :  { %v1646_v26 = vadd.f32 %v1644_v45, %v1642_v57  ;;  %v1649_v54 = vadd.f32 %v1647_v10, %v1645_v42 }
 0xee0   :  { %v1650_v60 = vadd.f32 %v1648_v52, %v1646_v26 }
 0xee2   :  { %v1652_v47 = vpack.c.bf16 %v1650_v60, %v1649_v54 }
 0xee4   :  { %7344 = vmatprep.subr.bf16.mxu0 %v1652_v47 }
 0xee5   :  { %7345 = vmatpush3.bf16.msra.mxu0 %v1652_v47 }
 0xee8   :  { %7347 = vmatmul.mubr.msk.bf16.vlgmr.msra.gmra.mrb[24].mxu0 %vm13330_vm2, %v8518_v28 }
 0xee9   :  { %7350 = vmatprep.mubr.msk.bf16.mxu0 %vm13330_vm2, %v8525_v11 }
 0xef0   :  { %7351 = vmatmul.mubr.msk.bf16.gmra.mrb[28].mxu0 %vm13330_vm2, %v8532_v29 }
 0xef1   :  { %2108 = vmatprep.mubr.f32.mxu0 %v13526_v7 }
 0xfbb   :  { %v8817_v44 = vpop.f32.mrb[24].mxu0 }
 0xfbc   :  { %v8819_v50 = vpop.f32.mrb[25].mxu0 }
 0xfbd   :  { %1718 = vadd.xlane.f32.xlu0 %v8819_v50  ;;  %v8822_v53 = vpop.f32.mrb[26].mxu0 }
 0xfbe   :  { %v8824_v4 = vpop.f32.mrb[27].mxu0 }
 0xfbf   :  { %1720 = vadd.xlane.f32.xlu1 %v8824_v4 }
 0xfc1   :  { %1722 = vadd.xlane.f32.xlu0 %v8817_v44 }
 0xfc3   :  { %v8828_v58 = vpop.f32.mrb[28].mxu0 }
 0xfc4   :  { %v8830_v28 = vpop.f32.mrb[29].mxu0 }
 0xfc5   :  { %1724 = vadd.xlane.f32.xlu0 %v8822_v53  ;;  %1726 = vadd.xlane.f32.xlu1 %v8830_v28  ;;  %v8834_v11 = vpop.f32.mrb[30].mxu0 }
 0xfc6   :  { %v8836_v29 = vpop.f32.mrb[31].mxu0 }
 0xfc9   :  { %1730 = vadd.xlane.f32.xlu1 %v8828_v58  ;;  %1728 = vadd.xlane.f32.xlu0 %v8836_v29 }
 0xfcd   :  { %1732 = vadd.xlane.f32.xlu0 %v8834_v11 }
0x104a   :  { %v1719_v18 = vpop.xlane.xlu0 %1718 }
0x104b   :  { %v8841_v15 = vmul.f32 0.0078125, %v1719_v18 }
0x104c   :  { %v1721_v36 = vpop.xlane.xlu1 %1720 }
0x104d   :  { %v1742_v48 = vsub.f32 %v8819_v50, %v8841_v15  ;;  %v8845_v19 = vmul.f32 0.0078125, %v1721_v36 }
0x104e   :  { %v1723_v20 = vpop.xlane.xlu0 %1722 }
0x104f   :  { %v1743_v17 = vsub.f32 %v8824_v4, %v8845_v19  ;;  %v8849_v62 = vmul.f32 0.0078125, %v1723_v20  ;;  %v1750_v31 = vmul.f32 %v1742_v48, %v1742_v48 }
0x1051   :  { %v1744_v32 = vsub.f32 %v8817_v44, %v8849_v62  ;;  %1758 = vadd.xlane.f32.xlu1 %v1750_v31  ;;  %v1751_v30 = vmul.f32 %v1743_v17, %v1743_v17 }
0x1052   :  { %v1725_v63 = vpop.xlane.xlu0 %1724  ;;  %v1727_v3 = vpop.xlane.xlu1 %1726 }
0x1053   :  { %v8853_v49 = vmul.f32 0.0078125, %v1725_v63  ;;  %v8855_v27 = vmul.f32 0.0078125, %v1727_v3  ;;  %1760 = vadd.xlane.f32.xlu0 %v1751_v30  ;;  %v1752_v38 = vmul.f32 %v1744_v32, %v1744_v32 }
0x1055   :  { %v1745_v5 = vsub.f32 %v8822_v53, %v8853_v49  ;;  %v1746_v39 = vsub.f32 %v8830_v28, %v8855_v27  ;;  %1762 = vadd.xlane.f32.xlu1 %v1752_v38 }
0x1056   :  { %v1731_v33 = vpop.xlane.xlu1 %1730  ;;  %v1729_v61 = vpop.xlane.xlu0 %1728 }
0x1057   :  { %v8861_v12 = vmul.f32 0.0078125, %v1731_v33  ;;  %v8863_v1 = vmul.f32 0.0078125, %v1729_v61  ;;  %v1754_v34 = vmul.f32 %v1746_v39, %v1746_v39  ;;  %v1753_v2 = vmul.f32 %v1745_v5, %v1745_v5 }
0x1059   :  { %v1748_v35 = vsub.f32 %v8828_v58, %v8861_v12  ;;  %v1747_v6 = vsub.f32 %v8836_v29, %v8863_v1  ;;  %1766 = vadd.xlane.f32.xlu1 %v1754_v34  ;;  %1764 = vadd.xlane.f32.xlu0 %v1753_v2 }
0x105a   :  { %v1733_v8 = vpop.xlane.xlu0 %1732 }
0x105b   :  { %v8869_v13 = vmul.f32 0.0078125, %v1733_v8  ;;  %v1756_v16 = vmul.f32 %v1748_v35, %v1748_v35  ;;  %v1755_v43 = vmul.f32 %v1747_v6, %v1747_v6  ;;  %v13552_v6 = vld [vmem:[#allocation5_spill] sm:$0xff] }
0x105d   :  { %v1749_v41 = vsub.f32 %v8834_v11, %v8869_v13  ;;  %1770 = vadd.xlane.f32.xlu1 %v1756_v16  ;;  %1768 = vadd.xlane.f32.xlu0 %v1755_v43  ;;  %v13553_v16 = vld [vmem:[#allocation7_spill] sm:$0xff] }
0x105f   :  { %v1757_v51 = vmul.f32 %v1749_v41, %v1749_v41 }
0x1061   :  { %1772 = vadd.xlane.f32.xlu0 %v1757_v51  ;;  %v13555_v51 = vld [vmem:[#allocation6_spill] sm:$0xff] }
0x10de   :  { %v1759_v56 = vpop.xlane.xlu1 %1758 }
0x10df   :  { %v1774_v40 = vmul.f32 0.0078125, %v1759_v56  ;;  %v13556_v56 = vld [vmem:[#allocation11_spill] sm:$0xff] }
0x10e0   :  { %v1761_v24 = vpop.xlane.xlu0 %1760 }
0x10e1   :  { %v1782_v0 = vadd.f32 1e-05, %v1774_v40  ;;  %v1775_v37 = vmul.f32 0.0078125, %v1761_v24 }
0x10e2   :  { %v1763_v21 = vpop.xlane.xlu1 %1762 }
0x10e3   :  { %7543 = vrsqrt.f32 %v1782_v0  ;;  %v1776_v25 = vmul.f32 0.0078125, %v1763_v21  ;;  %v1783_v45 = vadd.f32 1e-05, %v1775_v37  ;;  %v13557_v37 = vld [vmem:[#allocation9_spill] sm:$0xff] }
0x10e5   :  { %v1784_v57 = vadd.f32 1e-05, %v1776_v25 }
0x10e6   :  { %v1767_v42 = vpop.xlane.xlu1 %1766  ;;  %v1765_v10 = vpop.xlane.xlu0 %1764 }
0x10e7   :  { %7545 = vrsqrt.f32 %v1784_v57  ;;  %v1777_v52 = vmul.f32 0.0078125, %v1765_v10  ;;  %v1778_v26 = vmul.f32 0.0078125, %v1767_v42  ;;  %v13559_v42 = vld [vmem:[#allocation13_spill] sm:$0xff] }
0x10e8   :  { %7547 = vrsqrt.f32 %v1783_v45 }
0x10e9   :  { %v1785_v54 = vadd.f32 1e-05, %v1777_v52  ;;  %v1786_v36 = vadd.f32 1e-05, %v1778_v26  ;;  %v13560_v52 = vld [vmem:[#allocation10_spill] sm:$0xff] }
0x10ea   :  { %v1771_v60 = vpop.xlane.xlu1 %1770  ;;  %v1769_v47 = vpop.xlane.xlu0 %1768 }
0x10eb   :  { %v1780_v18 = vmul.f32 0.0078125, %v1771_v60  ;;  %7549 = vrsqrt.f32 %v1785_v54  ;;  %v1779_v30 = vmul.f32 0.0078125, %v1769_v47  ;;  %v13562_v60 = vld [vmem:[#allocation15_spill] sm:$0xff] }
0x10ec   :  { %7551 = vrsqrt.f32 %v1786_v36  ;;  %v13563_v36 = vmov 3  }
0x10ed   :  { %v7544_v48 = vpop.eup %7543  ;;  %v1788_v20 = vadd.f32 1e-05, %v1780_v18  ;;  %v1787_v5 = vadd.f32 1e-05, %v1779_v30 }
0x10ee   :  { %v1798_v17 = vmul.f32 %v8599_v14, %v7544_v48  ;;  %v1773_v31 = vpop.xlane.xlu0 %1772 }
0x10ef   :  { %7553 = vrsqrt.f32 %v1788_v20  ;;  %v1781_v63 = vmul.f32 0.0078125, %v1773_v31  ;;  %v8901_v20 = vld [vmem:[%s13219_s11 + $0x8] sm:$0xff]  ;;  %v1980_v31 = vld [vmem:[%s13220_s8] sm:$0xff] }
0x10f0   :  { %1824 = vperm.xlu1 %7465, %v1798_v17   ;;  %v1806_v2 = vmul.f32 %v1798_v17, %v8841_v15  ;;  %7555 = vrsqrt.f32 %v1787_v5 }
0x10f1   :  { %v7546_v32 = vpop.eup %7545  ;;  %v1789_v33 = vadd.f32 1e-05, %v1781_v63  ;;  %v1989_v63 = vld [vmem:[%s13220_s8 + $0x48] sm:$0xff] }
0x10f2   :  { %v1800_v3 = vmul.f32 %v8605_v9, %v7546_v32  ;;  %v7548_v38 = vpop.eup %7547  ;;  %v1814_v43 = vsub.f32 %v13553_v16, %v1806_v2  ;;  %v1984_v32 = vld [vmem:[%s13220_s8 + $0x20] sm:$0xff]  ;;  %v2009_v16 = vld [vmem:[%s13220_s8 + $0xe8] sm:$0xff] }
0x10f3   :  { %v1799_v61 = vmul.f32 %v8611_v23, %v7548_v38  ;;  %7557 = vrsqrt.f32 %v1789_v33  ;;  %v13554_v23 = vld [vmem:[#allocation8_spill] sm:$0xff]  ;;  %v7368_v30 = vpack.c.bf16 %v1984_v32, %v1980_v31  ;;  %v13565_v38 = vmov 0   ;;  %v1992_v33 = vld [vmem:[%s13220_s8 + $0x60] sm:$0xff] }
0x10f4   :  { %1834 = vperm.xlu0 %7466, %v1800_v3   ;;  %v1808_v34 = vmul.f32 %v1800_v3, %v8849_v62  ;;  %v1993_v3 = vld [vmem:[%s13220_s8 + $0x68] sm:$0xff] }
0x10f5   :  { %v7550_v39 = vpop.eup %7549  ;;  %v1807_v40 = vmul.f32 %v1799_v61, %v8845_v19  ;;  %v13561_v19 = vld [vmem:[#allocation14_spill] sm:$0xff]  ;;  %v7370_v5 = vpack.c.bf16 %v1993_v3, %v1989_v63 }
0x10f6   :  { %v1801_v14 = vmul.f32 %v8618_v55, %v7550_v39  ;;  %v7552_v35 = vpop.eup %7551  ;;  %v1816_v9 = vsub.f32 %v13552_v6, %v1808_v34  ;;  %v1988_v39 = vld [vmem:[%s13220_s8 + $0x40] sm:$0xff]  ;;  %v1997_v34 = vld [vmem:[%s13220_s8 + $0x88] sm:$0xff] }
0x10f7   :  { %v1802_v55 = vmul.f32 %v13555_v51, %v7552_v35  ;;  %v1815_v21 = vsub.f32 %v13557_v37, %v1807_v40  ;;  %v1996_v35 = vld [vmem:[%s13220_s8 + $0x80] sm:$0xff]  ;;  %v2013_v51 = vld [vmem:[%s13220_s8 + $0x108] sm:$0xff] }
0x10f8   :  { %1829 = vperm.xlu0 %7466, %v1799_v61   ;;  %1839 = vperm.xlu1 %7465, %v1801_v14   ;;  %v1809_v41 = vmul.f32 %v1801_v14, %v8853_v49  ;;  %v13558_v49 = vld [vmem:[#allocation12_spill] sm:$0xff]  ;;  %v7372_v61 = vpack.c.bf16 %v1992_v33, %v1988_v39  ;;  %v2001_v14 = vld [vmem:[%s13220_s8 + $0xa8] sm:$0xff]  ;;  %v2000_v6 = vld [vmem:[%s13220_s8 + $0xa0] sm:$0xff] }
0x10f9   :  { %v7554_v8 = vpop.eup %7553  ;;  %v1810_v24 = vmul.f32 %v1802_v55, %v8855_v27  ;;  %v7374_v2 = vpack.c.bf16 %v2001_v14, %v1997_v34  ;;  %v2016_v40 = vld [vmem:[%s13220_s8 + $0x120] sm:$0xff]  ;;  %v2025_v37 = vld [vmem:[%s13220_s8 + $0x168] sm:$0xff] }
0x10fa   :  { %v1804_v62 = vmul.f32 %v13554_v23, %v7554_v8  ;;  %v1817_v15 = vsub.f32 %v13556_v56, %v1809_v41  ;;  %v7556_v0 = vpop.eup %7555  ;;  %v2005_v8 = vld [vmem:[%s13220_s8 + $0xc8] sm:$0xff]  ;;  %v2004_v41 = vld [vmem:[%s13220_s8 + $0xc0] sm:$0xff] }
0x10fb   :  { %v1818_v45 = vsub.f32 %v13558_v49, %v1810_v24  ;;  %v1803_v26 = vmul.f32 %v13560_v52, %v7556_v0  ;;  %v2008_v23 = vld [vmem:[%s13220_s8 + $0xe0] sm:$0xff]  ;;  %v2021_v0 = vld [vmem:[%s13220_s8 + $0x148] sm:$0xff] }
0x10fc   :  { %1882 = vperm.xlu0 %7466, %v1816_v9   ;;  %1872 = vperm.xlu1 %7465, %v1814_v43   ;;  %v1812_v57 = vmul.f32 %v1804_v62, %v8861_v12  ;;  %v13564_v12 = vld [vmem:[#allocation3_spill] sm:$0xff]  ;;  %v7376_v9 = vpack.c.bf16 %v2000_v6, %v1996_v35  ;;  %v7378_v43 = vpack.c.bf16 %v2009_v16, %v2005_v8  ;;  %v2024_v49 = vld [vmem:[%s13220_s8 + $0x160] sm:$0xff] }
0x10fd   :  { %v7558_v25 = vpop.eup %7557  ;;  %v1811_v27 = vmul.f32 %v1803_v26, %v8863_v1  ;;  %v1981_v1 = vld [vmem:[%s13220_s8 + $0x8] sm:$0xff]  ;;  %v2028_v52 = vld [vmem:[%s13220_s8 + $0x180] sm:$0xff] }
0x10fe   :  { %v1805_v10 = vmul.f32 %v13559_v42, %v7558_v25  ;;  %v1820_v54 = vsub.f32 %v13561_v19, %v1812_v57  ;;  %v2020_v25 = vld [vmem:[%s13220_s8 + $0x140] sm:$0xff]  ;;  %v2029_v57 = vld [vmem:[%s13220_s8 + $0x188] sm:$0xff] }
0x10ff   :  { %v1819_v47 = vsub.f32 %v13562_v60, %v1811_v27  ;;  %v2033_v42 = vld [vmem:[%s13220_s8 + $0x1a8] sm:$0xff] }
0x1100   :  { %1854 = vperm.xlu0 %7466, %v1804_v62   ;;  %1887 = vperm.xlu1 %7465, %v1817_v15   ;;  %v1813_v18 = vmul.f32 %v1805_v10, %v8869_v13  ;;  %v1985_v13 = vld [vmem:[%s13220_s8 + $0x28] sm:$0xff]  ;;  %v7380_v62 = vpack.c.bf16 %v2008_v23, %v2004_v41  ;;  %v2012_v15 = vld [vmem:[%s13220_s8 + $0x100] sm:$0xff] }
0x1101   :  { %v7366_v17 = vpack.c.bf16 %v1985_v13, %v1981_v1  ;;  %v7384_v24 = vpack.c.bf16 %v2016_v40, %v2012_v15 }
0x1102   :  { %v1821_v48 = vsub.f32 %v13564_v12, %v1813_v18 }
0x1103   :  { %7367 = vmatprep.subr.bf16.mxu0 %v7366_v17 }
0x1104   :  { %1844 = vperm.xlu0 %7466, %v1802_v55   ;;  %1877 = vperm.xlu1 %7465, %v1815_v21   ;;  %v2017_v55 = vld [vmem:[%s13220_s8 + $0x128] sm:$0xff]  ;;  %v7386_v21 = vpack.c.bf16 %v2025_v37, %v2021_v0  ;;  %v1986_v37 = vld [vmem:[%s13220_s8 + $0x30] sm:$0xff] }
0x1105   :  { %7369 = vmatpush1.bf16.msra.mxu0 %v7368_v30  ;;  %v7382_v56 = vpack.c.bf16 %v2017_v55, %v2013_v51 }
0x1106   :  { %7371 = vmatprep.subr.bf16.mxu0 %v7370_v5 }
0x1108   :  { %1892 = vperm.xlu0 %7466, %v1818_v45   ;;  %1859 = vperm.xlu1 %7465, %v1805_v10   ;;  %v7388_v45 = vpack.c.bf16 %v2024_v49, %v2020_v25  ;;  %v7390_v10 = vpack.c.bf16 %v2033_v42, %v2029_v57  ;;  %v1991_v25 = vld [vmem:[%s13220_s8 + $0x58] sm:$0xff]  ;;  %v1990_v42 = vld [vmem:[%s13220_s8 + $0x50] sm:$0xff] }
0x1109   :  { %7373 = vmatpush1.bf16.msra.mxu0 %v7372_v61  ;;  %v1995_v49 = vld [vmem:[%s13220_s8 + $0x78] sm:$0xff] }
0x110a   :  { %7375 = vmatprep.subr.bf16.mxu0 %v7374_v2  ;;  %v7402_v57 = vpack.c.bf16 %v1995_v49, %v1991_v25 }
0x110c   :  { %1902 = vperm.xlu0 %7466, %v1820_v54   ;;  %1849 = vperm.xlu1 %7465, %v1803_v26   ;;  %v2032_v26 = vld [vmem:[%s13220_s8 + $0x1a0] sm:$0xff] }
0x110d   :  { %7377 = vmatpush1.bf16.msra.mxu0 %v7376_v9  ;;  %v7392_v19 = vpack.c.bf16 %v2032_v26, %v2028_v52  ;;  %v1999_v52 = vld [vmem:[%s13220_s8 + $0x98] sm:$0xff] }
0x110e   :  { %7379 = vmatprep.subr.bf16.mxu0 %v7378_v43  ;;  %v2003_v26 = vld [vmem:[%s13220_s8 + $0xb8] sm:$0xff] }
0x1110   :  { %7467 = vset.pattern.permute.xlu0 %v13563_v36  ;;  %1897 = vperm.xlu1 %7465, %v1819_v47  }
0x1111   :  { %7381 = vmatpush1.bf16.msra.mxu0 %v7380_v62 }
0x1112   :  { %7383 = vmatprep.subr.bf16.mxu0 %v7382_v56 }
0x1114   :  { %1907 = vperm.xlu1 %7465, %v1821_v48  }
0x1115   :  { %7385 = vmatpush1.bf16.msra.mxu0 %v7384_v24 }
0x1116   :  { %7387 = vmatprep.subr.bf16.mxu0 %v7386_v21 }
0x1118   :  { %2258 = vperm.xlu1 %7465, %v8901_v20  }
0x1119   :  { %7389 = vmatpush1.bf16.msra.mxu0 %v7388_v45 }
0x111a   :  { %7391 = vmatprep.subr.bf16.mxu0 %v7390_v10  ;;  %v1994_v10 = vld [vmem:[%s13220_s8 + $0x70] sm:$0xff] }
0x111c   :  { %7468 = vset.pattern.permute.xlu1 %v13563_v36 }
0x111d   :  { %2282 = vperm.xlu1 %7468, %v8901_v20   ;;  %7393 = vmatpush1.bf16.msra.mxu0 %v7392_v19  ;;  %v7404_v19 = vpack.c.bf16 %v1994_v10, %v1990_v42 }
0x1121   :  { %7469 = vset.pattern.permute.xlu1 %v13565_v38 }
0x116f   :  { %v1825_v27 = vpop.permute.xlu1 %1824 }
0x1170   :  { %v1862_v31 = vmul.f32 %v1825_v27, %v8819_v50  ;;  %v1998_v27 = vld [vmem:[%s13220_s8 + $0x90] sm:$0xff] }
0x1173   :  { %v1835_v54 = vpop.permute.xlu0 %1834 }
0x1174   :  { %v1864_v12 = vmul.f32 %v8817_v44, %v1835_v54  ;;  %v7406_v54 = vpack.c.bf16 %v2003_v26, %v1999_v52 }
0x1177   :  { %v1830_v60 = vpop.permute.xlu0 %1829  ;;  %v1840_v47 = vpop.permute.xlu1 %1839 }
0x1178   :  { %v1865_v48 = vmul.f32 %v8822_v53, %v1840_v47  ;;  %v1863_v30 = vmul.f32 %v1830_v60, %v8824_v4  ;;  %v2002_v60 = vld [vmem:[%s13220_s8 + $0xb0] sm:$0xff]  ;;  %v2007_v47 = vld [vmem:[%s13220_s8 + $0xd8] sm:$0xff] }
0x117b   :  { %v1883_v18 = vpop.permute.xlu0 %1882  ;;  %v1873_v36 = vpop.permute.xlu1 %1872 }
0x117c   :  { %v1912_v1 = vadd.f32 %v1883_v18, %v1864_v12  ;;  %v1910_v63 = vadd.f32 %v1873_v36, %v1862_v31  ;;  %v7408_v18 = vpack.c.bf16 %v2002_v60, %v1998_v27  ;;  %v2006_v12 = vld [vmem:[%s13220_s8 + $0xd0] sm:$0xff] }
0x117e   :  { %v1920_v3 = vmax.f32 %v1912_v1, 0.0  ;;  %v1918_v14 = vmax.f32 %v1910_v63, 0.0  ;;  %v2015_v1 = vld [vmem:[%s13220_s8 + $0x118] sm:$0xff] }
0x117f   :  { %v1855_v13 = vpop.permute.xlu0 %1854  ;;  %v1888_v17 = vpop.permute.xlu1 %1887  ;;  %v2023_v63 = vld [vmem:[%s13220_s8 + $0x158] sm:$0xff] }
0x1180   :  { %v1913_v32 = vadd.f32 %v1888_v17, %v1865_v48  ;;  %v1868_v43 = vmul.f32 %v8828_v58, %v1855_v13  ;;  %v2010_v48 = vld [vmem:[%s13220_s8 + $0xf0] sm:$0xff]  ;;  %v2019_v13 = vld [vmem:[%s13220_s8 + $0x138] sm:$0xff] }
0x1181   :  { %v7412_v17 = vpack.c.bf16 %v2010_v48, %v2006_v12  ;;  %v7414_v31 = vpack.c.bf16 %v2019_v13, %v2015_v1 }
0x1182   :  { %v1921_v5 = vmax.f32 %v1913_v32, 0.0  ;;  %v2014_v32 = vld [vmem:[%s13220_s8 + $0x110] sm:$0xff] }
0x1183   :  { %v1878_v39 = vpop.permute.xlu1 %1877  ;;  %v1845_v33 = vpop.permute.xlu0 %1844 }
0x1184   :  { %v1927_v61 = vpack.c.bf16 %v1921_v5, %v1920_v3  ;;  %v1911_v34 = vadd.f32 %v1878_v39, %v1863_v30  ;;  %v1866_v50 = vmul.f32 %v1845_v33, %v8830_v28  ;;  %v1983_v28 = vld [vmem:[%s13220_s8 + $0x18] sm:$0xff]  ;;  %v2018_v30 = vld [vmem:[%s13220_s8 + $0x130] sm:$0xff] }
0x1185   :  { %v2027_v3 = vld [vmem:[%s13220_s8 + $0x178] sm:$0xff]  ;;  %v7416_v5 = vpack.c.bf16 %v2018_v30, %v2014_v32  ;;  %v2022_v33 = vld [vmem:[%s13220_s8 + $0x150] sm:$0xff] }
0x1186   :  { %v1919_v2 = vmax.f32 %v1911_v34, 0.0  ;;  %v7418_v39 = vpack.c.bf16 %v2027_v3, %v2023_v63  ;;  %v2031_v34 = vld [vmem:[%s13220_s8 + $0x198] sm:$0xff] }
0x1187   :  { %v1860_v44 = vpop.permute.xlu1 %1859  ;;  %v1893_v53 = vpop.permute.xlu0 %1892 }
0x1188   :  { %v1926_v35 = vpack.c.bf16 %v1919_v2, %v1918_v14  ;;  %v1914_v9 = vadd.f32 %v1893_v53, %v1866_v50  ;;  %v1869_v23 = vmul.f32 %v8834_v11, %v1860_v44  ;;  %v1982_v11 = vld [vmem:[%s13220_s8 + $0x10] sm:$0xff]  ;;  %v2035_v14 = vld [vmem:[%s13220_s8 + $0x1b8] sm:$0xff]  ;;  %v2037_v50 = vld [vmem:[%s13220_s8 + $0x1c8] sm:$0xff] }
0x1189   :  { %v7400_v45 = vpack.c.bf16 %v1986_v37, %v1982_v11  ;;  %v7422_v44 = vpack.c.bf16 %v2035_v14, %v2031_v34  ;;  %v2034_v53 = vld [vmem:[%s13220_s8 + $0x1b0] sm:$0xff]  ;;  %v13571_v11 = vmov 5   ;;  %v13572_v37 = vmov 8  }
0x118a   :  { %7355 = vmatpush3.bf16.msra.mxu1 %v1926_v35  ;;  %v1922_v62 = vmax.f32 %v1914_v9, 0.0  ;;  %v2030_v35 = vld [vmem:[%s13220_s8 + $0x190] sm:$0xff]  ;;  %v2041_v9 = vld [vmem:[%s13220_s8 + $0x1e8] sm:$0xff] }
0x118b   :  { %v1850_v6 = vpop.permute.xlu1 %1849  ;;  %7356 = vmatprep.subr.bf16.mxu1 %v13526_v7  ;;  %v1903_v8 = vpop.permute.xlu0 %1902 }
0x118c   :  { %v1867_v4 = vmul.f32 %v1850_v6, %v8836_v29  ;;  %v1916_v51 = vadd.f32 %v1903_v8, %v1868_v43  ;;  %v1987_v29 = vld [vmem:[%s13220_s8 + $0x38] sm:$0xff]  ;;  %v7424_v6 = vpack.c.bf16 %v2034_v53, %v2030_v35  ;;  %v7394_v8 = vpack.c.bf16 %v2041_v9, %v2037_v50  ;;  %v2036_v43 = vld [vmem:[%s13220_s8 + $0x1c0] sm:$0xff] }
0x118d   :  { %v7398_v58 = vpack.c.bf16 %v1987_v29, %v1983_v28  ;;  %v13566_v28 = vmov 1   ;;  %v13567_v29 = vmov 6  }
0x118e   :  { %7357 = vmatpush3.bf16.msra.mxu1 %v1927_v61  ;;  %v1924_v24 = vmax.f32 %v1916_v51, 0.0  ;;  %v2026_v61 = vld [vmem:[%s13220_s8 + $0x170] sm:$0xff]  ;;  %7395 = vmatprep.subr.bf16.mxu0 %v7394_v8 }
0x118f   :  { %v1898_v16 = vpop.permute.xlu1 %1897  ;;  %7358 = vmatprep.subr.bf16.mxu1 %v13526_v7  ;;  %v7420_v2 = vpack.c.bf16 %v2026_v61, %v2022_v33  ;;  %v2038_v51 = vld [vmem:[%s13220_s8 + $0x1d0] sm:$0xff]  ;;  %v2326_v61 = vld [vmem:[%s13221_s12 + $0x8] sm:$0xff] }
0x1190   :  { %v1915_v41 = vadd.f32 %v1898_v16, %v1867_v4  ;;  %v2039_v4 = vld [vmem:[%s13220_s8 + $0x1d8] sm:$0xff] }
0x1191   :  { %v2043_v16 = vld [vmem:[%s13220_s8 + $0x1f8] sm:$0xff] }
0x1192   :  { %v1923_v55 = vmax.f32 %v1915_v41, 0.0  ;;  %v2040_v41 = vld [vmem:[%s13220_s8 + $0x1e0] sm:$0xff] }
0x1193   :  { %v1908_v56 = vpop.permute.xlu1 %1907 }
0x1194   :  { %v1928_v15 = vpack.c.bf16 %v1923_v55, %v1922_v62  ;;  %v1917_v40 = vadd.f32 %v1908_v56, %v1869_v23  ;;  %v7426_v23 = vpack.c.bf16 %v2043_v16, %v2039_v4  ;;  %v7396_v62 = vpack.c.bf16 %v2040_v41, %v2036_v43  ;;  %v2042_v55 = vld [vmem:[%s13220_s8 + $0x1f0] sm:$0xff] }
0x1195   :  { %v7428_v56 = vpack.c.bf16 %v2042_v55, %v2038_v51 }
0x1196   :  { %v1925_v0 = vmax.f32 %v1917_v40, 0.0  ;;  %7359 = vmatpush3.bf16.msra.mxu1 %v1928_v15  ;;  %7397 = vmatpush1.bf16.msra.mxu0 %v7396_v62  ;;  %v9116_v15 = vld [vmem:[%s13219_s11] sm:$0xff] }
0x1197   :  { %7360 = vmatprep.subr.bf16.mxu1 %v13526_v7  ;;  %v2325_v40 = vld [vmem:[%s13221_s12] sm:$0xff]  ;;  %2278 = vperm.xlu0 %7467, %v9116_v15  }
0x1198   :  { %v1929_v21 = vpack.c.bf16 %v1925_v0, %v1924_v24  ;;  %2329 = vperm.xlu1 %7469, %v2325_v40   ;;  %v13568_v24 = vmov 4   ;;  %v13569_v0 = vmov 7  }
0x119a   :  { %7361 = vmatpush3.bf16.msra.mxu1 %v1929_v21  ;;  %v7177_v21 = vld [vmem:[%s13218_s1 + $0x3] ss:$0 sm:$0xff] }
0x119b   :  { %7399 = vmatprep.subr.bf16.mxu1 %v7398_v58  ;;  %7471 = vset.pattern.permute.xlu0 %v13566_v28  ;;  %v13570_v58 = vmov 2  }
0x119c   :  { %7470 = vset.pattern.permute.xlu1 %v13567_v29  ;;  %2262 = vperm.xlu0 %7471, %v9116_v15  }
0x119d   :  { %7363 = vmatmul.mubr.msk.bf16.vlgmr.msra.gmra.mrb[12].mxu1 %vm13329_vm6, %v8715_v22  ;;  %v2011_v22 = vld [vmem:[%s13220_s8 + $0xf8] sm:$0xff]  ;;  %2302 = vperm.xlu1 %7470, %v9116_v15  }
0x119e   :  { %7401 = vmatpush1.bf16.msra.mxu1 %v7400_v45  ;;  %2185 = vmatprep.mubr.f32.mxu1 %v13526_v7  ;;  %v7410_v36 = vpack.c.bf16 %v2011_v22, %v2007_v47 }
0x119f   :  { %7403 = vmatprep.subr.bf16.mxu1 %v7402_v57 }
0x11a0   :  { %7474 = vset.pattern.permute.xlu0 %v13568_v24 }
0x11a1   :  { %2306 = vperm.xlu1 %7470, %v8901_v20   ;;  %2290 = vperm.xlu0 %7474, %v8901_v20  }
0x11a2   :  { %7405 = vmatpush1.bf16.msra.mxu1 %v7404_v19  ;;  %v13573_v19 = vlaneseq }
0x11a3   :  { %7407 = vmatprep.subr.bf16.mxu1 %v7406_v54 }
0x11a4   :  { %v9159_v54 = vshrl.u32 %v13573_v19, 7 }
0x11a5   :  { %7472 = vset.pattern.permute.xlu1 %v13566_v28  ;;  %7475 = vset.pattern.permute.xlu0 %v13569_v0 }
0x11a6   :  { %7409 = vmatpush1.bf16.msra.mxu1 %v7408_v18  ;;  %2266 = vperm.xlu1 %7472, %v8901_v20   ;;  %13574 = vst [vmem:[#allocation4_spill] sm:$0xff] %v9159_v54  ;;  %vm60_vm7 = vcmp.lt.s32.totalorder %v9159_v54, 2  ;;  %v2199_v18 = vld [vmem:[%s13222_s9 + $0x8] sm:$0xff]  ;;  %v13616_v54 = vmov 0 }
0x11a7   :  { %7411 = vmatprep.subr.bf16.mxu1 %v7410_v36  ;;  %2310 = vperm.xlu0 %7475, %v9116_v15   ;;  %v2201_v36 = vld [vmem:[%s13222_s9 + $0x18] sm:$0xff] }
0x11aa   :  { %7413 = vmatpush1.bf16.msra.mxu1 %v7412_v17  ;;  %7473 = vset.pattern.permute.xlu1 %v13568_v24 }
0x11ab   :  { %7415 = vmatprep.subr.bf16.mxu1 %v7414_v31  ;;  %7478 = vset.pattern.permute.xlu0 %v13570_v58 }
0x11ac   :  { %2286 = vperm.xlu1 %7473, %v9116_v15   ;;  %2274 = vperm.xlu0 %7478, %v8901_v20  }
0x11ae   :  { %7417 = vmatpush1.bf16.msra.mxu1 %v7416_v5 }
0x11af   :  { %7419 = vmatprep.subr.bf16.mxu1 %v7418_v39  ;;  %v9258_v39 = vpop.permute.xlu1 %2258 }
0x11b0   :  { %7476 = vset.pattern.permute.xlu1 %v13569_v0  ;;  %7479 = vset.pattern.permute.xlu0 %v13571_v11  ;;  %13583 = vst [vmem:[#allocation10_spill] sm:$0xff] %v9258_v39 }
0x11b1   :  { %2314 = vperm.xlu1 %7476, %v8901_v20   ;;  %2294 = vperm.xlu0 %7479, %v9116_v15  }
0x11b2   :  { %7421 = vmatpush1.bf16.msra.mxu1 %v7420_v2 }
0x11b3   :  { %7423 = vmatprep.subr.bf16.mxu1 %v7422_v44  ;;  %v9263_v33 = vpop.permute.xlu1 %2282 }
0x11b4   :  { %13584 = vst [vmem:[#allocation14_spill] sm:$0xff] %v9263_v33 }
0x11b5   :  { %7477 = vset.pattern.permute.xlu1 %v13570_v58  ;;  %7482 = vset.pattern.permute.xlu0 %v13572_v37 }
0x11b6   :  { %7425 = vmatpush1.bf16.msra.mxu1 %v7424_v6  ;;  %2270 = vperm.xlu1 %7477, %v9116_v15  }
0x11b7   :  { %7427 = vmatprep.subr.bf16.mxu1 %v7426_v23 }
0x11ba   :  { %7429 = vmatpush1.bf16.msra.mxu1 %v7428_v56  ;;  %7480 = vset.pattern.permute.xlu1 %v13571_v11  ;;  %v13600_v56 = vld [vmem:[#allocation2_spill] sm:$0xff]  ;;  %v13601_v11 = vmov 0 }
0x11bb   :  { %2298 = vperm.xlu1 %7480, %v8901_v20   ;;  %v9319_v24 = vadd.s32 256, %v13600_v56 }
0x11bf   :  { %7481 = vset.pattern.permute.xlu1 %v13572_v37  ;;  %v2223_v37 = vand.u32 15, %v9319_v24 }
0x11c0   :  { %2318 = vperm.xlu1 %7481, %v9116_v15  }
0x11c1   :  { %vm9340_vm11 = vcmp.eq.s32.totalorder %v2223_v37, 0  ;;  %vm9435_vm1 = vcmp.eq.s32.totalorder %v2223_v37, 15 }
0x11c4   :  { %7484 = vset.pattern.permute.xlu1 %v13565_v38 }
0x1216   :  { %v9286_v2 = vpop.permute.xlu0 %2278 }
0x1217   :  { %13588 = vst [vmem:[#allocation17_spill] sm:$0xff] %v9286_v2 }
0x121b   :  { %v9290_v35 = vpop.permute.xlu0 %2262 }
0x121c   :  { %13590 = vst [vmem:[#allocation19_spill] sm:$0xff] %v9290_v35 }
0x1220   :  { %v9296_v50 = vpop.permute.xlu0 %2290 }
0x1221   :  { %13593 = vst [vmem:[#allocation22_spill] sm:$0xff] %v9296_v50 }
0x1226   :  { %v9300_v4 = vpop.permute.xlu0 %2310 }
0x1227   :  { %13595 = vst [vmem:[#allocation24_spill] sm:$0xff] %v9300_v4 }
0x122b   :  { %v9304_v16 = vpop.permute.xlu0 %2274 }
0x122c   :  { %13597 = vst [vmem:[#allocation26_spill] sm:$0xff] %v9304_v16  ;;  %v13619_v16 = vmov 0 }
0x1230   :  { %v9308_v41 = vpop.permute.xlu0 %2294 }
0x1231   :  { %13599 = vst [vmem:[#allocation28_spill] sm:$0xff] %v9308_v41 }
0x1270   :  { %v1964_v25 = vpop.f32.mrb[12].mxu1 }
0x1271   :  { %v1976_v49 = vmul.f32 %v7177_v21, %v1964_v25  ;;  %v7364_v45 = vpop.f32.mrb[13].mxu1 }
0x1272   :  { %v1967_v57 = vpop.f32.mrb[14].mxu1 }
0x1273   :  { %v1978_v42 = vadd.f32 %v1976_v49, %v8725_v59  ;;  %v1977_v10 = vmul.f32 %v7177_v21, %v1967_v57  ;;  %v7365_v52 = vpop.f32.mrb[15].mxu1  ;;  %v2198_v59 = vld [vmem:[%s13222_s9] sm:$0xff]  ;;  %v9327_v21 = vadd.s32 384, %v13600_v56 }
0x1274   :  { %v13604_v52 = vmov 0 }
0x1275   :  { %2109 = vmatmul.mubr.f32.vlgmr.msra.gmra.mrb[32].mxu0 %v1978_v42  ;;  %2186 = vmatmul.mubr.f32.vlgmr.msra.gmra.mrb[16].mxu1 %v1978_v42  ;;  %v1979_v26 = vadd.f32 %v1977_v10, %v8728_v46  ;;  %v2200_v46 = vld [vmem:[%s13222_s9 + $0x10] sm:$0xff]  ;;  %s7723_s9 = smov 112   ;;  %v13605_v52 = vsel %vm9340_vm11, 4294967295, %v13604_v52  ;;  %v2224_v19 = vand.u32 15, %v9327_v21 }
0x1276   :  { %2114 = vmatprep.mubr.f32.mxu0 %v13526_v7  ;;  %2191 = vmatprep.mubr.f32.mxu1 %v13526_v7  ;;  %13606 = vst [vmem:[#allocation29_spill] sm:$0xff] %v13605_v52 }
0x1277   :  { %vm9361_vm13 = vcmp.eq.s32.totalorder %v2224_v19, 0  ;;  %vm9413_vm0 = vcmp.eq.s32.totalorder %v2224_v19, 15 }
0x1278   :  { %v13620_v16 = vsel %vm9413_vm0, 4294967295, %v13619_v16 }
0x1279   :  { %2115 = vmatmul.mubr.f32.gmra.mrb[34].mxu0 %v1979_v26  ;;  %2192 = vmatmul.mubr.f32.gmra.mrb[18].mxu1 %v1979_v26  ;;  %v2221_v26 = vand.u32 15, %v13600_v56  ;;  %13621 = vst [vmem:[#allocation34_spill] sm:$0xff] %v13620_v16 }
0x127a   :  { %2973 = vmatprep.mubr.bf16.mxu0 %v13565_v38  ;;  %3046 = vmatprep.mubr.bf16.mxu1 %v13565_v38 }
0x127b   :  { %vm9357_vm12 = vcmp.eq.s32.totalorder %v2221_v26, 0  ;;  %vm9399_vm15 = vcmp.eq.s32.totalorder %v2221_v26, 15 }
0x127c   :  { %v13617_v54 = vsel %vm9399_vm15, 4294967295, %v13616_v54 }
0x127d   :  { %13618 = vst [vmem:[#allocation33_spill] sm:$0xff] %v13617_v54  ;;  %v2225_v54 = vshra.s32 %v13600_v56, 4 }
0x1348   :  { %v2110_v27 = vpop.f32.mrb[32].mxu0  ;;  %v2187_v60 = vpop.f32.mrb[16].mxu1 }
0x1349   :  { %v9167_v7 = vsel %vm60_vm7, %v2198_v59, %v2110_v27  ;;  %v2112_v47 = vpop.f32.mrb[33].mxu0  ;;  %v2189_v22 = vpop.f32.mrb[17].mxu1  ;;  %v9188_v1 = vsel %vm60_vm7, %v2200_v46, %v2187_v60 }
0x134a   :  { %13575 = vst [vmem:[#allocation5_spill] sm:$0xff] %v9167_v7  ;;  %2635 = vrot.lane.b32.xlu1 %v9167_v7, %s7722_s23  ;;  %2371 = vrot.lane.b32.xlu0 %v9167_v7, %s7709_s28  ;;  %13578 = vst [vmem:[#allocation6_spill] sm:$0xff] %v9188_v1  ;;  %v9192_v13 = vsel %vm60_vm7, %v2199_v18, %v2112_v47  ;;  %v9196_v17 = vsel %vm60_vm7, %v2201_v36, %v2189_v22  ;;  %v13607_v47 = vmov 0  ;;  %v13610_v22 = vmov 0 }
0x134b   :  { %13579 = vst [vmem:[#allocation11_spill] sm:$0xff] %v9192_v13  ;;  %13580 = vst [vmem:[#allocation9_spill] sm:$0xff] %v9196_v17  ;;  %v13608_v47 = vsel %vm9357_vm12, 4294967295, %v13607_v47  ;;  %v13611_v22 = vsel %vm9361_vm13, 4294967295, %v13610_v22 }
0x134c   :  { %v9182_v12 = vpop.f32.mrb[34].mxu0  ;;  %v9184_v48 = vpop.f32.mrb[18].mxu1  ;;  %13609 = vst [vmem:[#allocation30_spill] sm:$0xff] %v13608_v47  ;;  %13612 = vst [vmem:[#allocation31_spill] sm:$0xff] %v13611_v22 }
0x134d   :  { %13576 = vst [vmem:[#allocation7_spill] sm:$0xff] %v9182_v12  ;;  %13577 = vst [vmem:[#allocation8_spill] sm:$0xff] %v9184_v48  ;;  %v9198_v31 = vpop.f32.mrb[35].mxu0  ;;  %v9200_v32 = vpop.f32.mrb[19].mxu1  ;;  %v2901_v3 = vpack.c.bf16 %v9182_v12, %v9167_v7  ;;  %v2903_v5 = vpack.c.bf16 %v9184_v48, %v9188_v1 }
0x134e   :  { %13581 = vst [vmem:[#allocation12_spill] sm:$0xff] %v9198_v31  ;;  %13582 = vst [vmem:[#allocation13_spill] sm:$0xff] %v9200_v32  ;;  %2639 = vrot.lane.b32.xlu1 %v9188_v1, %s7722_s23  ;;  %2375 = vrot.lane.b32.xlu0 %v9188_v1, %s7709_s28  ;;  %v2902_v30 = vpack.c.bf16 %v9198_v31, %v9192_v13  ;;  %v2904_v63 = vpack.c.bf16 %v9200_v32, %v9196_v17 }
0x1350   :  { %2941 = vmatprep.subr.bf16.mxu0 %v2902_v30  ;;  %3014 = vmatprep.subr.bf16.mxu1 %v2904_v63 }
0x1351   :  { %2942 = vmatpush1.bf16.msra.mxu0 %v2901_v3  ;;  %3015 = vmatpush1.bf16.msra.mxu1 %v2903_v5 }
0x1352   :  { %2373 = vrot.lane.b32.xlu1 %v9192_v13, %s7709_s28  ;;  %2411 = vrot.lane.b32.xlu0 %v9167_v7, %s7708_s27 }
0x1356   :  { %2415 = vrot.lane.b32.xlu0 %v9188_v1, %s7708_s27  ;;  %2377 = vrot.lane.b32.xlu1 %v9196_v17, %s7709_s28 }
0x135a   :  { %2667 = vrot.lane.b32.xlu0 %v9188_v1, %s7723_s9  ;;  %2413 = vrot.lane.b32.xlu1 %v9192_v13, %s7708_s27 }
0x135e   :  { %2663 = vrot.lane.b32.xlu0 %v9167_v7, %s7723_s9  ;;  %2665 = vrot.lane.b32.xlu1 %v9192_v13, %s7723_s9 }
0x1362   :  { %2405 = vrot.lane.b32.xlu0 %v9196_v17, %s7708_s27  ;;  %2629 = vrot.lane.b32.xlu1 %v9196_v17, %s7722_s23 }
0x1366   :  { %2637 = vrot.lane.b32.xlu0 %v9192_v13, %s7722_s23  ;;  %2669 = vrot.lane.b32.xlu1 %v9196_v17, %s7723_s9 }
0x136a   :  { %2379 = vrot.lane.b32.xlu0 %v9182_v12, %s7709_s28  ;;  %2417 = vrot.lane.b32.xlu1 %v9182_v12, %s7708_s27 }
0x136e   :  { %2421 = vrot.lane.b32.xlu1 %v9184_v48, %s7708_s27  ;;  %2383 = vrot.lane.b32.xlu0 %v9184_v48, %s7709_s28 }
0x1372   :  { %2641 = vrot.lane.b32.xlu1 %v9182_v12, %s7722_s23  ;;  %2675 = vrot.lane.b32.xlu0 %v9184_v48, %s7723_s9 }
0x1376   :  { %2671 = vrot.lane.b32.xlu1 %v9182_v12, %s7723_s9  ;;  %2645 = vrot.lane.b32.xlu0 %v9184_v48, %s7722_s23 }
0x137a   :  { %2381 = vrot.lane.b32.xlu1 %v9198_v31, %s7709_s28  ;;  %2419 = vrot.lane.b32.xlu0 %v9198_v31, %s7708_s27 }
0x137e   :  { %2322 = vperm.xlu0 %7482, %v8901_v20   ;;  %2385 = vrot.lane.b32.xlu1 %v9200_v32, %s7709_s28  ;;  %v9274_v20 = vpop.permute.xlu1 %2329 }
0x137f   :  { %13585 = vst [vmem:[#allocation15_spill] sm:$0xff] %v9274_v20 }
0x1382   :  { %7483 = vset.pattern.permute.xlu0 %v13565_v38  ;;  %2407 = vrot.lane.b32.xlu1 %v9200_v32, %s7708_s27  ;;  %v9280_v34 = vpop.permute.xlu1 %2302 }
0x1383   :  { %2253 = vperm.xlu0 %7483, %v9116_v15   ;;  %13586 = vst [vmem:[#allocation3_spill] sm:$0xff] %v9280_v34  ;;  %v9315_v15 = vadd.s32 128, %v13600_v56 }
0x1385   :  { %v2222_v29 = vand.u32 15, %v9315_v15  ;;  %v2226_v16 = vshra.s32 %v9315_v15, 4 }
0x1386   :  { %2673 = vrot.lane.b32.xlu1 %v9198_v31, %s7723_s9  ;;  %v9284_v14 = vpop.permute.xlu1 %2306 }
0x1387   :  { %2334 = vperm.xlu0 %7483, %v2326_v61   ;;  %13587 = vst [vmem:[#allocation16_spill] sm:$0xff] %v9284_v14  ;;  %vm9321_vm10 = vcmp.eq.s32.totalorder %v2222_v29, 0  ;;  %vm9393_vm14 = vcmp.eq.s32.totalorder %v2222_v29, 15 }
0x1388   :  { %v13602_v11 = vsel %vm9321_vm10, 4294967295, %v13601_v11 }
0x1389   :  { %13603 = vst [vmem:[#allocation2_spill] sm:$0xff] %v13602_v11 }
0x138a   :  { %2631 = vrot.lane.b32.xlu1 %v9200_v32, %s7722_s23  ;;  %v9288_v44 = vpop.permute.xlu1 %2266 }
0x138b   :  { %2643 = vrot.lane.b32.xlu0 %v9198_v31, %s7722_s23  ;;  %13589 = vst [vmem:[#allocation18_spill] sm:$0xff] %v9288_v44 }
0x138e   :  { %v9292_v53 = vpop.permute.xlu1 %2286 }
0x138f   :  { %2677 = vrot.lane.b32.xlu0 %v9200_v32, %s7723_s9  ;;  %13591 = vst [vmem:[#allocation20_spill] sm:$0xff] %v9292_v53 }
0x1392   :  { %v9294_v6 = vpop.permute.xlu1 %2314 }
0x1393   :  { %13592 = vst [vmem:[#allocation21_spill] sm:$0xff] %v9294_v6 }
0x1396   :  { %v9298_v9 = vpop.permute.xlu1 %2270 }
0x1397   :  { %13594 = vst [vmem:[#allocation23_spill] sm:$0xff] %v9298_v9 }
0x139a   :  { %v9302_v8 = vpop.permute.xlu1 %2298 }
0x139b   :  { %13596 = vst [vmem:[#allocation25_spill] sm:$0xff] %v9302_v8 }
0x139e   :  { %v9306_v43 = vpop.permute.xlu1 %2318 }
0x139f   :  { %13598 = vst [vmem:[#allocation27_spill] sm:$0xff] %v9306_v43 }
0x13bc   :  { %v9310_v23 = vpop.permute.xlu1 %2635  ;;  %v2372_v62 = vpop.permute.xlu0 %2371 }
0x13c0   :  { %v9312_v51 = vpop.permute.xlu1 %2639  ;;  %v2376_v55 = vpop.permute.xlu0 %2375 }
0x13c4   :  { %v2374_v40 = vpop.permute.xlu1 %2373  ;;  %v2412_v28 = vpop.permute.xlu0 %2411 }
0x13c5   :  { %v2388_v45 = vsel %vm13311_vm8, %v2374_v40, %v2376_v55  ;;  %v2387_v30 = vsel %vm13311_vm8, %v2372_v62, %v2374_v40 }
0x13c8   :  { %v2416_v0 = vpop.permute.xlu0 %2415  ;;  %v2378_v58 = vpop.permute.xlu1 %2377 }
0x13c9   :  { %v2389_v60 = vsel %vm13311_vm8, %v2376_v55, %v2378_v58  ;;  %v2403_v63 = vsel %vm13311_vm8, %v2378_v58, %v2372_v62  ;;  %v13613_v58 = vmov 0 }
0x13ca   :  { %v13614_v58 = vsel %vm9393_vm14, 4294967295, %v13613_v58 }
0x13cb   :  { %13615 = vst [vmem:[#allocation32_spill] sm:$0xff] %v13614_v58  ;;  %v9547_v58 = vand.u32 15, %v2225_v54 }
0x13cc   :  { %v9329_v25 = vpop.permute.xlu0 %2667  ;;  %v2414_v49 = vpop.permute.xlu1 %2413 }
0x13cd   :  { %v2423_v57 = vsel %vm13310_vm9, %v2412_v28, %v2414_v49  ;;  %v2424_v10 = vsel %vm13310_vm9, %v2414_v49, %v2416_v0  ;;  %13645 = vst [vmem:[#allocation56_spill] sm:$0xff] %v9547_v58  ;;  %vm13332_vm7 = vcmp.eq.s32.totalorder %v9547_v58, 0 }
0x13ce   :  { %v9335_v42 = vsel %vm9321_vm10, %v2388_v45, %v2423_v57  ;;  %v9353_v46 = vsel %vm9340_vm11, %v2389_v60, %v2424_v10  ;;  %v9405_v38 = vsel %vm9393_vm14, %v2423_v57, %v2388_v45 }
0x13cf   :  { %2487 = vrot.lane.b32.xlu1 %v9335_v42, %s7722_s23 }
0x13d0   :  { %v9346_v59 = vpop.permute.xlu0 %2663  ;;  %v9348_v27 = vpop.permute.xlu1 %2665 }
0x13d3   :  { %2518 = vrot.lane.b32.xlu1 %v9353_v46, %s7723_s9 }
0x13d4   :  { %v2406_v18 = vpop.permute.xlu0 %2405  ;;  %v9365_v36 = vpop.permute.xlu1 %2629 }
0x13d5   :  { %v2425_v3 = vsel %vm13310_vm9, %v2416_v0, %v2406_v18  ;;  %v2437_v5 = vsel %vm13310_vm9, %v2406_v18, %v2412_v28 }
0x13d6   :  { %v9373_v61 = vsel %vm9357_vm12, %v2387_v30, %v2437_v5  ;;  %v9377_v55 = vsel %vm9361_vm13, %v2403_v63, %v2425_v3  ;;  %v9411_v29 = vsel %vm9399_vm15, %v2437_v5, %v2387_v30  ;;  %v9425_v45 = vsel %vm9413_vm0, %v2425_v3, %v2403_v63 }
0x13d7   :  { %2485 = vrot.lane.b32.xlu0 %v9373_v61, %s7722_s23  ;;  %2473 = vrot.lane.b32.xlu1 %v9377_v55, %s7722_s23  ;;  %v13626_v30 = vmov 0  ;;  %v9443_v63 = vsel %vm9435_vm1, %v2424_v10, %v2389_v60 }
0x13d8   :  { %v9383_v40 = vpop.permute.xlu0 %2637  ;;  %v9385_v62 = vpop.permute.xlu1 %2669  ;;  %v13627_v30 = vsel %vm9435_vm1, 4294967295, %v13626_v30 }
0x13d9   :  { %13628 = vst [vmem:[#allocation39_spill] sm:$0xff] %v13627_v30  ;;  %v9543_v30 = vand.u32 15, %v2226_v16 }
0x13db   :  { %2516 = vrot.lane.b32.xlu0 %v9335_v42, %s7723_s9  ;;  %2514 = vrot.lane.b32.xlu1 %v9373_v61, %s7723_s9  ;;  %13644 = vst [vmem:[#allocation55_spill] sm:$0xff] %v9543_v30  ;;  %vm13357_vm5 = vcmp.eq.s32.totalorder %v9543_v30, 0 }
0x13dc   :  { %v2380_v28 = vpop.permute.xlu0 %2379  ;;  %v2418_v0 = vpop.permute.xlu1 %2417 }
0x13df   :  { %2520 = vrot.lane.b32.xlu0 %v9377_v55, %s7723_s9  ;;  %2489 = vrot.lane.b32.xlu1 %v9353_v46, %s7722_s23 }
0x13e0   :  { %v2422_v49 = vpop.permute.xlu1 %2421  ;;  %v2384_v18 = vpop.permute.xlu0 %2383 }
0x13e3   :  { %2805 = vrot.lane.b32.xlu0 %v9405_v38, %s7723_s9  ;;  %2775 = vrot.lane.b32.xlu1 %v9411_v29, %s7722_s23 }
0x13e4   :  { %v9419_v26 = vpop.permute.xlu1 %2641  ;;  %v9421_v43 = vpop.permute.xlu0 %2675 }
0x13e5   :  { %13622 = vst [vmem:[#allocation35_spill] sm:$0xff] %v9419_v26  ;;  %13623 = vst [vmem:[#allocation36_spill] sm:$0xff] %v9421_v43 }
0x13e7   :  { %2763 = vrot.lane.b32.xlu0 %v9425_v45, %s7722_s23  ;;  %2777 = vrot.lane.b32.xlu1 %v9405_v38, %s7722_s23 }
0x13e8   :  { %v9431_v57 = vpop.permute.xlu1 %2671  ;;  %v9433_v19 = vpop.permute.xlu0 %2645 }
0x13e9   :  { %13624 = vst [vmem:[#allocation37_spill] sm:$0xff] %v9431_v57  ;;  %13625 = vst [vmem:[#allocation38_spill] sm:$0xff] %v9433_v19 }
0x13eb   :  { %2803 = vrot.lane.b32.xlu0 %v9411_v29, %s7723_s9  ;;  %2807 = vrot.lane.b32.xlu1 %v9443_v63, %s7723_s9 }
0x13ec   :  { %v2382_v3 = vpop.permute.xlu1 %2381  ;;  %v2420_v5 = vpop.permute.xlu0 %2419 }
0x13ed   :  { %v2391_v6 = vsel %vm13311_vm8, %v2382_v3, %v2384_v18  ;;  %v2426_v14 = vsel %vm13310_vm9, %v2418_v0, %v2420_v5  ;;  %v2427_v10 = vsel %vm13310_vm9, %v2420_v5, %v2422_v49  ;;  %v2390_v11 = vsel %vm13311_vm8, %v2380_v28, %v2382_v3 }
0x13ee   :  { %v9451_v37 = vsel %vm9321_vm10, %v2391_v6, %v2426_v14  ;;  %v9485_v3 = vsel %vm9393_vm14, %v2426_v14, %v2391_v6 }
0x13ef   :  { %13629 = vst [vmem:[#allocation40_spill] sm:$0xff] %v9451_v37  ;;  %2493 = vrot.lane.b32.xlu1 %v9451_v37, %s7722_s23  ;;  %13633 = vst [vmem:[#allocation44_spill] sm:$0xff] %v9485_v3 }
0x13f0   :  { %v2386_v44 = vpop.permute.xlu1 %2385 }
0x13f1   :  { %v2392_v60 = vsel %vm13311_vm8, %v2384_v18, %v2386_v44  ;;  %v2404_v5 = vsel %vm13311_vm8, %v2386_v44, %v2380_v28  ;;  %vm2246_vm8 = vcmp.eq.s32.totalorder %v9543_v30, 15 }
0x13f2   :  { %v9459_v39 = vsel %vm9340_vm11, %v2392_v60, %v2427_v10  ;;  %v9493_v44 = vsel %vm9435_vm1, %v2427_v10, %v2392_v60 }
0x13f3   :  { %13630 = vst [vmem:[#allocation41_spill] sm:$0xff] %v9459_v39  ;;  %2526 = vrot.lane.b32.xlu1 %v9459_v39, %s7723_s9  ;;  %13634 = vst [vmem:[#allocation45_spill] sm:$0xff] %v9493_v44 }
0x13f4   :  { %v2408_v19 = vpop.permute.xlu1 %2407 }
0x13f5   :  { %v2438_v43 = vsel %vm13310_vm9, %v2408_v19, %v2418_v0  ;;  %v2428_v18 = vsel %vm13310_vm9, %v2422_v49, %v2408_v19  ;;  %vm13331_vm9 = vcmp.eq.s32.totalorder %v9547_v58, 15 }
0x13f6   :  { %v9467_v57 = vsel %vm9357_vm12, %v2390_v11, %v2438_v43  ;;  %v9479_v0 = vsel %vm9361_vm13, %v2404_v5, %v2428_v18  ;;  %v9501_v14 = vsel %vm9413_vm0, %v2428_v18, %v2404_v5  ;;  %v9509_v6 = vsel %vm9399_vm15, %v2438_v43, %v2390_v11 }
0x13f7   :  { %13631 = vst [vmem:[#allocation42_spill] sm:$0xff] %v9467_v57  ;;  %2491 = vrot.lane.b32.xlu0 %v9467_v57, %s7722_s23  ;;  %2495 = vrot.lane.b32.xlu1 %v9459_v39, %s7722_s23  ;;  %13632 = vst [vmem:[#allocation43_spill] sm:$0xff] %v9479_v0 }
0x13f8   :  { %13635 = vst [vmem:[#allocation46_spill] sm:$0xff] %v9501_v14  ;;  %13636 = vst [vmem:[#allocation47_spill] sm:$0xff] %v9509_v6  ;;  %v9527_v28 = vpop.permute.xlu1 %2673 }
0x13f9   :  { %13639 = vst [vmem:[#allocation50_spill] sm:$0xff] %v9527_v28 }
0x13fb   :  { %2524 = vrot.lane.b32.xlu0 %v9451_v37, %s7723_s9  ;;  %2528 = vrot.lane.b32.xlu1 %v9479_v0, %s7723_s9 }
0x13fc   :  { %v9531_v19 = vpop.permute.xlu1 %2631 }
0x13fd   :  { %v9523_v43 = vpop.permute.xlu0 %2322  ;;  %13641 = vst [vmem:[#allocation52_spill] sm:$0xff] %v9531_v19 }
0x13fe   :  { %13637 = vst [vmem:[#allocation48_spill] sm:$0xff] %v9523_v43 }
0x13ff   :  { %2475 = vrot.lane.b32.xlu0 %v9479_v0, %s7722_s23  ;;  %2783 = vrot.lane.b32.xlu1 %v9485_v3, %s7722_s23  ;;  %v2227_v0 = vshra.s32 %v9319_v24, 4 }
0x1401   :  { %v9601_v37 = vand.u32 15, %v2227_v0 }
0x1402   :  { %v9525_v11 = vpop.permute.xlu0 %2253 }
0x1403   :  { %2522 = vrot.lane.b32.xlu0 %v9467_v57, %s7723_s9  ;;  %2815 = vrot.lane.b32.xlu1 %v9493_v44, %s7723_s9  ;;  %13638 = vst [vmem:[#allocation49_spill] sm:$0xff] %v9525_v11  ;;  %13646 = vst [vmem:[#allocation57_spill] sm:$0xff] %v9601_v37  ;;  %vm13366_vm6 = vcmp.eq.s32.totalorder %v9601_v37, 0  ;;  %vm13367_vm2 = vcmp.eq.s32.totalorder %v9601_v37, 15 }
0x1406   :  { %v9529_v49 = vpop.permute.xlu0 %2334 }
0x1407   :  { %2779 = vrot.lane.b32.xlu0 %v9443_v63, %s7722_s23  ;;  %2765 = vrot.lane.b32.xlu1 %v9501_v14, %s7722_s23  ;;  %13640 = vst [vmem:[#allocation51_spill] sm:$0xff] %v9529_v49 }
0x140a   :  { %v9533_v10 = vpop.permute.xlu0 %2643 }
0x140b   :  { %2781 = vrot.lane.b32.xlu0 %v9509_v6, %s7722_s23  ;;  %2811 = vrot.lane.b32.xlu1 %v9509_v6, %s7723_s9  ;;  %13642 = vst [vmem:[#allocation53_spill] sm:$0xff] %v9533_v10 }
0x140e   :  { %v9537_v18 = vpop.permute.xlu0 %2677 }
0x140f   :  { %2813 = vrot.lane.b32.xlu0 %v9485_v3, %s7723_s9  ;;  %2785 = vrot.lane.b32.xlu1 %v9493_v44, %s7722_s23  ;;  %13643 = vst [vmem:[#allocation54_spill] sm:$0xff] %v9537_v18  ;;  %v2661_v18 = vsel %vm2497_vm4, %v9365_v36, %v9310_v23 }
0x1413   :  { %2809 = vrot.lane.b32.xlu0 %v9425_v45, %s7723_s9  ;;  %2817 = vrot.lane.b32.xlu1 %v9501_v14, %s7723_s9 }
0x1441   :  { %v9535_v60 = vpop.permute.xlu1 %2487 }
0x1445   :  { %v9539_v5 = vpop.permute.xlu1 %2518 }
0x1449   :  { %v2486_v22 = vpop.permute.xlu0 %2485  ;;  %v9545_v47 = vpop.permute.xlu1 %2473 }
0x144a   :  { %v2498_v14 = vsel %vm2497_vm4, %v2486_v22, %v9535_v60  ;;  %v2512_v16 = vsel %vm2497_vm4, %v9545_v47, %v2486_v22  ;;  %v2647_v22 = vsel %vm2497_vm4, %v9310_v23, %v9383_v40  ;;  %v2679_v23 = vsel %vm2530_vm3, %v9346_v59, %v9348_v27 }
0x144b   :  { %v2697_v24 = vsel %vm13332_vm7, %v2679_v23, %v2661_v18 }
0x144d   :  { %v2517_v52 = vpop.permute.xlu0 %2516  ;;  %v9554_v43 = vpop.permute.xlu1 %2514 }
0x144e   :  { %v2532_v15 = vsel %vm2530_vm3, %v2517_v52, %v9539_v5  ;;  %v2531_v56 = vsel %vm2530_vm3, %v9554_v43, %v2517_v52 }
0x144f   :  { %v2558_v54 = vsel %vm13357_vm5, %v2532_v15, %v2498_v14  ;;  %v2557_v49 = vsel %vm13332_vm7, %v2531_v56, %v2512_v16  ;;  %v2574_v52 = vsel %vm2246_vm8, %v2498_v14, %v2532_v15  ;;  %v2573_v26 = vsel %vm13331_vm9, %v2512_v16, %v2531_v56 }
0x1450   :  { %v2582_v6 = vmul.f32 %v2558_v54, %v9525_v11  ;;  %v2581_v19 = vmul.f32 %v2557_v49, %v9525_v11  ;;  %v2598_v54 = vmul.f32 %v9335_v42, %v9286_v2  ;;  %v2680_v14 = vsel %vm2530_vm3, %v9348_v27, %v9329_v25 }
0x1451   :  { %v2521_v28 = vpop.permute.xlu0 %2520  ;;  %v2490_v10 = vpop.permute.xlu1 %2489  ;;  %v2597_v49 = vmul.f32 %v9373_v61, %v9286_v2  ;;  %v2614_v16 = vmul.f32 %v2574_v52, %v9280_v34  ;;  %v2228_v56 = vshra.s32 %v9327_v21, 4  ;;  %v2613_v3 = vmul.f32 %v2573_v26, %v9280_v34 }
0x1452   :  { %v2590_v57 = vadd.f32 %v2582_v6, %v9274_v20  ;;  %v2589_v42 = vadd.f32 %v2581_v19, %v9274_v20  ;;  %v2698_v6 = vsel %vm13357_vm5, %v2680_v14, %v2647_v22  ;;  %v2713_v61 = vmul.f32 %v2697_v24, %v9290_v35 }
0x1453   :  { %v2714_v19 = vmul.f32 %v2698_v6, %v9290_v35  ;;  %v9603_v33 = vand.u32 15, %v2228_v56  ;;  %v2705_v21 = vsel %vm13331_vm9, %v2661_v18, %v2679_v23  ;;  %v2706_v0 = vsel %vm2246_vm8, %v2647_v22, %v2680_v14 }
0x1454   :  { %v2606_v15 = vadd.f32 %v2598_v54, %v2590_v57  ;;  %v2605_v44 = vadd.f32 %v2597_v49, %v2589_v42  ;;  %v2729_v49 = vmul.f32 %v9292_v53, %v9167_v7  ;;  %v2730_v42 = vmul.f32 %v9292_v53, %v9192_v13  ;;  %v13669_v13 = vld [vmem:[#allocation36_spill] sm:$0xff] }
0x1455   :  { %v2806_v27 = vpop.permute.xlu0 %2805  ;;  %v2776_v39 = vpop.permute.xlu1 %2775  ;;  %13647 = vst [vmem:[#allocation58_spill] sm:$0xff] %v9603_v33  ;;  %vm13368_vm9 = vcmp.eq.s32.totalorder %v9603_v33, 0  ;;  %v2746_v23 = vmul.f32 %v2706_v0, %v9300_v4  ;;  %v2533_v14 = vsel %vm2530_vm3, %v9539_v5, %v2521_v28 }
0x1456   :  { %v2622_v8 = vadd.f32 %v2614_v16, %v2606_v15  ;;  %v2621_v20 = vadd.f32 %v2613_v3, %v2605_v44  ;;  %v2745_v3 = vmul.f32 %v2705_v21, %v9300_v4  ;;  %v2648_v44 = vsel %vm2497_vm4, %v9383_v40, %v9312_v51 }
0x1457   :  { %v2499_v40 = vsel %vm2497_vm4, %v9535_v60, %v2490_v10 }
0x1458   :  { %v2722_v57 = vadd.f32 %v2714_v19, %v2622_v8  ;;  %v2721_v54 = vadd.f32 %v2713_v61, %v2621_v20  ;;  %v9619_v8 = vmul.f32 %v9292_v53, %v9196_v17  ;;  %v2681_v61 = vsel %vm2530_vm3, %v9329_v25, %v9385_v62 }
0x1459   :  { %v9605_v52 = vpop.permute.xlu0 %2763  ;;  %v9609_v26 = vpop.permute.xlu1 %2777  ;;  %v2695_v25 = vsel %vm2530_vm3, %v9385_v62, %v9346_v59  ;;  %v2649_v59 = vsel %vm2497_vm4, %v9312_v51, %v9365_v36  ;;  %v2699_v62 = vsel %vm13366_vm6, %v2681_v61, %v2648_v44 }
0x145a   :  { %13648 = vst [vmem:[#allocation59_spill] sm:$0xff] %v9605_v52  ;;  %v2737_v20 = vadd.f32 %v2729_v49, %v2721_v54  ;;  %v2738_v22 = vadd.f32 %v2730_v42, %v2722_v57  ;;  %v9635_v24 = vsel %vm2497_vm4, %v9605_v52, %v2776_v39  ;;  %v9647_v16 = vsel %vm2497_vm4, %v2776_v39, %v9609_v26 }
0x145b   :  { %v2547_v57 = vsel %vm2530_vm3, %v2521_v28, %v9554_v43  ;;  %v2500_v54 = vsel %vm2497_vm4, %v2490_v10, %v9545_v47  ;;  %v2869_v49 = vmul.f32 %v9411_v29, %v9308_v41  ;;  %v2559_v42 = vsel %vm13366_vm6, %v2533_v14, %v2499_v40 }
0x145c   :  { %v2753_v19 = vadd.f32 %v2745_v3, %v2737_v20  ;;  %v2870_v47 = vmul.f32 %v9405_v38, %v9308_v41  ;;  %v9682_v28 = vmul.f32 %v9292_v53, %v9188_v1  ;;  %v2560_v29 = vsel %vm13368_vm9, %v2547_v57, %v2500_v54  ;;  %v13659_v53 = vld [vmem:[#allocation44_spill] sm:$0xff] }
0x145d   :  { %v9628_v18 = vpop.permute.xlu0 %2803  ;;  %v9641_v15 = vpop.permute.xlu1 %2807  ;;  %v2700_v38 = vsel %vm13368_vm9, %v2695_v25, %v2649_v59  ;;  %v2707_v3 = vsel %vm13367_vm2, %v2648_v44, %v2681_v61  ;;  %v2599_v44 = vmul.f32 %v9353_v46, %v9286_v2  ;;  %v9718_v61 = vmul.f32 %v9443_v63, %v9308_v41 }
0x145e   :  { %13649 = vst [vmem:[#allocation60_spill] sm:$0xff] %v9628_v18  ;;  %v9639_v6 = vsel %vm2530_vm3, %v9628_v18, %v2806_v27  ;;  %13650 = vst [vmem:[#allocation61_spill] sm:$0xff] %v9641_v15  ;;  %v9655_v56 = vsel %vm2530_vm3, %v2806_v27, %v9641_v15  ;;  %v2754_v27 = vadd.f32 %v2746_v23, %v2738_v22 }
0x145f   :  { %v2837_v5 = vsel %vm13332_vm7, %v9639_v6, %v9635_v24  ;;  %v2838_v39 = vsel %vm13357_vm5, %v9655_v56, %v9647_v16  ;;  %vm13358_vm7 = vcmp.eq.s32.totalorder %v9603_v33, 15  ;;  %v2583_v22 = vmul.f32 %v2559_v42, %v9525_v11  ;;  %13651 = vst [vmem:[#allocation62_spill] sm:$0xff] %v9718_v61 }
0x1460   :  { %v2853_v60 = vmul.f32 %v2837_v5, %v9298_v9  ;;  %v2854_v21 = vmul.f32 %v2838_v39, %v9298_v9  ;;  %v2708_v51 = vsel %vm13358_vm7, %v2649_v59, %v2695_v25  ;;  %v9704_v5 = vmul.f32 %v9296_v50, %v9182_v12  ;;  %v13656_v59 = vld [vmem:[#allocation15_spill] sm:$0xff]  ;;  %v13670_v12 = vld [vmem:[#allocation52_spill] sm:$0xff] }
0x1461   :  { %v2494_v20 = vpop.permute.xlu1 %2493  ;;  %v2584_v39 = vmul.f32 %v2560_v29, %v9525_v11  ;;  %v2715_v25 = vmul.f32 %v2699_v62, %v9290_v35  ;;  %v9732_v46 = vmul.f32 %v2707_v3, %v9300_v4  ;;  %v9735_v63 = vmul.f32 %v2708_v51, %v9300_v4  ;;  %v13657_v62 = vld [vmem:[#allocation41_spill] sm:$0xff]  ;;  %v13666_v11 = vld [vmem:[#allocation43_spill] sm:$0xff] }
0x1462   :  { %v2861_v0 = vadd.f32 %v2853_v60, %v2753_v19  ;;  %v2862_v43 = vadd.f32 %v2854_v21, %v2754_v27  ;;  %v9708_v19 = vmul.f32 %v9296_v50, %v9198_v31  ;;  %v9712_v60 = vmul.f32 %v9296_v50, %v9184_v48  ;;  %v13661_v51 = vld [vmem:[#allocation45_spill] sm:$0xff]  ;;  %v13676_v9 = vld [vmem:[#allocation51_spill] sm:$0xff] }
0x1463   :  { %v9723_v27 = vmul.f32 %v9296_v50, %v9200_v32  ;;  %v2600_v21 = vmul.f32 %v9377_v55, %v9286_v2  ;;  %v9739_v42 = vmul.f32 %v9425_v45, %v9308_v41  ;;  %v2591_v55 = vadd.f32 %v2583_v22, %v13656_v59  ;;  %v13658_v50 = vld [vmem:[#allocation25_spill] sm:$0xff]  ;;  %v13664_v45 = vld [vmem:[#allocation35_spill] sm:$0xff] }
0x1464   :  { %v9691_v10 = vadd.f32 %v2869_v49, %v2861_v0  ;;  %v9698_v23 = vadd.f32 %v2870_v47, %v2862_v43  ;;  %v9729_v49 = vmul.f32 %v2700_v38, %v9290_v35  ;;  %v13654_v0 = vld [vmem:[#allocation14_spill] sm:$0xff]  ;;  %v13655_v47 = vld [vmem:[#allocation40_spill] sm:$0xff]  ;;  %v9748_v3 = vmul.f32 %v13659_v53, %v13658_v50  ;;  %v13663_v35 = vld [vmem:[#allocation53_spill] sm:$0xff] }
0x1465   :  { %v2527_v36 = vpop.permute.xlu1 %2526  ;;  %13652 = vst [vmem:[#allocation63_spill] sm:$0xff] %v9723_v27  ;;  %13653 = vst [vmem:[#allocation64_spill] sm:$0xff] %v9739_v42  ;;  %v2602_v43 = vmul.f32 %v13655_v47, %v13654_v0  ;;  %v2603_v38 = vmul.f32 %v13657_v62, %v13654_v0  ;;  %v9752_v4 = vmul.f32 %v13661_v51, %v13658_v50  ;;  %v13665_v47 = vld [vmem:[#allocation42_spill] sm:$0xff]  ;;  %v13668_v31 = vld [vmem:[#allocation37_spill] sm:$0xff] }
0x1466   :  { %13660 = vst [vmem:[#allocation40_spill] sm:$0xff] %v9748_v3  ;;  %v2650_v41 = vsel %vm2497_vm4, %v13664_v45, %v13663_v35  ;;  %v9759_v22 = vmul.f32 %v13665_v47, %v13654_v0  ;;  %v9763_v62 = vmul.f32 %v13666_v11, %v13654_v0  ;;  %v2575_v53 = vsel %vm13367_vm2, %v2499_v40, %v2533_v14  ;;  %v13667_v51 = vld [vmem:[#allocation50_spill] sm:$0xff] }
0x1467   :  { %13662 = vst [vmem:[#allocation41_spill] sm:$0xff] %v9752_v4  ;;  %v2592_v32 = vadd.f32 %v2584_v39, %v13656_v59  ;;  %v2682_v17 = vsel %vm2530_vm3, %v13668_v31, %v13667_v51  ;;  %v2683_v48 = vsel %vm2530_vm3, %v13667_v51, %v13669_v13  ;;  %v13671_v47 = vld [vmem:[#allocation38_spill] sm:$0xff]  ;;  %v2662_v11 = vsel %vm2497_vm4, %v13670_v12, %v13664_v45 }
0x1468   :  { %v2652_v1 = vsel %vm2497_vm4, %v13671_v47, %v13670_v12  ;;  %v2651_v14 = vsel %vm2497_vm4, %v13663_v35, %v13671_v47  ;;  %v2702_v40 = vsel %vm13357_vm5, %v2683_v48, %v2650_v41  ;;  %v13672_v39 = vld [vmem:[#allocation54_spill] sm:$0xff]  ;;  %v2607_v51 = vadd.f32 %v2599_v44, %v2591_v55 }
0x1469   :  { %v2492_v29 = vpop.permute.xlu0 %2491  ;;  %v2496_v2 = vpop.permute.xlu1 %2495  ;;  %v2684_v0 = vsel %vm2530_vm3, %v13669_v13, %v13672_v39  ;;  %v2576_v7 = vsel %vm13358_vm7, %v2500_v54, %v2547_v57  ;;  %v2615_v4 = vmul.f32 %v2575_v53, %v9280_v34  ;;  %v2608_v35 = vadd.f32 %v2600_v21, %v2592_v32  ;;  %v13673_v54 = vld [vmem:[#allocation10_spill] sm:$0xff] }
0x146a   :  { %v2501_v12 = vsel %vm2497_vm4, %v2492_v29, %v2494_v20  ;;  %v2502_v47 = vsel %vm2497_vm4, %v2494_v20, %v2496_v2  ;;  %v2696_v44 = vsel %vm2530_vm3, %v13672_v39, %v13668_v31  ;;  %v2703_v57 = vsel %vm13366_vm6, %v2684_v0, %v2651_v14 }
0x146b   :  { %v2616_v32 = vmul.f32 %v2576_v7, %v9280_v34  ;;  %v2623_v20 = vadd.f32 %v2615_v4, %v2607_v51  ;;  %vm13675_vm7 = vcmp.eq.s32.totalorder %v9547_v58, 15  ;;  %v2710_v7 = vsel %vm2246_vm8, %v2650_v41, %v2683_v48  ;;  %v13677_v4 = vld [vmem:[#allocation18_spill] sm:$0xff] }
0x146c   :  { %v2709_v39 = vsel %vm13675_vm7, %v2662_v11, %v2682_v17  ;;  %v2718_v51 = vmul.f32 %v2702_v40, %v13677_v4  ;;  %vm13679_vm7 = vcmp.eq.s32.totalorder %v9603_v33, 15 }
0x146d   :  { %v2525_v59 = vpop.permute.xlu0 %2524  ;;  %v2529_v42 = vpop.permute.xlu1 %2528  ;;  %v2723_v52 = vadd.f32 %v2715_v25, %v2623_v20 }
0x146e   :  { %v2535_v45 = vsel %vm2530_vm3, %v2525_v59, %v2527_v36  ;;  %v2536_v13 = vsel %vm2530_vm3, %v2527_v36, %v2529_v42 }
0x146f   :  { %v2562_v61 = vsel %vm13357_vm5, %v2535_v45, %v2501_v12  ;;  %v2563_v53 = vsel %vm13366_vm6, %v2536_v13, %v2502_v47  ;;  %v2578_v21 = vsel %vm2246_vm8, %v2501_v12, %v2535_v45  ;;  %vm13674_vm5 = vcmp.eq.s32.totalorder %v9547_v58, 0 }
0x1470   :  { %v2586_v55 = vmul.f32 %v2562_v61, %v13673_v54  ;;  %v2587_v36 = vmul.f32 %v2563_v53, %v13673_v54  ;;  %v2701_v31 = vsel %vm13674_vm5, %v2682_v17, %v2662_v11  ;;  %v2579_v18 = vsel %vm13367_vm2, %v2502_v47, %v2536_v13 }
0x1471   :  { %v2476_v3 = vpop.permute.xlu0 %2475  ;;  %v9816_v15 = vpop.permute.xlu1 %2783  ;;  %v2624_v12 = vadd.f32 %v2616_v32, %v2608_v35  ;;  %v2704_v53 = vsel %vm13368_vm9, %v2696_v44, %v2652_v1  ;;  %v2719_v17 = vmul.f32 %v2703_v57, %v13677_v4  ;;  %vm13680_vm6 = vcmp.eq.s32.totalorder %v9547_v58, 15 }
0x1472   :  { %v2594_v61 = vadd.f32 %v2586_v55, %v13676_v9  ;;  %v2595_v45 = vadd.f32 %v2587_v36, %v13676_v9  ;;  %v13678_v55 = vld [vmem:[#allocation16_spill] sm:$0xff]  ;;  %v2503_v27 = vsel %vm2497_vm4, %v2496_v2, %v2476_v3  ;;  %v2513_v40 = vsel %vm2497_vm4, %v2476_v3, %v2492_v29 }
0x1473   :  { %v2618_v34 = vmul.f32 %v2578_v21, %v13678_v55  ;;  %v2619_v13 = vmul.f32 %v2579_v18, %v13678_v55 }
0x1474   :  { %v2610_v11 = vadd.f32 %v2602_v43, %v2594_v61  ;;  %v2611_v47 = vadd.f32 %v2603_v38, %v2595_v45  ;;  %v2724_v43 = vadd.f32 %v9729_v49, %v2624_v12 }
0x1475   :  { %v2523_v48 = vpop.permute.xlu0 %2522  ;;  %v9831_v36 = vpop.permute.xlu1 %2815 }
0x1476   :  { %v2626_v41 = vadd.f32 %v2618_v34, %v2610_v11  ;;  %v2534_v35 = vsel %vm2530_vm3, %v2523_v48, %v2525_v59  ;;  %v2548_v32 = vsel %vm2530_vm3, %v2529_v42, %v2523_v48  ;;  %v2627_v57 = vadd.f32 %v2619_v13, %v2611_v47  ;;  %v13685_v47 = vld [vmem:[#allocation27_spill] sm:$0xff] }
0x1477   :  { %v2561_v25 = vsel %vm13674_vm5, %v2534_v35, %v2513_v40  ;;  %v2564_v18 = vsel %vm13368_vm9, %v2548_v32, %v2503_v27  ;;  %v2711_v34 = vsel %vm13367_vm2, %v2651_v14, %v2684_v0  ;;  %v2712_v42 = vsel %vm13679_vm7, %v2652_v1, %v2696_v44  ;;  %vm13681_vm5 = vmmov %vm13679_vm7 }
0x1478   :  { %v2726_v2 = vadd.f32 %v2718_v51, %v2626_v41  ;;  %v2585_v29 = vmul.f32 %v2561_v25, %v13673_v54  ;;  %v2588_v59 = vmul.f32 %v2564_v18, %v13673_v54  ;;  %v2727_v38 = vadd.f32 %v2719_v17, %v2627_v57  ;;  %vm13682_vm2 = vmmov %vm13680_vm6 }
0x1479   :  { %v2577_v49 = vsel %vm13680_vm6, %v2513_v40, %v2534_v35  ;;  %v2580_v3 = vsel %vm13681_vm5, %v2503_v27, %v2548_v32  ;;  %v2780_v20 = vpop.permute.xlu0 %2779  ;;  %v2845_v0 = vsel %vm13682_vm2, %v9635_v24, %v9639_v6  ;;  %v2766_v61 = vpop.permute.xlu1 %2765  ;;  %v2739_v1 = vadd.f32 %v9682_v28, %v2723_v52  ;;  %v13683_v28 = vld [vmem:[#allocation21_spill] sm:$0xff] }
0x147a   :  { %v2593_v14 = vadd.f32 %v2585_v29, %v13676_v9  ;;  %v2596_v21 = vadd.f32 %v2588_v59, %v13676_v9  ;;  %v2846_v44 = vsel %vm2246_vm8, %v9647_v16, %v9655_v56  ;;  %v2742_v27 = vadd.f32 %v9708_v19, %v2726_v2  ;;  %v13684_v56 = vld [vmem:[#allocation47_spill] sm:$0xff] }
0x147b   :  { %v2740_v51 = vadd.f32 %v9619_v8, %v2724_v43  ;;  %v2743_v12 = vadd.f32 %v9712_v60, %v2727_v38  ;;  %v2617_v45 = vmul.f32 %v2577_v49, %v13678_v55  ;;  %v2620_v17 = vmul.f32 %v2580_v3, %v13678_v55  ;;  %v13686_v29 = vld [vmem:[#allocation63_spill] sm:$0xff]  ;;  %v13690_v3 = vld [vmem:[#allocation26_spill] sm:$0xff] }
0x147c   :  { %v2609_v24 = vadd.f32 %v9759_v22, %v2593_v14  ;;  %v2612_v6 = vadd.f32 %v9763_v62, %v2596_v21  ;;  %v2717_v52 = vmul.f32 %v2701_v31, %v13677_v4  ;;  %v2749_v11 = vmul.f32 %v2709_v39, %v13683_v28  ;;  %v13691_v21 = vld [vmem:[#allocation59_spill] sm:$0xff] }
0x147d   :  { %v2750_v16 = vmul.f32 %v2710_v7, %v13683_v28  ;;  %v2873_v19 = vmul.f32 %v13684_v56, %v13658_v50  ;;  %v2782_v8 = vpop.permute.xlu0 %2781  ;;  %v2720_v60 = vmul.f32 %v2704_v53, %v13677_v4  ;;  %v2885_v22 = vmul.f32 %v2845_v0, %v13685_v47  ;;  %v2812_v48 = vpop.permute.xlu1 %2811  ;;  %v13693_v56 = vld [vmem:[#allocation61_spill] sm:$0xff] }
0x147e   :  { %v2625_v13 = vadd.f32 %v2617_v45, %v2609_v24  ;;  %v2628_v62 = vadd.f32 %v2620_v17, %v2612_v6  ;;  %v2751_v41 = vmul.f32 %v2711_v34, %v13683_v28  ;;  %v2752_v40 = vmul.f32 %v2712_v42, %v13683_v28 }
0x147f   :  { %v2886_v31 = vmul.f32 %v2846_v44, %v13685_v47  ;;  %v2755_v39 = vadd.f32 %v9732_v46, %v2739_v1  ;;  %v9878_v7 = vadd.f32 %v2885_v22, %v9691_v10  ;;  %v2756_v53 = vadd.f32 %v9735_v63, %v2740_v51  ;;  %v13692_v44 = vld [vmem:[#allocation48_spill] sm:$0xff] }
0x1480   :  { %v2725_v35 = vadd.f32 %v2717_v52, %v2625_v13  ;;  %v2728_v32 = vadd.f32 %v2720_v60, %v2628_v62  ;;  %v2788_v43 = vsel %vm2497_vm4, %v9609_v26, %v2780_v20  ;;  %v2790_v57 = vsel %vm2497_vm4, %v2782_v8, %v9816_v15 }
0x1481   :  { %v2802_v25 = vsel %vm2497_vm4, %v2766_v61, %v2782_v8  ;;  %v2814_v18 = vpop.permute.xlu0 %2813  ;;  %v9887_v34 = vadd.f32 %v2886_v31, %v9698_v23  ;;  %v2786_v63 = vpop.permute.xlu1 %2785  ;;  %vm13687_vm2 = vcmp.eq.s32.totalorder %v9547_v58, 0  ;;  %vm13688_vm6 = vcmp.eq.s32.totalorder %v9543_v30, 0 }
0x1482   :  { %v2741_v46 = vadd.f32 %v9704_v5, %v2725_v35  ;;  %v2822_v10 = vsel %vm2530_vm3, %v2812_v48, %v2814_v18  ;;  %v2823_v2 = vsel %vm2530_vm3, %v2814_v18, %v9831_v36  ;;  %v2744_v59 = vadd.f32 %v13686_v29, %v2728_v32 }
0x1483   :  { %v2841_v26 = vsel %vm13687_vm2, %v2822_v10, %v2802_v25  ;;  %v2842_v42 = vsel %vm13688_vm6, %v2823_v2, %v2790_v57  ;;  %vm13689_vm7 = vcmp.eq.s32.totalorder %v9547_v58, 15  ;;  %v2850_v5 = vsel %vm2246_vm8, %v2790_v57, %v2823_v2  ;;  %v13698_v57 = vld [vmem:[#allocation40_spill] sm:$0xff] }
0x1484   :  { %v2849_v23 = vsel %vm13689_vm7, %v2802_v25, %v2822_v10  ;;  %v2757_v38 = vadd.f32 %v2749_v11, %v2741_v46  ;;  %v2758_v49 = vadd.f32 %v2750_v16, %v2742_v27  ;;  %v2857_v0 = vmul.f32 %v2841_v26, %v13690_v3  ;;  %v13694_v11 = vld [vmem:[#allocation60_spill] sm:$0xff] }
0x1485   :  { %v2858_v14 = vmul.f32 %v2842_v42, %v13690_v3  ;;  %v2789_v1 = vsel %vm2497_vm4, %v2780_v20, %v13691_v21  ;;  %v2889_v51 = vmul.f32 %v2849_v23, %v13692_v44  ;;  %v2890_v24 = vmul.f32 %v2850_v5, %v13692_v44  ;;  %v2810_v6 = vpop.permute.xlu0 %2809  ;;  %v2818_v16 = vpop.permute.xlu1 %2817  ;;  %v13704_v23 = vld [vmem:[#allocation64_spill] sm:$0xff] }
0x1486   :  { %v2759_v45 = vadd.f32 %v2751_v41, %v2743_v12  ;;  %v2865_v17 = vadd.f32 %v2857_v0, %v2757_v38  ;;  %v2821_v8 = vsel %vm2530_vm3, %v13693_v56, %v2810_v6  ;;  %v2835_v27 = vsel %vm2530_vm3, %v2810_v6, %v13694_v11  ;;  %v13697_v41 = vld [vmem:[#allocation23_spill] sm:$0xff]  ;;  %v13705_v38 = vld [vmem:[#allocation46_spill] sm:$0xff] }
0x1487   :  { %v2866_v52 = vadd.f32 %v2858_v14, %v2758_v49  ;;  %v2791_v60 = vsel %vm2497_vm4, %v9816_v15, %v2786_v63  ;;  %v2792_v20 = vsel %vm2497_vm4, %v2786_v63, %v2766_v61  ;;  %vm13695_vm5 = vcmp.eq.s32.totalorder %v9601_v37, 0  ;;  %v13701_v63 = vld [vmem:[#allocation62_spill] sm:$0xff] }
0x1488   :  { %v2839_v22 = vsel %vm13695_vm5, %v2821_v8, %v2788_v43  ;;  %v2840_v12 = vsel %vm13368_vm9, %v2835_v27, %v2789_v1  ;;  %v2881_v13 = vadd.f32 %v2873_v19, %v2865_v17  ;;  %vm13696_vm2 = vcmp.eq.s32.totalorder %v9601_v37, 15  ;;  %vm13699_vm6 = vmmov %vm13695_vm5  ;;  %v7490_v56 = vld [vmem:[%s13223_s13] sm:$0xff]  }
0x1489   :  { %v2847_v62 = vsel %vm13696_vm2, %v2788_v43, %v2821_v8  ;;  %v2855_v31 = vmul.f32 %v2839_v22, %v13697_v41  ;;  %v2856_v35 = vmul.f32 %v2840_v12, %v13697_v41  ;;  %v2760_v32 = vadd.f32 %v2752_v40, %v2744_v59  ;;  %vm13702_vm5 = vmmov %vm13696_vm2 }
0x148a   :  { %v2824_v15 = vsel %vm2530_vm3, %v9831_v36, %v2818_v16  ;;  %v2836_v61 = vsel %vm2530_vm3, %v2818_v16, %v2812_v48  ;;  %v2882_v25 = vadd.f32 %v13698_v57, %v2866_v52  ;;  %v2897_v18 = vadd.f32 %v2889_v51, %v2881_v13 }
0x148b   :  { %v2863_v46 = vadd.f32 %v2855_v31, %v2755_v39  ;;  %v2864_v10 = vadd.f32 %v2856_v35, %v2756_v53  ;;  %v2843_v19 = vsel %vm13699_vm6, %v2824_v15, %v2791_v60  ;;  %vm13700_vm7 = vcmp.eq.s32.totalorder %v9603_v33, 15 }
0x148c   :  { %v2848_v43 = vsel %vm13700_vm7, %v2789_v1, %v2835_v27  ;;  %v2887_v2 = vmul.f32 %v2847_v62, %v13685_v47  ;;  %v2844_v40 = vsel %vm13368_vm9, %v2836_v61, %v2792_v20  ;;  %v2859_v36 = vmul.f32 %v2843_v19, %v13690_v3  ;;  %vm13703_vm2 = vmmov %vm13700_vm7  ;;  %v13706_v1 = vld [vmem:[#allocation41_spill] sm:$0xff] }
0x148d   :  { %v2879_v48 = vadd.f32 %v13701_v63, %v2863_v46  ;;  %v2851_v29 = vsel %vm13702_vm5, %v2791_v60, %v2824_v15  ;;  %v2852_v39 = vsel %vm13703_vm2, %v2792_v20, %v2836_v61  ;;  %v2860_v53 = vmul.f32 %v2844_v40, %v13690_v3  ;;  %v7492_v60 = vld [vmem:[%s13223_s13 + $0x10] sm:$0xff]   ;;  %v7493_v20 = vld [vmem:[%s13223_s13 + $0x18] sm:$0xff]  }
0x148e   :  { %v2867_v59 = vadd.f32 %v2859_v36, %v2759_v45  ;;  %v2898_v26 = vadd.f32 %v2890_v24, %v2882_v25  ;;  %v2905_v42 = vpack.c.bf16 %v2897_v18, %v9878_v7  ;;  %v2880_v5 = vadd.f32 %v13704_v23, %v2864_v10 }
0x148f   :  { %v2876_v49 = vmul.f32 %v13705_v38, %v13658_v50  ;;  %v2888_v0 = vmul.f32 %v2848_v43, %v13685_v47  ;;  %v2868_v14 = vadd.f32 %v2860_v53, %v2760_v32  ;;  %v2895_v21 = vadd.f32 %v2887_v2, %v2879_v48 }
0x1490   :  { %v2883_v51 = vadd.f32 %v13706_v1, %v2867_v59  ;;  %v2891_v6 = vmul.f32 %v2851_v29, %v13692_v44  ;;  %v2906_v17 = vpack.c.bf16 %v2898_v26, %v9887_v34  ;;  %v2892_v45 = vmul.f32 %v2852_v39, %v13692_v44  ;;  %v7491_v34 = vld [vmem:[%s13223_s13 + $0x8] sm:$0xff]  }
0x1491   :  { %v2884_v24 = vadd.f32 %v2876_v49, %v2868_v14  ;;  %v2896_v52 = vadd.f32 %v2888_v0, %v2880_v5  ;;  %vm13707_vm6 = vcmask 261120   ;;  %v13708_v16 = vmov 0  }
0x1492   :  { %v2899_v7 = vadd.f32 %v2891_v6, %v2883_v51  ;;  %2943 = vmatprep.subr.bf16.mxu0 %v2906_v17  ;;  %vm13709_vm7 = vmmov %vm13707_vm6 }
0x1493   :  { %2944 = vmatpush1.bf16.msra.mxu0 %v2905_v42  ;;  %v2900_v8 = vadd.f32 %v2892_v45, %v2884_v24  ;;  %vm13710_vm5 = vmmov %vm13707_vm6 }
0x1494   :  { %v2907_v11 = vpack.c.bf16 %v2899_v7, %v2895_v21  ;;  %vm13711_vm2 = vmmov %vm13710_vm5 }
0x1495   :  { %v2908_v27 = vpack.c.bf16 %v2900_v8, %v2896_v52  ;;  %vm13715_vm9 = vmmov %vm13711_vm2 }
0x1496   :  { %7182 = vmatmul.mubr.msk.bf16.vlgmr.msra.gmra.mrb[36].mxu0 %vm13707_vm6, %v7490_v56  ;;  %vm13712_vm6 = vmmov %vm13711_vm2 }
0x1497   :  { %3016 = vmatprep.subr.bf16.mxu1 %v2908_v27  ;;  %2983 = vmatprep.mubr.bf16.mxu0 %v13708_v16 }
0x1498   :  { %3017 = vmatpush1.bf16.msra.mxu1 %v2907_v11 }
0x149b   :  { %7186 = vmatmul.mubr.msk.bf16.vlgmr.msra.gmra.mrb[20].mxu1 %vm13709_vm7, %v7490_v56  ;;  %vm13713_vm7 = vmmov %vm13711_vm2 }
0x149c   :  { %3056 = vmatprep.mubr.bf16.mxu1 %v13708_v16 }
0x149e   :  { %7183 = vmatmul.mubr.msk.bf16.gmra.mrb[40].mxu0 %vm13710_vm5, %v7491_v34  ;;  %vm13714_vm5 = vmmov %vm13711_vm2 }
0x149f   :  { %2993 = vmatprep.mubr.bf16.mxu0 %v13708_v16 }
0x14a3   :  { %7187 = vmatmul.mubr.msk.bf16.gmra.mrb[24].mxu1 %vm13711_vm2, %v7491_v34 }
0x14a4   :  { %3066 = vmatprep.mubr.bf16.mxu1 %v13708_v16 }
0x14a6   :  { %7184 = vmatmul.mubr.msk.bf16.gmra.mrb[44].mxu0 %vm13712_vm6, %v7492_v60  ;;  %vm13739_vm6 = vcmask 1039360  }
0x14a7   :  { %3003 = vmatprep.mubr.bf16.mxu0 %v13708_v16 }
0x14ab   :  { %7188 = vmatmul.mubr.msk.bf16.gmra.mrb[28].mxu1 %vm13713_vm7, %v7492_v60  ;;  %vm13740_vm7 = vcmask 7168  }
0x14ac   :  { %3076 = vmatprep.mubr.bf16.mxu1 %v13708_v16 }
0x14ae   :  { %7185 = vmatmul.mubr.msk.bf16.gmra.mrb[48].mxu0 %vm13714_vm5, %v7493_v20  ;;  %vm13742_vm5 = vmmov %vm13740_vm7 }
0x14af   :  { %3520 = vmatprep.mubr.bf16.mxu0 %v13708_v16 }
0x14b3   :  { %7189 = vmatmul.mubr.msk.bf16.gmra.mrb[32].mxu1 %vm13715_vm9, %v7493_v20  ;;  %vm13716_vm9 = vcmask 523264  }
0x14b4   :  { %3563 = vmatprep.mubr.bf16.mxu1 %v13708_v16  ;;  %vm13717_vm2 = vmmov %vm13716_vm9 }
0x1569   :  { %v9978_v22 = vpop.f32.mrb[36].mxu0 }
0x156a   :  { %v9980_v12 = vpop.f32.mrb[37].mxu0 }
0x156b   :  { %v3087_v13 = vadd.f32 %v9980_v12, %v9978_v22  ;;  %v9984_v62 = vpop.f32.mrb[38].mxu0 }
0x156c   :  { %v9986_v31 = vpop.f32.mrb[39].mxu0 }
0x156d   :  { %v3092_v35 = vadd.f32 %v9986_v31, %v9984_v62 }
0x156e   :  { %v9990_v32 = vpop.f32.mrb[20].mxu1 }
0x156f   :  { %v3088_v15 = vadd.f32 %v3087_v13, %v9990_v32  ;;  %v9993_v61 = vpop.f32.mrb[21].mxu1 }
0x1570   :  { %v9995_v57 = vpop.f32.mrb[22].mxu1 }
0x1571   :  { %v3089_v25 = vadd.f32 %v3088_v15, %v9993_v61  ;;  %v3093_v18 = vadd.f32 %v3092_v35, %v9995_v57  ;;  %v9999_v46 = vpop.f32.mrb[23].mxu1  ;;  %v10001_v10 = vpop.f32.mrb[40].mxu0 }
0x1572   :  { %v10003_v19 = vpop.f32.mrb[41].mxu0 }
0x1573   :  { %v3094_v43 = vadd.f32 %v3093_v18, %v9999_v46  ;;  %3090 = vadd.xlane.f32.xlu0 %v3089_v25  ;;  %v3097_v2 = vadd.f32 %v10003_v19, %v10001_v10  ;;  %v10008_v40 = vpop.f32.mrb[42].mxu0 }
0x1574   :  { %v10010_v36 = vpop.f32.mrb[43].mxu0 }
0x1575   :  { %3095 = vadd.xlane.f32.xlu1 %v3094_v43  ;;  %v3102_v63 = vadd.f32 %v10010_v36, %v10008_v40 }
0x1576   :  { %v10014_v48 = vpop.f32.mrb[24].mxu1 }
0x1577   :  { %v3098_v29 = vadd.f32 %v3097_v2, %v10014_v48  ;;  %v10017_v39 = vpop.f32.mrb[25].mxu1 }
0x1578   :  { %v10019_v53 = vpop.f32.mrb[26].mxu1 }
0x1579   :  { %v3099_v59 = vadd.f32 %v3098_v29, %v10017_v39  ;;  %v3103_v26 = vadd.f32 %v3102_v63, %v10019_v53  ;;  %v10023_v42 = vpop.f32.mrb[27].mxu1  ;;  %v10025_v23 = vpop.f32.mrb[44].mxu0 }
0x157a   :  { %v10027_v5 = vpop.f32.mrb[45].mxu0 }
0x157b   :  { %v3104_v38 = vadd.f32 %v3103_v26, %v10023_v42  ;;  %3100 = vadd.xlane.f32.xlu0 %v3099_v59  ;;  %v3107_v49 = vadd.f32 %v10027_v5, %v10025_v23  ;;  %v10032_v0 = vpop.f32.mrb[46].mxu0 }
0x157c   :  { %v10034_v14 = vpop.f32.mrb[47].mxu0 }
0x157d   :  { %v3112_v21 = vadd.f32 %v10034_v14, %v10032_v0 }
0x157e   :  { %v10038_v1 = vpop.f32.mrb[28].mxu1 }
0x157f   :  { %v3108_v51 = vadd.f32 %v3107_v49, %v10038_v1  ;;  %3105 = vadd.xlane.f32.xlu0 %v3104_v38  ;;  %v10041_v6 = vpop.f32.mrb[29].mxu1 }
0x1580   :  { %v10043_v17 = vpop.f32.mrb[30].mxu1 }
0x1581   :  { %v3109_v45 = vadd.f32 %v3108_v51, %v10041_v6  ;;  %v3113_v24 = vadd.f32 %v3112_v21, %v10043_v17  ;;  %v10047_v52 = vpop.f32.mrb[31].mxu1  ;;  %v10049_v7 = vpop.f32.mrb[48].mxu0 }
0x1582   :  { %v10051_v56 = vpop.f32.mrb[49].mxu0 }
0x1583   :  { %v3114_v8 = vadd.f32 %v3113_v24, %v10047_v52  ;;  %3110 = vadd.xlane.f32.xlu1 %v3109_v45  ;;  %v3117_v11 = vadd.f32 %v10051_v56, %v10049_v7  ;;  %v10056_v27 = vpop.f32.mrb[50].mxu0 }
0x1584   :  { %v10058_v34 = vpop.f32.mrb[51].mxu0 }
0x1585   :  { %3115 = vadd.xlane.f32.xlu0 %v3114_v8  ;;  %v3122_v60 = vadd.f32 %v10058_v34, %v10056_v27 }
0x1586   :  { %v10062_v20 = vpop.f32.mrb[32].mxu1 }
0x1587   :  { %v3118_v13 = vadd.f32 %v3117_v11, %v10062_v20  ;;  %v10065_v35 = vpop.f32.mrb[33].mxu1 }
0x1588   :  { %v10067_v15 = vpop.f32.mrb[34].mxu1 }
0x1589   :  { %v3119_v25 = vadd.f32 %v3118_v13, %v10065_v35  ;;  %v3123_v18 = vadd.f32 %v3122_v60, %v10067_v15  ;;  %v10071_v43 = vpop.f32.mrb[35].mxu1 }
0x158b   :  { %v3124_v2 = vadd.f32 %v3123_v18, %v10071_v43  ;;  %3120 = vadd.xlane.f32.xlu1 %v3119_v25 }
0x158d   :  { %3125 = vadd.xlane.f32.xlu0 %v3124_v2 }
0x1600   :  { %v3091_v63 = vpop.xlane.xlu0 %3090 }
0x1601   :  { %v10074_v29 = vmul.f32 0.001953125, %v3091_v63 }
0x1602   :  { %v3096_v59 = vpop.xlane.xlu1 %3095 }
0x1603   :  { %v10076_v26 = vmul.f32 0.001953125, %v3096_v59  ;;  %v3136_v38 = vsub.f32 %v9978_v22, %v10074_v29  ;;  %v3137_v49 = vsub.f32 %v9980_v12, %v10074_v29  ;;  %v3138_v21 = vsub.f32 %v9990_v32, %v10074_v29 }
0x1604   :  { %v3139_v51 = vsub.f32 %v9993_v61, %v10074_v29 }
0x1605   :  { %v3168_v45 = vmul.f32 %v3136_v38, %v3136_v38  ;;  %v3169_v24 = vmul.f32 %v3137_v49, %v3137_v49  ;;  %v3140_v8 = vsub.f32 %v9984_v62, %v10076_v26  ;;  %v3141_v11 = vsub.f32 %v9986_v31, %v10076_v26 }
0x1606   :  { %v3142_v60 = vsub.f32 %v9995_v57, %v10076_v26  ;;  %v3170_v13 = vmul.f32 %v3138_v21, %v3138_v21  ;;  %v3143_v63 = vsub.f32 %v9999_v46, %v10076_v26  ;;  %v3171_v38 = vmul.f32 %v3139_v51, %v3139_v51 }
0x1607   :  { %v3200_v25 = vadd.f32 %v3169_v24, %v3168_v45  ;;  %v3172_v18 = vmul.f32 %v3140_v8, %v3140_v8  ;;  %v3173_v59 = vmul.f32 %v3141_v11, %v3141_v11 }
0x1608   :  { %v3101_v2 = vpop.xlane.xlu0 %3100  ;;  %v3174_v3 = vmul.f32 %v3142_v60, %v3142_v60  ;;  %v3175_v8 = vmul.f32 %v3143_v63, %v3143_v63 }
0x1609   :  { %v10094_v44 = vmul.f32 0.001953125, %v3101_v2  ;;  %v3201_v49 = vadd.f32 %v3200_v25, %v3170_v13  ;;  %v3205_v47 = vadd.f32 %v3173_v59, %v3172_v18 }
0x160b   :  { %v3202_v55 = vadd.f32 %v3201_v49, %v3171_v38  ;;  %v3144_v9 = vsub.f32 %v10001_v10, %v10094_v44  ;;  %v3145_v21 = vsub.f32 %v10003_v19, %v10094_v44  ;;  %v3146_v45 = vsub.f32 %v10014_v48, %v10094_v44 }
0x160c   :  { %v3106_v24 = vpop.xlane.xlu0 %3105  ;;  %v3206_v54 = vadd.f32 %v3205_v47, %v3174_v3  ;;  %v3147_v11 = vsub.f32 %v10017_v39, %v10094_v44 }
0x160d   :  { %v10104_v51 = vmul.f32 0.001953125, %v3106_v24  ;;  %3203 = vadd.xlane.f32.xlu1 %v3202_v55  ;;  %v3176_v60 = vmul.f32 %v3144_v9, %v3144_v9  ;;  %v3177_v13 = vmul.f32 %v3145_v21, %v3145_v21  ;;  %v3178_v18 = vmul.f32 %v3146_v45, %v3146_v45 }
0x160e   :  { %v3207_v25 = vadd.f32 %v3206_v54, %v3175_v8  ;;  %v3179_v63 = vmul.f32 %v3147_v11, %v3147_v11 }
0x160f   :  { %v3210_v2 = vadd.f32 %v3177_v13, %v3176_v60  ;;  %v3148_v59 = vsub.f32 %v10008_v40, %v10104_v51  ;;  %v3149_v38 = vsub.f32 %v10010_v36, %v10104_v51  ;;  %v3150_v47 = vsub.f32 %v10019_v53, %v10104_v51 }
0x1610   :  { %3208 = vadd.xlane.f32.xlu0 %v3207_v25  ;;  %v3111_v3 = vpop.xlane.xlu1 %3110  ;;  %v3151_v55 = vsub.f32 %v10023_v42, %v10104_v51 }
0x1611   :  { %v10114_v9 = vmul.f32 0.001953125, %v3111_v3  ;;  %v3211_v54 = vadd.f32 %v3210_v2, %v3178_v18  ;;  %v3180_v49 = vmul.f32 %v3148_v59, %v3148_v59  ;;  %v3181_v21 = vmul.f32 %v3149_v38, %v3149_v38 }
0x1612   :  { %v3116_v45 = vpop.xlane.xlu0 %3115  ;;  %v3182_v24 = vmul.f32 %v3150_v47, %v3150_v47  ;;  %v3183_v25 = vmul.f32 %v3151_v55, %v3151_v55 }
0x1613   :  { %v10116_v8 = vmul.f32 0.001953125, %v3116_v45  ;;  %v3212_v60 = vadd.f32 %v3211_v54, %v3179_v63  ;;  %v3215_v13 = vadd.f32 %v3181_v21, %v3180_v49  ;;  %v3152_v28 = vsub.f32 %v10025_v23, %v10114_v9 }
0x1614   :  { %v3153_v11 = vsub.f32 %v10027_v5, %v10114_v9  ;;  %v3154_v3 = vsub.f32 %v10038_v1, %v10114_v9  ;;  %v3155_v47 = vsub.f32 %v10041_v6, %v10114_v9 }
0x1615   :  { %3213 = vadd.xlane.f32.xlu1 %v3212_v60  ;;  %v3216_v18 = vadd.f32 %v3215_v13, %v3182_v24  ;;  %v3184_v2 = vmul.f32 %v3152_v28, %v3152_v28  ;;  %v3156_v59 = vsub.f32 %v10032_v0, %v10116_v8  ;;  %v3157_v38 = vsub.f32 %v10034_v14, %v10116_v8 }
0x1616   :  { %v3185_v63 = vmul.f32 %v3153_v11, %v3153_v11  ;;  %v3158_v55 = vsub.f32 %v10043_v17, %v10116_v8  ;;  %v3159_v49 = vsub.f32 %v10047_v52, %v10116_v8  ;;  %v3186_v24 = vmul.f32 %v3154_v3, %v3154_v3 }
0x1617   :  { %v3217_v54 = vadd.f32 %v3216_v18, %v3183_v25  ;;  %v3188_v21 = vmul.f32 %v3156_v59, %v3156_v59  ;;  %v3189_v45 = vmul.f32 %v3157_v38, %v3157_v38  ;;  %v3187_v33 = vmul.f32 %v3155_v47, %v3155_v47 }
0x1618   :  { %v3121_v28 = vpop.xlane.xlu1 %3120  ;;  %v3220_v60 = vadd.f32 %v3185_v63, %v3184_v2  ;;  %v3190_v4 = vmul.f32 %v3158_v55, %v3158_v55  ;;  %v3191_v37 = vmul.f32 %v3159_v49, %v3159_v49 }
0x1619   :  { %v10134_v13 = vmul.f32 0.001953125, %v3121_v28  ;;  %3218 = vadd.xlane.f32.xlu0 %v3217_v54  ;;  %v3225_v50 = vadd.f32 %v3189_v45, %v3188_v21 }
0x161a   :  { %v3126_v41 = vpop.xlane.xlu0 %3125  ;;  %v3221_v11 = vadd.f32 %v3220_v60, %v3186_v24 }
0x161b   :  { %v10136_v58 = vmul.f32 0.001953125, %v3126_v41  ;;  %v3226_v25 = vadd.f32 %v3225_v50, %v3190_v4  ;;  %v3160_v18 = vsub.f32 %v10049_v7, %v10134_v13  ;;  %v3161_v59 = vsub.f32 %v10051_v56, %v10134_v13 }
0x161c   :  { %v3222_v3 = vadd.f32 %v3221_v11, %v3187_v33  ;;  %v3162_v2 = vsub.f32 %v10062_v20, %v10134_v13  ;;  %v3163_v38 = vsub.f32 %v10065_v35, %v10134_v13 }
0x161d   :  { %v3227_v63 = vadd.f32 %v3226_v25, %v3191_v37  ;;  %v3192_v47 = vmul.f32 %v3160_v18, %v3160_v18  ;;  %v3193_v55 = vmul.f32 %v3161_v59, %v3161_v59  ;;  %v3164_v41 = vsub.f32 %v10056_v27, %v10136_v58 }
0x161e   :  { %3223 = vadd.xlane.f32.xlu1 %v3222_v3  ;;  %v3165_v50 = vsub.f32 %v10058_v34, %v10136_v58  ;;  %v3166_v4 = vsub.f32 %v10067_v15, %v10136_v58  ;;  %v3194_v33 = vmul.f32 %v3162_v2, %v3162_v2  ;;  %v3167_v21 = vsub.f32 %v10071_v43, %v10136_v58 }
0x161f   :  { %3228 = vadd.xlane.f32.xlu0 %v3227_v63  ;;  %v3230_v54 = vadd.f32 %v3193_v55, %v3192_v47  ;;  %v3196_v49 = vmul.f32 %v3164_v41, %v3164_v41  ;;  %v3195_v45 = vmul.f32 %v3163_v38, %v3163_v38 }
0x1620   :  { %v3197_v37 = vmul.f32 %v3165_v50, %v3165_v50  ;;  %v3198_v24 = vmul.f32 %v3166_v4, %v3166_v4  ;;  %v3199_v25 = vmul.f32 %v3167_v21, %v3167_v21 }
0x1621   :  { %v3231_v28 = vadd.f32 %v3230_v54, %v3194_v33  ;;  %v2347_v54 = vld [vmem:[%s13224_s14] sm:$0xff] }
0x1622   :  { %v3235_v60 = vadd.f32 %v3197_v37, %v3196_v49 }
0x1623   :  { %v3232_v11 = vadd.f32 %v3231_v28, %v3195_v45  ;;  %v2355_v28 = vld [vmem:[%s13225_s15] sm:$0xff] }
0x1624   :  { %v3236_v18 = vadd.f32 %v3235_v60, %v3198_v24 }
0x1625   :  { %3233 = vadd.xlane.f32.xlu1 %v3232_v11 }
0x1626   :  { %v3237_v59 = vadd.f32 %v3236_v18, %v3199_v25 }
0x1628   :  { %3238 = vadd.xlane.f32.xlu0 %v3237_v59 }
0x169a   :  { %v3204_v3 = vpop.xlane.xlu1 %3203 }
0x169b   :  { %v3240_v30 = vmul.f32 0.001953125, %v3204_v3 }
0x169d   :  { %v3248_v63 = vadd.f32 1e-05, %v3240_v30  ;;  %v3209_v2 = vpop.xlane.xlu0 %3208  ;;  %v2348_v30 = vld [vmem:[%s13224_s14 + $0x8] sm:$0xff] }
0x169e   :  { %v3241_v47 = vmul.f32 0.001953125, %v3209_v2  ;;  %v2356_v2 = vld [vmem:[%s13225_s15 + $0x8] sm:$0xff] }
0x169f   :  { %7559 = vrsqrt.f32 %v3248_v63 }
0x16a0   :  { %v3249_v55 = vadd.f32 1e-05, %v3241_v47 }
0x16a2   :  { %7561 = vrsqrt.f32 %v3249_v55  ;;  %v3214_v41 = vpop.xlane.xlu1 %3213 }
0x16a3   :  { %v3242_v50 = vmul.f32 0.001953125, %v3214_v41 }
0x16a5   :  { %v3250_v38 = vadd.f32 1e-05, %v3242_v50 }
0x16a6   :  { %v3219_v33 = vpop.xlane.xlu0 %3218 }
0x16a7   :  { %v3243_v4 = vmul.f32 0.001953125, %v3219_v33  ;;  %7563 = vrsqrt.f32 %v3250_v38 }
0x16a9   :  { %v7560_v49 = vpop.eup %7559  ;;  %v3251_v21 = vadd.f32 1e-05, %v3243_v4 }
0x16aa   :  { %v3264_v37 = vmul.f32 %v7560_v49, %v2347_v54 }
0x16ab   :  { %v3224_v45 = vpop.xlane.xlu1 %3223  ;;  %7565 = vrsqrt.f32 %v3251_v21 }
0x16ac   :  { %v7562_v24 = vpop.eup %7561  ;;  %3290 = vperm.xlu1 %7484, %v3264_v37   ;;  %v3229_v60 = vpop.xlane.xlu0 %3228  ;;  %v3272_v11 = vmul.f32 %v3264_v37, %v10074_v29  ;;  %v3244_v25 = vmul.f32 0.001953125, %v3224_v45  ;;  %v2349_v29 = vld [vmem:[%s13224_s14 + $0x10] sm:$0xff]  ;;  %v2352_v45 = vld [vmem:[%s13224_s14 + $0x28] sm:$0xff] }
0x16ad   :  { %v3245_v18 = vmul.f32 0.001953125, %v3229_v60  ;;  %v3265_v59 = vmul.f32 %v7562_v24, %v2348_v30 }
0x16ae   :  { %v3280_v3 = vsub.f32 %v2355_v28, %v3272_v11  ;;  %v3252_v55 = vadd.f32 1e-05, %v3244_v25  ;;  %v2357_v11 = vld [vmem:[%s13225_s15 + $0x10] sm:$0xff] }
0x16af   :  { %v3253_v63 = vadd.f32 1e-05, %v3245_v18  ;;  %3295 = vperm.xlu0 %7483, %v3265_v59   ;;  %v3273_v47 = vmul.f32 %v3265_v59, %v10076_v26  ;;  %v2350_v26 = vld [vmem:[%s13224_s14 + $0x18] sm:$0xff]  ;;  %v2360_v18 = vld [vmem:[%s13225_s15 + $0x28] sm:$0xff] }
0x16b0   :  { %3362 = vperm.xlu1 %7484, %v3280_v3  }
0x16b1   :  { %7567 = vrsqrt.f32 %v3253_v63  ;;  %v3281_v50 = vsub.f32 %v2356_v2, %v3273_v47  ;;  %v7564_v38 = vpop.eup %7563  ;;  %v2351_v47 = vld [vmem:[%s13224_s14 + $0x20] sm:$0xff] }
0x16b2   :  { %v3234_v41 = vpop.xlane.xlu1 %3233  ;;  %7569 = vrsqrt.f32 %v3252_v55  ;;  %v3266_v49 = vmul.f32 %v7564_v38, %v2349_v29  ;;  %v2362_v29 = vld [vmem:[%s13225_s15 + $0x38] sm:$0xff] }
0x16b3   :  { %v3246_v33 = vmul.f32 0.001953125, %v3234_v41 }
0x16b4   :  { %3367 = vperm.xlu1 %7484, %v3281_v50   ;;  %v3274_v24 = vmul.f32 %v3266_v49, %v10094_v44  ;;  %v2358_v44 = vld [vmem:[%s13225_s15 + $0x18] sm:$0xff] }
0x16b5   :  { %v3239_v4 = vpop.xlane.xlu0 %3238  ;;  %v7566_v21 = vpop.eup %7565  ;;  %v3254_v30 = vadd.f32 1e-05, %v3246_v33  ;;  %v2354_v50 = vld [vmem:[%s13224_s14 + $0x38] sm:$0xff] }
0x16b6   :  { %v3247_v54 = vmul.f32 0.001953125, %v3239_v4  ;;  %v3267_v28 = vmul.f32 %v7566_v21, %v2350_v26  ;;  %v3282_v59 = vsub.f32 %v2357_v11, %v3274_v24  ;;  %v2353_v21 = vld [vmem:[%s13224_s14 + $0x30] sm:$0xff] }
0x16b8   :  { %v3255_v37 = vadd.f32 1e-05, %v3247_v54  ;;  %3300 = vperm.xlu1 %7484, %v3266_v49   ;;  %v3275_v63 = vmul.f32 %v3267_v28, %v10104_v51  ;;  %v2359_v49 = vld [vmem:[%s13225_s15 + $0x20] sm:$0xff] }
0x16ba   :  { %7571 = vrsqrt.f32 %v3255_v37  ;;  %v3283_v41 = vsub.f32 %v2358_v44, %v3275_v63 }
0x16bb   :  { %v7568_v60 = vpop.eup %7567  ;;  %7573 = vrsqrt.f32 %v3254_v30 }
0x16bc   :  { %3305 = vperm.xlu1 %7484, %v3267_v28   ;;  %v3269_v25 = vmul.f32 %v7568_v60, %v2352_v45  ;;  %v7570_v2 = vpop.eup %7569 }
0x16be   :  { %3315 = vperm.xlu0 %7483, %v3269_v25   ;;  %v3277_v3 = vmul.f32 %v3269_v25, %v10116_v8  ;;  %v3268_v8 = vmul.f32 %v7570_v2, %v2351_v47 }
0x16c0   :  { %3372 = vperm.xlu1 %7484, %v3282_v59   ;;  %v3285_v55 = vsub.f32 %v2360_v18, %v3277_v3  ;;  %v3276_v33 = vmul.f32 %v3268_v8, %v10114_v9 }
0x16c2   :  { %3387 = vperm.xlu0 %7483, %v3285_v55   ;;  %v3284_v37 = vsub.f32 %v2359_v49, %v3276_v33 }
0x16c4   :  { %v7572_v38 = vpop.eup %7571  ;;  %3377 = vperm.xlu1 %7484, %v3283_v41  }
0x16c5   :  { %v3271_v51 = vmul.f32 %v7572_v38, %v2354_v50  ;;  %v7574_v4 = vpop.eup %7573 }
0x16c6   :  { %v3270_v30 = vmul.f32 %v7574_v4, %v2353_v21 }
0x16c7   :  { %3325 = vperm.xlu0 %7483, %v3271_v51   ;;  %v3279_v54 = vmul.f32 %v3271_v51, %v10136_v58  ;;  %v2361_v58 = vld [vmem:[%s13225_s15 + $0x30] sm:$0xff] }
0x16c8   :  { %3310 = vperm.xlu1 %7484, %v3268_v8   ;;  %v3278_v9 = vmul.f32 %v3270_v30, %v10134_v13 }
0x16c9   :  { %v3287_v26 = vsub.f32 %v2362_v29, %v3279_v54 }
0x16ca   :  { %v3286_v45 = vsub.f32 %v2361_v58, %v3278_v9 }
0x16cb   :  { %3397 = vperm.xlu0 %7483, %v3287_v26  }
0x16cc   :  { %3382 = vperm.xlu1 %7484, %v3284_v37  }
0x16d0   :  { %3320 = vperm.xlu1 %7484, %v3270_v30  }
0x16d4   :  { %3392 = vperm.xlu1 %7484, %v3286_v45  }
0x172b   :  { %v3291_v28 = vpop.permute.xlu1 %3290 }
0x172c   :  { %v3329_v11 = vmul.f32 %v3291_v28, %v9980_v12  ;;  %v3331_v25 = vmul.f32 %v3291_v28, %v9993_v61  ;;  %v3328_v18 = vmul.f32 %v3291_v28, %v9978_v22  ;;  %v3330_v59 = vmul.f32 %v3291_v28, %v9990_v32 }
0x172e   :  { %v3296_v24 = vpop.permute.xlu0 %3295 }
0x172f   :  { %v3363_v60 = vpop.permute.xlu1 %3362  ;;  %v3332_v63 = vmul.f32 %v3296_v24, %v9984_v62  ;;  %v3334_v2 = vmul.f32 %v3296_v24, %v9995_v57  ;;  %v3333_v44 = vmul.f32 %v3296_v24, %v9986_v31  ;;  %v3335_v47 = vmul.f32 %v3296_v24, %v9999_v46 }
0x1730   :  { %v3401_v3 = vadd.f32 %v3363_v60, %v3329_v11  ;;  %v3403_v13 = vadd.f32 %v3363_v60, %v3331_v25  ;;  %v3400_v55 = vadd.f32 %v3363_v60, %v3328_v18  ;;  %v3402_v41 = vadd.f32 %v3363_v60, %v3330_v59 }
0x1732   :  { %v3433_v22 = vmax.f32 %v3401_v3, 0.0  ;;  %v3435_v51 = vmax.f32 %v3403_v13, 0.0  ;;  %v3432_v62 = vmax.f32 %v3400_v55, 0.0  ;;  %v3434_v54 = vmax.f32 %v3402_v41, 0.0 }
0x1733   :  { %v3368_v50 = vpop.permute.xlu1 %3367 }
0x1734   :  { %v3404_v12 = vadd.f32 %v3368_v50, %v3332_v63  ;;  %v3406_v8 = vadd.f32 %v3368_v50, %v3334_v2  ;;  %v3405_v61 = vadd.f32 %v3368_v50, %v3333_v44  ;;  %v3407_v38 = vadd.f32 %v3368_v50, %v3335_v47 }
0x1736   :  { %v3436_v32 = vmax.f32 %v3404_v12, 0.0  ;;  %v3438_v29 = vmax.f32 %v3406_v8, 0.0  ;;  %v3437_v33 = vmax.f32 %v3405_v61, 0.0  ;;  %v3439_v4 = vmax.f32 %v3407_v38, 0.0 }
0x1737   :  { %v3301_v57 = vpop.permute.xlu1 %3300 }
0x1738   :  { %v3465_v49 = vpack.c.bf16 %v3437_v33, %v3433_v22  ;;  %v3467_v31 = vpack.c.bf16 %v3439_v4, %v3435_v51  ;;  %v3464_v21 = vpack.c.bf16 %v3436_v32, %v3432_v62  ;;  %v3466_v46 = vpack.c.bf16 %v3438_v29, %v3434_v54 }
0x1739   :  { %v3336_v9 = vmul.f32 %v3301_v57, %v10001_v10  ;;  %v3338_v58 = vmul.f32 %v3301_v57, %v10014_v48  ;;  %v3337_v28 = vmul.f32 %v3301_v57, %v10003_v19  ;;  %v3339_v24 = vmul.f32 %v3301_v57, %v10017_v39 }
0x173a   :  { %3488 = vmatprep.subr.bf16.mxu0 %v3465_v49  ;;  %3531 = vmatprep.subr.bf16.mxu1 %v3467_v31 }
0x173b   :  { %v3306_v26 = vpop.permute.xlu1 %3305  ;;  %3489 = vmatpush1.bf16.msra.mxu0 %v3464_v21  ;;  %3532 = vmatpush1.bf16.msra.mxu1 %v3466_v46 }
0x173c   :  { %v3340_v60 = vmul.f32 %v3306_v26, %v10008_v40  ;;  %v3342_v11 = vmul.f32 %v3306_v26, %v10019_v53  ;;  %v3341_v3 = vmul.f32 %v3306_v26, %v10010_v36  ;;  %v3343_v63 = vmul.f32 %v3306_v26, %v10023_v42 }
0x173d   :  { %v3316_v37 = vpop.permute.xlu0 %3315 }
0x173e   :  { %v3348_v48 = vmul.f32 %v3316_v37, %v10032_v0  ;;  %v3350_v19 = vmul.f32 %v3316_v37, %v10043_v17  ;;  %v3349_v40 = vmul.f32 %v3316_v37, %v10034_v14  ;;  %v3351_v32 = vmul.f32 %v3316_v37, %v10047_v52 }
0x173f   :  { %v3373_v30 = vpop.permute.xlu1 %3372 }
0x1740   :  { %v3408_v25 = vadd.f32 %v3373_v30, %v3336_v9  ;;  %v3410_v18 = vadd.f32 %v3373_v30, %v3338_v58  ;;  %v3409_v13 = vadd.f32 %v3373_v30, %v3337_v28  ;;  %v3411_v10 = vadd.f32 %v3373_v30, %v3339_v24 }
0x1741   :  { %v3388_v45 = vpop.permute.xlu0 %3387 }
0x1742   :  { %v3440_v53 = vmax.f32 %v3408_v25, 0.0  ;;  %v3442_v55 = vmax.f32 %v3410_v18, 0.0  ;;  %v3441_v8 = vmax.f32 %v3409_v13, 0.0  ;;  %v3443_v42 = vmax.f32 %v3411_v10, 0.0 }
0x1743   :  { %v3378_v59 = vpop.permute.xlu1 %3377  ;;  %v3420_v22 = vadd.f32 %v3388_v45, %v3348_v48  ;;  %v3422_v17 = vadd.f32 %v3388_v45, %v3350_v19  ;;  %v3421_v4 = vadd.f32 %v3388_v45, %v3349_v40  ;;  %v3423_v31 = vadd.f32 %v3388_v45, %v3351_v32 }
0x1744   :  { %v3412_v2 = vadd.f32 %v3378_v59, %v3340_v60  ;;  %v3414_v44 = vadd.f32 %v3378_v59, %v3342_v11  ;;  %v3413_v39 = vadd.f32 %v3378_v59, %v3341_v3  ;;  %v3415_v47 = vadd.f32 %v3378_v59, %v3343_v63 }
0x1745   :  { %v3452_v21 = vmax.f32 %v3420_v22, 0.0  ;;  %v3454_v37 = vmax.f32 %v3422_v17, 0.0  ;;  %v3453_v9 = vmax.f32 %v3421_v4, 0.0  ;;  %v3455_v45 = vmax.f32 %v3423_v31, 0.0 }
0x1746   :  { %v3444_v41 = vmax.f32 %v3412_v2, 0.0  ;;  %v3446_v50 = vmax.f32 %v3414_v44, 0.0  ;;  %v3326_v12 = vpop.permute.xlu0 %3325  ;;  %v3445_v61 = vmax.f32 %v3413_v39, 0.0  ;;  %v3447_v38 = vmax.f32 %v3415_v47, 0.0 }
0x1747   :  { %v3311_v36 = vpop.permute.xlu1 %3310  ;;  %v3356_v30 = vmul.f32 %v3326_v12, %v10056_v27  ;;  %v3357_v11 = vmul.f32 %v3326_v12, %v10058_v34  ;;  %v3359_v25 = vmul.f32 %v3326_v12, %v10071_v43 }
0x1748   :  { %v3468_v0 = vpack.c.bf16 %v3444_v41, %v3440_v53  ;;  %v3470_v51 = vpack.c.bf16 %v3446_v50, %v3442_v55  ;;  %v3469_v29 = vpack.c.bf16 %v3445_v61, %v3441_v8  ;;  %v3471_v33 = vpack.c.bf16 %v3447_v38, %v3443_v42  ;;  %v7494_v42 = vld [vmem:[%s13226_s16] sm:$0xff]   ;;  %v13718_v38 = vld [vmem:[#allocation4_spill] sm:$0xff] }
0x1749   :  { %v3344_v14 = vmul.f32 %v3311_v36, %v10025_v23  ;;  %v3346_v62 = vmul.f32 %v3311_v36, %v10038_v1  ;;  %v3345_v54 = vmul.f32 %v3311_v36, %v10027_v5  ;;  %v3347_v49 = vmul.f32 %v3311_v36, %v10041_v6 }
0x174a   :  { %3490 = vmatprep.subr.bf16.mxu0 %v3469_v29  ;;  %3533 = vmatprep.subr.bf16.mxu1 %v3471_v33  ;;  %v3398_v23 = vpop.permute.xlu0 %3397  ;;  %v3358_v5 = vmul.f32 %v3326_v12, %v10067_v15  ;;  %v10250_v22 = vsub.s32 0, %v13718_v38  ;;  %v10259_v32 = vsub.s32 1, %v13718_v38  ;;  %v10262_v17 = vsub.s32 3, %v13718_v38 }
0x174b   :  { %v3383_v57 = vpop.permute.xlu1 %3382  ;;  %3491 = vmatpush1.bf16.msra.mxu0 %v3468_v0  ;;  %3534 = vmatpush1.bf16.msra.mxu1 %v3470_v51  ;;  %v3428_v18 = vadd.f32 %v3398_v23, %v3356_v30  ;;  %v3429_v10 = vadd.f32 %v3398_v23, %v3357_v11  ;;  %v3431_v48 = vadd.f32 %v3398_v23, %v3359_v25  ;;  %v10253_v0 = vsub.s32 2, %v13718_v38  ;;  %v3574_v51 = vld [vmem:[%s13227_s10] ss:$4 sm:$0xf]  ;;  %v13723_v30 = vld [vmem:[#allocation5_spill] sm:$0xff]  ;;  %v13729_v25 = vld [vmem:[#allocation8_spill] sm:$0xff] }
0x174c   :  { %v3416_v46 = vadd.f32 %v3383_v57, %v3344_v14  ;;  %v3418_v26 = vadd.f32 %v3383_v57, %v3346_v62  ;;  %v3417_v52 = vadd.f32 %v3383_v57, %v3345_v54  ;;  %v3419_v1 = vadd.f32 %v3383_v57, %v3347_v49  ;;  %13719 = vst [vmem:[#allocation44_spill] sm:$0xff] %v10250_v22 }
0x174d   :  { %v3430_v59 = vadd.f32 %v3398_v23, %v3358_v5  ;;  %v3460_v53 = vmax.f32 %v3428_v18, 0.0  ;;  %v3461_v41 = vmax.f32 %v3429_v10, 0.0  ;;  %v3463_v50 = vmax.f32 %v3431_v48, 0.0  ;;  %13720 = vst [vmem:[#allocation45_spill] sm:$0xff] %v10253_v0  ;;  %13721 = vst [vmem:[#allocation53_spill] sm:$0xff] %v10259_v32  ;;  %v13737_v48 = vld [vmem:[#allocation13_spill] sm:$0xff] }
0x174e   :  { %v3448_v58 = vmax.f32 %v3416_v46, 0.0  ;;  %v3450_v28 = vmax.f32 %v3418_v26, 0.0  ;;  %v3449_v24 = vmax.f32 %v3417_v52, 0.0  ;;  %v3451_v6 = vmax.f32 %v3419_v1, 0.0  ;;  %13722 = vst [vmem:[#allocation35_spill] sm:$0xff] %v10262_v17 }
0x174f   :  { %v3321_v60 = vpop.permute.xlu1 %3320  ;;  %v3462_v55 = vmax.f32 %v3430_v59, 0.0  ;;  %v3579_v29 = vrot.slane %v3574_v51, %v10250_v22  ;;  %v3587_v33 = vrot.slane %v3574_v51, %v10253_v0  ;;  %v3583_v4 = vrot.slane %v3574_v51, %v10259_v32  ;;  %v13731_v59 = vld [vmem:[#allocation11_spill] sm:$0xff]  ;;  %v13773_v0 = vld [vmem:[#allocation56_spill] sm:$0xff] }
0x1750   :  { %v3473_v3 = vpack.c.bf16 %v3453_v9, %v3449_v24  ;;  %v3472_v13 = vpack.c.bf16 %v3452_v21, %v3448_v58  ;;  %v3475_v27 = vpack.c.bf16 %v3455_v45, %v3451_v6  ;;  %v3474_v63 = vpack.c.bf16 %v3454_v37, %v3450_v28  ;;  %v13725_v9 = vld [vmem:[#allocation6_spill] sm:$0xff]  ;;  %v13727_v45 = vld [vmem:[#allocation7_spill] sm:$0xff] }
0x1751   :  { %v3352_v15 = vmul.f32 %v3321_v60, %v10049_v7  ;;  %v3354_v2 = vmul.f32 %v3321_v60, %v10062_v20  ;;  %v3353_v44 = vmul.f32 %v3321_v60, %v10051_v56  ;;  %v3355_v19 = vmul.f32 %v3321_v60, %v10065_v35 }
0x1752   :  { %3492 = vmatprep.subr.bf16.mxu0 %v3473_v3  ;;  %3535 = vmatprep.subr.bf16.mxu1 %v3475_v27  ;;  %v3591_v14 = vrot.slane %v3574_v51, %v10262_v17 }
0x1753   :  { %v3393_v34 = vpop.permute.xlu1 %3392  ;;  %3493 = vmatpush1.bf16.msra.mxu0 %v3472_v13  ;;  %3536 = vmatpush1.bf16.msra.mxu1 %v3474_v63  ;;  %v13733_v13 = vld [vmem:[#allocation9_spill] sm:$0xff]  ;;  %v13735_v63 = vld [vmem:[#allocation12_spill] sm:$0xff] }
0x1754   :  { %v3424_v43 = vadd.f32 %v3393_v34, %v3352_v15  ;;  %v3426_v39 = vadd.f32 %v3393_v34, %v3354_v2  ;;  %v3425_v47 = vadd.f32 %v3393_v34, %v3353_v44  ;;  %v3427_v40 = vadd.f32 %v3393_v34, %v3355_v19 }
0x1756   :  { %v3456_v7 = vmax.f32 %v3424_v43, 0.0  ;;  %v3458_v12 = vmax.f32 %v3426_v39, 0.0  ;;  %v3457_v20 = vmax.f32 %v3425_v47, 0.0  ;;  %v3459_v36 = vmax.f32 %v3427_v40, 0.0 }
0x1758   :  { %v3477_v8 = vpack.c.bf16 %v3461_v41, %v3457_v20  ;;  %v3479_v56 = vpack.c.bf16 %v3463_v50, %v3459_v36  ;;  %v3476_v61 = vpack.c.bf16 %v3460_v53, %v3456_v7  ;;  %v3478_v35 = vpack.c.bf16 %v3462_v55, %v3458_v12 }
0x175a   :  { %3494 = vmatprep.subr.bf16.mxu0 %v3477_v8  ;;  %3537 = vmatprep.subr.bf16.mxu1 %v3479_v56 }
0x175b   :  { %3495 = vmatpush1.bf16.msra.mxu0 %v3476_v61  ;;  %3538 = vmatpush1.bf16.msra.mxu1 %v3478_v35 }
0x175e   :  { %7191 = vmatmul.mubr.msk.bf16.vlgmr.msra.gmra.mrb[52].mxu0 %vm13716_vm9, %v7494_v42  ;;  %7192 = vmatmul.mubr.msk.bf16.vlgmr.msra.gmra.mrb[36].mxu1 %vm13717_vm2, %v7494_v42  ;;  %vm13743_vm9 = vmmov %vm13739_vm6 }
0x175f   :  { %4156 = vmatprep.mubr.bf16.mxu0 %v13708_v16  ;;  %4229 = vmatprep.mubr.bf16.mxu1 %v13708_v16  ;;  %vm13746_vm2 = vmmov %vm13739_vm6 }
0x1831   :  { %v3522_v62 = vpop.f32.mrb[52].mxu0  ;;  %v3565_v54 = vpop.f32.mrb[36].mxu1 }
0x1832   :  { %v3596_v57 = vmul.f32 %v3579_v29, %v3522_v62  ;;  %v3598_v49 = vmul.f32 %v3587_v33, %v3565_v54  ;;  %v3524_v31 = vpop.f32.mrb[53].mxu0  ;;  %v3567_v21 = vpop.f32.mrb[37].mxu1 }
0x1833   :  { %v3597_v46 = vmul.f32 %v3583_v4, %v3524_v31  ;;  %v3599_v26 = vmul.f32 %v3591_v14, %v3567_v21  ;;  %v3526_v52 = vpop.f32.mrb[54].mxu0  ;;  %v3569_v37 = vpop.f32.mrb[38].mxu1 }
0x1834   :  { %v10269_v23 = vadd.f32 %v3596_v57, %v13723_v30  ;;  %v10272_v1 = vadd.f32 %v3598_v49, %v13725_v9  ;;  %v3600_v5 = vmul.f32 %v3579_v29, %v3526_v52  ;;  %v3602_v58 = vmul.f32 %v3587_v33, %v3569_v37  ;;  %v3528_v28 = vpop.f32.mrb[55].mxu0  ;;  %v3571_v24 = vpop.f32.mrb[39].mxu1 }
0x1835   :  { %v3601_v60 = vmul.f32 %v3583_v4, %v3528_v28  ;;  %v3603_v6 = vmul.f32 %v3591_v14, %v3571_v24  ;;  %v10285_v3 = vadd.f32 %v3597_v46, %v13731_v59  ;;  %v10288_v27 = vadd.f32 %v3599_v26, %v13733_v13 }
0x1836   :  { %13724 = vst [vmem:[#allocation42_spill] sm:$0xff] %v10269_v23  ;;  %13726 = vst [vmem:[#allocation43_spill] sm:$0xff] %v10272_v1  ;;  %v10275_v11 = vadd.f32 %v3600_v5, %v13727_v45  ;;  %v10278_v18 = vadd.f32 %v3602_v58, %v13729_v25  ;;  %3882 = vrot.lane.b32.xlu0 %v10272_v1, %s7723_s9  ;;  %3620 = vrot.lane.b32.xlu1 %v10269_v23, %s7709_s28  ;;  %v13772_v5 = vld [vmem:[#allocation17_spill] sm:$0xff] }
0x1837   :  { %13732 = vst [vmem:[#allocation36_spill] sm:$0xff] %v10285_v3  ;;  %13734 = vst [vmem:[#allocation52_spill] sm:$0xff] %v10288_v27  ;;  %v10291_v10 = vadd.f32 %v3601_v60, %v13735_v63  ;;  %v10294_v15 = vadd.f32 %v3603_v6, %v13737_v48 }
0x1838   :  { %13728 = vst [vmem:[#allocation50_spill] sm:$0xff] %v10275_v11  ;;  %13730 = vst [vmem:[#allocation37_spill] sm:$0xff] %v10278_v18  ;;  %v4116_v19 = vpack.c.bf16 %v10275_v11, %v10269_v23  ;;  %v4118_v34 = vpack.c.bf16 %v10278_v18, %v10272_v1 }
0x1839   :  { %13736 = vst [vmem:[#allocation38_spill] sm:$0xff] %v10291_v10  ;;  %13738 = vst [vmem:[#allocation54_spill] sm:$0xff] %v10294_v15  ;;  %v4117_v2 = vpack.c.bf16 %v10291_v10, %v10285_v3  ;;  %v4119_v44 = vpack.c.bf16 %v10294_v15, %v10288_v27 }
0x183a   :  { %3624 = vrot.lane.b32.xlu1 %v10272_v1, %s7709_s28  ;;  %3622 = vrot.lane.b32.xlu0 %v10285_v3, %s7709_s28 }
0x183b   :  { %4124 = vmatprep.subr.bf16.mxu0 %v4117_v2  ;;  %4197 = vmatprep.subr.bf16.mxu1 %v4119_v44 }
0x183c   :  { %4125 = vmatpush1.bf16.msra.mxu0 %v4116_v19  ;;  %4198 = vmatpush1.bf16.msra.mxu1 %v4118_v34 }
0x183e   :  { %3660 = vrot.lane.b32.xlu1 %v10269_v23, %s7708_s27  ;;  %3626 = vrot.lane.b32.xlu0 %v10288_v27, %s7709_s28 }
0x1842   :  { %3664 = vrot.lane.b32.xlu1 %v10272_v1, %s7708_s27  ;;  %3662 = vrot.lane.b32.xlu0 %v10285_v3, %s7708_s27 }
0x1846   :  { %3850 = vrot.lane.b32.xlu1 %v10269_v23, %s7722_s23  ;;  %3852 = vrot.lane.b32.xlu0 %v10285_v3, %s7722_s23 }
0x184a   :  { %3878 = vrot.lane.b32.xlu1 %v10269_v23, %s7723_s9  ;;  %3666 = vrot.lane.b32.xlu0 %v10275_v11, %s7708_s27 }
0x184e   :  { %3654 = vrot.lane.b32.xlu1 %v10288_v27, %s7708_s27  ;;  %3670 = vrot.lane.b32.xlu0 %v10278_v18, %s7708_s27 }
0x1852   :  { %3880 = vrot.lane.b32.xlu1 %v10285_v3, %s7723_s9  ;;  %3890 = vrot.lane.b32.xlu0 %v10278_v18, %s7723_s9 }
0x1856   :  { %3844 = vrot.lane.b32.xlu1 %v10288_v27, %s7722_s23  ;;  %3886 = vrot.lane.b32.xlu0 %v10275_v11, %s7723_s9 }
0x185a   :  { %3628 = vrot.lane.b32.xlu1 %v10275_v11, %s7709_s28  ;;  %3630 = vrot.lane.b32.xlu0 %v10291_v10, %s7709_s28 }
0x185e   :  { %3632 = vrot.lane.b32.xlu1 %v10278_v18, %s7709_s28  ;;  %3634 = vrot.lane.b32.xlu0 %v10294_v15, %s7709_s28 }
0x1862   :  { %3856 = vrot.lane.b32.xlu1 %v10275_v11, %s7722_s23  ;;  %3656 = vrot.lane.b32.xlu0 %v10294_v15, %s7708_s27 }
0x1866   :  { %3668 = vrot.lane.b32.xlu1 %v10291_v10, %s7708_s27  ;;  %3860 = vrot.lane.b32.xlu0 %v10278_v18, %s7722_s23 }
0x186a   :  { %3854 = vrot.lane.b32.xlu1 %v10272_v1, %s7722_s23  ;;  %3858 = vrot.lane.b32.xlu0 %v10291_v10, %s7722_s23 }
0x186e   :  { %3884 = vrot.lane.b32.xlu1 %v10288_v27, %s7723_s9  ;;  %3846 = vrot.lane.b32.xlu0 %v10294_v15, %s7722_s23 }
0x1872   :  { %3888 = vrot.lane.b32.xlu1 %v10291_v10, %s7723_s9  ;;  %3892 = vrot.lane.b32.xlu0 %v10294_v15, %s7723_s9 }
0x18a8   :  { %v10364_v43 = vpop.permute.xlu0 %3882  ;;  %v3621_v39 = vpop.permute.xlu1 %3620 }
0x18ac   :  { %v3625_v47 = vpop.permute.xlu1 %3624  ;;  %v3623_v40 = vpop.permute.xlu0 %3622 }
0x18ad   :  { %v3637_v7 = vsel %vm13739_vm6, %v3623_v40, %v3625_v47  ;;  %v3636_v54 = vsel %vm13746_vm2, %v3621_v39, %v3623_v40  ;;  %vm13747_vm6 = vmmov %vm13742_vm5 }
0x18b0   :  { %v3661_v53 = vpop.permute.xlu1 %3660  ;;  %v3627_v55 = vpop.permute.xlu0 %3626 }
0x18b1   :  { %v3638_v35 = vsel %vm13743_vm9, %v3625_v47, %v3627_v55  ;;  %vm13755_vm9 = vmmov %vm13746_vm2 }
0x18b4   :  { %v3665_v41 = vpop.permute.xlu1 %3664  ;;  %v3663_v50 = vpop.permute.xlu0 %3662 }
0x18b5   :  { %v3672_v12 = vsel %vm13740_vm7, %v3661_v53, %v3663_v50  ;;  %v3673_v8 = vsel %vm13742_vm5, %v3663_v50, %v3665_v41  ;;  %vm13751_vm7 = vmmov %vm13742_vm5 }
0x18b6   :  { %v10370_v36 = vsel %vm9321_vm10, %v3637_v7, %v3672_v12  ;;  %v10382_v38 = vsel %vm9340_vm11, %v3638_v35, %v3673_v8  ;;  %v10390_v4 = vsel %vm9393_vm14, %v3672_v12, %v3637_v7  ;;  %v10402_v46 = vsel %vm9435_vm1, %v3673_v8, %v3638_v35  ;;  %vm13752_vm5 = vmmov %vm13746_vm2 }
0x18b7   :  { %3720 = vrot.lane.b32.xlu0 %v10370_v36, %s7722_s23  ;;  %v3652_v9 = vsel %vm13752_vm5, %v3627_v55, %v3621_v39  ;;  %vm13756_vm2 = vmmov %vm13747_vm6  ;;  %v13771_v55 = vld [vmem:[#allocation15_spill] sm:$0xff]  ;;  %v3813_v21 = vmul.f32 %v10370_v36, %v13772_v5 }
0x18b8   :  { %v10375_v56 = vpop.permute.xlu1 %3850  ;;  %v10377_v61 = vpop.permute.xlu0 %3852 }
0x18bb   :  { %3750 = vrot.lane.b32.xlu0 %v10382_v38, %s7723_s9 }
0x18bc   :  { %v10386_v51 = vpop.permute.xlu1 %3878  ;;  %v3667_v29 = vpop.permute.xlu0 %3666 }
0x18bf   :  { %3992 = vrot.lane.b32.xlu0 %v10390_v4, %s7722_s23 }
0x18c0   :  { %v3655_v14 = vpop.permute.xlu1 %3654  ;;  %v3671_v62 = vpop.permute.xlu0 %3670 }
0x18c1   :  { %v3686_v57 = vsel %vm13747_vm6, %v3655_v14, %v3661_v53  ;;  %v3674_v37 = vsel %vm13751_vm7, %v3665_v41, %v3655_v14  ;;  %vm13758_vm6 = vmmov %vm13756_vm2 }
0x18c2   :  { %v10398_v31 = vsel %vm9357_vm12, %v3636_v54, %v3686_v57  ;;  %v10420_v58 = vsel %vm9361_vm13, %v3652_v9, %v3674_v37  ;;  %v10438_v2 = vsel %vm9399_vm15, %v3686_v57, %v3636_v54  ;;  %vm13759_vm7 = vmmov %vm13752_vm5  ;;  %v10462_v41 = vsel %vm9413_vm0, %v3674_v37, %v3652_v9 }
0x18c3   :  { %3718 = vrot.lane.b32.xlu1 %v10398_v31, %s7722_s23  ;;  %4022 = vrot.lane.b32.xlu0 %v10402_v46, %s7723_s9  ;;  %vm13760_vm5 = vmmov %vm13756_vm2 }
0x18c4   :  { %v10408_v26 = vpop.permute.xlu1 %3880  ;;  %v10410_v52 = vpop.permute.xlu0 %3890 }
0x18c5   :  { %13750 = vst [vmem:[#allocation47_spill] sm:$0xff] %v10410_v52  ;;  %v3895_v17 = vsel %vm2530_vm3, %v10408_v26, %v10364_v43  ;;  %v13778_v52 = vld [vmem:[#allocation20_spill] sm:$0xff] }
0x18c7   :  { %3748 = vrot.lane.b32.xlu1 %v10370_v36, %s7723_s9 }
0x18c8   :  { %v10415_v30 = vpop.permute.xlu1 %3844  ;;  %v10422_v28 = vpop.permute.xlu0 %3886 }
0x18c9   :  { %13754 = vst [vmem:[#allocation63_spill] sm:$0xff] %v10422_v28  ;;  %v3944_v28 = vmul.f32 %v10269_v23, %v13778_v52  ;;  %v13780_v23 = vld [vmem:[#allocation22_spill] sm:$0xff] }
0x18cb   :  { %3706 = vrot.lane.b32.xlu1 %v10420_v58, %s7722_s23 }
0x18cc   :  { %v3629_v24 = vpop.permute.xlu1 %3628  ;;  %v3631_v6 = vpop.permute.xlu0 %3630 }
0x18cf   :  { %3746 = vrot.lane.b32.xlu1 %v10398_v31, %s7723_s9 }
0x18d0   :  { %v3633_v60 = vpop.permute.xlu1 %3632  ;;  %v3635_v25 = vpop.permute.xlu0 %3634 }
0x18d1   :  { %v3640_v13 = vsel %vm13755_vm9, %v3631_v6, %v3633_v60  ;;  %v3641_v34 = vsel %vm13759_vm7, %v3633_v60, %v3635_v25  ;;  %vm13761_vm9 = vmmov %vm13759_vm7 }
0x18d2   :  { %v3653_v53 = vsel %vm13761_vm9, %v3635_v25, %v3629_v24 }
0x18d3   :  { %3722 = vrot.lane.b32.xlu1 %v10382_v38, %s7722_s23 }
0x18d4   :  { %v10430_v45 = vpop.permute.xlu1 %3856  ;;  %v3657_v39 = vpop.permute.xlu0 %3656 }
0x18d5   :  { %v3677_v40 = vsel %vm13760_vm5, %v3671_v62, %v3657_v39  ;;  %v3687_v7 = vsel %vm13756_vm2, %v3657_v39, %v3667_v29  ;;  %v13768_v39 = vld [vmem:[#allocation55_spill] sm:$0xff]  ;;  %vm13774_vm5 = vcmp.eq.s32.totalorder %v13773_v0, 0 }
0x18d6   :  { %v10468_v50 = vsel %vm9361_vm13, %v3653_v53, %v3677_v40 }
0x18d7   :  { %3752 = vrot.lane.b32.xlu1 %v10420_v58, %s7723_s9 }
0x18d8   :  { %v3669_v59 = vpop.permute.xlu1 %3668  ;;  %v10526_v54 = vpop.permute.xlu0 %3860 }
0x18d9   :  { %v3675_v63 = vsel %vm13756_vm2, %v3667_v29, %v3669_v59  ;;  %v3676_v19 = vsel %vm13758_vm6, %v3669_v59, %v3671_v62  ;;  %vm13763_vm6 = vmmov %vm13759_vm7  ;;  %v10514_v62 = vsel %vm9413_vm0, %v3677_v40, %v3653_v53  ;;  %vm13769_vm7 = vcmp.eq.s32.totalorder %v13768_v39, 0  ;;  %v13770_v53 = vld [vmem:[#allocation49_spill] sm:$0xff] }
0x18da   :  { %v10442_v44 = vsel %vm9321_vm10, %v3640_v13, %v3675_v63  ;;  %v10452_v47 = vsel %vm9340_vm11, %v3641_v34, %v3676_v19  ;;  %v3639_v12 = vsel %vm13763_vm6, %v3629_v24, %v3631_v6  ;;  %v10494_v35 = vsel %vm9393_vm14, %v3675_v63, %v3640_v13  ;;  %13765 = vst [vmem:[#allocation61_spill] sm:$0xff] %v10514_v62  ;;  %vm13776_vm9 = vmmov %vm13769_vm7 }
0x18db   :  { %3990 = vrot.lane.b32.xlu1 %v10438_v2, %s7722_s23  ;;  %3726 = vrot.lane.b32.xlu0 %v10442_v44, %s7722_s23  ;;  %v10478_v8 = vsel %vm9357_vm12, %v3639_v12, %v3687_v7  ;;  %v10500_v29 = vsel %vm9399_vm15, %v3687_v7, %v3639_v12  ;;  %v10506_v14 = vsel %vm9435_vm1, %v3676_v19, %v3641_v34  ;;  %vm13779_vm2 = vcmp.eq.s32.totalorder %v13773_v0, 15  ;;  %vm13783_vm6 = vmmov %vm13774_vm5 }
0x18dc   :  { %13764 = vst [vmem:[#allocation59_spill] sm:$0xff] %v10506_v14  ;;  %v10528_v57 = vpop.permute.xlu0 %3858  ;;  %v10530_v37 = vpop.permute.xlu1 %3854 }
0x18df   :  { %4020 = vrot.lane.b32.xlu1 %v10390_v4, %s7723_s9  ;;  %3758 = vrot.lane.b32.xlu0 %v10452_v47, %s7723_s9 }
0x18e0   :  { %v10532_v9 = vpop.permute.xlu0 %3846  ;;  %v10534_v24 = vpop.permute.xlu1 %3884 }
0x18e3   :  { %3978 = vrot.lane.b32.xlu1 %v10462_v41, %s7722_s23  ;;  %3708 = vrot.lane.b32.xlu0 %v10468_v50, %s7722_s23 }
0x18e4   :  { %v10536_v60 = vpop.permute.xlu0 %3892  ;;  %v10538_v6 = vpop.permute.xlu1 %3888 }
0x18e5   :  { %13766 = vst [vmem:[#allocation60_spill] sm:$0xff] %v10536_v60  ;;  %13767 = vst [vmem:[#allocation40_spill] sm:$0xff] %v10538_v6 }
0x18e7   :  { %4018 = vrot.lane.b32.xlu1 %v10438_v2, %s7723_s9  ;;  %3754 = vrot.lane.b32.xlu0 %v10478_v8, %s7723_s9 }
0x18eb   :  { %3724 = vrot.lane.b32.xlu1 %v10478_v8, %s7722_s23  ;;  %3728 = vrot.lane.b32.xlu0 %v10452_v47, %s7722_s23 }
0x18ef   :  { %3756 = vrot.lane.b32.xlu1 %v10442_v44, %s7723_s9  ;;  %3760 = vrot.lane.b32.xlu0 %v10468_v50, %s7723_s9 }
0x18f3   :  { %3994 = vrot.lane.b32.xlu1 %v10402_v46, %s7722_s23  ;;  %3998 = vrot.lane.b32.xlu0 %v10494_v35, %s7722_s23 }
0x18f7   :  { %3996 = vrot.lane.b32.xlu1 %v10500_v29, %s7722_s23  ;;  %4030 = vrot.lane.b32.xlu0 %v10506_v14, %s7723_s9 }
0x18fb   :  { %4028 = vrot.lane.b32.xlu1 %v10494_v35, %s7723_s9  ;;  %3980 = vrot.lane.b32.xlu0 %v10514_v62, %s7722_s23 }
0x18ff   :  { %4024 = vrot.lane.b32.xlu1 %v10462_v41, %s7723_s9  ;;  %4026 = vrot.lane.b32.xlu0 %v10500_v29, %s7723_s9 }
0x1903   :  { %4000 = vrot.lane.b32.xlu0 %v10506_v14, %s7722_s23 }
0x1907   :  { %4032 = vrot.lane.b32.xlu0 %v10514_v62, %s7723_s9  ;;  %v13777_v62 = vld [vmem:[#allocation19_spill] sm:$0xff] }
0x1929   :  { %v10540_v25 = vpop.permute.xlu0 %3720 }
0x192d   :  { %v3751_v13 = vpop.permute.xlu0 %3750 }
0x1931   :  { %v10558_v32 = vpop.permute.xlu0 %3992 }
0x1935   :  { %v3719_v59 = vpop.permute.xlu1 %3718 }
0x1936   :  { %v3730_v19 = vsel %vm2497_vm4, %v3719_v59, %v10540_v25 }
0x1939   :  { %v3749_v63 = vpop.permute.xlu1 %3748 }
0x193a   :  { %v3763_v34 = vsel %vm2530_vm3, %v3749_v63, %v3751_v13 }
0x193b   :  { %v3781_v40 = vsel %vm13769_vm7, %v3763_v34, %v3730_v19  ;;  %v3789_v33 = vsel %vm2246_vm8, %v3730_v19, %v3763_v34  ;;  %v3862_v19 = vsel %vm2497_vm4, %v10375_v56, %v10377_v61  ;;  %v13775_v34 = vld [vmem:[#allocation3_spill] sm:$0xff]  ;;  %vm13786_vm7 = vmmov %vm13779_vm2 }
0x193c   :  { %v3797_v7 = vmul.f32 %v3781_v40, %v13770_v53 }
0x193d   :  { %v3707_v12 = vpop.permute.xlu1 %3706 }
0x193e   :  { %v3805_v48 = vadd.f32 %v3797_v7, %v13771_v55  ;;  %v3744_v42 = vsel %vm2497_vm4, %v3707_v12, %v3719_v59  ;;  %v3829_v59 = vmul.f32 %v3789_v33, %v13775_v34  ;;  %v3876_v33 = vsel %vm2497_vm4, %v10415_v30, %v10375_v56 }
0x1940   :  { %v3821_v40 = vadd.f32 %v3813_v21, %v3805_v48  ;;  %v10571_v48 = vpop.permute.xlu0 %4022 }
0x1941   :  { %v3747_v49 = vpop.permute.xlu1 %3746 }
0x1942   :  { %v3762_v20 = vsel %vm2530_vm3, %v3747_v49, %v3749_v63  ;;  %v3913_v63 = vsel %vm13776_vm9, %v3895_v17, %v3862_v19  ;;  %v3837_v16 = vadd.f32 %v3829_v59, %v3821_v40 }
0x1943   :  { %v3780_v7 = vsel %vm13774_vm5, %v3762_v20, %v3744_v42  ;;  %v3929_v21 = vmul.f32 %v3913_v63, %v13777_v62  ;;  %v3788_v40 = vsel %vm13779_vm2, %v3744_v42, %v3762_v20  ;;  %v10586_v63 = vmul.f32 %v10272_v1, %v13778_v52  ;;  %vm13790_vm5 = vmmov %vm13776_vm9  ;;  %v13795_v1 = vld [vmem:[#allocation23_spill] sm:$0xff] }
0x1944   :  { %v3796_v36 = vmul.f32 %v3780_v7, %v13770_v53  ;;  %v3812_v7 = vmul.f32 %v10398_v31, %v13772_v5  ;;  %v10590_v31 = vmul.f32 %v10288_v27, %v13778_v52  ;;  %v10603_v42 = vmul.f32 %v10291_v10, %v13780_v23  ;;  %v13784_v10 = vld [vmem:[#allocation28_spill] sm:$0xff] }
0x1945   :  { %v3723_v22 = vpop.permute.xlu1 %3722  ;;  %v3937_v6 = vadd.f32 %v3929_v21, %v3837_v16  ;;  %v3894_v16 = vsel %vm2530_vm3, %v10386_v51, %v10408_v26  ;;  %v10611_v21 = vmul.f32 %v10294_v15, %v13780_v23  ;;  %v3921_v26 = vsel %vm2246_vm8, %v3862_v19, %v3895_v17 }
0x1946   :  { %v3804_v14 = vadd.f32 %v3796_v36, %v13771_v55  ;;  %v3945_v36 = vmul.f32 %v10285_v3, %v13778_v52  ;;  %v10594_v55 = vmul.f32 %v10275_v11, %v13780_v23  ;;  %v3912_v52 = vsel %vm13783_vm6, %v3894_v16, %v3876_v33 }
0x1947   :  { %13782 = vst [vmem:[#allocation64_spill] sm:$0xff] %v10611_v21  ;;  %v3828_v27 = vmul.f32 %v3788_v40, %v13775_v34  ;;  %v10626_v3 = vmul.f32 %v10402_v46, %v13784_v10  ;;  %v10632_v15 = vmul.f32 %v10420_v58, %v13772_v5  ;;  %v10636_v17 = vmul.f32 %v10438_v2, %v13784_v10  ;;  %v13788_v40 = vld [vmem:[#allocation24_spill] sm:$0xff]  ;;  %v13789_v2 = vld [vmem:[#allocation14_spill] sm:$0xff] }
0x1948   :  { %v3820_v59 = vadd.f32 %v3812_v7, %v3804_v14  ;;  %v10607_v14 = vmul.f32 %v10278_v18, %v13780_v23  ;;  %v10615_v7 = vmul.f32 %v10382_v38, %v13772_v5  ;;  %v4085_v18 = vmul.f32 %v10390_v4, %v13784_v10 }
0x1949   :  { %v3753_v60 = vpop.permute.xlu1 %3752  ;;  %13785 = vst [vmem:[#allocation46_spill] sm:$0xff] %v10626_v3  ;;  %v3920_v23 = vsel %vm13786_vm7, %v3876_v33, %v3894_v16  ;;  %v3953_v38 = vadd.f32 %v3945_v36, %v3937_v6  ;;  %v10640_v19 = vmul.f32 %v10462_v41, %v13784_v10  ;;  %v3961_v46 = vmul.f32 %v3921_v26, %v13788_v40  ;;  %v13793_v26 = vld [vmem:[#allocation58_spill] sm:$0xff] }
0x194a   :  { %13781 = vst [vmem:[#allocation62_spill] sm:$0xff] %v10607_v14  ;;  %v3836_v4 = vadd.f32 %v3828_v27, %v3820_v59  ;;  %v3928_v11 = vmul.f32 %v3912_v52, %v13777_v62  ;;  %v3764_v33 = vsel %vm2530_vm3, %v3751_v13, %v3753_v60  ;;  %v3778_v6 = vsel %vm2530_vm3, %v3753_v60, %v3747_v49  ;;  %v13791_v13 = vld [vmem:[#allocation57_spill] sm:$0xff] }
0x194b   :  { %13787 = vst [vmem:[#allocation41_spill] sm:$0xff] %v10640_v19  ;;  %v3960_v16 = vmul.f32 %v3920_v23, %v13788_v40  ;;  %v10651_v5 = vmul.f32 %v10468_v50, %v13789_v2  ;;  %v3731_v49 = vsel %vm2497_vm4, %v10540_v25, %v3723_v22  ;;  %v3732_v41 = vsel %vm2497_vm4, %v3723_v22, %v3707_v12 }
0x194c   :  { %v3969_v60 = vadd.f32 %v3961_v46, %v3953_v38  ;;  %v3936_v50 = vadd.f32 %v3928_v11, %v3836_v4  ;;  %vm13792_vm9 = vcmp.eq.s32.totalorder %v13791_v13, 0  ;;  %vm13794_vm2 = vcmp.eq.s32.totalorder %v13793_v26, 0  ;;  %v13796_v11 = vld [vmem:[#allocation25_spill] sm:$0xff] }
0x194d   :  { %v3991_v20 = vpop.permute.xlu1 %3990  ;;  %v10599_v56 = vpop.permute.xlu0 %3726  ;;  %v3782_v59 = vsel %vm13792_vm9, %v3764_v33, %v3731_v49  ;;  %v3783_v10 = vsel %vm13794_vm2, %v3778_v6, %v3732_v41  ;;  %v10675_v25 = vmul.f32 %v10442_v44, %v13789_v2  ;;  %v10679_v22 = vmul.f32 %v10452_v47, %v13789_v2  ;;  %vm13799_vm6 = vmmov %vm13792_vm9 }
0x194e   :  { %v10655_v27 = vsel %vm2497_vm4, %v3991_v20, %v10558_v32  ;;  %v10683_v12 = vmul.f32 %v10478_v8, %v13789_v2  ;;  %v10687_v38 = vmul.f32 %v10500_v29, %v13796_v11  ;;  %v3896_v46 = vsel %vm2530_vm3, %v10364_v43, %v10534_v24  ;;  %vm13800_vm7 = vmmov %vm13794_vm2 }
0x194f   :  { %v3910_v44 = vsel %vm2530_vm3, %v10534_v24, %v10386_v51  ;;  %v10699_v47 = vmul.f32 %v10494_v35, %v13796_v11  ;;  %v3863_v29 = vsel %vm2497_vm4, %v10377_v61, %v10530_v37  ;;  %v3864_v2 = vsel %vm2497_vm4, %v10530_v37, %v10415_v30 }
0x1950   :  { %13797 = vst [vmem:[#allocation4_spill] sm:$0xff] %v10687_v38  ;;  %v3798_v43 = vmul.f32 %v3782_v59, %v13770_v53  ;;  %v3799_v38 = vmul.f32 %v3783_v10, %v13770_v53  ;;  %v3865_v51 = vsel %vm2497_vm4, %v10430_v45, %v10528_v57  ;;  %v10715_v35 = vsel %vm2497_vm4, %v10528_v57, %v10526_v54  ;;  %v13802_v57 = vld [vmem:[#allocation40_spill] sm:$0xff]  ;;  %v13805_v53 = vld [vmem:[#allocation15_spill] sm:$0xff] }
0x1951   :  { %v4021_v36 = vpop.permute.xlu1 %4020  ;;  %v10646_v58 = vpop.permute.xlu0 %3758  ;;  %13798 = vst [vmem:[#allocation5_spill] sm:$0xff] %v10699_v47  ;;  %v3952_v24 = vadd.f32 %v3944_v28, %v3936_v50  ;;  %v3914_v61 = vsel %vm13799_vm6, %v3896_v46, %v3863_v29  ;;  %v3915_v30 = vsel %vm13800_vm7, %v3910_v44, %v3864_v2  ;;  %v10728_v37 = vsel %vm2497_vm4, %v10526_v54, %v10532_v9  ;;  %v13803_v28 = vld [vmem:[#allocation63_spill] sm:$0xff] }
0x1952   :  { %v10659_v52 = vsel %vm2530_vm3, %v4021_v36, %v10571_v48  ;;  %v13804_v50 = vld [vmem:[#allocation47_spill] sm:$0xff]  ;;  %v3806_v11 = vadd.f32 %v3798_v43, %v13805_v53  ;;  %v3807_v19 = vadd.f32 %v3799_v38, %v13805_v53  ;;  %vm13806_vm9 = vcmp.eq.s32.totalorder %v13773_v0, 0 }
0x1953   :  { %v4053_v23 = vsel %vm13790_vm5, %v10659_v52, %v10655_v27  ;;  %vm13801_vm5 = vcmp.eq.s32.totalorder %v13791_v13, 15  ;;  %v3898_v59 = vsel %vm2530_vm3, %v13802_v57, %v13804_v50  ;;  %vm13807_vm2 = vcmp.eq.s32.totalorder %v13793_v26, 15  ;;  %vm13808_vm6 = vmmov %vm13806_vm9 }
0x1954   :  { %v4069_v21 = vmul.f32 %v4053_v23, %v13795_v1  ;;  %v3922_v10 = vsel %vm13801_vm5, %v3863_v29, %v3896_v46  ;;  %v3877_v29 = vsel %vm2497_vm4, %v10532_v9, %v10430_v45  ;;  %v3968_v14 = vadd.f32 %v3960_v16, %v3952_v24 }
0x1955   :  { %v10689_v4 = vpop.permute.xlu1 %3978  ;;  %v3709_v23 = vpop.permute.xlu0 %3708  ;;  %v3931_v47 = vmul.f32 %v3915_v30, %v13777_v62  ;;  %v10761_v45 = vmul.f32 %v3922_v10, %v13788_v40  ;;  %vm13809_vm7 = vcmp.eq.s32.totalorder %v13768_v39, 0  ;;  %vm13810_vm5 = vcmp.eq.s32.totalorder %v13773_v0, 15  ;;  %v13812_v10 = vld [vmem:[#allocation60_spill] sm:$0xff] }
0x1956   :  { %v4077_v8 = vadd.f32 %v4069_v21, %v3969_v60  ;;  %v3917_v38 = vsel %vm13809_vm7, %v3898_v59, %v3865_v51  ;;  %v3823_v53 = vadd.f32 %v10632_v15, %v3807_v19 }
0x1958   :  { %v10717_v21 = vadd.f32 %v4085_v18, %v4077_v8  ;;  %v3897_v18 = vsel %vm2530_vm3, %v13803_v28, %v13802_v57  ;;  %v10740_v8 = vsel %vm2497_vm4, %v10689_v4, %v3991_v20  ;;  %v3923_v20 = vsel %vm13807_vm2, %v3864_v2, %v3910_v44 }
0x1959   :  { %v10730_v60 = vpop.permute.xlu1 %4018  ;;  %v3755_v54 = vpop.permute.xlu0 %3754  ;;  %v3916_v9 = vsel %vm13808_vm6, %v3897_v18, %v3877_v29  ;;  %v3924_v2 = vsel %vm13810_vm5, %v3877_v29, %v3897_v18  ;;  %v3791_v44 = vsel %vm13807_vm2, %v3732_v41, %v3778_v6  ;;  %v10774_v30 = vmul.f32 %v3923_v20, %v13788_v40  ;;  %v13815_v41 = vld [vmem:[#allocation21_spill] sm:$0xff] }
0x195a   :  { %v10744_v46 = vsel %vm2530_vm3, %v10730_v60, %v4021_v36  ;;  %v3930_v36 = vmul.f32 %v3914_v61, %v13777_v62  ;;  %v3822_v62 = vadd.f32 %v10615_v7, %v3806_v11  ;;  %v3925_v18 = vsel %vm2246_vm8, %v3865_v51, %v3898_v59 }
0x195b   :  { %v4052_v57 = vsel %vm13806_vm9, %v10744_v46, %v10740_v8  ;;  %vm13811_vm9 = vcmp.eq.s32.totalorder %v13791_v13, 15  ;;  %v3831_v7 = vmul.f32 %v3791_v44, %v13775_v34  ;;  %vm13820_vm2 = vcmp.eq.s32.totalorder %v13793_v26, 0 }
0x195c   :  { %v4068_v3 = vmul.f32 %v4052_v57, %v13795_v1  ;;  %v3790_v16 = vsel %vm13811_vm9, %v3731_v49, %v3764_v33  ;;  %v3899_v57 = vsel %vm2530_vm3, %v13804_v50, %v13812_v10  ;;  %v13813_v33 = vld [vmem:[#allocation18_spill] sm:$0xff]  ;;  %v10794_v50 = vmul.f32 %v3924_v2, %v13815_v41 }
0x195d   :  { %v3725_v43 = vpop.permute.xlu1 %3724  ;;  %v3729_v61 = vpop.permute.xlu0 %3728  ;;  %v10784_v49 = vmul.f32 %v3916_v9, %v13813_v33  ;;  %v3933_v6 = vmul.f32 %v3917_v38, %v13813_v33  ;;  %v3830_v15 = vmul.f32 %v3790_v16, %v13775_v34  ;;  %v3839_v20 = vadd.f32 %v3831_v7, %v3823_v53 }
0x195e   :  { %v4076_v24 = vadd.f32 %v4068_v3, %v3968_v14  ;;  %v3911_v3 = vsel %vm2530_vm3, %v13812_v10, %v13803_v28  ;;  %13816 = vst [vmem:[#allocation7_spill] sm:$0xff] %v10794_v50  ;;  %v3733_v11 = vsel %vm2497_vm4, %v3725_v43, %v10599_v56  ;;  %v3745_v51 = vsel %vm2497_vm4, %v3709_v23, %v3725_v43  ;;  %v13817_v43 = vld [vmem:[#allocation10_spill] sm:$0xff] }
0x195f   :  { %v3838_v29 = vadd.f32 %v3830_v15, %v3822_v62  ;;  %v3734_v2 = vsel %vm2497_vm4, %v10599_v56, %v3729_v61  ;;  %v3735_v16 = vsel %vm2497_vm4, %v3729_v61, %v3709_v23  ;;  %vm13819_vm9 = vcmp.eq.s32.totalorder %v13791_v13, 0 }
0x1960   :  { %v10790_v14 = vadd.f32 %v10636_v17, %v4076_v24 }
0x1961   :  { %v3757_v19 = vpop.permute.xlu1 %3756  ;;  %v3761_v59 = vpop.permute.xlu0 %3760  ;;  %v3938_v40 = vadd.f32 %v3930_v36, %v3838_v29 }
0x1962   :  { %13814 = vst [vmem:[#allocation6_spill] sm:$0xff] %v10790_v14  ;;  %v3765_v28 = vsel %vm2530_vm3, %v3755_v54, %v3757_v19  ;;  %v3766_v17 = vsel %vm2530_vm3, %v3757_v19, %v10646_v58  ;;  %v3767_v53 = vsel %vm2530_vm3, %v10646_v58, %v3761_v59  ;;  %v3779_v15 = vsel %vm2530_vm3, %v3761_v59, %v3755_v54  ;;  %v13818_v19 = vld [vmem:[#allocation51_spill] sm:$0xff] }
0x1963   :  { %v3784_v9 = vsel %vm13808_vm6, %v3765_v28, %v3745_v51  ;;  %v3785_v38 = vsel %vm13809_vm7, %v3766_v17, %v3733_v11  ;;  %v3792_v10 = vsel %vm13810_vm5, %v3745_v51, %v3765_v28  ;;  %v3793_v62 = vsel %vm2246_vm8, %v3733_v11, %v3766_v17  ;;  %vm13821_vm6 = vmmov %vm13819_vm9 }
0x1964   :  { %v3800_v44 = vmul.f32 %v3784_v9, %v13817_v43  ;;  %v3801_v24 = vmul.f32 %v3785_v38, %v13817_v43  ;;  %v3786_v61 = vsel %vm13819_vm9, %v3767_v53, %v3734_v2  ;;  %v3787_v9 = vsel %vm13820_vm2, %v3779_v15, %v3735_v16  ;;  %vm13823_vm7 = vmmov %vm13820_vm2 }
0x1965   :  { %v3995_v7 = vpop.permute.xlu1 %3994  ;;  %v10826_v51 = vpop.permute.xlu0 %3998  ;;  %v3965_v11 = vmul.f32 %v3925_v18, %v13815_v41  ;;  %v3918_v58 = vsel %vm13821_vm6, %v3899_v57, %v10715_v35  ;;  %v3802_v54 = vmul.f32 %v3786_v61, %v13817_v43  ;;  %v3803_v28 = vmul.f32 %v3787_v9, %v13817_v43 }
0x1966   :  { %v3808_v56 = vadd.f32 %v3800_v44, %v13818_v19  ;;  %v3809_v23 = vadd.f32 %v3801_v24, %v13818_v19  ;;  %v3939_v17 = vadd.f32 %v3931_v47, %v3839_v20  ;;  %v13822_v44 = vld [vmem:[#allocation16_spill] sm:$0xff]  ;;  %v3919_v61 = vsel %vm13823_vm7, %v3911_v3, %v10728_v37 }
0x1967   :  { %v3833_v24 = vmul.f32 %v3793_v62, %v13822_v44  ;;  %v3832_v34 = vmul.f32 %v3792_v10, %v13822_v44  ;;  %v3810_v18 = vadd.f32 %v3802_v54, %v13818_v19  ;;  %v3811_v14 = vadd.f32 %v3803_v28, %v13818_v19 }
0x1968   :  { %v3824_v59 = vadd.f32 %v10683_v12, %v3808_v56  ;;  %v3825_v38 = vadd.f32 %v10675_v25, %v3809_v23  ;;  %vm13824_vm5 = vcmp.eq.s32.totalorder %v13791_v13, 15  ;;  %vm13825_vm9 = vcmp.eq.s32.totalorder %v13793_v26, 15 }
0x1969   :  { %v3997_v50 = vpop.permute.xlu1 %3996  ;;  %v3926_v12 = vsel %vm13824_vm5, %v10715_v35, %v3899_v57  ;;  %v10849_v25 = vsel %vm13825_vm9, %v10728_v37, %v3911_v3  ;;  %v10851_v36 = vpop.permute.xlu0 %4030  ;;  %v3934_v29 = vmul.f32 %v3918_v58, %v13813_v33  ;;  %v4061_v20 = vsel %vm2246_vm8, %v10655_v27, %v10659_v52  ;;  %vm13826_vm2 = vmmov %vm13824_vm5  ;;  %v13830_v58 = vld [vmem:[#allocation26_spill] sm:$0xff] }
0x196a   :  { %v3841_v47 = vadd.f32 %v3833_v24, %v3825_v38  ;;  %v3840_v10 = vadd.f32 %v3832_v34, %v3824_v59  ;;  %v3794_v62 = vsel %vm13826_vm2, %v3734_v2, %v3767_v53  ;;  %vm13827_vm6 = vmmov %vm13825_vm9  ;;  %v3826_v37 = vadd.f32 %v10679_v22, %v3810_v18 }
0x196b   :  { %v3795_v57 = vsel %vm13827_vm6, %v3735_v16, %v3779_v15  ;;  %v3955_v3 = vadd.f32 %v10590_v31, %v3939_v17  ;;  %v3935_v56 = vmul.f32 %v3919_v61, %v13813_v33  ;;  %v10866_v23 = vmul.f32 %v3926_v12, %v13815_v41  ;;  %v13828_v16 = vld [vmem:[#allocation27_spill] sm:$0xff] }
0x196c   :  { %v3941_v35 = vadd.f32 %v3933_v6, %v3841_v47  ;;  %v3827_v9 = vadd.f32 %v10651_v5, %v3811_v14  ;;  %v3954_v34 = vadd.f32 %v10586_v63, %v3938_v40  ;;  %v3834_v52 = vmul.f32 %v3794_v62, %v13822_v44  ;;  %v13834_v62 = vld [vmem:[#allocation5_spill] sm:$0xff] }
0x196d   :  { %v4029_v27 = vpop.permute.xlu1 %4028  ;;  %v4005_v6 = vsel %vm2497_vm4, %v3997_v50, %v10826_v51  ;;  %v3981_v22 = vpop.permute.xlu0 %3980  ;;  %v4101_v53 = vmul.f32 %v4061_v20, %v13828_v16  ;;  %v3940_v15 = vadd.f32 %v10784_v49, %v3840_v10  ;;  %v3835_v5 = vmul.f32 %v3795_v57, %v13822_v44  ;;  %v13835_v57 = vld [vmem:[#allocation48_spill] sm:$0xff] }
0x196e   :  { %v3957_v2 = vadd.f32 %v10603_v42, %v3941_v35  ;;  %v4038_v31 = vsel %vm2530_vm3, %v4029_v27, %v10851_v36  ;;  %vm13829_vm7 = vcmp.eq.s32.totalorder %v13768_v39, 0  ;;  %v3842_v40 = vadd.f32 %v3834_v52, %v3826_v37 }
0x196f   :  { %v4057_v63 = vsel %vm13829_vm7, %v4038_v31, %v4005_v6  ;;  %v3971_v28 = vadd.f32 %v10774_v30, %v3955_v3  ;;  %v3843_v42 = vadd.f32 %v3835_v5, %v3827_v9  ;;  %v4003_v17 = vsel %vm2497_vm4, %v10558_v32, %v3995_v7 }
0x1970   :  { %v3973_v14 = vadd.f32 %v3965_v11, %v3957_v2  ;;  %v4073_v54 = vmul.f32 %v4057_v63, %v13830_v58  ;;  %v3970_v38 = vadd.f32 %v10761_v45, %v3954_v34  ;;  %v4109_v49 = vadd.f32 %v4101_v53, %v10717_v21  ;;  %v13841_v53 = vld [vmem:[#allocation41_spill] sm:$0xff]  ;;  %v13842_v63 = vld [vmem:[#allocation6_spill] sm:$0xff] }
0x1971   :  { %v4025_v59 = vpop.permute.xlu1 %4024  ;;  %v4004_v24 = vsel %vm2497_vm4, %v3995_v7, %v10689_v4  ;;  %v4027_v30 = vpop.permute.xlu0 %4026  ;;  %v4065_v12 = vsel %vm2246_vm8, %v4005_v6, %v4038_v31  ;;  %vm13831_vm5 = vcmp.eq.s32.totalorder %v13791_v13, 0  ;;  %vm13832_vm9 = vcmp.eq.s32.totalorder %v13793_v26, 0  ;;  %v13840_v6 = vld [vmem:[#allocation62_spill] sm:$0xff] }
0x1972   :  { %v4081_v18 = vadd.f32 %v4073_v54, %v3973_v14  ;;  %v4036_v11 = vsel %vm2530_vm3, %v10571_v48, %v4025_v59  ;;  %v4050_v61 = vsel %vm2530_vm3, %v4025_v59, %v10730_v60  ;;  %v3956_v45 = vadd.f32 %v10594_v55, %v3940_v15  ;;  %v13843_v54 = vld [vmem:[#allocation64_spill] sm:$0xff] }
0x1973   :  { %v4054_v32 = vsel %vm13831_vm5, %v4036_v11, %v4003_v17  ;;  %v4055_v21 = vsel %vm13832_vm9, %v4050_v61, %v4004_v24  ;;  %vm13833_vm2 = vcmp.eq.s32.totalorder %v13773_v0, 15  ;;  %v3942_v4 = vadd.f32 %v3934_v29, %v3842_v40  ;;  %v13837_v29 = vld [vmem:[#allocation7_spill] sm:$0xff] }
0x1974   :  { %v4060_v48 = vsel %vm13833_vm2, %v10740_v8, %v10744_v46  ;;  %v4070_v60 = vmul.f32 %v4054_v32, %v13795_v1  ;;  %v4071_v7 = vmul.f32 %v4055_v21, %v13795_v1  ;;  %v3943_v47 = vadd.f32 %v3935_v56, %v3843_v42  ;;  %vm13838_vm7 = vmmov %vm13833_vm2  ;;  %v13845_v32 = vld [vmem:[#allocation4_spill] sm:$0xff] }
0x1975   :  { %v4017_v20 = vsel %vm2497_vm4, %v3981_v22, %v3997_v50  ;;  %v4037_v10 = vsel %vm2530_vm3, %v4027_v30, %v4029_v27  ;;  %v4097_v35 = vadd.f32 %v13834_v62, %v4081_v18  ;;  %v4105_v37 = vmul.f32 %v4065_v12, %v13835_v57  ;;  %v4001_v8 = vpop.permute.xlu0 %4000  ;;  %v13839_v27 = vld [vmem:[#allocation46_spill] sm:$0xff] }
0x1976   :  { %v4078_v55 = vadd.f32 %v4070_v60, %v3970_v38  ;;  %v4079_v3 = vadd.f32 %v4071_v7, %v3971_v28  ;;  %vm13836_vm6 = vcmp.eq.s32.totalorder %v13773_v0, 0  ;;  %v4100_v46 = vmul.f32 %v4060_v48, %v13828_v16  ;;  %v13849_v7 = vld [vmem:[#allocation25_spill] sm:$0xff] }
0x1977   :  { %v4056_v9 = vsel %vm13836_vm6, %v4037_v10, %v4017_v20  ;;  %v3972_v34 = vadd.f32 %v13837_v29, %v3956_v45  ;;  %v4064_v56 = vsel %vm13838_vm7, %v4017_v20, %v4037_v10  ;;  %v3958_v2 = vadd.f32 %v13840_v6, %v3942_v4 }
0x1978   :  { %v4072_v50 = vmul.f32 %v4056_v9, %v13830_v58  ;;  %v4094_v52 = vadd.f32 %v13839_v27, %v4078_v55  ;;  %v4113_v31 = vadd.f32 %v4105_v37, %v4097_v35  ;;  %v4095_v15 = vadd.f32 %v13841_v53, %v4079_v3  ;;  %v7644_v27 = vld [vmem:[%s13223_s13] sm:$0xff]   ;;  %v7646_v53 = vld [vmem:[%s13223_s13 + $0x10] sm:$0xff]  }
0x1979   :  { %v3967_v5 = vmul.f32 %v10849_v25, %v13815_v41  ;;  %v4108_v40 = vadd.f32 %v4100_v46, %v13842_v63  ;;  %v3959_v28 = vadd.f32 %v13843_v54, %v3943_v47  ;;  %vm13844_vm5 = vcmp.eq.s32.totalorder %v13791_v13, 15  ;;  %v4033_v18 = vpop.permute.xlu0 %4032 }
0x197a   :  { %v4080_v14 = vadd.f32 %v4072_v50, %v3972_v34  ;;  %v4062_v42 = vsel %vm13844_vm5, %v4003_v17, %v4036_v11  ;;  %v4104_v59 = vmul.f32 %v4064_v56, %v13835_v57  ;;  %v4006_v38 = vsel %vm2497_vm4, %v10826_v51, %v4001_v8  ;;  %vm13851_vm7 = vmmov %vm13844_vm5 }
0x197b   :  { %v4121_v12 = vpack.c.bf16 %v4113_v31, %v4109_v49  ;;  %v4007_v45 = vsel %vm2497_vm4, %v4001_v8, %v3981_v22  ;;  %v4039_v25 = vsel %vm2530_vm3, %v10851_v36, %v4033_v18  ;;  %v4051_v48 = vsel %vm2530_vm3, %v4033_v18, %v4027_v30  ;;  %v13850_v30 = vld [vmem:[#allocation61_spill] sm:$0xff] }
0x197c   :  { %v4096_v21 = vadd.f32 %v13845_v32, %v4080_v14  ;;  %vm13846_vm9 = vcmp.eq.s32.totalorder %v13793_v26, 15  ;;  %v3974_v17 = vadd.f32 %v10866_v23, %v3958_v2  ;;  %vm13847_vm2 = vcmp.eq.s32.totalorder %v13791_v13, 0 }
0x197d   :  { %v4063_v4 = vsel %vm13846_vm9, %v4004_v24, %v4050_v61  ;;  %v4058_v11 = vsel %vm13847_vm2, %v4039_v25, %v4006_v38  ;;  %vm13848_vm6 = vcmp.eq.s32.totalorder %v13793_v26, 0  ;;  %4126 = vmatprep.subr.bf16.mxu0 %v4121_v12  ;;  %v3975_v60 = vadd.f32 %v3967_v5, %v3959_v28  ;;  %vm13852_vm5 = vmmov %vm13846_vm9  ;;  %v13853_v61 = vld [vmem:[#allocation59_spill] sm:$0xff] }
0x197e   :  { %v4059_v51 = vsel %vm13848_vm6, %v4051_v48, %v4007_v45  ;;  %v4112_v49 = vadd.f32 %v4104_v59, %v4096_v21  ;;  %v4074_v22 = vmul.f32 %v4058_v11, %v13830_v58  ;;  %v4091_v47 = vmul.f32 %v13850_v30, %v13849_v7 }
0x197f   :  { %v4075_v36 = vmul.f32 %v4059_v51, %v13830_v58  ;;  %v4066_v24 = vsel %vm13851_vm7, %v4006_v38, %v4039_v25  ;;  %v4067_v23 = vsel %vm13852_vm5, %v4007_v45, %v4051_v48  ;;  %v4090_v20 = vmul.f32 %v13853_v61, %v13849_v7 }
0x1980   :  { %v4082_v10 = vadd.f32 %v4074_v22, %v3974_v17  ;;  %v4120_v35 = vpack.c.bf16 %v4112_v49, %v4108_v40  ;;  %v4102_v37 = vmul.f32 %v4062_v42, %v13828_v16  ;;  %v4103_v55 = vmul.f32 %v4063_v4, %v13828_v16 }
0x1981   :  { %v4083_v62 = vadd.f32 %v4075_v36, %v3975_v60  ;;  %v4106_v9 = vmul.f32 %v4066_v24, %v13835_v57  ;;  %v4107_v8 = vmul.f32 %v4067_v23, %v13835_v57  ;;  %vm13854_vm9 = vcmask 261120  }
0x1982   :  { %v4098_v3 = vadd.f32 %v4090_v20, %v4082_v10  ;;  %4127 = vmatpush1.bf16.msra.mxu0 %v4120_v35  ;;  %v4110_v29 = vadd.f32 %v4102_v37, %v4094_v52  ;;  %v4111_v56 = vadd.f32 %v4103_v55, %v4095_v15  ;;  %v13855_v31 = vmov 0   ;;  %vm13856_vm2 = vmmov %vm13854_vm9  ;;  %v7645_v52 = vld [vmem:[%s13223_s13 + $0x8] sm:$0xff]   ;;  %v7647_v15 = vld [vmem:[%s13223_s13 + $0x18] sm:$0xff]  }
0x1983   :  { %v4099_v46 = vadd.f32 %v4091_v47, %v4083_v62  ;;  %vm13857_vm6 = vmmov %vm13856_vm2 }
0x1984   :  { %v4114_v34 = vadd.f32 %v4106_v9, %v4098_v3  ;;  %vm13858_vm7 = vmmov %vm13856_vm2 }
0x1985   :  { %v4115_v50 = vadd.f32 %v4107_v8, %v4099_v46  ;;  %7193 = vmatmul.mubr.msk.bf16.vlgmr.msra.gmra.mrb[56].mxu0 %vm13854_vm9, %v7644_v27  ;;  %vm13859_vm5 = vmmov %vm13856_vm2 }
0x1986   :  { %v4122_v2 = vpack.c.bf16 %v4114_v34, %v4110_v29  ;;  %4166 = vmatprep.mubr.bf16.mxu0 %v13855_v31  ;;  %vm13860_vm9 = vmmov %vm13856_vm2 }
0x1987   :  { %v4123_v6 = vpack.c.bf16 %v4115_v50, %v4111_v56 }
0x1989   :  { %4199 = vmatprep.subr.bf16.mxu1 %v4123_v6 }
0x198a   :  { %4200 = vmatpush1.bf16.msra.mxu1 %v4122_v2 }
0x198d   :  { %7197 = vmatmul.mubr.msk.bf16.vlgmr.msra.gmra.mrb[40].mxu1 %vm13856_vm2, %v7644_v27  ;;  %7194 = vmatmul.mubr.msk.bf16.gmra.mrb[60].mxu0 %vm13857_vm6, %v7645_v52  ;;  %vm13861_vm6 = vmmov %vm13856_vm2 }
0x198e   :  { %4239 = vmatprep.mubr.bf16.mxu1 %v13855_v31  ;;  %4176 = vmatprep.mubr.bf16.mxu0 %v13855_v31 }
0x1995   :  { %7198 = vmatmul.mubr.msk.bf16.gmra.mrb[44].mxu1 %vm13858_vm7, %v7645_v52  ;;  %7195 = vmatmul.mubr.msk.bf16.gmra.mrb[64].mxu0 %vm13859_vm5, %v7646_v53  ;;  %vm13862_vm7 = vcmask 523264  }
0x1996   :  { %4249 = vmatprep.mubr.bf16.mxu1 %v13855_v31  ;;  %4186 = vmatprep.mubr.bf16.mxu0 %v13855_v31  ;;  %vm13863_vm5 = vmmov %vm13862_vm7 }
0x199d   :  { %7199 = vmatmul.mubr.msk.bf16.gmra.mrb[48].mxu1 %vm13860_vm9, %v7646_v53  ;;  %7196 = vmatmul.mubr.msk.bf16.gmra.mrb[68].mxu0 %vm13856_vm2, %v7647_v15  ;;  %vm13884_vm9 = vcmask 1039360   ;;  %vm13885_vm2 = vcmask 7168  }
0x199e   :  { %4259 = vmatprep.mubr.bf16.mxu1 %v13855_v31  ;;  %4694 = vmatprep.mubr.bf16.mxu0 %v13855_v31 }
0x19a5   :  { %7200 = vmatmul.mubr.msk.bf16.gmra.mrb[52].mxu1 %vm13861_vm6, %v7647_v15  ;;  %vm13887_vm6 = vmmov %vm13885_vm2 }
0x19a6   :  { %4737 = vmatprep.mubr.bf16.mxu1 %v13855_v31 }
0x1a58   :  { %v10983_v5 = vpop.f32.mrb[56].mxu0 }
0x1a59   :  { %v10985_v63 = vpop.f32.mrb[57].mxu0 }
0x1a5a   :  { %v4270_v40 = vadd.f32 %v10985_v63, %v10983_v5  ;;  %v10989_v14 = vpop.f32.mrb[58].mxu0 }
0x1a5b   :  { %v10991_v54 = vpop.f32.mrb[59].mxu0 }
0x1a5c   :  { %v4275_v28 = vadd.f32 %v10991_v54, %v10989_v14 }
0x1a60   :  { %v10995_v42 = vpop.f32.mrb[40].mxu1  ;;  %v11000_v18 = vpop.f32.mrb[60].mxu0 }
0x1a61   :  { %v4271_v59 = vadd.f32 %v4270_v40, %v10995_v42  ;;  %v10998_v38 = vpop.f32.mrb[41].mxu1  ;;  %v11004_v32 = vpop.f32.mrb[61].mxu0 }
0x1a62   :  { %v11002_v12 = vpop.f32.mrb[42].mxu1  ;;  %v4280_v25 = vadd.f32 %v11004_v32, %v11000_v18  ;;  %v11012_v4 = vpop.f32.mrb[62].mxu0 }
0x1a63   :  { %v4272_v21 = vadd.f32 %v4271_v59, %v10998_v38  ;;  %v4276_v45 = vadd.f32 %v4275_v28, %v11002_v12  ;;  %v11010_v48 = vpop.f32.mrb[43].mxu1  ;;  %v11014_v17 = vpop.f32.mrb[63].mxu0 }
0x1a64   :  { %v4285_v51 = vadd.f32 %v11014_v17, %v11012_v4 }
0x1a65   :  { %v4277_v11 = vadd.f32 %v4276_v45, %v11010_v48  ;;  %4273 = vadd.xlane.f32.xlu1 %v4272_v21 }
0x1a67   :  { %4278 = vadd.xlane.f32.xlu0 %v4277_v11 }
0x1a68   :  { %v11019_v49 = vpop.f32.mrb[44].mxu1  ;;  %v11024_v36 = vpop.f32.mrb[64].mxu0 }
0x1a69   :  { %v4281_v60 = vadd.f32 %v4280_v25, %v11019_v49  ;;  %v11022_v22 = vpop.f32.mrb[45].mxu1  ;;  %v11028_v47 = vpop.f32.mrb[65].mxu0 }
0x1a6a   :  { %v11026_v30 = vpop.f32.mrb[46].mxu1  ;;  %v4290_v61 = vadd.f32 %v11028_v47, %v11024_v36  ;;  %v11036_v10 = vpop.f32.mrb[66].mxu0 }
0x1a6b   :  { %v4282_v24 = vadd.f32 %v4281_v60, %v11022_v22  ;;  %v4286_v23 = vadd.f32 %v4285_v51, %v11026_v30  ;;  %v11034_v20 = vpop.f32.mrb[47].mxu1  ;;  %v11038_v62 = vpop.f32.mrb[67].mxu0 }
0x1a6c   :  { %v4295_v37 = vadd.f32 %v11038_v62, %v11036_v10 }
0x1a6d   :  { %v4287_v35 = vadd.f32 %v4286_v23, %v11034_v20  ;;  %4283 = vadd.xlane.f32.xlu0 %v4282_v24 }
0x1a6f   :  { %4288 = vadd.xlane.f32.xlu1 %v4287_v35 }
0x1a70   :  { %v11043_v55 = vpop.f32.mrb[48].mxu1  ;;  %v11048_v8 = vpop.f32.mrb[68].mxu0 }
0x1a71   :  { %v4291_v3 = vadd.f32 %v4290_v61, %v11043_v55  ;;  %v11046_v9 = vpop.f32.mrb[49].mxu1  ;;  %v11052_v29 = vpop.f32.mrb[69].mxu0 }
0x1a72   :  { %v11050_v46 = vpop.f32.mrb[50].mxu1  ;;  %v4300_v50 = vadd.f32 %v11052_v29, %v11048_v8  ;;  %v11060_v6 = vpop.f32.mrb[70].mxu0 }
0x1a73   :  { %v4292_v34 = vadd.f32 %v4291_v3, %v11046_v9  ;;  %v4296_v56 = vadd.f32 %v4295_v37, %v11050_v46  ;;  %v11058_v27 = vpop.f32.mrb[51].mxu1  ;;  %v11062_v2 = vpop.f32.mrb[71].mxu0 }
0x1a74   :  { %v4305_v53 = vadd.f32 %v11062_v2, %v11060_v6 }
0x1a75   :  { %v4297_v52 = vadd.f32 %v4296_v56, %v11058_v27  ;;  %4293 = vadd.xlane.f32.xlu0 %v4292_v34 }
0x1a77   :  { %4298 = vadd.xlane.f32.xlu1 %v4297_v52 }
0x1a78   :  { %v11067_v15 = vpop.f32.mrb[52].mxu1 }
0x1a79   :  { %v4301_v40 = vadd.f32 %v4300_v50, %v11067_v15  ;;  %v11070_v28 = vpop.f32.mrb[53].mxu1 }
0x1a7a   :  { %v11072_v59 = vpop.f32.mrb[54].mxu1 }
0x1a7b   :  { %v4302_v21 = vadd.f32 %v4301_v40, %v11070_v28  ;;  %v4306_v45 = vadd.f32 %v4305_v53, %v11072_v59  ;;  %v11076_v25 = vpop.f32.mrb[55].mxu1 }
0x1a7d   :  { %v4307_v11 = vadd.f32 %v4306_v45, %v11076_v25  ;;  %4303 = vadd.xlane.f32.xlu0 %v4302_v21 }
0x1a7f   :  { %4308 = vadd.xlane.f32.xlu1 %v4307_v11 }
0x1af2   :  { %v4274_v51 = vpop.xlane.xlu1 %4273 }
0x1af3   :  { %v11079_v60 = vmul.f32 0.001953125, %v4274_v51 }
0x1af4   :  { %v4279_v24 = vpop.xlane.xlu0 %4278 }
0x1af5   :  { %v11081_v23 = vmul.f32 0.001953125, %v4279_v24  ;;  %v4318_v61 = vsub.f32 %v10983_v5, %v11079_v60  ;;  %v4319_v35 = vsub.f32 %v10985_v63, %v11079_v60  ;;  %v4320_v37 = vsub.f32 %v10995_v42, %v11079_v60 }
0x1af6   :  { %v4321_v3 = vsub.f32 %v10998_v38, %v11079_v60 }
0x1af7   :  { %v4350_v34 = vmul.f32 %v4318_v61, %v4318_v61  ;;  %v4351_v56 = vmul.f32 %v4319_v35, %v4319_v35  ;;  %v4322_v50 = vsub.f32 %v10989_v14, %v11081_v23  ;;  %v4323_v52 = vsub.f32 %v10991_v54, %v11081_v23 }
0x1af8   :  { %v4324_v53 = vsub.f32 %v11002_v12, %v11081_v23  ;;  %v4352_v40 = vmul.f32 %v4320_v37, %v4320_v37  ;;  %v4325_v51 = vsub.f32 %v11010_v48, %v11081_v23  ;;  %v4353_v61 = vmul.f32 %v4321_v3, %v4321_v3 }
0x1af9   :  { %v4382_v21 = vadd.f32 %v4351_v56, %v4350_v34  ;;  %v4354_v45 = vmul.f32 %v4322_v50, %v4322_v50  ;;  %v4355_v24 = vmul.f32 %v4323_v52, %v4323_v52 }
0x1afa   :  { %v4284_v11 = vpop.xlane.xlu0 %4283  ;;  %v4356_v16 = vmul.f32 %v4324_v53, %v4324_v53  ;;  %v4357_v56 = vmul.f32 %v4325_v51, %v4325_v51 }
0x1afb   :  { %v11099_v57 = vmul.f32 0.001953125, %v4284_v11  ;;  %v4383_v35 = vadd.f32 %v4382_v21, %v4352_v40  ;;  %v4387_v44 = vadd.f32 %v4355_v24, %v4354_v45 }
0x1afc   :  { %v4289_v58 = vpop.xlane.xlu1 %4288 }
0x1afd   :  { %v11101_v19 = vmul.f32 0.001953125, %v4289_v58  ;;  %v4384_v43 = vadd.f32 %v4383_v35, %v4353_v61  ;;  %v4326_v37 = vsub.f32 %v11000_v18, %v11099_v57  ;;  %v4327_v34 = vsub.f32 %v11004_v32, %v11099_v57 }
0x1afe   :  { %v4388_v50 = vadd.f32 %v4387_v44, %v4356_v16  ;;  %v4328_v52 = vsub.f32 %v11019_v49, %v11099_v57  ;;  %v4329_v3 = vsub.f32 %v11022_v22, %v11099_v57 }
0x1aff   :  { %4385 = vadd.xlane.f32.xlu0 %v4384_v43  ;;  %v4358_v53 = vmul.f32 %v4326_v37, %v4326_v37  ;;  %v4359_v40 = vmul.f32 %v4327_v34, %v4327_v34  ;;  %v4330_v58 = vsub.f32 %v11012_v4, %v11101_v19  ;;  %v4331_v21 = vsub.f32 %v11014_v17, %v11101_v19 }
0x1b00   :  { %v4389_v45 = vadd.f32 %v4388_v50, %v4357_v56  ;;  %v4360_v11 = vmul.f32 %v4328_v52, %v4328_v52  ;;  %v4332_v44 = vsub.f32 %v11026_v30, %v11101_v19  ;;  %v4333_v51 = vsub.f32 %v11034_v20, %v11101_v19 }
0x1b01   :  { %v4392_v16 = vadd.f32 %v4359_v40, %v4358_v53  ;;  %v4362_v24 = vmul.f32 %v4330_v58, %v4330_v58  ;;  %v4363_v61 = vmul.f32 %v4331_v21, %v4331_v21  ;;  %v4361_v35 = vmul.f32 %v4329_v3, %v4329_v3 }
0x1b02   :  { %4390 = vadd.xlane.f32.xlu1 %v4389_v45  ;;  %v4294_v43 = vpop.xlane.xlu0 %4293  ;;  %v4364_v41 = vmul.f32 %v4332_v44, %v4332_v44  ;;  %v4365_v56 = vmul.f32 %v4333_v51, %v4333_v51 }
0x1b03   :  { %v11119_v37 = vmul.f32 0.001953125, %v4294_v43  ;;  %v4393_v34 = vadd.f32 %v4392_v16, %v4360_v11  ;;  %v4397_v33 = vadd.f32 %v4363_v61, %v4362_v24 }
0x1b04   :  { %v4299_v7 = vpop.xlane.xlu1 %4298 }
0x1b05   :  { %v11121_v50 = vmul.f32 0.001953125, %v4299_v7  ;;  %v4394_v52 = vadd.f32 %v4393_v34, %v4361_v35  ;;  %v4398_v1 = vadd.f32 %v4397_v33, %v4364_v41  ;;  %v4334_v53 = vsub.f32 %v11024_v36, %v11119_v37 }
0x1b06   :  { %v4335_v40 = vsub.f32 %v11028_v47, %v11119_v37  ;;  %v4336_v3 = vsub.f32 %v11043_v55, %v11119_v37  ;;  %v4337_v33 = vsub.f32 %v11046_v9, %v11119_v37 }
0x1b07   :  { %4395 = vadd.xlane.f32.xlu0 %v4394_v52  ;;  %v4399_v58 = vadd.f32 %v4398_v1, %v4365_v56  ;;  %v4366_v21 = vmul.f32 %v4334_v53, %v4334_v53  ;;  %v4338_v45 = vsub.f32 %v11036_v10, %v11121_v50  ;;  %v4339_v7 = vsub.f32 %v11038_v62, %v11121_v50 }
0x1b08   :  { %v4367_v41 = vmul.f32 %v4335_v40, %v4335_v40  ;;  %v4340_v11 = vsub.f32 %v11050_v46, %v11121_v50  ;;  %v4341_v44 = vsub.f32 %v11058_v27, %v11121_v50  ;;  %v4368_v24 = vmul.f32 %v4336_v3, %v4336_v3 }
0x1b09   :  { %4400 = vadd.xlane.f32.xlu1 %v4399_v58  ;;  %v4370_v16 = vmul.f32 %v4338_v45, %v4338_v45  ;;  %v4371_v1 = vmul.f32 %v4339_v7, %v4339_v7  ;;  %v4369_v52 = vmul.f32 %v4337_v33, %v4337_v33 }
0x1b0a   :  { %v4304_v51 = vpop.xlane.xlu0 %4303  ;;  %v4402_v61 = vadd.f32 %v4367_v41, %v4366_v21  ;;  %v4372_v35 = vmul.f32 %v4340_v11, %v4340_v11  ;;  %v4373_v40 = vmul.f32 %v4341_v44, %v4341_v44 }
0x1b0b   :  { %v11139_v43 = vmul.f32 0.001953125, %v4304_v51  ;;  %v4407_v34 = vadd.f32 %v4371_v1, %v4370_v16 }
0x1b0c   :  { %v4309_v56 = vpop.xlane.xlu1 %4308  ;;  %v4403_v53 = vadd.f32 %v4402_v61, %v4368_v24 }
0x1b0d   :  { %v11141_v26 = vmul.f32 0.001953125, %v4309_v56  ;;  %v4408_v13 = vadd.f32 %v4407_v34, %v4372_v35  ;;  %v4342_v58 = vsub.f32 %v11048_v8, %v11139_v43  ;;  %v4343_v45 = vsub.f32 %v11052_v29, %v11139_v43 }
0x1b0e   :  { %v4404_v7 = vadd.f32 %v4403_v53, %v4369_v52  ;;  %v4344_v3 = vsub.f32 %v11067_v15, %v11139_v43  ;;  %v4345_v21 = vsub.f32 %v11070_v28, %v11139_v43 }
0x1b0f   :  { %v4409_v41 = vadd.f32 %v4408_v13, %v4373_v40  ;;  %v4374_v33 = vmul.f32 %v4342_v58, %v4342_v58  ;;  %v4375_v11 = vmul.f32 %v4343_v45, %v4343_v45  ;;  %v4346_v44 = vsub.f32 %v11060_v6, %v11141_v26 }
0x1b10   :  { %4405 = vadd.xlane.f32.xlu0 %v4404_v7  ;;  %v4347_v16 = vsub.f32 %v11062_v2, %v11141_v26  ;;  %v4348_v1 = vsub.f32 %v11072_v59, %v11141_v26  ;;  %v4376_v51 = vmul.f32 %v4344_v3, %v4344_v3  ;;  %v4349_v35 = vsub.f32 %v11076_v25, %v11141_v26 }
0x1b11   :  { %4410 = vadd.xlane.f32.xlu1 %v4409_v41  ;;  %v4412_v24 = vadd.f32 %v4375_v11, %v4374_v33  ;;  %v4378_v61 = vmul.f32 %v4346_v44, %v4346_v44  ;;  %v4377_v34 = vmul.f32 %v4345_v21, %v4345_v21 }
0x1b12   :  { %v4379_v13 = vmul.f32 %v4347_v16, %v4347_v16  ;;  %v4380_v52 = vmul.f32 %v4348_v1, %v4348_v1  ;;  %v4381_v58 = vmul.f32 %v4349_v35, %v4349_v35  ;;  %v7648_v35 = vld [vmem:[%s13224_s14] sm:$0xff] }
0x1b13   :  { %v4413_v56 = vadd.f32 %v4412_v24, %v4376_v51 }
0x1b14   :  { %v4417_v53 = vadd.f32 %v4379_v13, %v4378_v61 }
0x1b15   :  { %v4414_v40 = vadd.f32 %v4413_v56, %v4377_v34 }
0x1b16   :  { %v4418_v45 = vadd.f32 %v4417_v53, %v4380_v52  ;;  %v7649_v53 = vld [vmem:[%s13224_s14 + $0x8] sm:$0xff] }
0x1b17   :  { %4415 = vadd.xlane.f32.xlu0 %v4414_v40 }
0x1b18   :  { %v4419_v7 = vadd.f32 %v4418_v45, %v4381_v58 }
0x1b1a   :  { %4420 = vadd.xlane.f32.xlu1 %v4419_v7 }
0x1b8c   :  { %v4386_v0 = vpop.xlane.xlu0 %4385 }
0x1b8d   :  { %v4422_v39 = vmul.f32 0.001953125, %v4386_v0 }
0x1b8f   :  { %v4430_v41 = vadd.f32 1e-05, %v4422_v39  ;;  %v4391_v3 = vpop.xlane.xlu1 %4390 }
0x1b90   :  { %v4423_v33 = vmul.f32 0.001953125, %v4391_v3 }
0x1b91   :  { %7575 = vrsqrt.f32 %v4430_v41 }
0x1b92   :  { %v4431_v11 = vadd.f32 1e-05, %v4423_v33  ;;  %v7650_v33 = vld [vmem:[%s13225_s15] sm:$0xff] }
0x1b94   :  { %7577 = vrsqrt.f32 %v4431_v11  ;;  %v4396_v44 = vpop.xlane.xlu0 %4395 }
0x1b95   :  { %v4424_v16 = vmul.f32 0.001953125, %v4396_v44  ;;  %v7651_v44 = vld [vmem:[%s13225_s15 + $0x8] sm:$0xff] }
0x1b96   :  { %v4401_v21 = vpop.xlane.xlu1 %4400 }
0x1b97   :  { %v4432_v51 = vadd.f32 1e-05, %v4424_v16  ;;  %v4425_v1 = vmul.f32 0.001953125, %v4401_v21 }
0x1b99   :  { %7579 = vrsqrt.f32 %v4432_v51  ;;  %v4433_v24 = vadd.f32 1e-05, %v4425_v1 }
0x1b9b   :  { %v7576_v61 = vpop.eup %7575  ;;  %7581 = vrsqrt.f32 %v4433_v24  ;;  %v7653_v24 = vld [vmem:[%s13224_s14 + $0x18] sm:$0xff] }
0x1b9c   :  { %v4446_v0 = vmul.f32 %v7648_v35, %v7576_v61 }
0x1b9d   :  { %v4406_v39 = vpop.xlane.xlu0 %4405 }
0x1b9e   :  { %v7578_v13 = vpop.eup %7577  ;;  %v4426_v34 = vmul.f32 0.001953125, %v4406_v39  ;;  %4472 = vperm.xlu0 %7483, %v4446_v0   ;;  %v4411_v56 = vpop.xlane.xlu1 %4410  ;;  %v4454_v58 = vmul.f32 %v4446_v0, %v11079_v60  ;;  %v7652_v60 = vld [vmem:[%s13224_s14 + $0x10] sm:$0xff] }
0x1b9f   :  { %v4427_v52 = vmul.f32 0.001953125, %v4411_v56  ;;  %v4447_v40 = vmul.f32 %v7649_v53, %v7578_v13 }
0x1ba0   :  { %v4434_v45 = vadd.f32 1e-05, %v4426_v34  ;;  %v4462_v11 = vsub.f32 %v7650_v33, %v4454_v58 }
0x1ba1   :  { %v4435_v7 = vadd.f32 1e-05, %v4427_v52  ;;  %4477 = vperm.xlu1 %7484, %v4447_v40   ;;  %v4455_v41 = vmul.f32 %v4447_v40, %v11081_v23  ;;  %v7654_v52 = vld [vmem:[%s13225_s15 + $0x18] sm:$0xff]  ;;  %v7655_v40 = vld [vmem:[%s13225_s15 + $0x10] sm:$0xff] }
0x1ba2   :  { %7583 = vrsqrt.f32 %v4434_v45 }
0x1ba3   :  { %v7580_v3 = vpop.eup %7579  ;;  %7585 = vrsqrt.f32 %v4435_v7  ;;  %v4463_v16 = vsub.f32 %v7651_v44, %v4455_v41  ;;  %v7657_v41 = vld [vmem:[%s13224_s14 + $0x28] sm:$0xff] }
0x1ba4   :  { %v4416_v21 = vpop.xlane.xlu0 %4415  ;;  %v4448_v51 = vmul.f32 %v7652_v60, %v7580_v3  ;;  %v7658_v44 = vld [vmem:[%s13225_s15 + $0x28] sm:$0xff]  ;;  %v7659_v60 = vld [vmem:[%s13225_s15 + $0x20] sm:$0xff] }
0x1ba5   :  { %v7582_v23 = vpop.eup %7581  ;;  %v4428_v1 = vmul.f32 0.001953125, %v4416_v21  ;;  %4544 = vperm.xlu1 %7484, %v4462_v11   ;;  %4549 = vperm.xlu0 %7483, %v4463_v16  }
0x1ba6   :  { %v4449_v61 = vmul.f32 %v7653_v24, %v7582_v23  ;;  %v4456_v39 = vmul.f32 %v4448_v51, %v11099_v57  ;;  %v7660_v23 = vld [vmem:[%s13224_s14 + $0x30] sm:$0xff] }
0x1ba7   :  { %v4436_v35 = vadd.f32 1e-05, %v4428_v1  ;;  %v4421_v0 = vpop.xlane.xlu1 %4420  ;;  %v7661_v1 = vld [vmem:[%s13224_s14 + $0x38] sm:$0xff] }
0x1ba8   :  { %v4429_v13 = vmul.f32 0.001953125, %v4421_v0  ;;  %v4457_v34 = vmul.f32 %v4449_v61, %v11101_v19  ;;  %v4464_v58 = vsub.f32 %v7655_v40, %v4456_v39  ;;  %v7656_v19 = vld [vmem:[%s13224_s14 + $0x20] sm:$0xff]  ;;  %v7662_v0 = vld [vmem:[%s13225_s15 + $0x30] sm:$0xff] }
0x1ba9   :  { %7587 = vrsqrt.f32 %v4436_v35  ;;  %4482 = vperm.xlu1 %7484, %v4448_v51   ;;  %4487 = vperm.xlu0 %7483, %v4449_v61  }
0x1baa   :  { %v4437_v56 = vadd.f32 1e-05, %v4429_v13  ;;  %v4465_v53 = vsub.f32 %v7654_v52, %v4457_v34  ;;  %v7663_v13 = vld [vmem:[%s13225_s15 + $0x38] sm:$0xff] }
0x1bac   :  { %v7584_v45 = vpop.eup %7583  ;;  %7589 = vrsqrt.f32 %v4437_v56 }
0x1bad   :  { %v7586_v57 = vpop.eup %7585  ;;  %4554 = vperm.xlu1 %7484, %v4464_v58   ;;  %4559 = vperm.xlu0 %7483, %v4465_v53   ;;  %v4450_v7 = vmul.f32 %v7656_v19, %v7584_v45 }
0x1bae   :  { %v4451_v3 = vmul.f32 %v7657_v41, %v7586_v57 }
0x1baf   :  { %v4458_v33 = vmul.f32 %v4450_v7, %v11119_v37 }
0x1bb0   :  { %v4459_v11 = vmul.f32 %v4451_v3, %v11121_v50 }
0x1bb1   :  { %4492 = vperm.xlu1 %7484, %v4450_v7   ;;  %4497 = vperm.xlu0 %7483, %v4451_v3   ;;  %v4466_v51 = vsub.f32 %v7659_v60, %v4458_v33 }
0x1bb2   :  { %v4467_v16 = vsub.f32 %v7658_v44, %v4459_v11 }
0x1bb3   :  { %v7588_v21 = vpop.eup %7587 }
0x1bb4   :  { %v4452_v37 = vmul.f32 %v7660_v23, %v7588_v21 }
0x1bb5   :  { %4564 = vperm.xlu1 %7484, %v4466_v51   ;;  %4569 = vperm.xlu0 %7483, %v4467_v16  }
0x1bb6   :  { %v7590_v50 = vpop.eup %7589  ;;  %v4460_v61 = vmul.f32 %v4452_v37, %v11139_v43 }
0x1bb7   :  { %v4453_v24 = vmul.f32 %v7661_v1, %v7590_v50 }
0x1bb8   :  { %v4468_v39 = vsub.f32 %v7662_v0, %v4460_v61 }
0x1bb9   :  { %4502 = vperm.xlu1 %7484, %v4452_v37   ;;  %4507 = vperm.xlu0 %7483, %v4453_v24   ;;  %v4461_v35 = vmul.f32 %v4453_v24, %v11141_v26 }
0x1bbb   :  { %v4469_v34 = vsub.f32 %v7663_v13, %v4461_v35 }
0x1bbd   :  { %4574 = vperm.xlu1 %7484, %v4468_v39   ;;  %4579 = vperm.xlu0 %7483, %v4469_v34  }
0x1c1d   :  { %v4473_v56 = vpop.permute.xlu0 %4472 }
0x1c1e   :  { %v4510_v43 = vmul.f32 %v4473_v56, %v10983_v5  ;;  %v4512_v53 = vmul.f32 %v4473_v56, %v10995_v42  ;;  %v4511_v57 = vmul.f32 %v4473_v56, %v10985_v63  ;;  %v4513_v7 = vmul.f32 %v4473_v56, %v10998_v38 }
0x1c20   :  { %v4478_v52 = vpop.permute.xlu1 %4477 }
0x1c21   :  { %v4514_v26 = vmul.f32 %v4478_v52, %v10989_v14  ;;  %v4516_v40 = vmul.f32 %v4478_v52, %v11002_v12  ;;  %v4515_v19 = vmul.f32 %v4478_v52, %v10991_v54  ;;  %v4517_v41 = vmul.f32 %v4478_v52, %v11010_v48 }
0x1c24   :  { %v4550_v58 = vpop.permute.xlu0 %4549  ;;  %v4545_v45 = vpop.permute.xlu1 %4544 }
0x1c25   :  { %v4586_v3 = vadd.f32 %v4550_v58, %v4514_v26  ;;  %v4588_v33 = vadd.f32 %v4550_v58, %v4516_v40  ;;  %v4582_v11 = vadd.f32 %v4545_v45, %v4510_v43  ;;  %v4584_v5 = vadd.f32 %v4545_v45, %v4512_v53 }
0x1c26   :  { %v4583_v44 = vadd.f32 %v4545_v45, %v4511_v57  ;;  %v4587_v42 = vadd.f32 %v4550_v58, %v4515_v19  ;;  %v4585_v16 = vadd.f32 %v4545_v45, %v4513_v7  ;;  %v4589_v14 = vadd.f32 %v4550_v58, %v4517_v41 }
0x1c27   :  { %v4618_v21 = vmax.f32 %v4586_v3, 0.0  ;;  %v4620_v12 = vmax.f32 %v4588_v33, 0.0  ;;  %v4614_v60 = vmax.f32 %v4582_v11, 0.0  ;;  %v4616_v51 = vmax.f32 %v4584_v5, 0.0 }
0x1c28   :  { %v4488_v23 = vpop.permute.xlu0 %4487  ;;  %v4483_v63 = vpop.permute.xlu1 %4482  ;;  %v4615_v37 = vmax.f32 %v4583_v44, 0.0  ;;  %v4619_v54 = vmax.f32 %v4587_v42, 0.0  ;;  %v4617_v50 = vmax.f32 %v4585_v16, 0.0  ;;  %v4621_v38 = vmax.f32 %v4589_v14, 0.0 }
0x1c29   :  { %v4522_v48 = vmul.f32 %v4488_v23, %v11012_v4  ;;  %v4646_v61 = vpack.c.bf16 %v4618_v21, %v4614_v60  ;;  %v4648_v35 = vpack.c.bf16 %v4620_v12, %v4616_v51  ;;  %v4524_v0 = vmul.f32 %v4488_v23, %v11026_v30 }
0x1c2a   :  { %v4647_v1 = vpack.c.bf16 %v4619_v54, %v4615_v37  ;;  %v4649_v24 = vpack.c.bf16 %v4621_v38, %v4617_v50  ;;  %v4518_v39 = vmul.f32 %v4483_v63, %v11000_v18  ;;  %v4520_v13 = vmul.f32 %v4483_v63, %v11019_v49 }
0x1c2b   :  { %v4519_v34 = vmul.f32 %v4483_v63, %v11004_v32  ;;  %v4523_v43 = vmul.f32 %v4488_v23, %v11014_v17  ;;  %v4521_v4 = vmul.f32 %v4483_v63, %v11022_v22  ;;  %v4525_v53 = vmul.f32 %v4488_v23, %v11034_v20 }
0x1c2c   :  { %4662 = vmatprep.subr.bf16.mxu0 %v4647_v1  ;;  %4705 = vmatprep.subr.bf16.mxu1 %v4649_v24  ;;  %v4560_v56 = vpop.permute.xlu0 %4559  ;;  %v4555_v52 = vpop.permute.xlu1 %4554 }
0x1c2d   :  { %v4594_v26 = vadd.f32 %v4560_v56, %v4522_v48  ;;  %v4596_v40 = vadd.f32 %v4560_v56, %v4524_v0  ;;  %4663 = vmatpush1.bf16.msra.mxu0 %v4646_v61  ;;  %4706 = vmatpush1.bf16.msra.mxu1 %v4648_v35  ;;  %v4590_v30 = vadd.f32 %v4555_v52, %v4518_v39 }
0x1c2e   :  { %v4592_v18 = vadd.f32 %v4555_v52, %v4520_v13  ;;  %v4591_v58 = vadd.f32 %v4555_v52, %v4519_v34  ;;  %v4595_v49 = vadd.f32 %v4560_v56, %v4523_v43  ;;  %v4593_v45 = vadd.f32 %v4555_v52, %v4521_v4 }
0x1c2f   :  { %v4626_v32 = vmax.f32 %v4594_v26, 0.0  ;;  %v4628_v57 = vmax.f32 %v4596_v40, 0.0  ;;  %v4622_v19 = vmax.f32 %v4590_v30, 0.0  ;;  %v4597_v7 = vadd.f32 %v4560_v56, %v4525_v53 }
0x1c30   :  { %v4624_v41 = vmax.f32 %v4592_v18, 0.0  ;;  %v4498_v3 = vpop.permute.xlu0 %4497  ;;  %v4493_v17 = vpop.permute.xlu1 %4492  ;;  %v4623_v33 = vmax.f32 %v4591_v58, 0.0  ;;  %v4627_v22 = vmax.f32 %v4595_v49, 0.0  ;;  %v4625_v11 = vmax.f32 %v4593_v45, 0.0 }
0x1c31   :  { %v4530_v20 = vmul.f32 %v4498_v3, %v11036_v10  ;;  %v4629_v44 = vmax.f32 %v4597_v7, 0.0  ;;  %v4650_v42 = vpack.c.bf16 %v4626_v32, %v4622_v19  ;;  %v4532_v14 = vmul.f32 %v4498_v3, %v11050_v46 }
0x1c32   :  { %v4651_v5 = vpack.c.bf16 %v4627_v22, %v4623_v33  ;;  %v4652_v16 = vpack.c.bf16 %v4628_v57, %v4624_v41  ;;  %v4526_v21 = vmul.f32 %v4493_v17, %v11024_v36  ;;  %v4528_v12 = vmul.f32 %v4493_v17, %v11043_v55 }
0x1c33   :  { %v4527_v60 = vmul.f32 %v4493_v17, %v11028_v47  ;;  %v4653_v51 = vpack.c.bf16 %v4629_v44, %v4625_v11  ;;  %v4531_v37 = vmul.f32 %v4498_v3, %v11038_v62  ;;  %v4529_v10 = vmul.f32 %v4493_v17, %v11046_v9 }
0x1c34   :  { %4664 = vmatprep.subr.bf16.mxu0 %v4651_v5  ;;  %v4570_v23 = vpop.permute.xlu0 %4569  ;;  %v4565_v63 = vpop.permute.xlu1 %4564  ;;  %v4533_v54 = vmul.f32 %v4498_v3, %v11058_v27 }
0x1c35   :  { %v4602_v50 = vadd.f32 %v4570_v23, %v4530_v20  ;;  %v4604_v38 = vadd.f32 %v4570_v23, %v4532_v14  ;;  %4665 = vmatpush1.bf16.msra.mxu0 %v4650_v42  ;;  %v4598_v46 = vadd.f32 %v4565_v63, %v4526_v21  ;;  %v4600_v48 = vadd.f32 %v4565_v63, %v4528_v12  ;;  %v7203_v14 = vld [vmem:[%s13227_s10 + $0x1] ss:$4 sm:$0xf]  ;;  %v13864_v21 = vld [vmem:[#allocation44_spill] sm:$0xff] }
0x1c36   :  { %4707 = vmatprep.subr.bf16.mxu1 %v4653_v51  ;;  %v4599_v36 = vadd.f32 %v4565_v63, %v4527_v60  ;;  %v4603_v55 = vadd.f32 %v4570_v23, %v4531_v37  ;;  %v4601_v1 = vadd.f32 %v4565_v63, %v4529_v10  ;;  %v4605_v47 = vadd.f32 %v4570_v23, %v4533_v54  ;;  %v13865_v60 = vld [vmem:[#allocation45_spill] sm:$0xff]  ;;  %v13867_v37 = vld [vmem:[#allocation35_spill] sm:$0xff] }
0x1c37   :  { %v4634_v24 = vmax.f32 %v4602_v50, 0.0  ;;  %v4636_v61 = vmax.f32 %v4604_v38, 0.0  ;;  %4708 = vmatpush1.bf16.msra.mxu1 %v4652_v16  ;;  %v4630_v35 = vmax.f32 %v4598_v46, 0.0  ;;  %v4632_v0 = vmax.f32 %v4600_v48, 0.0  ;;  %v7664_v16 = vld [vmem:[%s13226_s16] sm:$0xff]   ;;  %v13866_v23 = vld [vmem:[#allocation53_spill] sm:$0xff] }
0x1c38   :  { %v4508_v62 = vpop.permute.xlu0 %4507  ;;  %v4503_v39 = vpop.permute.xlu1 %4502  ;;  %v4631_v9 = vmax.f32 %v4599_v36, 0.0  ;;  %v4635_v13 = vmax.f32 %v4603_v55, 0.0  ;;  %v4633_v27 = vmax.f32 %v4601_v1, 0.0  ;;  %v4637_v34 = vmax.f32 %v4605_v47, 0.0  ;;  %v13868_v47 = vld [vmem:[#allocation42_spill] sm:$0xff] }
0x1c39   :  { %v4538_v56 = vmul.f32 %v4508_v62, %v11060_v6  ;;  %v4654_v4 = vpack.c.bf16 %v4634_v24, %v4630_v35  ;;  %v4656_v53 = vpack.c.bf16 %v4636_v61, %v4632_v0  ;;  %v4540_v26 = vmul.f32 %v4508_v62, %v11072_v59 }
0x1c3a   :  { %v4655_v52 = vpack.c.bf16 %v4635_v13, %v4631_v9  ;;  %v4657_v43 = vpack.c.bf16 %v4637_v34, %v4633_v27  ;;  %v4534_v40 = vmul.f32 %v4503_v39, %v11048_v8  ;;  %v4536_v30 = vmul.f32 %v4503_v39, %v11067_v15 }
0x1c3b   :  { %v4535_v18 = vmul.f32 %v4503_v39, %v11052_v29  ;;  %v4539_v45 = vmul.f32 %v4508_v62, %v11062_v2  ;;  %v4537_v6 = vmul.f32 %v4503_v39, %v11070_v28  ;;  %v4541_v32 = vmul.f32 %v4508_v62, %v11076_v25  ;;  %v13870_v39 = vld [vmem:[#allocation43_spill] sm:$0xff] }
0x1c3c   :  { %4666 = vmatprep.subr.bf16.mxu0 %v4655_v52  ;;  %4709 = vmatprep.subr.bf16.mxu1 %v4657_v43  ;;  %v4580_v58 = vpop.permute.xlu0 %4579  ;;  %v4575_v49 = vpop.permute.xlu1 %4574  ;;  %v4754_v12 = vrot.slane %v7203_v14, %v13864_v21  ;;  %v4762_v51 = vrot.slane %v7203_v14, %v13865_v60  ;;  %v4758_v63 = vrot.slane %v7203_v14, %v13866_v23  ;;  %v13917_v60 = vld [vmem:[#allocation56_spill] sm:$0xff] }
0x1c3d   :  { %v4610_v57 = vadd.f32 %v4580_v58, %v4538_v56  ;;  %v4612_v19 = vadd.f32 %v4580_v58, %v4540_v26  ;;  %4667 = vmatpush1.bf16.msra.mxu0 %v4654_v4  ;;  %4710 = vmatpush1.bf16.msra.mxu1 %v4656_v53  ;;  %v4606_v59 = vadd.f32 %v4575_v49, %v4534_v40  ;;  %v13872_v56 = vld [vmem:[#allocation50_spill] sm:$0xff]  ;;  %v13874_v4 = vld [vmem:[#allocation36_spill] sm:$0xff]  ;;  %v13876_v26 = vld [vmem:[#allocation37_spill] sm:$0xff] }
0x1c3e   :  { %v4608_v8 = vadd.f32 %v4575_v49, %v4536_v30  ;;  %v4607_v7 = vadd.f32 %v4575_v49, %v4535_v18  ;;  %v4611_v15 = vadd.f32 %v4580_v58, %v4539_v45  ;;  %v4609_v41 = vadd.f32 %v4575_v49, %v4537_v6  ;;  %v13878_v30 = vld [vmem:[#allocation38_spill] sm:$0xff] }
0x1c3f   :  { %v4642_v29 = vmax.f32 %v4610_v57, 0.0  ;;  %v4644_v3 = vmax.f32 %v4612_v19, 0.0  ;;  %v4638_v17 = vmax.f32 %v4606_v59, 0.0  ;;  %v4613_v33 = vadd.f32 %v4580_v58, %v4541_v32  ;;  %v13880_v58 = vld [vmem:[#allocation52_spill] sm:$0xff]  ;;  %v13882_v45 = vld [vmem:[#allocation54_spill] sm:$0xff] }
0x1c40   :  { %v4640_v22 = vmax.f32 %v4608_v8, 0.0  ;;  %v4639_v11 = vmax.f32 %v4607_v7, 0.0  ;;  %v4643_v2 = vmax.f32 %v4611_v15, 0.0  ;;  %v4641_v20 = vmax.f32 %v4609_v41, 0.0 }
0x1c41   :  { %v4645_v28 = vmax.f32 %v4613_v33, 0.0  ;;  %v4658_v5 = vpack.c.bf16 %v4642_v29, %v4638_v17  ;;  %v4766_v10 = vrot.slane %v7203_v14, %v13867_v37 }
0x1c42   :  { %v4659_v25 = vpack.c.bf16 %v4643_v2, %v4639_v11  ;;  %v4660_v44 = vpack.c.bf16 %v4644_v3, %v4640_v22 }
0x1c43   :  { %v4661_v42 = vpack.c.bf16 %v4645_v28, %v4641_v20 }
0x1c44   :  { %4668 = vmatprep.subr.bf16.mxu0 %v4659_v25 }
0x1c45   :  { %4711 = vmatprep.subr.bf16.mxu1 %v4661_v42  ;;  %4669 = vmatpush1.bf16.msra.mxu0 %v4658_v5 }
0x1c46   :  { %4712 = vmatpush1.bf16.msra.mxu1 %v4660_v44 }
0x1c48   :  { %7201 = vmatmul.mubr.msk.bf16.vlgmr.msra.gmra.mrb[72].mxu0 %vm13862_vm7, %v7664_v16  ;;  %vm13888_vm7 = vmmov %vm13884_vm9 }
0x1c49   :  { %7202 = vmatmul.mubr.msk.bf16.vlgmr.msra.gmra.mrb[56].mxu1 %vm13863_vm5, %v7664_v16  ;;  %5331 = vmatprep.mubr.bf16.mxu0 %v13855_v31  ;;  %vm13891_vm5 = vmmov %vm13888_vm7 }
0x1c4a   :  { %5404 = vmatprep.mubr.bf16.mxu1 %v13855_v31 }
0x1d1b   :  { %v4696_v54 = vpop.f32.mrb[72].mxu0 }
0x1d1c   :  { %v4771_v50 = vmul.f32 %v4754_v12, %v4696_v54  ;;  %v4739_v38 = vpop.f32.mrb[56].mxu1  ;;  %v4698_v46 = vpop.f32.mrb[73].mxu0 }
0x1d1d   :  { %v4773_v48 = vmul.f32 %v4762_v51, %v4739_v38  ;;  %v4772_v36 = vmul.f32 %v4758_v63, %v4698_v46  ;;  %v4741_v55 = vpop.f32.mrb[57].mxu1  ;;  %v4700_v1 = vpop.f32.mrb[74].mxu0 }
0x1d1e   :  { %v11262_v24 = vadd.f32 %v4771_v50, %v13868_v47  ;;  %v4774_v61 = vmul.f32 %v4766_v10, %v4741_v55  ;;  %v4775_v35 = vmul.f32 %v4754_v12, %v4700_v1  ;;  %v4743_v0 = vpop.f32.mrb[58].mxu1  ;;  %v4702_v62 = vpop.f32.mrb[75].mxu0 }
0x1d1f   :  { %v11265_v9 = vadd.f32 %v4773_v48, %v13870_v39  ;;  %v4777_v13 = vmul.f32 %v4762_v51, %v4743_v0  ;;  %v4776_v27 = vmul.f32 %v4758_v63, %v4702_v62  ;;  %v4745_v34 = vpop.f32.mrb[59].mxu1  ;;  %v11273_v53 = vadd.f32 %v4772_v36, %v13874_v4  ;;  %v13916_v62 = vld [vmem:[#allocation17_spill] sm:$0xff] }
0x1d20   :  { %13869 = vst [vmem:[#allocation8_spill] sm:$0xff] %v11262_v24  ;;  %v11268_v52 = vadd.f32 %v4775_v35, %v13872_v56  ;;  %v4778_v43 = vmul.f32 %v4766_v10, %v4745_v34  ;;  %4795 = vrot.lane.b32.xlu1 %v11262_v24, %s7709_s28  ;;  %v11284_v49 = vadd.f32 %v4774_v61, %v13880_v58 }
0x1d21   :  { %13871 = vst [vmem:[#allocation11_spill] sm:$0xff] %v11265_v9  ;;  %13875 = vst [vmem:[#allocation12_spill] sm:$0xff] %v11273_v53  ;;  %v11276_v40 = vadd.f32 %v4777_v13, %v13876_v26  ;;  %v11279_v18 = vadd.f32 %v4776_v27, %v13878_v30  ;;  %5057 = vrot.lane.b32.xlu0 %v11265_v9, %s7723_s9 }
0x1d22   :  { %13873 = vst [vmem:[#allocation9_spill] sm:$0xff] %v11268_v52  ;;  %13881 = vst [vmem:[#allocation63_spill] sm:$0xff] %v11284_v49  ;;  %v11287_v6 = vadd.f32 %v4778_v43, %v13882_v45  ;;  %v5291_v19 = vpack.c.bf16 %v11268_v52, %v11262_v24 }
0x1d23   :  { %13877 = vst [vmem:[#allocation13_spill] sm:$0xff] %v11276_v40  ;;  %13879 = vst [vmem:[#allocation40_spill] sm:$0xff] %v11279_v18  ;;  %v5292_v32 = vpack.c.bf16 %v11279_v18, %v11273_v53  ;;  %v5293_v59 = vpack.c.bf16 %v11276_v40, %v11265_v9 }
0x1d24   :  { %13883 = vst [vmem:[#allocation47_spill] sm:$0xff] %v11287_v6  ;;  %4799 = vrot.lane.b32.xlu1 %v11265_v9, %s7709_s28  ;;  %v5294_v57 = vpack.c.bf16 %v11287_v6, %v11284_v49 }
0x1d25   :  { %4797 = vrot.lane.b32.xlu0 %v11273_v53, %s7709_s28  ;;  %5299 = vmatprep.subr.bf16.mxu0 %v5292_v32 }
0x1d26   :  { %5372 = vmatprep.subr.bf16.mxu1 %v5294_v57  ;;  %5300 = vmatpush1.bf16.msra.mxu0 %v5291_v19 }
0x1d27   :  { %5373 = vmatpush1.bf16.msra.mxu1 %v5293_v59 }
0x1d28   :  { %4835 = vrot.lane.b32.xlu1 %v11262_v24, %s7708_s27 }
0x1d29   :  { %4801 = vrot.lane.b32.xlu0 %v11284_v49, %s7709_s28 }
0x1d2c   :  { %4839 = vrot.lane.b32.xlu1 %v11265_v9, %s7708_s27 }
0x1d2d   :  { %4837 = vrot.lane.b32.xlu0 %v11273_v53, %s7708_s27 }
0x1d30   :  { %5025 = vrot.lane.b32.xlu1 %v11262_v24, %s7722_s23 }
0x1d31   :  { %5027 = vrot.lane.b32.xlu0 %v11273_v53, %s7722_s23 }
0x1d34   :  { %5053 = vrot.lane.b32.xlu1 %v11262_v24, %s7723_s9 }
0x1d35   :  { %4841 = vrot.lane.b32.xlu0 %v11268_v52, %s7708_s27 }
0x1d38   :  { %4829 = vrot.lane.b32.xlu1 %v11284_v49, %s7708_s27 }
0x1d39   :  { %4845 = vrot.lane.b32.xlu0 %v11276_v40, %s7708_s27 }
0x1d3c   :  { %5055 = vrot.lane.b32.xlu1 %v11273_v53, %s7723_s9 }
0x1d3d   :  { %5065 = vrot.lane.b32.xlu0 %v11276_v40, %s7723_s9 }
0x1d40   :  { %5019 = vrot.lane.b32.xlu1 %v11284_v49, %s7722_s23 }
0x1d41   :  { %5061 = vrot.lane.b32.xlu0 %v11268_v52, %s7723_s9 }
0x1d44   :  { %4803 = vrot.lane.b32.xlu1 %v11268_v52, %s7709_s28 }
0x1d45   :  { %4805 = vrot.lane.b32.xlu0 %v11279_v18, %s7709_s28 }
0x1d48   :  { %4807 = vrot.lane.b32.xlu1 %v11276_v40, %s7709_s28 }
0x1d49   :  { %4809 = vrot.lane.b32.xlu0 %v11287_v6, %s7709_s28 }
0x1d4c   :  { %5031 = vrot.lane.b32.xlu1 %v11268_v52, %s7722_s23 }
0x1d4d   :  { %4831 = vrot.lane.b32.xlu0 %v11287_v6, %s7708_s27 }
0x1d50   :  { %4843 = vrot.lane.b32.xlu1 %v11279_v18, %s7708_s27 }
0x1d51   :  { %5035 = vrot.lane.b32.xlu0 %v11276_v40, %s7722_s23 }
0x1d54   :  { %5029 = vrot.lane.b32.xlu1 %v11265_v9, %s7722_s23 }
0x1d55   :  { %5033 = vrot.lane.b32.xlu0 %v11279_v18, %s7722_s23 }
0x1d58   :  { %5059 = vrot.lane.b32.xlu1 %v11284_v49, %s7723_s9 }
0x1d59   :  { %5021 = vrot.lane.b32.xlu0 %v11287_v6, %s7722_s23 }
0x1d5c   :  { %5063 = vrot.lane.b32.xlu1 %v11279_v18, %s7723_s9 }
0x1d5d   :  { %5067 = vrot.lane.b32.xlu0 %v11287_v6, %s7723_s9 }
0x1d92   :  { %v4796_v8 = vpop.permute.xlu1 %4795 }
0x1d93   :  { %v11357_v7 = vpop.permute.xlu0 %5057 }
0x1d96   :  { %v4800_v15 = vpop.permute.xlu1 %4799 }
0x1d97   :  { %v4798_v41 = vpop.permute.xlu0 %4797 }
0x1d98   :  { %v4812_v22 = vsel %vm13884_vm9, %v4798_v41, %v4800_v15  ;;  %v4811_v54 = vsel %vm13891_vm5, %v4796_v8, %v4798_v41  ;;  %vm13892_vm9 = vmmov %vm13885_vm2 }
0x1d9a   :  { %v4836_v29 = vpop.permute.xlu1 %4835 }
0x1d9b   :  { %v4802_v3 = vpop.permute.xlu0 %4801 }
0x1d9c   :  { %v4813_v44 = vsel %vm13888_vm7, %v4800_v15, %v4802_v3  ;;  %vm13899_vm7 = vmmov %vm13891_vm5 }
0x1d9e   :  { %v4840_v17 = vpop.permute.xlu1 %4839 }
0x1d9f   :  { %v4838_v33 = vpop.permute.xlu0 %4837 }
0x1da0   :  { %v4847_v11 = vsel %vm13885_vm2, %v4836_v29, %v4838_v33  ;;  %v4848_v28 = vsel %vm13887_vm6, %v4838_v33, %v4840_v17  ;;  %vm13896_vm6 = vmmov %vm13891_vm5 }
0x1da1   :  { %v11363_v20 = vsel %vm9321_vm10, %v4812_v22, %v4847_v11  ;;  %v11375_v16 = vsel %vm9340_vm11, %v4813_v44, %v4848_v28  ;;  %v11383_v63 = vsel %vm9393_vm14, %v4847_v11, %v4812_v22  ;;  %v11397_v55 = vsel %vm9435_vm1, %v4848_v28, %v4813_v44  ;;  %vm13900_vm5 = vmmov %vm13885_vm2 }
0x1da2   :  { %4895 = vrot.lane.b32.xlu0 %v11363_v20, %s7722_s23  ;;  %v11368_v5 = vpop.permute.xlu1 %5025  ;;  %v4827_v0 = vsel %vm13896_vm6, %v4802_v3, %v4796_v8  ;;  %v13915_v3 = vld [vmem:[#allocation15_spill] sm:$0xff]  ;;  %v4988_v36 = vmul.f32 %v11363_v20, %v13916_v62 }
0x1da3   :  { %v11370_v25 = vpop.permute.xlu0 %5027 }
0x1da6   :  { %4925 = vrot.lane.b32.xlu0 %v11375_v16, %s7723_s9  ;;  %v11379_v14 = vpop.permute.xlu1 %5053 }
0x1da7   :  { %v4842_v12 = vpop.permute.xlu0 %4841 }
0x1daa   :  { %5167 = vrot.lane.b32.xlu0 %v11383_v63, %s7722_s23  ;;  %v4830_v10 = vpop.permute.xlu1 %4829 }
0x1dab   :  { %v4861_v50 = vsel %vm13892_vm9, %v4830_v10, %v4836_v29  ;;  %v4846_v38 = vpop.permute.xlu0 %4845  ;;  %v4849_v61 = vsel %vm13885_vm2, %v4840_v17, %v4830_v10  ;;  %vm13902_vm9 = vmmov %vm13885_vm2 }
0x1dac   :  { %v11391_v48 = vsel %vm9357_vm12, %v4811_v54, %v4861_v50  ;;  %v11413_v39 = vsel %vm9361_vm13, %v4827_v0, %v4849_v61  ;;  %v11431_v32 = vsel %vm9399_vm15, %v4861_v50, %v4811_v54  ;;  %vm13903_vm2 = vmmov %vm13896_vm6  ;;  %v11455_v17 = vsel %vm9413_vm0, %v4849_v61, %v4827_v0 }
0x1dad   :  { %4893 = vrot.lane.b32.xlu1 %v11391_v48, %s7722_s23  ;;  %vm13904_vm6 = vmmov %vm13900_vm5 }
0x1dae   :  { %5197 = vrot.lane.b32.xlu0 %v11397_v55, %s7723_s9  ;;  %v11401_v1 = vpop.permute.xlu1 %5055 }
0x1daf   :  { %v11403_v47 = vpop.permute.xlu0 %5065  ;;  %v5070_v37 = vsel %vm2530_vm3, %v11401_v1, %v11357_v7 }
0x1db0   :  { %13895 = vst [vmem:[#allocation60_spill] sm:$0xff] %v11403_v47 }
0x1db1   :  { %4923 = vrot.lane.b32.xlu1 %v11363_v20, %s7723_s9 }
0x1db2   :  { %v11408_v35 = vpop.permute.xlu1 %5019 }
0x1db3   :  { %v11415_v13 = vpop.permute.xlu0 %5061 }
0x1db4   :  { %13898 = vst [vmem:[#allocation5_spill] sm:$0xff] %v11415_v13 }
0x1db5   :  { %4881 = vrot.lane.b32.xlu1 %v11413_v39, %s7722_s23 }
0x1db6   :  { %v4804_v27 = vpop.permute.xlu1 %4803 }
0x1db7   :  { %v4806_v56 = vpop.permute.xlu0 %4805 }
0x1db9   :  { %4921 = vrot.lane.b32.xlu1 %v11391_v48, %s7723_s9 }
0x1dba   :  { %v4808_v34 = vpop.permute.xlu1 %4807 }
0x1dbb   :  { %v4810_v4 = vpop.permute.xlu0 %4809  ;;  %v4815_v30 = vsel %vm13899_vm7, %v4806_v56, %v4808_v34  ;;  %vm13905_vm7 = vmmov %vm13903_vm2 }
0x1dbc   :  { %v4816_v59 = vsel %vm13903_vm2, %v4808_v34, %v4810_v4  ;;  %v4828_v29 = vsel %vm13905_vm7, %v4810_v4, %v4804_v27 }
0x1dbd   :  { %4897 = vrot.lane.b32.xlu1 %v11375_v16, %s7722_s23 }
0x1dbe   :  { %v11423_v43 = vpop.permute.xlu1 %5031 }
0x1dbf   :  { %v4832_v8 = vpop.permute.xlu0 %4831 }
0x1dc0   :  { %v4852_v41 = vsel %vm13904_vm6, %v4846_v38, %v4832_v8  ;;  %v4862_v22 = vsel %vm13900_vm5, %v4832_v8, %v4842_v12  ;;  %v13912_v8 = vld [vmem:[#allocation55_spill] sm:$0xff]  ;;  %vm13918_vm6 = vcmp.eq.s32.totalorder %v13917_v60, 0 }
0x1dc1   :  { %4927 = vrot.lane.b32.xlu1 %v11413_v39, %s7723_s9  ;;  %v11461_v33 = vsel %vm9361_vm13, %v4828_v29, %v4852_v41  ;;  %v11507_v54 = vsel %vm9413_vm0, %v4852_v41, %v4828_v29  ;;  %v13914_v29 = vld [vmem:[#allocation49_spill] sm:$0xff] }
0x1dc2   :  { %v4844_v26 = vpop.permute.xlu1 %4843  ;;  %13909 = vst [vmem:[#allocation46_spill] sm:$0xff] %v11507_v54 }
0x1dc3   :  { %v4850_v58 = vsel %vm13900_vm5, %v4842_v12, %v4844_v26  ;;  %v4851_v19 = vsel %vm13902_vm9, %v4844_v26, %v4846_v38  ;;  %vm13907_vm9 = vmmov %vm13903_vm2  ;;  %v11519_v50 = vpop.permute.xlu0 %5035  ;;  %vm13913_vm2 = vcmp.eq.s32.totalorder %v13912_v8, 0  ;;  %vm13923_vm5 = vcmp.eq.s32.totalorder %v13917_v60, 15 }
0x1dc4   :  { %v11435_v57 = vsel %vm9321_vm10, %v4815_v30, %v4850_v58  ;;  %v11445_v15 = vsel %vm9340_vm11, %v4816_v59, %v4851_v19  ;;  %v4814_v11 = vsel %vm13907_vm9, %v4804_v27, %v4806_v56  ;;  %v11487_v44 = vsel %vm9393_vm14, %v4850_v58, %v4815_v30  ;;  %vm13920_vm7 = vmmov %vm13913_vm2 }
0x1dc5   :  { %5165 = vrot.lane.b32.xlu1 %v11431_v32, %s7722_s23  ;;  %4901 = vrot.lane.b32.xlu0 %v11435_v57, %s7722_s23  ;;  %v11471_v28 = vsel %vm9357_vm12, %v4814_v11, %v4862_v22  ;;  %v11493_v12 = vsel %vm9399_vm15, %v4862_v22, %v4814_v11  ;;  %v11499_v10 = vsel %vm9435_vm1, %v4851_v19, %v4816_v59  ;;  %vm13927_vm9 = vmmov %vm13918_vm6 }
0x1dc6   :  { %13908 = vst [vmem:[#allocation7_spill] sm:$0xff] %v11499_v10  ;;  %v11523_v61 = vpop.permute.xlu1 %5029 }
0x1dc7   :  { %v11521_v38 = vpop.permute.xlu0 %5033 }
0x1dc9   :  { %5195 = vrot.lane.b32.xlu1 %v11383_v63, %s7723_s9  ;;  %4933 = vrot.lane.b32.xlu0 %v11445_v15, %s7723_s9 }
0x1dca   :  { %v11527_v27 = vpop.permute.xlu1 %5059 }
0x1dcb   :  { %v11525_v0 = vpop.permute.xlu0 %5021 }
0x1dcc   :  { %13910 = vst [vmem:[#allocation62_spill] sm:$0xff] %v11525_v0  ;;  %v13922_v0 = vld [vmem:[#allocation20_spill] sm:$0xff] }
0x1dcd   :  { %5153 = vrot.lane.b32.xlu1 %v11455_v17, %s7722_s23  ;;  %4883 = vrot.lane.b32.xlu0 %v11461_v33, %s7722_s23  ;;  %v5119_v47 = vmul.f32 %v11262_v24, %v13922_v0  ;;  %v13924_v24 = vld [vmem:[#allocation22_spill] sm:$0xff] }
0x1dce   :  { %v11531_v56 = vpop.permute.xlu1 %5063 }
0x1dcf   :  { %v11529_v34 = vpop.permute.xlu0 %5067 }
0x1dd0   :  { %13911 = vst [vmem:[#allocation41_spill] sm:$0xff] %v11529_v34 }
0x1dd1   :  { %5193 = vrot.lane.b32.xlu1 %v11431_v32, %s7723_s9  ;;  %4929 = vrot.lane.b32.xlu0 %v11471_v28, %s7723_s9 }
0x1dd5   :  { %4899 = vrot.lane.b32.xlu1 %v11471_v28, %s7722_s23  ;;  %4903 = vrot.lane.b32.xlu0 %v11445_v15, %s7722_s23 }
0x1dd9   :  { %4931 = vrot.lane.b32.xlu1 %v11435_v57, %s7723_s9  ;;  %4935 = vrot.lane.b32.xlu0 %v11461_v33, %s7723_s9 }
0x1ddd   :  { %5169 = vrot.lane.b32.xlu1 %v11397_v55, %s7722_s23  ;;  %5173 = vrot.lane.b32.xlu0 %v11487_v44, %s7722_s23 }
0x1de1   :  { %5171 = vrot.lane.b32.xlu1 %v11493_v12, %s7722_s23  ;;  %5205 = vrot.lane.b32.xlu0 %v11499_v10, %s7723_s9 }
0x1de5   :  { %5203 = vrot.lane.b32.xlu1 %v11487_v44, %s7723_s9  ;;  %5155 = vrot.lane.b32.xlu0 %v11507_v54, %s7722_s23 }
0x1de9   :  { %5199 = vrot.lane.b32.xlu1 %v11455_v17, %s7723_s9  ;;  %5201 = vrot.lane.b32.xlu0 %v11493_v12, %s7723_s9 }
0x1ded   :  { %5175 = vrot.lane.b32.xlu0 %v11499_v10, %s7722_s23 }
0x1df1   :  { %5207 = vrot.lane.b32.xlu0 %v11507_v54, %s7723_s9  ;;  %v13921_v54 = vld [vmem:[#allocation19_spill] sm:$0xff] }
0x1e14   :  { %v11533_v4 = vpop.permute.xlu0 %4895 }
0x1e18   :  { %v4926_v30 = vpop.permute.xlu0 %4925 }
0x1e1c   :  { %v11551_v23 = vpop.permute.xlu0 %5167 }
0x1e1f   :  { %v4894_v26 = vpop.permute.xlu1 %4893 }
0x1e20   :  { %v4905_v19 = vsel %vm2497_vm4, %v4894_v26, %v11533_v4 }
0x1e23   :  { %v4924_v58 = vpop.permute.xlu1 %4923 }
0x1e24   :  { %v4938_v59 = vsel %vm2530_vm3, %v4924_v58, %v4926_v30 }
0x1e25   :  { %v4956_v41 = vsel %vm13913_vm2, %v4938_v59, %v4905_v19  ;;  %v4964_v51 = vsel %vm2246_vm8, %v4905_v19, %v4938_v59  ;;  %v5037_v19 = vsel %vm2497_vm4, %v11368_v5, %v11370_v25  ;;  %v13919_v59 = vld [vmem:[#allocation3_spill] sm:$0xff]  ;;  %vm13930_vm2 = vmmov %vm13923_vm5 }
0x1e26   :  { %v4972_v22 = vmul.f32 %v4956_v41, %v13914_v29 }
0x1e27   :  { %v4882_v11 = vpop.permute.xlu1 %4881 }
0x1e28   :  { %v4980_v45 = vadd.f32 %v4972_v22, %v13915_v3  ;;  %v4919_v42 = vsel %vm2497_vm4, %v4882_v11, %v4894_v26  ;;  %v5004_v26 = vmul.f32 %v4964_v51, %v13919_v59  ;;  %v5051_v51 = vsel %vm2497_vm4, %v11408_v35, %v11368_v5 }
0x1e2a   :  { %v4996_v41 = vadd.f32 %v4988_v36, %v4980_v45  ;;  %v11564_v45 = vpop.permute.xlu0 %5197 }
0x1e2b   :  { %v4922_v46 = vpop.permute.xlu1 %4921 }
0x1e2c   :  { %v4937_v2 = vsel %vm2530_vm3, %v4922_v46, %v4924_v58  ;;  %v5088_v58 = vsel %vm13920_vm7, %v5070_v37, %v5037_v19  ;;  %v5012_v31 = vadd.f32 %v5004_v26, %v4996_v41 }
0x1e2d   :  { %v4955_v22 = vsel %vm13918_vm6, %v4937_v2, %v4919_v42  ;;  %v5104_v36 = vmul.f32 %v5088_v58, %v13921_v54  ;;  %v4963_v41 = vsel %vm13923_vm5, %v4919_v42, %v4937_v2  ;;  %v11579_v58 = vmul.f32 %v11265_v9, %v13922_v0  ;;  %vm13934_vm6 = vmmov %vm13920_vm7  ;;  %v13939_v9 = vld [vmem:[#allocation23_spill] sm:$0xff] }
0x1e2e   :  { %v4971_v20 = vmul.f32 %v4955_v22, %v13914_v29  ;;  %v4987_v22 = vmul.f32 %v11391_v48, %v13916_v62  ;;  %v11583_v48 = vmul.f32 %v11284_v49, %v13922_v0  ;;  %v11596_v42 = vmul.f32 %v11279_v18, %v13924_v24  ;;  %v13928_v49 = vld [vmem:[#allocation28_spill] sm:$0xff] }
0x1e2f   :  { %v4898_v21 = vpop.permute.xlu1 %4897  ;;  %v5112_v13 = vadd.f32 %v5104_v36, %v5012_v31  ;;  %v5069_v31 = vsel %vm2530_vm3, %v11379_v14, %v11401_v1  ;;  %v11604_v36 = vmul.f32 %v11287_v6, %v13924_v24  ;;  %v5096_v1 = vsel %vm2246_vm8, %v5037_v19, %v5070_v37 }
0x1e30   :  { %v4979_v10 = vadd.f32 %v4971_v20, %v13915_v3  ;;  %v5120_v20 = vmul.f32 %v11273_v53, %v13922_v0  ;;  %v11587_v3 = vmul.f32 %v11268_v52, %v13924_v24  ;;  %v5087_v0 = vsel %vm13927_vm9, %v5069_v31, %v5051_v51 }
0x1e31   :  { %13926 = vst [vmem:[#allocation64_spill] sm:$0xff] %v11604_v36  ;;  %v5003_v18 = vmul.f32 %v4963_v41, %v13919_v59  ;;  %v5260_v53 = vmul.f32 %v11383_v63, %v13928_v49  ;;  %v11625_v6 = vmul.f32 %v11413_v39, %v13916_v62  ;;  %v11629_v37 = vmul.f32 %v11431_v32, %v13928_v49  ;;  %v13932_v41 = vld [vmem:[#allocation24_spill] sm:$0xff]  ;;  %v13933_v32 = vld [vmem:[#allocation14_spill] sm:$0xff] }
0x1e32   :  { %v4995_v26 = vadd.f32 %v4987_v22, %v4979_v10  ;;  %v11600_v10 = vmul.f32 %v11276_v40, %v13924_v24  ;;  %v11608_v22 = vmul.f32 %v11375_v16, %v13916_v62  ;;  %v11619_v40 = vmul.f32 %v11397_v55, %v13928_v49 }
0x1e33   :  { %v4928_v34 = vpop.permute.xlu1 %4927  ;;  %v5095_v24 = vsel %vm13930_vm2, %v5051_v51, %v5069_v31  ;;  %v5128_v16 = vadd.f32 %v5120_v20, %v5112_v13  ;;  %v11633_v19 = vmul.f32 %v11455_v17, %v13928_v49  ;;  %v5136_v55 = vmul.f32 %v5096_v1, %v13932_v41  ;;  %v13937_v1 = vld [vmem:[#allocation58_spill] sm:$0xff] }
0x1e34   :  { %13925 = vst [vmem:[#allocation6_spill] sm:$0xff] %v11600_v10  ;;  %13929 = vst [vmem:[#allocation4_spill] sm:$0xff] %v11619_v40  ;;  %v5011_v63 = vadd.f32 %v5003_v18, %v4995_v26  ;;  %v5103_v52 = vmul.f32 %v5087_v0, %v13921_v54  ;;  %v4939_v51 = vsel %vm2530_vm3, %v4926_v30, %v4928_v34  ;;  %v13935_v30 = vld [vmem:[#allocation57_spill] sm:$0xff]  ;;  %vm13938_vm5 = vcmp.eq.s32.totalorder %v13937_v1, 0 }
0x1e35   :  { %13931 = vst [vmem:[#allocation61_spill] sm:$0xff] %v11633_v19  ;;  %v4953_v13 = vsel %vm2530_vm3, %v4928_v34, %v4922_v46  ;;  %v5135_v31 = vmul.f32 %v5095_v24, %v13932_v41  ;;  %v11644_v62 = vmul.f32 %v11461_v33, %v13933_v32  ;;  %v4906_v46 = vsel %vm2497_vm4, %v11533_v4, %v4898_v21  ;;  %vm13944_vm2 = vmmov %vm13938_vm5 }
0x1e36   :  { %v4907_v0 = vsel %vm2497_vm4, %v4898_v21, %v4882_v11  ;;  %v5144_v34 = vadd.f32 %v5136_v55, %v5128_v16  ;;  %v5111_v33 = vadd.f32 %v5103_v52, %v5011_v63  ;;  %vm13936_vm7 = vcmp.eq.s32.totalorder %v13935_v30, 0  ;;  %v13940_v52 = vld [vmem:[#allocation25_spill] sm:$0xff] }
0x1e37   :  { %v5166_v2 = vpop.permute.xlu1 %5165  ;;  %v11592_v5 = vpop.permute.xlu0 %4901  ;;  %v4957_v26 = vsel %vm13936_vm7, %v4939_v51, %v4906_v46  ;;  %v4958_v49 = vsel %vm13938_vm5, %v4953_v13, %v4907_v0  ;;  %v11668_v4 = vmul.f32 %v11435_v57, %v13933_v32  ;;  %v5071_v21 = vsel %vm2530_vm3, %v11357_v7, %v11527_v27  ;;  %vm13943_vm9 = vmmov %vm13936_vm7 }
0x1e38   :  { %v11648_v18 = vsel %vm2497_vm4, %v5166_v2, %v11551_v23  ;;  %v11675_v11 = vmul.f32 %v11471_v28, %v13933_v32  ;;  %v11679_v16 = vmul.f32 %v11493_v12, %v13940_v52  ;;  %v11685_v55 = vmul.f32 %v11445_v15, %v13933_v32 }
0x1e39   :  { %v5085_v57 = vsel %vm2530_vm3, %v11527_v27, %v11379_v14  ;;  %v11692_v7 = vmul.f32 %v11487_v44, %v13940_v52  ;;  %v5038_v12 = vsel %vm2497_vm4, %v11370_v25, %v11523_v61  ;;  %v4973_v15 = vmul.f32 %v4957_v26, %v13914_v29 }
0x1e3a   :  { %13941 = vst [vmem:[#allocation59_spill] sm:$0xff] %v11679_v16  ;;  %v5039_v16 = vsel %vm2497_vm4, %v11523_v61, %v11408_v35  ;;  %v4974_v32 = vmul.f32 %v4958_v49, %v13914_v29  ;;  %v5040_v14 = vsel %vm2497_vm4, %v11423_v43, %v11521_v38  ;;  %v5089_v44 = vsel %vm13943_vm9, %v5071_v21, %v5038_v12 }
0x1e3b   :  { %v5196_v20 = vpop.permute.xlu1 %5195  ;;  %v11639_v39 = vpop.permute.xlu0 %4933  ;;  %13942 = vst [vmem:[#allocation42_spill] sm:$0xff] %v11692_v7  ;;  %v5127_v27 = vadd.f32 %v5119_v47, %v5111_v33  ;;  %v11712_v25 = vsel %vm2497_vm4, %v11521_v38, %v11519_v50  ;;  %v5090_v35 = vsel %vm13944_vm2, %v5085_v57, %v5039_v16  ;;  %vm13946_vm7 = vcmp.eq.s32.totalorder %v13937_v1, 15  ;;  %v13947_v47 = vld [vmem:[#allocation5_spill] sm:$0xff]  ;;  %v13948_v33 = vld [vmem:[#allocation60_spill] sm:$0xff] }
0x1e3c   :  { %v11652_v17 = vsel %vm2530_vm3, %v5196_v20, %v11564_v45  ;;  %v5098_v61 = vsel %vm13946_vm7, %v5039_v16, %v5085_v57  ;;  %v5073_v38 = vsel %vm2530_vm3, %v11531_v56, %v13948_v33  ;;  %v5105_v16 = vmul.f32 %v5089_v44, %v13921_v54  ;;  %v13949_v57 = vld [vmem:[#allocation15_spill] sm:$0xff] }
0x1e3d   :  { %v5228_v24 = vsel %vm13934_vm6, %v11652_v17, %v11648_v18  ;;  %vm13945_vm6 = vcmp.eq.s32.totalorder %v13935_v30, 15  ;;  %v4982_v29 = vadd.f32 %v4974_v32, %v13949_v57  ;;  %vm13950_vm5 = vcmp.eq.s32.totalorder %v13917_v60, 0 }
0x1e3e   :  { %v5244_v36 = vmul.f32 %v5228_v24, %v13939_v9  ;;  %v5097_v49 = vsel %vm13945_vm6, %v5038_v12, %v5071_v21  ;;  %v4981_v12 = vadd.f32 %v4973_v15, %v13949_v57  ;;  %v5106_v52 = vmul.f32 %v5090_v35, %v13921_v54  ;;  %vm13952_vm9 = vmmov %vm13950_vm5 }
0x1e3f   :  { %v11681_v63 = vpop.permute.xlu1 %5153  ;;  %v4884_v24 = vpop.permute.xlu0 %4883  ;;  %v11749_v44 = vmul.f32 %v5097_v49, %v13932_v41  ;;  %vm13953_vm2 = vcmp.eq.s32.totalorder %v13912_v8, 0  ;;  %vm13954_vm6 = vcmp.eq.s32.totalorder %v13917_v60, 15  ;;  %v5100_v54 = vsel %vm2246_vm8, %v5040_v14, %v5073_v38 }
0x1e40   :  { %v5252_v28 = vadd.f32 %v5244_v36, %v5144_v34  ;;  %v11730_v26 = vsel %vm2497_vm4, %v11681_v63, %v5166_v2  ;;  %v13951_v2 = vld [vmem:[#allocation62_spill] sm:$0xff]  ;;  %v5092_v15 = vsel %vm13953_vm2, %v5073_v38, %v5040_v14  ;;  %vm13955_vm7 = vcmp.eq.s32.totalorder %v13935_v30, 15 }
0x1e41   :  { %v5052_v19 = vsel %vm2497_vm4, %v13951_v2, %v11423_v43  ;;  %v4965_v43 = vsel %vm13955_vm7, %v4906_v46, %v4939_v51  ;;  %v5042_v40 = vsel %vm2497_vm4, %v11519_v50, %v13951_v2  ;;  %v13957_v14 = vld [vmem:[#allocation18_spill] sm:$0xff]  ;;  %v13958_v46 = vld [vmem:[#allocation21_spill] sm:$0xff]  ;;  %vm13964_vm7 = vcmp.eq.s32.totalorder %v13935_v30, 0 }
0x1e42   :  { %v11707_v36 = vadd.f32 %v5260_v53, %v5252_v28  ;;  %v5072_v53 = vsel %vm2530_vm3, %v13947_v47, %v11531_v56  ;;  %v5108_v51 = vmul.f32 %v5092_v15, %v13957_v14 }
0x1e43   :  { %v11720_v34 = vpop.permute.xlu1 %5193  ;;  %v4930_v28 = vpop.permute.xlu0 %4929  ;;  %v5091_v32 = vsel %vm13952_vm9, %v5072_v53, %v5052_v19  ;;  %v5099_v57 = vsel %vm13954_vm6, %v5052_v19, %v5072_v53  ;;  %v4997_v19 = vadd.f32 %v11608_v22, %v4981_v12  ;;  %v4998_v53 = vadd.f32 %v11625_v6, %v4982_v29 }
0x1e44   :  { %v11734_v21 = vsel %vm2530_vm3, %v11720_v34, %v5196_v20  ;;  %v5143_v20 = vadd.f32 %v5135_v31, %v5127_v27  ;;  %v11772_v38 = vmul.f32 %v5091_v32, %v13957_v14  ;;  %v5005_v6 = vmul.f32 %v4965_v43, %v13919_v59 }
0x1e45   :  { %v5227_v56 = vsel %vm13950_vm5, %v11734_v21, %v11730_v26  ;;  %vm13956_vm5 = vcmp.eq.s32.totalorder %v13937_v1, 15 }
0x1e46   :  { %v5243_v10 = vmul.f32 %v5227_v56, %v13939_v9  ;;  %v4966_v31 = vsel %vm13956_vm5, %v4907_v0, %v4953_v13  ;;  %v11764_v56 = vmul.f32 %v5098_v61, %v13932_v41  ;;  %v11776_v13 = vmul.f32 %v5099_v57, %v13958_v46  ;;  %v13961_v61 = vld [vmem:[#allocation41_spill] sm:$0xff] }
0x1e47   :  { %v4900_v35 = vpop.permute.xlu1 %4899  ;;  %v4904_v49 = vpop.permute.xlu0 %4903  ;;  %v11782_v0 = vmul.f32 %v5100_v54, %v13958_v46  ;;  %v5074_v50 = vsel %vm2530_vm3, %v13948_v33, %v13961_v61  ;;  %v5006_v29 = vmul.f32 %v4966_v31, %v13919_v59  ;;  %v13963_v59 = vld [vmem:[#allocation51_spill] sm:$0xff]  ;;  %vm13965_vm5 = vcmp.eq.s32.totalorder %v13937_v1, 0 }
0x1e48   :  { %v5251_v27 = vadd.f32 %v5243_v10, %v5143_v20  ;;  %13959 = vst [vmem:[#allocation43_spill] sm:$0xff] %v11776_v13  ;;  %v4908_v12 = vsel %vm2497_vm4, %v4900_v35, %v11592_v5  ;;  %v4920_v57 = vsel %vm2497_vm4, %v4884_v24, %v4900_v35  ;;  %v5013_v20 = vadd.f32 %v5005_v6, %v4997_v19  ;;  %v13962_v35 = vld [vmem:[#allocation10_spill] sm:$0xff] }
0x1e49   :  { %v5014_v32 = vadd.f32 %v5006_v29, %v4998_v53  ;;  %v4909_v43 = vsel %vm2497_vm4, %v11592_v5, %v4904_v49  ;;  %v4910_v31 = vsel %vm2497_vm4, %v4904_v49, %v4884_v24 }
0x1e4a   :  { %v11779_v10 = vadd.f32 %v11629_v37, %v5251_v27 }
0x1e4b   :  { %v4932_v22 = vpop.permute.xlu1 %4931  ;;  %v4936_v2 = vpop.permute.xlu0 %4935 }
0x1e4c   :  { %13960 = vst [vmem:[#allocation50_spill] sm:$0xff] %v11779_v10  ;;  %v4940_v37 = vsel %vm2530_vm3, %v4930_v28, %v4932_v22  ;;  %v4941_v54 = vsel %vm2530_vm3, %v4932_v22, %v11639_v39  ;;  %v4942_v53 = vsel %vm2530_vm3, %v11639_v39, %v4936_v2  ;;  %v4954_v6 = vsel %vm2530_vm3, %v4936_v2, %v4930_v28 }
0x1e4d   :  { %v4959_v33 = vsel %vm13952_vm9, %v4940_v37, %v4920_v57  ;;  %v4960_v15 = vsel %vm13953_vm2, %v4941_v54, %v4908_v12  ;;  %v4967_v22 = vsel %vm13954_vm6, %v4920_v57, %v4940_v37  ;;  %v4968_v19 = vsel %vm2246_vm8, %v4908_v12, %v4941_v54  ;;  %vm13966_vm9 = vmmov %vm13964_vm7 }
0x1e4e   :  { %v4975_v27 = vmul.f32 %v4959_v33, %v13962_v35  ;;  %v4976_v41 = vmul.f32 %v4960_v15, %v13962_v35  ;;  %v4961_v49 = vsel %vm13964_vm7, %v4942_v53, %v4909_v43  ;;  %v4962_v33 = vsel %vm13965_vm5, %v4954_v6, %v4910_v31  ;;  %v13967_v15 = vld [vmem:[#allocation16_spill] sm:$0xff]  ;;  %vm13968_vm2 = vmmov %vm13965_vm5 }
0x1e4f   :  { %v5170_v29 = vpop.permute.xlu1 %5169  ;;  %v11817_v57 = vpop.permute.xlu0 %5173  ;;  %v5086_v12 = vsel %vm2530_vm3, %v13961_v61, %v13947_v47  ;;  %v5093_v39 = vsel %vm13966_vm9, %v5074_v50, %v11712_v25  ;;  %v4977_v28 = vmul.f32 %v4961_v49, %v13962_v35  ;;  %v5114_v37 = vadd.f32 %v5106_v52, %v5014_v32 }
0x1e50   :  { %v4983_v5 = vadd.f32 %v4975_v27, %v13963_v59  ;;  %v4984_v24 = vadd.f32 %v4976_v41, %v13963_v59  ;;  %v4978_v41 = vmul.f32 %v4962_v33, %v13962_v35  ;;  %v5008_v27 = vmul.f32 %v4968_v19, %v13967_v15 }
0x1e51   :  { %v5113_v10 = vadd.f32 %v5105_v16, %v5013_v20  ;;  %v5007_v13 = vmul.f32 %v4967_v22, %v13967_v15  ;;  %v4985_v47 = vadd.f32 %v4977_v28, %v13963_v59  ;;  %v5094_v49 = vsel %vm13968_vm2, %v5086_v12, %v5042_v40  ;;  %v13975_v28 = vld [vmem:[#allocation26_spill] sm:$0xff] }
0x1e52   :  { %v4999_v54 = vadd.f32 %v11675_v11, %v4983_v5  ;;  %v5000_v2 = vadd.f32 %v11668_v4, %v4984_v24  ;;  %v4986_v61 = vadd.f32 %v4978_v41, %v13963_v59  ;;  %vm13969_vm6 = vcmp.eq.s32.totalorder %v13935_v30, 15 }
0x1e53   :  { %v5172_v7 = vpop.permute.xlu1 %5171  ;;  %v5101_v52 = vsel %vm13969_vm6, %v11712_v25, %v5074_v50  ;;  %vm13970_vm7 = vcmp.eq.s32.totalorder %v13937_v1, 15  ;;  %v11842_v16 = vpop.permute.xlu0 %5205  ;;  %v5109_v20 = vmul.f32 %v5093_v39, %v13957_v14  ;;  %v5236_v32 = vsel %vm2246_vm8, %v11648_v18, %v11652_v17  ;;  %vm13971_vm5 = vmmov %vm13969_vm6 }
0x1e54   :  { %v11840_v4 = vsel %vm13970_vm7, %v5042_v40, %v5086_v12  ;;  %v5016_v11 = vadd.f32 %v5008_v27, %v5000_v2  ;;  %v5015_v22 = vadd.f32 %v5007_v13, %v4999_v54  ;;  %v4969_v19 = vsel %vm13971_vm5, %v4909_v43, %v4942_v53  ;;  %vm13972_vm9 = vmmov %vm13970_vm7 }
0x1e55   :  { %v4970_v25 = vsel %vm13972_vm9, %v4910_v31, %v4954_v6  ;;  %v5001_v40 = vadd.f32 %v11685_v55, %v4985_v47  ;;  %v5130_v50 = vadd.f32 %v11583_v48, %v5114_v37  ;;  %v5110_v24 = vmul.f32 %v5094_v49, %v13957_v14  ;;  %v13973_v31 = vld [vmem:[#allocation27_spill] sm:$0xff] }
0x1e56   :  { %v5116_v5 = vadd.f32 %v5108_v51, %v5016_v11  ;;  %v11857_v33 = vmul.f32 %v5101_v52, %v13958_v46  ;;  %v5002_v12 = vadd.f32 %v11644_v62, %v4986_v61  ;;  %v5129_v17 = vadd.f32 %v11579_v58, %v5113_v10 }
0x1e57   :  { %v5204_v18 = vpop.permute.xlu1 %5203  ;;  %v5009_v13 = vmul.f32 %v4969_v19, %v13967_v15  ;;  %v5180_v51 = vsel %vm2497_vm4, %v5172_v7, %v11817_v57  ;;  %v5156_v55 = vpop.permute.xlu0 %5155  ;;  %v5276_v53 = vmul.f32 %v5236_v32, %v13973_v31  ;;  %v5115_v6 = vadd.f32 %v11772_v38, %v5015_v22  ;;  %v13979_v19 = vld [vmem:[#allocation42_spill] sm:$0xff] }
0x1e58   :  { %v5132_v43 = vadd.f32 %v11596_v42, %v5116_v5  ;;  %v5213_v48 = vsel %vm2530_vm3, %v5204_v18, %v11842_v16  ;;  %v5010_v62 = vmul.f32 %v4970_v25, %v13967_v15  ;;  %vm13974_vm2 = vcmp.eq.s32.totalorder %v13912_v8, 0  ;;  %v13980_v25 = vld [vmem:[#allocation48_spill] sm:$0xff] }
0x1e59   :  { %v5232_v58 = vsel %vm13974_vm2, %v5213_v48, %v5180_v51  ;;  %v5017_v10 = vadd.f32 %v5009_v13, %v5001_v40  ;;  %v5146_v42 = vadd.f32 %v11764_v56, %v5130_v50  ;;  %v5178_v54 = vsel %vm2497_vm4, %v11551_v23, %v5170_v29 }
0x1e5a   :  { %v5148_v39 = vadd.f32 %v11782_v0, %v5132_v43  ;;  %v5248_v41 = vmul.f32 %v5232_v58, %v13975_v28  ;;  %v5018_v37 = vadd.f32 %v5010_v62, %v5002_v12  ;;  %v5145_v27 = vadd.f32 %v11749_v44, %v5129_v17  ;;  %v13987_v58 = vld [vmem:[#allocation50_spill] sm:$0xff] }
0x1e5b   :  { %v5200_v2 = vpop.permute.xlu1 %5199  ;;  %v5284_v38 = vadd.f32 %v5276_v53, %v11707_v36  ;;  %v5179_v47 = vsel %vm2497_vm4, %v5170_v29, %v11681_v63  ;;  %v5202_v56 = vpop.permute.xlu0 %5201  ;;  %v5240_v52 = vsel %vm2246_vm8, %v5180_v51, %v5213_v48  ;;  %vm13976_vm6 = vcmp.eq.s32.totalorder %v13935_v30, 0  ;;  %v13985_v51 = vld [vmem:[#allocation6_spill] sm:$0xff]  ;;  %v13986_v53 = vld [vmem:[#allocation61_spill] sm:$0xff] }
0x1e5c   :  { %v5256_v61 = vadd.f32 %v5248_v41, %v5148_v39  ;;  %v5211_v0 = vsel %vm2530_vm3, %v11564_v45, %v5200_v2  ;;  %v5225_v49 = vsel %vm2530_vm3, %v5200_v2, %v11720_v34  ;;  %vm13977_vm7 = vcmp.eq.s32.totalorder %v13937_v1, 0  ;;  %v13988_v41 = vld [vmem:[#allocation64_spill] sm:$0xff] }
0x1e5d   :  { %v5229_v23 = vsel %vm13976_vm6, %v5211_v0, %v5178_v54  ;;  %v5230_v36 = vsel %vm13977_vm7, %v5225_v49, %v5179_v47  ;;  %v5131_v44 = vadd.f32 %v11587_v3, %v5115_v6  ;;  %vm13978_vm5 = vcmp.eq.s32.totalorder %v13917_v60, 15 }
0x1e5e   :  { %v5235_v45 = vsel %vm13978_vm5, %v11730_v26, %v11734_v21  ;;  %v5117_v63 = vadd.f32 %v5109_v20, %v5017_v10  ;;  %v5245_v34 = vmul.f32 %v5229_v23, %v13939_v9  ;;  %v5246_v29 = vmul.f32 %v5230_v36, %v13939_v9  ;;  %v13982_v20 = vld [vmem:[#allocation43_spill] sm:$0xff]  ;;  %vm13983_vm2 = vmmov %vm13978_vm5 }
0x1e5f   :  { %v5118_v11 = vadd.f32 %v5110_v24, %v5018_v37  ;;  %v5192_v32 = vsel %vm2497_vm4, %v5156_v55, %v5172_v7  ;;  %v5212_v22 = vsel %vm2530_vm3, %v5202_v56, %v5204_v18  ;;  %v5272_v5 = vadd.f32 %v13979_v19, %v5256_v61  ;;  %v5176_v26 = vpop.permute.xlu0 %5175  ;;  %v13984_v18 = vld [vmem:[#allocation4_spill] sm:$0xff]  ;;  %v13990_v23 = vld [vmem:[#allocation59_spill] sm:$0xff] }
0x1e60   :  { %v5280_v40 = vmul.f32 %v5240_v52, %v13980_v25  ;;  %v5253_v3 = vadd.f32 %v5245_v34, %v5145_v27  ;;  %v5254_v50 = vadd.f32 %v5246_v29, %v5146_v42  ;;  %vm13981_vm9 = vcmp.eq.s32.totalorder %v13917_v60, 0  ;;  %v13994_v29 = vld [vmem:[#allocation25_spill] sm:$0xff] }
0x1e61   :  { %v5231_v12 = vsel %vm13981_vm9, %v5212_v22, %v5192_v32  ;;  %v5275_v21 = vmul.f32 %v5235_v45, %v13973_v31  ;;  %v5147_v17 = vadd.f32 %v13982_v20, %v5131_v44  ;;  %v5239_v24 = vsel %vm13983_vm2, %v5192_v32, %v5212_v22 }
0x1e62   :  { %v5247_v7 = vmul.f32 %v5231_v12, %v13975_v28  ;;  %v5269_v13 = vadd.f32 %v13984_v18, %v5253_v3  ;;  %v5133_v43 = vadd.f32 %v13985_v51, %v5117_v63  ;;  %v5288_v48 = vadd.f32 %v5280_v40, %v5272_v5  ;;  %v7665_v18 = vld [vmem:[%s13223_s13] sm:$0xff]  }
0x1e63   :  { %v5270_v6 = vadd.f32 %v13986_v53, %v5254_v50  ;;  %v5142_v62 = vmul.f32 %v11840_v4, %v13958_v46  ;;  %v5283_v10 = vadd.f32 %v5275_v21, %v13987_v58  ;;  %v5134_v42 = vadd.f32 %v13988_v41, %v5118_v11  ;;  %v5208_v61 = vpop.permute.xlu0 %5207  ;;  %v7667_v53 = vld [vmem:[%s13223_s13 + $0x10] sm:$0xff]  }
0x1e64   :  { %v5255_v39 = vadd.f32 %v5247_v7, %v5147_v17  ;;  %vm13989_vm6 = vcmp.eq.s32.totalorder %v13935_v30, 15  ;;  %v5279_v2 = vmul.f32 %v5239_v24, %v13980_v25  ;;  %v5181_v27 = vsel %vm2497_vm4, %v11817_v57, %v5176_v26 }
0x1e65   :  { %v5237_v37 = vsel %vm13989_vm6, %v5178_v54, %v5211_v0  ;;  %v5296_v52 = vpack.c.bf16 %v5288_v48, %v5284_v38  ;;  %v5182_v44 = vsel %vm2497_vm4, %v5176_v26, %v5156_v55  ;;  %v5214_v4 = vsel %vm2530_vm3, %v11842_v16, %v5208_v61  ;;  %vm13996_vm2 = vmmov %vm13989_vm6 }
0x1e66   :  { %v5271_v36 = vadd.f32 %v13990_v23, %v5255_v39  ;;  %v5226_v45 = vsel %vm2530_vm3, %v5208_v61, %v5202_v56  ;;  %vm13991_vm7 = vcmp.eq.s32.totalorder %v13937_v1, 15  ;;  %v5149_v54 = vadd.f32 %v11857_v33, %v5133_v43  ;;  %v13995_v56 = vld [vmem:[#allocation46_spill] sm:$0xff] }
0x1e67   :  { %v5238_v63 = vsel %vm13991_vm7, %v5179_v47, %v5225_v49  ;;  %vm13992_vm5 = vcmp.eq.s32.totalorder %v13935_v30, 0  ;;  %vm13993_vm9 = vcmp.eq.s32.totalorder %v13937_v1, 0  ;;  %5301 = vmatprep.subr.bf16.mxu0 %v5296_v52  ;;  %v5150_v34 = vadd.f32 %v5142_v62, %v5134_v42  ;;  %vm13997_vm6 = vmmov %vm13991_vm7  ;;  %v13998_v49 = vld [vmem:[#allocation7_spill] sm:$0xff] }
0x1e68   :  { %v5233_v0 = vsel %vm13992_vm5, %v5214_v4, %v5181_v27  ;;  %v5234_v57 = vsel %vm13993_vm9, %v5226_v45, %v5182_v44  ;;  %v5287_v38 = vadd.f32 %v5279_v2, %v5271_v36  ;;  %v5266_v11 = vmul.f32 %v13995_v56, %v13994_v29 }
0x1e69   :  { %v5249_v55 = vmul.f32 %v5233_v0, %v13975_v28  ;;  %v5250_v16 = vmul.f32 %v5234_v57, %v13975_v28  ;;  %v5241_v47 = vsel %vm13996_vm2, %v5181_v27, %v5214_v4  ;;  %v5242_v33 = vsel %vm13997_vm6, %v5182_v44, %v5226_v45 }
0x1e6a   :  { %v5265_v32 = vmul.f32 %v13998_v49, %v13994_v29  ;;  %v5295_v5 = vpack.c.bf16 %v5287_v38, %v5283_v10  ;;  %v5277_v40 = vmul.f32 %v5237_v37, %v13973_v31  ;;  %v5278_v3 = vmul.f32 %v5238_v63, %v13973_v31 }
0x1e6b   :  { %v5257_v22 = vadd.f32 %v5249_v55, %v5149_v54  ;;  %v5258_v19 = vadd.f32 %v5250_v16, %v5150_v34  ;;  %v5281_v12 = vmul.f32 %v5241_v47, %v13980_v25  ;;  %v5282_v26 = vmul.f32 %v5242_v33, %v13980_v25 }
0x1e6c   :  { %5302 = vmatpush1.bf16.msra.mxu0 %v5295_v5  ;;  %v5285_v20 = vadd.f32 %v5277_v40, %v5269_v13  ;;  %v5286_v24 = vadd.f32 %v5278_v3, %v5270_v6  ;;  %vm13999_vm7 = vcmask 261120   ;;  %v14000_v48 = vmov 0   ;;  %v7666_v13 = vld [vmem:[%s13223_s13 + $0x8] sm:$0xff]   ;;  %v7668_v6 = vld [vmem:[%s13223_s13 + $0x18] sm:$0xff]  }
0x1e6d   :  { %v5273_v50 = vadd.f32 %v5265_v32, %v5257_v22  ;;  %v5274_v21 = vadd.f32 %v5266_v11, %v5258_v19  ;;  %vm14001_vm5 = vmmov %vm13999_vm7 }
0x1e6e   :  { %vm14002_vm9 = vmmov %vm14001_vm5 }
0x1e6f   :  { %v5289_v17 = vadd.f32 %v5281_v12, %v5273_v50  ;;  %v5290_v7 = vadd.f32 %v5282_v26, %v5274_v21  ;;  %7204 = vmatmul.mubr.msk.bf16.vlgmr.msra.gmra.mrb[76].mxu0 %vm13999_vm7, %v7665_v18  ;;  %vm14003_vm2 = vmmov %vm14001_vm5 }
0x1e70   :  { %5341 = vmatprep.mubr.bf16.mxu0 %v14000_v48  ;;  %vm14004_vm6 = vmmov %vm14003_vm2 }
0x1e71   :  { %v5298_v51 = vpack.c.bf16 %v5290_v7, %v5286_v24  ;;  %v5297_v43 = vpack.c.bf16 %v5289_v17, %v5285_v20  ;;  %vm14005_vm7 = vmmov %vm14003_vm2 }
0x1e73   :  { %5374 = vmatprep.subr.bf16.mxu1 %v5298_v51 }
0x1e74   :  { %5375 = vmatpush1.bf16.msra.mxu1 %v5297_v43 }
0x1e77   :  { %7208 = vmatmul.mubr.msk.bf16.vlgmr.msra.gmra.mrb[60].mxu1 %vm14001_vm5, %v7665_v18  ;;  %7205 = vmatmul.mubr.msk.bf16.gmra.mrb[80].mxu0 %vm14002_vm9, %v7666_v13  ;;  %vm14006_vm5 = vmmov %vm14003_vm2 }
0x1e78   :  { %5414 = vmatprep.mubr.bf16.mxu1 %v14000_v48  ;;  %5351 = vmatprep.mubr.bf16.mxu0 %v14000_v48  ;;  %vm14007_vm9 = vmmov %vm14003_vm2 }
0x1e7f   :  { %7209 = vmatmul.mubr.msk.bf16.gmra.mrb[64].mxu1 %vm14003_vm2, %v7666_v13  ;;  %7206 = vmatmul.mubr.msk.bf16.gmra.mrb[84].mxu0 %vm14004_vm6, %v7667_v53  ;;  %vm14008_vm2 = vcmask 523264  }
0x1e80   :  { %5424 = vmatprep.mubr.bf16.mxu1 %v14000_v48  ;;  %5361 = vmatprep.mubr.bf16.mxu0 %v14000_v48  ;;  %vm14009_vm6 = vmmov %vm14008_vm2 }
0x1e87   :  { %7210 = vmatmul.mubr.msk.bf16.gmra.mrb[68].mxu1 %vm14005_vm7, %v7667_v53  ;;  %7207 = vmatmul.mubr.msk.bf16.gmra.mrb[88].mxu0 %vm14006_vm5, %v7668_v6  ;;  %vm14029_vm7 = vcmask 1039360   ;;  %vm14030_vm5 = vcmask 7168  }
0x1e88   :  { %5434 = vmatprep.mubr.bf16.mxu1 %v14000_v48  ;;  %5869 = vmatprep.mubr.bf16.mxu0 %v14000_v48 }
0x1e8f   :  { %7211 = vmatmul.mubr.msk.bf16.gmra.mrb[72].mxu1 %vm14007_vm9, %v7668_v6  ;;  %vm14032_vm9 = vmmov %vm14030_vm5 }
0x1e90   :  { %5912 = vmatprep.mubr.bf16.mxu1 %v14000_v48 }
0x1f42   :  { %v11975_v62 = vpop.f32.mrb[76].mxu0 }
0x1f43   :  { %v11977_v58 = vpop.f32.mrb[77].mxu0 }
0x1f44   :  { %v5445_v10 = vadd.f32 %v11977_v58, %v11975_v62  ;;  %v11981_v39 = vpop.f32.mrb[78].mxu0 }
0x1f45   :  { %v11983_v41 = vpop.f32.mrb[79].mxu0 }
0x1f46   :  { %v5450_v42 = vadd.f32 %v11983_v41, %v11981_v39 }
0x1f4a   :  { %v11987_v37 = vpop.f32.mrb[60].mxu1  ;;  %v11992_v61 = vpop.f32.mrb[80].mxu0 }
0x1f4b   :  { %v5446_v2 = vadd.f32 %v5445_v10, %v11987_v37  ;;  %v11990_v27 = vpop.f32.mrb[61].mxu1  ;;  %v11996_v23 = vpop.f32.mrb[81].mxu0 }
0x1f4c   :  { %v11994_v52 = vpop.f32.mrb[62].mxu1  ;;  %v5455_v4 = vadd.f32 %v11996_v23, %v11992_v61  ;;  %v12004_v63 = vpop.f32.mrb[82].mxu0 }
0x1f4d   :  { %v5447_v36 = vadd.f32 %v5446_v2, %v11990_v27  ;;  %v5451_v44 = vadd.f32 %v5450_v42, %v11994_v52  ;;  %v12002_v45 = vpop.f32.mrb[63].mxu1  ;;  %v12006_v54 = vpop.f32.mrb[83].mxu0 }
0x1f4e   :  { %v5460_v57 = vadd.f32 %v12006_v54, %v12004_v63 }
0x1f4f   :  { %v5452_v0 = vadd.f32 %v5451_v44, %v12002_v45  ;;  %5448 = vadd.xlane.f32.xlu1 %v5447_v36 }
0x1f51   :  { %5453 = vadd.xlane.f32.xlu0 %v5452_v0 }
0x1f52   :  { %v12011_v38 = vpop.f32.mrb[64].mxu1  ;;  %v12016_v16 = vpop.f32.mrb[84].mxu0 }
0x1f53   :  { %v5456_v34 = vadd.f32 %v5455_v4, %v12011_v38  ;;  %v12014_v55 = vpop.f32.mrb[65].mxu1  ;;  %v12020_v11 = vpop.f32.mrb[85].mxu0 }
0x1f54   :  { %v12018_v56 = vpop.f32.mrb[66].mxu1  ;;  %v5465_v49 = vadd.f32 %v12020_v11, %v12016_v16  ;;  %v12028_v22 = vpop.f32.mrb[86].mxu0 }
0x1f55   :  { %v5457_v47 = vadd.f32 %v5456_v34, %v12014_v55  ;;  %v5461_v33 = vadd.f32 %v5460_v57, %v12018_v56  ;;  %v12026_v32 = vpop.f32.mrb[67].mxu1  ;;  %v12030_v19 = vpop.f32.mrb[87].mxu0 }
0x1f56   :  { %v5470_v40 = vadd.f32 %v12030_v19, %v12028_v22 }
0x1f57   :  { %v5462_v5 = vadd.f32 %v5461_v33, %v12026_v32  ;;  %5458 = vadd.xlane.f32.xlu0 %v5457_v47 }
0x1f59   :  { %5463 = vadd.xlane.f32.xlu1 %v5462_v5 }
0x1f5a   :  { %v12035_v3 = vpop.f32.mrb[68].mxu1  ;;  %v12040_v26 = vpop.f32.mrb[88].mxu0 }
0x1f5b   :  { %v5466_v50 = vadd.f32 %v5465_v49, %v12035_v3  ;;  %v12038_v12 = vpop.f32.mrb[69].mxu1  ;;  %v12044_v20 = vpop.f32.mrb[89].mxu0 }
0x1f5c   :  { %v12042_v21 = vpop.f32.mrb[70].mxu1  ;;  %v5475_v7 = vadd.f32 %v12044_v20, %v12040_v26  ;;  %v12052_v51 = vpop.f32.mrb[90].mxu0 }
0x1f5d   :  { %v5467_v17 = vadd.f32 %v5466_v50, %v12038_v12  ;;  %v5471_v24 = vadd.f32 %v5470_v40, %v12042_v21  ;;  %v12050_v18 = vpop.f32.mrb[71].mxu1  ;;  %v12054_v43 = vpop.f32.mrb[91].mxu0 }
0x1f5e   :  { %v5480_v53 = vadd.f32 %v12054_v43, %v12052_v51 }
0x1f5f   :  { %v5472_v13 = vadd.f32 %v5471_v24, %v12050_v18  ;;  %5468 = vadd.xlane.f32.xlu0 %v5467_v17 }
0x1f61   :  { %5473 = vadd.xlane.f32.xlu1 %v5472_v13 }
0x1f62   :  { %v12059_v6 = vpop.f32.mrb[72].mxu1 }
0x1f63   :  { %v5476_v10 = vadd.f32 %v5475_v7, %v12059_v6  ;;  %v12062_v42 = vpop.f32.mrb[73].mxu1 }
0x1f64   :  { %v12064_v2 = vpop.f32.mrb[74].mxu1 }
0x1f65   :  { %v5477_v36 = vadd.f32 %v5476_v10, %v12062_v42  ;;  %v5481_v44 = vadd.f32 %v5480_v53, %v12064_v2  ;;  %v12068_v4 = vpop.f32.mrb[75].mxu1 }
0x1f67   :  { %v5482_v0 = vadd.f32 %v5481_v44, %v12068_v4  ;;  %5478 = vadd.xlane.f32.xlu0 %v5477_v36 }
0x1f69   :  { %5483 = vadd.xlane.f32.xlu1 %v5482_v0 }
0x1fdc   :  { %v5449_v57 = vpop.xlane.xlu1 %5448 }
0x1fdd   :  { %v12071_v34 = vmul.f32 0.001953125, %v5449_v57 }
0x1fde   :  { %v5454_v47 = vpop.xlane.xlu0 %5453 }
0x1fdf   :  { %v12073_v33 = vmul.f32 0.001953125, %v5454_v47  ;;  %v5493_v49 = vsub.f32 %v11975_v62, %v12071_v34  ;;  %v5494_v5 = vsub.f32 %v11977_v58, %v12071_v34  ;;  %v5495_v40 = vsub.f32 %v11987_v37, %v12071_v34 }
0x1fe0   :  { %v5496_v50 = vsub.f32 %v11990_v27, %v12071_v34 }
0x1fe1   :  { %v5525_v17 = vmul.f32 %v5493_v49, %v5493_v49  ;;  %v5526_v24 = vmul.f32 %v5494_v5, %v5494_v5  ;;  %v5497_v7 = vsub.f32 %v11981_v39, %v12073_v33  ;;  %v5498_v13 = vsub.f32 %v11983_v41, %v12073_v33 }
0x1fe2   :  { %v5499_v53 = vsub.f32 %v11994_v52, %v12073_v33  ;;  %v5527_v10 = vmul.f32 %v5495_v40, %v5495_v40  ;;  %v5500_v57 = vsub.f32 %v12002_v45, %v12073_v33  ;;  %v5528_v49 = vmul.f32 %v5496_v50, %v5496_v50 }
0x1fe3   :  { %v5557_v36 = vadd.f32 %v5526_v24, %v5525_v17  ;;  %v5529_v44 = vmul.f32 %v5497_v7, %v5497_v7  ;;  %v5530_v47 = vmul.f32 %v5498_v13, %v5498_v13 }
0x1fe4   :  { %v5459_v0 = vpop.xlane.xlu0 %5458  ;;  %v5531_v28 = vmul.f32 %v5499_v53, %v5499_v53  ;;  %v5532_v24 = vmul.f32 %v5500_v57, %v5500_v57 }
0x1fe5   :  { %v12091_v25 = vmul.f32 0.001953125, %v5459_v0  ;;  %v5558_v5 = vadd.f32 %v5557_v36, %v5527_v10  ;;  %v5562_v29 = vadd.f32 %v5530_v47, %v5529_v44 }
0x1fe6   :  { %v5464_v31 = vpop.xlane.xlu1 %5463 }
0x1fe7   :  { %v12093_v46 = vmul.f32 0.001953125, %v5464_v31  ;;  %v5559_v14 = vadd.f32 %v5558_v5, %v5528_v49  ;;  %v5501_v40 = vsub.f32 %v11992_v61, %v12091_v25  ;;  %v5502_v17 = vsub.f32 %v11996_v23, %v12091_v25 }
0x1fe8   :  { %v5563_v7 = vadd.f32 %v5562_v29, %v5531_v28  ;;  %v5503_v13 = vsub.f32 %v12011_v38, %v12091_v25  ;;  %v5504_v50 = vsub.f32 %v12014_v55, %v12091_v25 }
0x1fe9   :  { %5560 = vadd.xlane.f32.xlu0 %v5559_v14  ;;  %v5533_v53 = vmul.f32 %v5501_v40, %v5501_v40  ;;  %v5534_v10 = vmul.f32 %v5502_v17, %v5502_v17  ;;  %v5505_v31 = vsub.f32 %v12004_v63, %v12093_v46  ;;  %v5506_v36 = vsub.f32 %v12006_v54, %v12093_v46 }
0x1fea   :  { %v5564_v44 = vadd.f32 %v5563_v7, %v5532_v24  ;;  %v5535_v0 = vmul.f32 %v5503_v13, %v5503_v13  ;;  %v5507_v28 = vsub.f32 %v12018_v56, %v12093_v46  ;;  %v5508_v57 = vsub.f32 %v12026_v32, %v12093_v46 }
0x1feb   :  { %v5567_v29 = vadd.f32 %v5534_v10, %v5533_v53  ;;  %v5537_v47 = vmul.f32 %v5505_v31, %v5505_v31  ;;  %v5538_v49 = vmul.f32 %v5506_v36, %v5506_v36  ;;  %v5536_v5 = vmul.f32 %v5504_v50, %v5504_v50 }
0x1fec   :  { %5565 = vadd.xlane.f32.xlu1 %v5564_v44  ;;  %v5469_v14 = vpop.xlane.xlu0 %5468  ;;  %v5539_v15 = vmul.f32 %v5507_v28, %v5507_v28  ;;  %v5540_v24 = vmul.f32 %v5508_v57, %v5508_v57 }
0x1fed   :  { %v12111_v40 = vmul.f32 0.001953125, %v5469_v14  ;;  %v5568_v17 = vadd.f32 %v5567_v29, %v5535_v0  ;;  %v5572_v59 = vadd.f32 %v5538_v49, %v5537_v47 }
0x1fee   :  { %v5474_v35 = vpop.xlane.xlu1 %5473 }
0x1fef   :  { %v12113_v7 = vmul.f32 0.001953125, %v5474_v35  ;;  %v5569_v13 = vadd.f32 %v5568_v17, %v5536_v5  ;;  %v5573_v9 = vadd.f32 %v5572_v59, %v5539_v15  ;;  %v5509_v53 = vsub.f32 %v12016_v16, %v12111_v40 }
0x1ff0   :  { %v5510_v10 = vsub.f32 %v12020_v11, %v12111_v40  ;;  %v5511_v50 = vsub.f32 %v12035_v3, %v12111_v40  ;;  %v5512_v59 = vsub.f32 %v12038_v12, %v12111_v40 }
0x1ff1   :  { %5570 = vadd.xlane.f32.xlu0 %v5569_v13  ;;  %v5574_v31 = vadd.f32 %v5573_v9, %v5540_v24  ;;  %v5541_v36 = vmul.f32 %v5509_v53, %v5509_v53  ;;  %v5513_v44 = vsub.f32 %v12028_v22, %v12113_v7  ;;  %v5514_v35 = vsub.f32 %v12030_v19, %v12113_v7 }
0x1ff2   :  { %v5542_v15 = vmul.f32 %v5510_v10, %v5510_v10  ;;  %v5515_v0 = vsub.f32 %v12042_v21, %v12113_v7  ;;  %v5516_v28 = vsub.f32 %v12050_v18, %v12113_v7  ;;  %v5543_v47 = vmul.f32 %v5511_v50, %v5511_v50 }
0x1ff3   :  { %5575 = vadd.xlane.f32.xlu1 %v5574_v31  ;;  %v5545_v29 = vmul.f32 %v5513_v44, %v5513_v44  ;;  %v5546_v9 = vmul.f32 %v5514_v35, %v5514_v35  ;;  %v5544_v13 = vmul.f32 %v5512_v59, %v5512_v59 }
0x1ff4   :  { %v5479_v57 = vpop.xlane.xlu0 %5478  ;;  %v5577_v49 = vadd.f32 %v5542_v15, %v5541_v36  ;;  %v5547_v5 = vmul.f32 %v5515_v0, %v5515_v0  ;;  %v5548_v10 = vmul.f32 %v5516_v28, %v5516_v28 }
0x1ff5   :  { %v12131_v14 = vmul.f32 0.001953125, %v5479_v57  ;;  %v5582_v17 = vadd.f32 %v5546_v9, %v5545_v29 }
0x1ff6   :  { %v5484_v24 = vpop.xlane.xlu1 %5483  ;;  %v5578_v53 = vadd.f32 %v5577_v49, %v5543_v47 }
0x1ff7   :  { %v12133_v1 = vmul.f32 0.001953125, %v5484_v24  ;;  %v5583_v30 = vadd.f32 %v5582_v17, %v5547_v5  ;;  %v5517_v31 = vsub.f32 %v12040_v26, %v12131_v14  ;;  %v5518_v44 = vsub.f32 %v12044_v20, %v12131_v14 }
0x1ff8   :  { %v5579_v35 = vadd.f32 %v5578_v53, %v5544_v13  ;;  %v5519_v50 = vsub.f32 %v12059_v6, %v12131_v14  ;;  %v5520_v36 = vsub.f32 %v12062_v42, %v12131_v14 }
0x1ff9   :  { %v5584_v15 = vadd.f32 %v5583_v30, %v5548_v10  ;;  %v5549_v59 = vmul.f32 %v5517_v31, %v5517_v31  ;;  %v5550_v0 = vmul.f32 %v5518_v44, %v5518_v44  ;;  %v5521_v28 = vsub.f32 %v12052_v51, %v12133_v1 }
0x1ffa   :  { %5580 = vadd.xlane.f32.xlu0 %v5579_v35  ;;  %v5522_v29 = vsub.f32 %v12054_v43, %v12133_v1  ;;  %v5523_v9 = vsub.f32 %v12064_v2, %v12133_v1  ;;  %v5551_v57 = vmul.f32 %v5519_v50, %v5519_v50  ;;  %v5524_v5 = vsub.f32 %v12068_v4, %v12133_v1 }
0x1ffb   :  { %5585 = vadd.xlane.f32.xlu1 %v5584_v15  ;;  %v5587_v47 = vadd.f32 %v5550_v0, %v5549_v59  ;;  %v5553_v49 = vmul.f32 %v5521_v28, %v5521_v28  ;;  %v5552_v17 = vmul.f32 %v5520_v36, %v5520_v36 }
0x1ffc   :  { %v5554_v30 = vmul.f32 %v5522_v29, %v5522_v29  ;;  %v5555_v13 = vmul.f32 %v5523_v9, %v5523_v9  ;;  %v5556_v31 = vmul.f32 %v5524_v5, %v5524_v5  ;;  %v7669_v5 = vld [vmem:[%s13224_s14] sm:$0xff] }
0x1ffd   :  { %v5588_v24 = vadd.f32 %v5587_v47, %v5551_v57 }
0x1ffe   :  { %v5592_v53 = vadd.f32 %v5554_v30, %v5553_v49 }
0x1fff   :  { %v5589_v10 = vadd.f32 %v5588_v24, %v5552_v17 }
0x2000   :  { %v5593_v44 = vadd.f32 %v5592_v53, %v5555_v13  ;;  %v7670_v53 = vld [vmem:[%s13224_s14 + $0x8] sm:$0xff] }
0x2001   :  { %5590 = vadd.xlane.f32.xlu0 %v5589_v10 }
0x2002   :  { %v5594_v35 = vadd.f32 %v5593_v44, %v5556_v31 }
0x2004   :  { %5595 = vadd.xlane.f32.xlu1 %v5594_v35 }
0x2076   :  { %v5561_v60 = vpop.xlane.xlu0 %5560 }
0x2077   :  { %v5597_v8 = vmul.f32 0.001953125, %v5561_v60 }
0x2079   :  { %v5605_v15 = vadd.f32 1e-05, %v5597_v8  ;;  %v5566_v50 = vpop.xlane.xlu1 %5565 }
0x207a   :  { %v5598_v59 = vmul.f32 0.001953125, %v5566_v50 }
0x207b   :  { %7591 = vrsqrt.f32 %v5605_v15 }
0x207c   :  { %v5606_v0 = vadd.f32 1e-05, %v5598_v59  ;;  %v7671_v59 = vld [vmem:[%s13225_s15] sm:$0xff] }
0x207e   :  { %7593 = vrsqrt.f32 %v5606_v0  ;;  %v5571_v28 = vpop.xlane.xlu0 %5570 }
0x207f   :  { %v5599_v29 = vmul.f32 0.001953125, %v5571_v28  ;;  %v7672_v28 = vld [vmem:[%s13225_s15 + $0x8] sm:$0xff] }
0x2080   :  { %v5576_v36 = vpop.xlane.xlu1 %5575 }
0x2081   :  { %v5607_v57 = vadd.f32 1e-05, %v5599_v29  ;;  %v5600_v9 = vmul.f32 0.001953125, %v5576_v36 }
0x2083   :  { %7595 = vrsqrt.f32 %v5607_v57  ;;  %v5608_v47 = vadd.f32 1e-05, %v5600_v9 }
0x2085   :  { %v7592_v49 = vpop.eup %7591  ;;  %7597 = vrsqrt.f32 %v5608_v47  ;;  %v7674_v47 = vld [vmem:[%s13224_s14 + $0x18] sm:$0xff] }
0x2086   :  { %v5621_v60 = vmul.f32 %v7669_v5, %v7592_v49 }
0x2087   :  { %v5581_v8 = vpop.xlane.xlu0 %5580 }
0x2088   :  { %v7594_v30 = vpop.eup %7593  ;;  %v5601_v17 = vmul.f32 0.001953125, %v5581_v8  ;;  %5647 = vperm.xlu0 %7483, %v5621_v60   ;;  %v5586_v24 = vpop.xlane.xlu1 %5585  ;;  %v5629_v31 = vmul.f32 %v5621_v60, %v12071_v34  ;;  %v7673_v34 = vld [vmem:[%s13224_s14 + $0x10] sm:$0xff] }
0x2089   :  { %v5602_v13 = vmul.f32 0.001953125, %v5586_v24  ;;  %v5622_v10 = vmul.f32 %v7670_v53, %v7594_v30 }
0x208a   :  { %v5609_v44 = vadd.f32 1e-05, %v5601_v17  ;;  %v5637_v0 = vsub.f32 %v7671_v59, %v5629_v31 }
0x208b   :  { %v5610_v35 = vadd.f32 1e-05, %v5602_v13  ;;  %5652 = vperm.xlu1 %7484, %v5622_v10   ;;  %v5630_v15 = vmul.f32 %v5622_v10, %v12073_v33  ;;  %v7675_v13 = vld [vmem:[%s13225_s15 + $0x18] sm:$0xff]  ;;  %v7676_v10 = vld [vmem:[%s13225_s15 + $0x10] sm:$0xff] }
0x208c   :  { %7599 = vrsqrt.f32 %v5609_v44 }
0x208d   :  { %v7596_v50 = vpop.eup %7595  ;;  %7601 = vrsqrt.f32 %v5610_v35  ;;  %v5638_v29 = vsub.f32 %v7672_v28, %v5630_v15  ;;  %v7678_v15 = vld [vmem:[%s13224_s14 + $0x28] sm:$0xff] }
0x208e   :  { %v5591_v36 = vpop.xlane.xlu0 %5590  ;;  %v5623_v57 = vmul.f32 %v7673_v34, %v7596_v50  ;;  %v7679_v28 = vld [vmem:[%s13225_s15 + $0x28] sm:$0xff]  ;;  %v7680_v34 = vld [vmem:[%s13225_s15 + $0x20] sm:$0xff] }
0x208f   :  { %v7598_v33 = vpop.eup %7597  ;;  %v5603_v9 = vmul.f32 0.001953125, %v5591_v36  ;;  %5719 = vperm.xlu1 %7484, %v5637_v0   ;;  %5724 = vperm.xlu0 %7483, %v5638_v29  }
0x2090   :  { %v5624_v49 = vmul.f32 %v7674_v47, %v7598_v33  ;;  %v5631_v8 = vmul.f32 %v5623_v57, %v12091_v25  ;;  %v7681_v33 = vld [vmem:[%s13224_s14 + $0x30] sm:$0xff] }
0x2091   :  { %v5611_v5 = vadd.f32 1e-05, %v5603_v9  ;;  %v5596_v60 = vpop.xlane.xlu1 %5595  ;;  %v7682_v9 = vld [vmem:[%s13224_s14 + $0x38] sm:$0xff] }
0x2092   :  { %v5604_v30 = vmul.f32 0.001953125, %v5596_v60  ;;  %v5632_v17 = vmul.f32 %v5624_v49, %v12093_v46  ;;  %v5639_v31 = vsub.f32 %v7676_v10, %v5631_v8  ;;  %v7677_v46 = vld [vmem:[%s13224_s14 + $0x20] sm:$0xff]  ;;  %v7683_v60 = vld [vmem:[%s13225_s15 + $0x30] sm:$0xff] }
0x2093   :  { %7603 = vrsqrt.f32 %v5611_v5  ;;  %5657 = vperm.xlu1 %7484, %v5623_v57   ;;  %5662 = vperm.xlu0 %7483, %v5624_v49  }
0x2094   :  { %v5612_v24 = vadd.f32 1e-05, %v5604_v30  ;;  %v5640_v53 = vsub.f32 %v7675_v13, %v5632_v17  ;;  %v7684_v30 = vld [vmem:[%s13225_s15 + $0x38] sm:$0xff] }
0x2096   :  { %v7600_v44 = vpop.eup %7599  ;;  %7605 = vrsqrt.f32 %v5612_v24 }
0x2097   :  { %v7602_v25 = vpop.eup %7601  ;;  %5729 = vperm.xlu1 %7484, %v5639_v31   ;;  %5734 = vperm.xlu0 %7483, %v5640_v53   ;;  %v5625_v35 = vmul.f32 %v7677_v46, %v7600_v44 }
0x2098   :  { %v5626_v50 = vmul.f32 %v7678_v15, %v7602_v25 }
0x2099   :  { %v5633_v59 = vmul.f32 %v5625_v35, %v12111_v40 }
0x209a   :  { %v5634_v0 = vmul.f32 %v5626_v50, %v12113_v7 }
0x209b   :  { %5667 = vperm.xlu1 %7484, %v5625_v35   ;;  %5672 = vperm.xlu0 %7483, %v5626_v50   ;;  %v5641_v57 = vsub.f32 %v7680_v34, %v5633_v59 }
0x209c   :  { %v5642_v29 = vsub.f32 %v7679_v28, %v5634_v0 }
0x209d   :  { %v7604_v36 = vpop.eup %7603 }
0x209e   :  { %v5627_v40 = vmul.f32 %v7681_v33, %v7604_v36 }
0x209f   :  { %5739 = vperm.xlu1 %7484, %v5641_v57   ;;  %5744 = vperm.xlu0 %7483, %v5642_v29  }
0x20a0   :  { %v7606_v7 = vpop.eup %7605  ;;  %v5635_v49 = vmul.f32 %v5627_v40, %v12131_v14 }
0x20a1   :  { %v5628_v47 = vmul.f32 %v7682_v9, %v7606_v7 }
0x20a2   :  { %v5643_v8 = vsub.f32 %v7683_v60, %v5635_v49 }
0x20a3   :  { %5677 = vperm.xlu1 %7484, %v5627_v40   ;;  %5682 = vperm.xlu0 %7483, %v5628_v47   ;;  %v5636_v5 = vmul.f32 %v5628_v47, %v12133_v1 }
0x20a5   :  { %v5644_v17 = vsub.f32 %v7684_v30, %v5636_v5 }
0x20a7   :  { %5749 = vperm.xlu1 %7484, %v5643_v8   ;;  %5754 = vperm.xlu0 %7483, %v5644_v17  }
0x2107   :  { %v5648_v24 = vpop.permute.xlu0 %5647 }
0x2108   :  { %v5685_v14 = vmul.f32 %v5648_v24, %v11975_v62  ;;  %v5687_v53 = vmul.f32 %v5648_v24, %v11987_v37  ;;  %v5686_v25 = vmul.f32 %v5648_v24, %v11977_v58  ;;  %v5688_v35 = vmul.f32 %v5648_v24, %v11990_v27 }
0x210a   :  { %v5653_v13 = vpop.permute.xlu1 %5652 }
0x210b   :  { %v5689_v1 = vmul.f32 %v5653_v13, %v11981_v39  ;;  %v5691_v10 = vmul.f32 %v5653_v13, %v11994_v52  ;;  %v5690_v46 = vmul.f32 %v5653_v13, %v11983_v41  ;;  %v5692_v15 = vmul.f32 %v5653_v13, %v12002_v45 }
0x210e   :  { %v5725_v31 = vpop.permute.xlu0 %5724  ;;  %v5720_v44 = vpop.permute.xlu1 %5719 }
0x210f   :  { %v5761_v50 = vadd.f32 %v5725_v31, %v5689_v1  ;;  %v5763_v59 = vadd.f32 %v5725_v31, %v5691_v10  ;;  %v5757_v0 = vadd.f32 %v5720_v44, %v5685_v14  ;;  %v5759_v62 = vadd.f32 %v5720_v44, %v5687_v53 }
0x2110   :  { %v5758_v28 = vadd.f32 %v5720_v44, %v5686_v25  ;;  %v5762_v37 = vadd.f32 %v5725_v31, %v5690_v46  ;;  %v5760_v29 = vadd.f32 %v5720_v44, %v5688_v35  ;;  %v5764_v39 = vadd.f32 %v5725_v31, %v5692_v15 }
0x2111   :  { %v5793_v36 = vmax.f32 %v5761_v50, 0.0  ;;  %v5795_v52 = vmax.f32 %v5763_v59, 0.0  ;;  %v5789_v34 = vmax.f32 %v5757_v0, 0.0  ;;  %v5791_v57 = vmax.f32 %v5759_v62, 0.0 }
0x2112   :  { %v5663_v33 = vpop.permute.xlu0 %5662  ;;  %v5658_v58 = vpop.permute.xlu1 %5657  ;;  %v5790_v40 = vmax.f32 %v5758_v28, 0.0  ;;  %v5794_v41 = vmax.f32 %v5762_v37, 0.0  ;;  %v5792_v7 = vmax.f32 %v5760_v29, 0.0  ;;  %v5796_v27 = vmax.f32 %v5764_v39, 0.0 }
0x2113   :  { %v5697_v45 = vmul.f32 %v5663_v33, %v12004_v63  ;;  %v5821_v49 = vpack.c.bf16 %v5793_v36, %v5789_v34  ;;  %v5823_v5 = vpack.c.bf16 %v5795_v52, %v5791_v57  ;;  %v5699_v60 = vmul.f32 %v5663_v33, %v12018_v56 }
0x2114   :  { %v5822_v9 = vpack.c.bf16 %v5794_v41, %v5790_v40  ;;  %v5824_v47 = vpack.c.bf16 %v5796_v27, %v5792_v7  ;;  %v5693_v8 = vmul.f32 %v5658_v58, %v11992_v61  ;;  %v5695_v30 = vmul.f32 %v5658_v58, %v12011_v38 }
0x2115   :  { %v5694_v17 = vmul.f32 %v5658_v58, %v11996_v23  ;;  %v5698_v14 = vmul.f32 %v5663_v33, %v12006_v54  ;;  %v5696_v63 = vmul.f32 %v5658_v58, %v12014_v55  ;;  %v5700_v53 = vmul.f32 %v5663_v33, %v12026_v32 }
0x2116   :  { %5837 = vmatprep.subr.bf16.mxu0 %v5822_v9  ;;  %5880 = vmatprep.subr.bf16.mxu1 %v5824_v47  ;;  %v5735_v24 = vpop.permute.xlu0 %5734  ;;  %v5730_v13 = vpop.permute.xlu1 %5729 }
0x2117   :  { %v5769_v1 = vadd.f32 %v5735_v24, %v5697_v45  ;;  %v5771_v10 = vadd.f32 %v5735_v24, %v5699_v60  ;;  %5838 = vmatpush1.bf16.msra.mxu0 %v5821_v49  ;;  %5881 = vmatpush1.bf16.msra.mxu1 %v5823_v5  ;;  %v5765_v56 = vadd.f32 %v5730_v13, %v5693_v8 }
0x2118   :  { %v5767_v61 = vadd.f32 %v5730_v13, %v5695_v30  ;;  %v5766_v31 = vadd.f32 %v5730_v13, %v5694_v17  ;;  %v5770_v38 = vadd.f32 %v5735_v24, %v5698_v14  ;;  %v5768_v44 = vadd.f32 %v5730_v13, %v5696_v63 }
0x2119   :  { %v5801_v23 = vmax.f32 %v5769_v1, 0.0  ;;  %v5803_v25 = vmax.f32 %v5771_v10, 0.0  ;;  %v5797_v46 = vmax.f32 %v5765_v56, 0.0  ;;  %v5772_v35 = vadd.f32 %v5735_v24, %v5700_v53 }
0x211a   :  { %v5799_v15 = vmax.f32 %v5767_v61, 0.0  ;;  %v5673_v50 = vpop.permute.xlu0 %5672  ;;  %v5668_v54 = vpop.permute.xlu1 %5667  ;;  %v5798_v59 = vmax.f32 %v5766_v31, 0.0  ;;  %v5802_v55 = vmax.f32 %v5770_v38, 0.0  ;;  %v5800_v0 = vmax.f32 %v5768_v44, 0.0 }
0x211b   :  { %v5705_v32 = vmul.f32 %v5673_v50, %v12028_v22  ;;  %v5804_v28 = vmax.f32 %v5772_v35, 0.0  ;;  %v5825_v37 = vpack.c.bf16 %v5801_v23, %v5797_v46  ;;  %v5707_v39 = vmul.f32 %v5673_v50, %v12042_v21 }
0x211c   :  { %v5826_v62 = vpack.c.bf16 %v5802_v55, %v5798_v59  ;;  %v5827_v29 = vpack.c.bf16 %v5803_v25, %v5799_v15  ;;  %v5701_v36 = vmul.f32 %v5668_v54, %v12016_v16  ;;  %v5703_v52 = vmul.f32 %v5668_v54, %v12035_v3 }
0x211d   :  { %v5702_v34 = vmul.f32 %v5668_v54, %v12020_v11  ;;  %v5828_v57 = vpack.c.bf16 %v5804_v28, %v5800_v0  ;;  %v5706_v40 = vmul.f32 %v5673_v50, %v12030_v19  ;;  %v5704_v22 = vmul.f32 %v5668_v54, %v12038_v12 }
0x211e   :  { %5839 = vmatprep.subr.bf16.mxu0 %v5826_v62  ;;  %v5745_v33 = vpop.permute.xlu0 %5744  ;;  %v5740_v58 = vpop.permute.xlu1 %5739  ;;  %v5708_v41 = vmul.f32 %v5673_v50, %v12050_v18 }
0x211f   :  { %v5777_v7 = vadd.f32 %v5745_v33, %v5705_v32  ;;  %v5779_v27 = vadd.f32 %v5745_v33, %v5707_v39  ;;  %5840 = vmatpush1.bf16.msra.mxu0 %v5825_v37  ;;  %v5773_v21 = vadd.f32 %v5740_v58, %v5701_v36  ;;  %v5775_v45 = vadd.f32 %v5740_v58, %v5703_v52  ;;  %v7214_v39 = vld [vmem:[%s13227_s10 + $0x2] ss:$4 sm:$0xf]  ;;  %v14010_v36 = vld [vmem:[#allocation44_spill] sm:$0xff] }
0x2120   :  { %5882 = vmatprep.subr.bf16.mxu1 %v5828_v57  ;;  %v5774_v16 = vadd.f32 %v5740_v58, %v5702_v34  ;;  %v5778_v3 = vadd.f32 %v5745_v33, %v5706_v40  ;;  %v5776_v9 = vadd.f32 %v5740_v58, %v5704_v22  ;;  %v5780_v11 = vadd.f32 %v5745_v33, %v5708_v41  ;;  %v14011_v34 = vld [vmem:[#allocation45_spill] sm:$0xff]  ;;  %v14013_v40 = vld [vmem:[#allocation35_spill] sm:$0xff] }
0x2121   :  { %v5809_v47 = vmax.f32 %v5777_v7, 0.0  ;;  %v5811_v49 = vmax.f32 %v5779_v27, 0.0  ;;  %5883 = vmatpush1.bf16.msra.mxu1 %v5827_v29  ;;  %v5805_v5 = vmax.f32 %v5773_v21, 0.0  ;;  %v5807_v60 = vmax.f32 %v5775_v45, 0.0  ;;  %v7685_v29 = vld [vmem:[%s13226_s16] sm:$0xff]   ;;  %v14012_v33 = vld [vmem:[#allocation53_spill] sm:$0xff] }
0x2122   :  { %v5683_v19 = vpop.permute.xlu0 %5682  ;;  %v5678_v8 = vpop.permute.xlu1 %5677  ;;  %v5806_v12 = vmax.f32 %v5774_v16, 0.0  ;;  %v5810_v30 = vmax.f32 %v5778_v3, 0.0  ;;  %v5808_v18 = vmax.f32 %v5776_v9, 0.0  ;;  %v5812_v17 = vmax.f32 %v5780_v11, 0.0 }
0x2123   :  { %v5713_v24 = vmul.f32 %v5683_v19, %v12052_v51  ;;  %v5829_v63 = vpack.c.bf16 %v5809_v47, %v5805_v5  ;;  %v5831_v53 = vpack.c.bf16 %v5811_v49, %v5807_v60  ;;  %v5714_v1 = vmul.f32 %v5683_v19, %v12054_v43  ;;  %v14014_v49 = vld [vmem:[#allocation8_spill] sm:$0xff]  ;;  %v14015_v60 = vld [vmem:[#allocation11_spill] sm:$0xff] }
0x2124   :  { %v5830_v13 = vpack.c.bf16 %v5810_v30, %v5806_v12  ;;  %v5832_v14 = vpack.c.bf16 %v5812_v17, %v5808_v18  ;;  %v5715_v10 = vmul.f32 %v5683_v19, %v12064_v2  ;;  %v5716_v56 = vmul.f32 %v5683_v19, %v12068_v4 }
0x2125   :  { %v5709_v61 = vmul.f32 %v5678_v8, %v12040_v26  ;;  %v5710_v38 = vmul.f32 %v5678_v8, %v12044_v20  ;;  %v5711_v44 = vmul.f32 %v5678_v8, %v12059_v6  ;;  %v5712_v51 = vmul.f32 %v5678_v8, %v12062_v42 }
0x2126   :  { %5841 = vmatprep.subr.bf16.mxu0 %v5830_v13  ;;  %5884 = vmatprep.subr.bf16.mxu1 %v5832_v14  ;;  %v5755_v31 = vpop.permute.xlu0 %5754  ;;  %v5750_v23 = vpop.permute.xlu1 %5749  ;;  %v5929_v52 = vrot.slane %v7214_v39, %v14010_v36  ;;  %v5937_v57 = vrot.slane %v7214_v39, %v14011_v34  ;;  %v5933_v58 = vrot.slane %v7214_v39, %v14012_v33  ;;  %v14017_v13 = vld [vmem:[#allocation9_spill] sm:$0xff]  ;;  %v14056_v34 = vld [vmem:[#allocation58_spill] sm:$0xff] }
0x2127   :  { %v5785_v25 = vadd.f32 %v5755_v31, %v5713_v24  ;;  %v5786_v46 = vadd.f32 %v5755_v31, %v5714_v1  ;;  %v5787_v35 = vadd.f32 %v5755_v31, %v5715_v10  ;;  %v5788_v43 = vadd.f32 %v5755_v31, %v5716_v56  ;;  %5842 = vmatpush1.bf16.msra.mxu0 %v5829_v63  ;;  %v14019_v63 = vld [vmem:[#allocation13_spill] sm:$0xff]  ;;  %v14021_v1 = vld [vmem:[#allocation12_spill] sm:$0xff]  ;;  %v14023_v56 = vld [vmem:[#allocation63_spill] sm:$0xff] }
0x2128   :  { %5885 = vmatpush1.bf16.msra.mxu1 %v5831_v53  ;;  %v5781_v2 = vadd.f32 %v5750_v23, %v5709_v61  ;;  %v5782_v4 = vadd.f32 %v5750_v23, %v5710_v38  ;;  %v5783_v15 = vadd.f32 %v5750_v23, %v5711_v44  ;;  %v5784_v26 = vadd.f32 %v5750_v23, %v5712_v51  ;;  %v14025_v31 = vld [vmem:[#allocation40_spill] sm:$0xff]  ;;  %v14027_v44 = vld [vmem:[#allocation47_spill] sm:$0xff] }
0x2129   :  { %v5817_v50 = vmax.f32 %v5785_v25, 0.0  ;;  %v5819_v54 = vmax.f32 %v5787_v35, 0.0  ;;  %v5818_v59 = vmax.f32 %v5786_v46, 0.0  ;;  %v5820_v55 = vmax.f32 %v5788_v43, 0.0 }
0x212a   :  { %v5813_v20 = vmax.f32 %v5781_v2, 0.0  ;;  %v5815_v0 = vmax.f32 %v5783_v15, 0.0  ;;  %v5814_v6 = vmax.f32 %v5782_v4, 0.0  ;;  %v5816_v32 = vmax.f32 %v5784_v26, 0.0 }
0x212b   :  { %v5941_v22 = vrot.slane %v7214_v39, %v14013_v40 }
0x212c   :  { %v5834_v42 = vpack.c.bf16 %v5818_v59, %v5814_v6  ;;  %v5836_v62 = vpack.c.bf16 %v5820_v55, %v5816_v32  ;;  %v5833_v28 = vpack.c.bf16 %v5817_v50, %v5813_v20  ;;  %v5835_v37 = vpack.c.bf16 %v5819_v54, %v5815_v0 }
0x212e   :  { %5843 = vmatprep.subr.bf16.mxu0 %v5834_v42  ;;  %5886 = vmatprep.subr.bf16.mxu1 %v5836_v62 }
0x212f   :  { %5844 = vmatpush1.bf16.msra.mxu0 %v5833_v28  ;;  %5887 = vmatpush1.bf16.msra.mxu1 %v5835_v37 }
0x2132   :  { %7212 = vmatmul.mubr.msk.bf16.vlgmr.msra.gmra.mrb[92].mxu0 %vm14008_vm2, %v7685_v29  ;;  %7213 = vmatmul.mubr.msk.bf16.vlgmr.msra.gmra.mrb[76].mxu1 %vm14009_vm6, %v7685_v29  ;;  %vm14033_vm2 = vmmov %vm14029_vm7 }
0x2133   :  { %6506 = vmatprep.mubr.bf16.mxu0 %v14000_v48  ;;  %6579 = vmatprep.mubr.bf16.mxu1 %v14000_v48  ;;  %vm14036_vm6 = vmmov %vm14033_vm2  ;;  %v14078_v48 = vld [vmem:[#allocation19_spill] sm:$0xff] }
0x2205   :  { %v5871_v41 = vpop.f32.mrb[92].mxu0  ;;  %v5914_v7 = vpop.f32.mrb[76].mxu1 }
0x2206   :  { %v5946_v27 = vmul.f32 %v5929_v52, %v5871_v41  ;;  %v5948_v21 = vmul.f32 %v5937_v57, %v5914_v7  ;;  %v5873_v45 = vpop.f32.mrb[93].mxu0  ;;  %v5916_v16 = vpop.f32.mrb[77].mxu1 }
0x2207   :  { %v5947_v3 = vmul.f32 %v5933_v58, %v5873_v45  ;;  %v5949_v9 = vmul.f32 %v5941_v22, %v5916_v16  ;;  %v5875_v11 = vpop.f32.mrb[94].mxu0  ;;  %v5918_v47 = vpop.f32.mrb[78].mxu1 }
0x2208   :  { %v12254_v5 = vadd.f32 %v5946_v27, %v14014_v49  ;;  %v12257_v19 = vadd.f32 %v5948_v21, %v14015_v60  ;;  %v5950_v8 = vmul.f32 %v5929_v52, %v5875_v11  ;;  %v5952_v12 = vmul.f32 %v5937_v57, %v5918_v47  ;;  %v5877_v30 = vpop.f32.mrb[95].mxu0  ;;  %v5920_v18 = vpop.f32.mrb[79].mxu1 }
0x2209   :  { %v5951_v17 = vmul.f32 %v5933_v58, %v5877_v30  ;;  %v5953_v24 = vmul.f32 %v5941_v22, %v5920_v18  ;;  %v12270_v10 = vadd.f32 %v5947_v3, %v14021_v1  ;;  %v12273_v61 = vadd.f32 %v5949_v9, %v14023_v56  ;;  %v14043_v1 = vld [vmem:[#allocation56_spill] sm:$0xff] }
0x220a   :  { %14016 = vst [vmem:[#allocation36_spill] sm:$0xff] %v12257_v19  ;;  %v12260_v14 = vadd.f32 %v5950_v8, %v14017_v13  ;;  %v12263_v53 = vadd.f32 %v5952_v12, %v14019_v63  ;;  %6232 = vrot.lane.b32.xlu0 %v12257_v19, %s7723_s9  ;;  %5970 = vrot.lane.b32.xlu1 %v12254_v5, %s7709_s28  ;;  %v14040_v8 = vld [vmem:[#allocation55_spill] sm:$0xff] }
0x220b   :  { %14022 = vst [vmem:[#allocation52_spill] sm:$0xff] %v12270_v10  ;;  %14024 = vst [vmem:[#allocation54_spill] sm:$0xff] %v12273_v61  ;;  %v12276_v38 = vadd.f32 %v5951_v17, %v14025_v31  ;;  %v12279_v51 = vadd.f32 %v5953_v24, %v14027_v44 }
0x220c   :  { %14018 = vst [vmem:[#allocation37_spill] sm:$0xff] %v12260_v14  ;;  %14020 = vst [vmem:[#allocation38_spill] sm:$0xff] %v12263_v53  ;;  %v6466_v46 = vpack.c.bf16 %v12260_v14, %v12254_v5  ;;  %v6468_v35 = vpack.c.bf16 %v12263_v53, %v12257_v19 }
0x220d   :  { %14026 = vst [vmem:[#allocation5_spill] sm:$0xff] %v12276_v38  ;;  %14028 = vst [vmem:[#allocation60_spill] sm:$0xff] %v12279_v51  ;;  %v6467_v23 = vpack.c.bf16 %v12276_v38, %v12270_v10  ;;  %v6469_v25 = vpack.c.bf16 %v12279_v51, %v12273_v61 }
0x220e   :  { %5974 = vrot.lane.b32.xlu1 %v12257_v19, %s7709_s28  ;;  %5972 = vrot.lane.b32.xlu0 %v12270_v10, %s7709_s28 }
0x220f   :  { %6474 = vmatprep.subr.bf16.mxu0 %v6467_v23  ;;  %6547 = vmatprep.subr.bf16.mxu1 %v6469_v25 }
0x2210   :  { %6475 = vmatpush1.bf16.msra.mxu0 %v6466_v46  ;;  %6548 = vmatpush1.bf16.msra.mxu1 %v6468_v35 }
0x2212   :  { %6010 = vrot.lane.b32.xlu1 %v12254_v5, %s7708_s27  ;;  %5976 = vrot.lane.b32.xlu0 %v12273_v61, %s7709_s28 }
0x2216   :  { %6014 = vrot.lane.b32.xlu1 %v12257_v19, %s7708_s27  ;;  %6012 = vrot.lane.b32.xlu0 %v12270_v10, %s7708_s27 }
0x221a   :  { %6200 = vrot.lane.b32.xlu1 %v12254_v5, %s7722_s23  ;;  %6202 = vrot.lane.b32.xlu0 %v12270_v10, %s7722_s23 }
0x221e   :  { %6228 = vrot.lane.b32.xlu1 %v12254_v5, %s7723_s9  ;;  %6016 = vrot.lane.b32.xlu0 %v12260_v14, %s7708_s27 }
0x2222   :  { %6004 = vrot.lane.b32.xlu1 %v12273_v61, %s7708_s27  ;;  %6020 = vrot.lane.b32.xlu0 %v12263_v53, %s7708_s27 }
0x2226   :  { %6230 = vrot.lane.b32.xlu1 %v12270_v10, %s7723_s9  ;;  %6240 = vrot.lane.b32.xlu0 %v12263_v53, %s7723_s9 }
0x222a   :  { %6194 = vrot.lane.b32.xlu1 %v12273_v61, %s7722_s23  ;;  %6236 = vrot.lane.b32.xlu0 %v12260_v14, %s7723_s9 }
0x222e   :  { %5978 = vrot.lane.b32.xlu1 %v12260_v14, %s7709_s28  ;;  %5980 = vrot.lane.b32.xlu0 %v12276_v38, %s7709_s28 }
0x2232   :  { %5982 = vrot.lane.b32.xlu1 %v12263_v53, %s7709_s28  ;;  %5984 = vrot.lane.b32.xlu0 %v12279_v51, %s7709_s28 }
0x2236   :  { %6206 = vrot.lane.b32.xlu1 %v12260_v14, %s7722_s23  ;;  %6006 = vrot.lane.b32.xlu0 %v12279_v51, %s7708_s27 }
0x223a   :  { %6018 = vrot.lane.b32.xlu1 %v12276_v38, %s7708_s27  ;;  %6210 = vrot.lane.b32.xlu0 %v12263_v53, %s7722_s23 }
0x223e   :  { %6204 = vrot.lane.b32.xlu1 %v12257_v19, %s7722_s23  ;;  %6208 = vrot.lane.b32.xlu0 %v12276_v38, %s7722_s23 }
0x2242   :  { %6234 = vrot.lane.b32.xlu1 %v12273_v61, %s7723_s9  ;;  %6196 = vrot.lane.b32.xlu0 %v12279_v51, %s7722_s23 }
0x2246   :  { %6238 = vrot.lane.b32.xlu1 %v12276_v38, %s7723_s9  ;;  %6242 = vrot.lane.b32.xlu0 %v12279_v51, %s7723_s9 }
0x227c   :  { %v12349_v43 = vpop.permute.xlu0 %6232  ;;  %v5971_v2 = vpop.permute.xlu1 %5970 }
0x2280   :  { %v5975_v4 = vpop.permute.xlu1 %5974  ;;  %v5973_v15 = vpop.permute.xlu0 %5972 }
0x2281   :  { %v5987_v55 = vsel %vm14029_vm7, %v5973_v15, %v5975_v4  ;;  %v5986_v27 = vsel %vm14036_vm6, %v5971_v2, %v5973_v15  ;;  %vm14037_vm7 = vmmov %vm14030_vm5  ;;  %vm14044_vm6 = vcmp.eq.s32.totalorder %v14043_v1, 0 }
0x2284   :  { %v6011_v26 = vpop.permute.xlu1 %6010  ;;  %v5977_v50 = vpop.permute.xlu0 %5976 }
0x2285   :  { %v5988_v28 = vsel %vm14033_vm2, %v5975_v4, %v5977_v50  ;;  %v6002_v13 = vsel %vm14033_vm2, %v5977_v50, %v5971_v2 }
0x2288   :  { %v6015_v54 = vpop.permute.xlu1 %6014  ;;  %v6013_v59 = vpop.permute.xlu0 %6012 }
0x2289   :  { %v6022_v20 = vsel %vm14030_vm5, %v6011_v26, %v6013_v59  ;;  %v6023_v32 = vsel %vm14032_vm9, %v6013_v59, %v6015_v54  ;;  %vm14041_vm5 = vcmp.eq.s32.totalorder %v14040_v8, 0  ;;  %vm14042_vm9 = vmmov %vm14037_vm7 }
0x228a   :  { %v12355_v6 = vsel %vm9321_vm10, %v5987_v55, %v6022_v20  ;;  %v12364_v39 = vsel %vm9340_vm11, %v5988_v28, %v6023_v32  ;;  %v12372_v22 = vsel %vm9393_vm14, %v6022_v20, %v5987_v55  ;;  %v12384_v9 = vsel %vm9435_vm1, %v6023_v32, %v5988_v28 }
0x228b   :  { %6070 = vrot.lane.b32.xlu0 %v12355_v6, %s7722_s23 }
0x228c   :  { %v6201_v42 = vpop.permute.xlu1 %6200  ;;  %v6203_v62 = vpop.permute.xlu0 %6202 }
0x228d   :  { %v6212_v37 = vsel %vm2497_vm4, %v6201_v42, %v6203_v62 }
0x228f   :  { %6100 = vrot.lane.b32.xlu0 %v12364_v39, %s7723_s9 }
0x2290   :  { %v6229_v52 = vpop.permute.xlu1 %6228  ;;  %v12368_v57 = vpop.permute.xlu0 %6016 }
0x2293   :  { %6342 = vrot.lane.b32.xlu0 %v12372_v22, %s7722_s23 }
0x2294   :  { %v6005_v41 = vpop.permute.xlu1 %6004  ;;  %v6021_v7 = vpop.permute.xlu0 %6020 }
0x2295   :  { %v6036_v21 = vsel %vm14037_vm7, %v6005_v41, %v6011_v26  ;;  %v6024_v18 = vsel %vm14042_vm9, %v6015_v54, %v6005_v41  ;;  %vm14045_vm7 = vcmp.eq.s32.totalorder %v14043_v1, 15 }
0x2296   :  { %v12380_v16 = vsel %vm9357_vm12, %v5986_v27, %v6036_v21  ;;  %v12418_v23 = vsel %vm9361_vm13, %v6002_v13, %v6024_v18  ;;  %v12433_v20 = vsel %vm9399_vm15, %v6036_v21, %v5986_v27 }
0x2297   :  { %6068 = vrot.lane.b32.xlu1 %v12380_v16, %s7722_s23  ;;  %6372 = vrot.lane.b32.xlu0 %v12384_v9, %s7723_s9 }
0x2298   :  { %v6231_v11 = vpop.permute.xlu1 %6230  ;;  %v12390_v47 = vpop.permute.xlu0 %6240 }
0x2299   :  { %v6244_v49 = vsel %vm2530_vm3, %v6229_v52, %v6231_v11  ;;  %v6245_v60 = vsel %vm2530_vm3, %v6231_v11, %v12349_v43 }
0x229a   :  { %v12397_v12 = vsel %vm14041_vm5, %v6245_v60, %v6212_v37  ;;  %v12401_v30 = vsel %vm2246_vm8, %v6212_v37, %v6245_v60  ;;  %vm14047_vm5 = vmmov %vm14033_vm2 }
0x229b   :  { %6098 = vrot.lane.b32.xlu1 %v12355_v6, %s7723_s9  ;;  %vm14049_vm2 = vmmov %vm14042_vm9 }
0x229c   :  { %v6195_v17 = vpop.permute.xlu1 %6194  ;;  %v6237_v24 = vpop.permute.xlu0 %6236 }
0x229d   :  { %v6226_v63 = vsel %vm2497_vm4, %v6195_v17, %v6201_v42 }
0x229e   :  { %v12410_v56 = vsel %vm14044_vm6, %v6244_v49, %v6226_v63  ;;  %v12414_v31 = vsel %vm14045_vm7, %v6226_v63, %v6244_v49  ;;  %vm14050_vm6 = vmmov %vm14047_vm5 }
0x229f   :  { %6056 = vrot.lane.b32.xlu1 %v12418_v23, %s7722_s23  ;;  %vm14052_vm7 = vmmov %vm14047_vm5 }
0x22a0   :  { %v5979_v25 = vpop.permute.xlu1 %5978  ;;  %v5981_v46 = vpop.permute.xlu0 %5980 }
0x22a3   :  { %6096 = vrot.lane.b32.xlu1 %v12380_v16, %s7723_s9 }
0x22a4   :  { %v5983_v35 = vpop.permute.xlu1 %5982  ;;  %v5985_v2 = vpop.permute.xlu0 %5984 }
0x22a5   :  { %v5990_v54 = vsel %vm14047_vm5, %v5981_v46, %v5983_v35  ;;  %v5991_v41 = vsel %vm14050_vm6, %v5983_v35, %v5985_v2  ;;  %vm14057_vm5 = vcmp.eq.s32.totalorder %v14056_v34, 0 }
0x22a7   :  { %6072 = vrot.lane.b32.xlu1 %v12364_v39, %s7722_s23 }
0x22a8   :  { %v6207_v4 = vpop.permute.xlu1 %6206  ;;  %v6007_v15 = vpop.permute.xlu0 %6006 }
0x22ab   :  { %6102 = vrot.lane.b32.xlu1 %v12418_v23, %s7723_s9 }
0x22ac   :  { %v6019_v26 = vpop.permute.xlu1 %6018  ;;  %v6211_v50 = vpop.permute.xlu0 %6210 }
0x22ad   :  { %v6025_v59 = vsel %vm14042_vm9, %v12368_v57, %v6019_v26  ;;  %v6026_v42 = vsel %vm14049_vm2, %v6019_v26, %v6021_v7  ;;  %v12463_v26 = vsel %vm9413_vm0, %v6024_v18, %v6002_v13  ;;  %v5989_v18 = vsel %vm14050_vm6, %v5979_v25, %v5981_v46 }
0x22ae   :  { %v12437_v32 = vsel %vm9321_vm10, %v5990_v54, %v6025_v59  ;;  %v12450_v21 = vsel %vm9340_vm11, %v5991_v41, %v6026_v42  ;;  %vm14051_vm10 = vmmov %vm14049_vm2  ;;  %vm14059_vm2 = vcmp.eq.s32.totalorder %v14056_v34, 15  ;;  %vm14068_vm6 = vcmp.eq.s32.totalorder %v14056_v34, 15 }
0x22af   :  { %6340 = vrot.lane.b32.xlu1 %v12433_v20, %s7722_s23  ;;  %6076 = vrot.lane.b32.xlu0 %v12437_v32, %s7722_s23  ;;  %v6027_v49 = vsel %vm14051_vm10, %v6021_v7, %v6007_v15  ;;  %v6037_v13 = vsel %vm14051_vm10, %v6007_v15, %v12368_v57  ;;  %v12553_v45 = vsel %vm9393_vm14, %v6025_v59, %v5990_v54 }
0x22b0   :  { %v6205_v28 = vpop.permute.xlu1 %6204  ;;  %v6209_v37 = vpop.permute.xlu0 %6208 }
0x22b1   :  { %v6213_v11 = vsel %vm2497_vm4, %v6203_v62, %v6205_v28  ;;  %v6214_v27 = vsel %vm2497_vm4, %v6205_v28, %v6195_v17  ;;  %v6216_v0 = vsel %vm2497_vm4, %v6209_v37, %v6211_v50  ;;  %v6003_v62 = vsel %vm14052_vm7, %v5985_v2, %v5979_v25  ;;  %v14054_v28 = vld [vmem:[#allocation57_spill] sm:$0xff] }
0x22b2   :  { %vm14055_vm11 = vcmp.eq.s32.totalorder %v14054_v28, 0  ;;  %vm14058_vm9 = vcmp.eq.s32.totalorder %v14054_v28, 15  ;;  %vm14061_vm7 = vcmp.eq.s32.totalorder %v14040_v8, 0  ;;  %v12573_v58 = vsel %vm9413_vm0, %v6027_v49, %v6003_v62 }
0x22b3   :  { %6370 = vrot.lane.b32.xlu1 %v12372_v22, %s7723_s9  ;;  %6108 = vrot.lane.b32.xlu0 %v12450_v21, %s7723_s9  ;;  %14072 = vst [vmem:[#allocation6_spill] sm:$0xff] %v12573_v58 }
0x22b4   :  { %v6235_v60 = vpop.permute.xlu1 %6234  ;;  %v6197_v63 = vpop.permute.xlu0 %6196 }
0x22b5   :  { %v6246_v17 = vsel %vm2530_vm3, %v12349_v43, %v6235_v60  ;;  %v6260_v35 = vsel %vm2530_vm3, %v6235_v60, %v6229_v52  ;;  %v12485_v52 = vsel %vm9361_vm13, %v6003_v62, %v6027_v49  ;;  %v6215_v60 = vsel %vm2497_vm4, %v6207_v4, %v6209_v37  ;;  %v14074_v62 = vld [vmem:[#allocation49_spill] sm:$0xff] }
0x22b6   :  { %v12467_v40 = vsel %vm14055_vm11, %v6246_v17, %v6213_v11  ;;  %v12471_v7 = vsel %vm14057_vm5, %v6260_v35, %v6214_v27  ;;  %v12475_v2 = vsel %vm14058_vm9, %v6213_v11, %v6246_v17  ;;  %v12479_v43 = vsel %vm14059_vm2, %v6214_v27, %v6260_v35 }
0x22b7   :  { %6328 = vrot.lane.b32.xlu1 %v12463_v26, %s7722_s23  ;;  %v6227_v11 = vsel %vm2497_vm4, %v6197_v63, %v6207_v4  ;;  %6058 = vrot.lane.b32.xlu0 %v12485_v52, %s7722_s23  ;;  %vm14060_vm13 = vcmp.eq.s32.totalorder %v14043_v1, 0  ;;  %vm14062_vm11 = vcmp.eq.s32.totalorder %v14043_v1, 15  ;;  %vm14064_vm5 = vcmp.eq.s32.totalorder %v14054_v28, 0 }
0x22b8   :  { %v6239_v27 = vpop.permute.xlu1 %6238  ;;  %v6243_v17 = vpop.permute.xlu0 %6242  ;;  %vm14065_vm9 = vcmp.eq.s32.totalorder %v14056_v34, 0  ;;  %vm14066_vm2 = vcmp.eq.s32.totalorder %v14054_v28, 15  ;;  %vm14079_vm14 = vmmov %vm14060_vm13 }
0x22b9   :  { %v6247_v35 = vsel %vm2530_vm3, %v6237_v24, %v6239_v27  ;;  %v6248_v44 = vsel %vm2530_vm3, %v6239_v27, %v12390_v47  ;;  %v6249_v25 = vsel %vm2530_vm3, %v12390_v47, %v6243_v17  ;;  %v6261_v46 = vsel %vm2530_vm3, %v6243_v17, %v6237_v24  ;;  %v14075_v17 = vld [vmem:[#allocation17_spill] sm:$0xff]  ;;  %vm14083_vm0 = vmmov %vm14064_vm5 }
0x22ba   :  { %v12502_v57 = vsel %vm14060_vm13, %v6247_v35, %v6227_v11  ;;  %v12506_v4 = vsel %vm14061_vm7, %v6248_v44, %v6215_v60  ;;  %v12510_v15 = vsel %vm14062_vm11, %v6227_v11, %v6247_v35  ;;  %v12514_v37 = vsel %vm2246_vm8, %v6215_v60, %v6248_v44  ;;  %v14076_v44 = vld [vmem:[#allocation15_spill] sm:$0xff]  ;;  %vm14085_vm10 = vmmov %vm14066_vm2 }
0x22bb   :  { %14063 = vst [vmem:[#allocation62_spill] sm:$0xff] %v12510_v15  ;;  %v6217_v47 = vsel %vm2497_vm4, %v6211_v50, %v6197_v63  ;;  %6368 = vrot.lane.b32.xlu1 %v12433_v20, %s7723_s9  ;;  %v12521_v24 = vsel %vm9357_vm12, %v5989_v18, %v6037_v13  ;;  %v12525_v27 = vsel %vm14064_vm5, %v6249_v25, %v6216_v0  ;;  %vm14073_vm12 = vmmov %vm14061_vm7 }
0x22bc   :  { %v12529_v11 = vsel %vm14065_vm9, %v6261_v46, %v6217_v47  ;;  %v12533_v60 = vsel %vm14066_vm2, %v6216_v0, %v6249_v25  ;;  %v12537_v50 = vsel %vm14068_vm6, %v6217_v47, %v6261_v46  ;;  %6104 = vrot.lane.b32.xlu0 %v12521_v24, %s7723_s9  ;;  %v12559_v0 = vsel %vm9399_vm15, %v6037_v13, %v5989_v18  ;;  %v14077_v47 = vld [vmem:[#allocation3_spill] sm:$0xff]  ;;  %vm14081_vm15 = vmmov %vm14062_vm11 }
0x22bd   :  { %14067 = vst [vmem:[#allocation41_spill] sm:$0xff] %v12533_v60  ;;  %14069 = vst [vmem:[#allocation42_spill] sm:$0xff] %v12537_v50  ;;  %v12565_v63 = vsel %vm9435_vm1, %v6026_v42, %v5991_v41  ;;  %v6163_v35 = vmul.f32 %v12355_v6, %v14075_v17 }
0x22be   :  { %14070 = vst [vmem:[#allocation43_spill] sm:$0xff] %v12559_v0  ;;  %14071 = vst [vmem:[#allocation4_spill] sm:$0xff] %v12565_v63 }
0x22bf   :  { %6074 = vrot.lane.b32.xlu1 %v12521_v24, %s7722_s23  ;;  %vm14084_vm1 = vmmov %vm14065_vm9 }
0x22c0   :  { %6078 = vrot.lane.b32.xlu0 %v12450_v21, %s7722_s23  ;;  %vm14086_vm13 = vmmov %vm14068_vm6 }
0x22c1   :  { %vm14089_vm11 = vmmov %vm14079_vm14 }
0x22c2   :  { %vm14092_vm5 = vmmov %vm14089_vm11 }
0x22c3   :  { %6106 = vrot.lane.b32.xlu1 %v12437_v32, %s7723_s9  ;;  %vm14093_vm9 = vmmov %vm14061_vm7 }
0x22c4   :  { %6110 = vrot.lane.b32.xlu0 %v12485_v52, %s7723_s9  ;;  %vm14094_vm2 = vmmov %vm14081_vm15 }
0x22c5   :  { %vm14097_vm6 = vmmov %vm14083_vm0 }
0x22c7   :  { %6344 = vrot.lane.b32.xlu1 %v12384_v9, %s7722_s23 }
0x22c8   :  { %6348 = vrot.lane.b32.xlu0 %v12553_v45, %s7722_s23 }
0x22cb   :  { %6346 = vrot.lane.b32.xlu1 %v12559_v0, %s7722_s23 }
0x22cc   :  { %6380 = vrot.lane.b32.xlu0 %v12565_v63, %s7723_s9 }
0x22cf   :  { %6378 = vrot.lane.b32.xlu1 %v12553_v45, %s7723_s9 }
0x22d0   :  { %6330 = vrot.lane.b32.xlu0 %v12573_v58, %s7722_s23 }
0x22d3   :  { %6374 = vrot.lane.b32.xlu1 %v12463_v26, %s7723_s9 }
0x22d4   :  { %6376 = vrot.lane.b32.xlu0 %v12559_v0, %s7723_s9 }
0x22d8   :  { %6350 = vrot.lane.b32.xlu0 %v12565_v63, %s7722_s23  ;;  %v6279_v63 = vmul.f32 %v12397_v12, %v14078_v48 }
0x22dc   :  { %6382 = vrot.lane.b32.xlu0 %v12573_v58, %s7723_s9 }
0x22fd   :  { %v6071_v3 = vpop.permute.xlu0 %6070 }
0x2301   :  { %v6101_v59 = vpop.permute.xlu0 %6100 }
0x2305   :  { %v12600_v50 = vpop.permute.xlu0 %6342 }
0x2309   :  { %v6069_v54 = vpop.permute.xlu1 %6068 }
0x230a   :  { %v6080_v42 = vsel %vm2497_vm4, %v6069_v54, %v6071_v3 }
0x230d   :  { %v6099_v55 = vpop.permute.xlu1 %6098 }
0x230e   :  { %v6113_v41 = vsel %vm2530_vm3, %v6099_v55, %v6101_v59 }
0x230f   :  { %v6131_v49 = vsel %vm14073_vm12, %v6113_v41, %v6080_v42  ;;  %v6139_v18 = vsel %vm2246_vm8, %v6080_v42, %v6113_v41  ;;  %vm14098_vm12 = vmmov %vm14084_vm1 }
0x2310   :  { %v6147_v29 = vmul.f32 %v6131_v49, %v14074_v62  ;;  %v6179_v33 = vmul.f32 %v6139_v18, %v14077_v47 }
0x2311   :  { %v6057_v13 = vpop.permute.xlu1 %6056 }
0x2312   :  { %v6155_v25 = vadd.f32 %v6147_v29, %v14076_v44  ;;  %v6094_v0 = vsel %vm2497_vm4, %v6057_v13, %v6069_v54  ;;  %v14080_v29 = vld [vmem:[#allocation20_spill] sm:$0xff] }
0x2313   :  { %v6295_v18 = vmul.f32 %v12270_v10, %v14080_v29  ;;  %v14082_v54 = vld [vmem:[#allocation24_spill] sm:$0xff]  ;;  %v12617_v10 = vpop.permute.xlu0 %6372 }
0x2314   :  { %v6171_v46 = vadd.f32 %v6163_v35, %v6155_v25 }
0x2315   :  { %v6097_v36 = vpop.permute.xlu1 %6096 }
0x2316   :  { %v6187_v58 = vadd.f32 %v6179_v33, %v6171_v46  ;;  %v6112_v49 = vsel %vm2530_vm3, %v6097_v36, %v6099_v55  ;;  %v6162_v33 = vmul.f32 %v12380_v16, %v14075_v17  ;;  %v6311_v55 = vmul.f32 %v12401_v30, %v14082_v54 }
0x2317   :  { %v6130_v42 = vsel %vm14079_vm14, %v6112_v49, %v6094_v0  ;;  %v6138_v35 = vsel %vm14081_vm15, %v6094_v0, %v6112_v49  ;;  %vm14100_vm14 = vmmov %vm14085_vm10 }
0x2318   :  { %v6287_v6 = vadd.f32 %v6279_v63, %v6187_v58  ;;  %v6146_v41 = vmul.f32 %v6130_v42, %v14074_v62  ;;  %v6178_v63 = vmul.f32 %v6138_v35, %v14077_v47  ;;  %v6278_v42 = vmul.f32 %v12410_v56, %v14078_v48  ;;  %vm14101_vm15 = vmmov %vm14086_vm13 }
0x2319   :  { %v6073_v12 = vpop.permute.xlu1 %6072  ;;  %v6294_v56 = vmul.f32 %v12254_v5, %v14080_v29 }
0x231a   :  { %v6154_v25 = vadd.f32 %v6146_v41, %v14076_v44  ;;  %v6303_v46 = vadd.f32 %v6295_v18, %v6287_v6  ;;  %v6081_v0 = vsel %vm2497_vm4, %v6071_v3, %v6073_v12  ;;  %v6082_v16 = vsel %vm2497_vm4, %v6073_v12, %v6057_v13 }
0x231c   :  { %v6170_v60 = vadd.f32 %v6162_v33, %v6154_v25  ;;  %v6319_v58 = vadd.f32 %v6311_v55, %v6303_v46 }
0x231d   :  { %v6103_v49 = vpop.permute.xlu1 %6102 }
0x231e   :  { %v6186_v15 = vadd.f32 %v6178_v63, %v6170_v60  ;;  %v6114_v30 = vsel %vm2530_vm3, %v6101_v59, %v6103_v49  ;;  %v6128_v41 = vsel %vm2530_vm3, %v6103_v49, %v6097_v36  ;;  %v6164_v36 = vmul.f32 %v12364_v39, %v14075_v17 }
0x231f   :  { %v6132_v6 = vsel %vm14083_vm0, %v6114_v30, %v6081_v0  ;;  %v6133_v18 = vsel %vm14084_vm1, %v6128_v41, %v6082_v16  ;;  %v6140_v3 = vsel %vm14085_vm10, %v6081_v0, %v6114_v30  ;;  %v6165_v59 = vmul.f32 %v12418_v23, %v14075_v17  ;;  %vm14106_vm0 = vmmov %vm14061_vm7 }
0x2320   :  { %v6286_v35 = vadd.f32 %v6278_v42, %v6186_v15  ;;  %v6148_v60 = vmul.f32 %v6132_v6, %v14074_v62  ;;  %v6149_v13 = vmul.f32 %v6133_v18, %v14074_v62  ;;  %v6141_v12 = vsel %vm14086_vm13, %v6082_v16, %v6128_v41  ;;  %v14087_v18 = vld [vmem:[#allocation23_spill] sm:$0xff]  ;;  %vm14110_vm1 = vmmov %vm14097_vm6 }
0x2321   :  { %v6341_v33 = vpop.permute.xlu1 %6340  ;;  %v12639_v55 = vpop.permute.xlu0 %6076  ;;  %v6310_v15 = vmul.f32 %v12414_v31, %v14082_v54  ;;  %v6180_v63 = vmul.f32 %v6140_v3, %v14077_v47  ;;  %v6181_v23 = vmul.f32 %v6141_v12, %v14077_v47  ;;  %v6280_v0 = vmul.f32 %v12467_v40, %v14078_v48  ;;  %v14088_v3 = vld [vmem:[#allocation28_spill] sm:$0xff]  ;;  %vm14111_vm10 = vmmov %vm14098_vm12 }
0x2322   :  { %v6156_v25 = vadd.f32 %v6148_v60, %v14076_v44  ;;  %v6157_v46 = vadd.f32 %v6149_v13, %v14076_v44  ;;  %v6302_v62 = vadd.f32 %v6294_v56, %v6286_v35  ;;  %v6281_v49 = vmul.f32 %v12471_v7, %v14078_v48  ;;  %vm14115_vm13 = vmmov %vm14094_vm2 }
0x2323   :  { %v12653_v44 = vsel %vm2497_vm4, %v6341_v33, %v12600_v50  ;;  %v6296_v48 = vmul.f32 %v12257_v19, %v14080_v29  ;;  %v6297_v35 = vmul.f32 %v12273_v61, %v14080_v29  ;;  %v6435_v60 = vmul.f32 %v12372_v22, %v14088_v3 }
0x2324   :  { %v6172_v39 = vadd.f32 %v6164_v36, %v6156_v25  ;;  %v6173_v42 = vadd.f32 %v6165_v59, %v6157_v46  ;;  %v6318_v17 = vadd.f32 %v6310_v15, %v6302_v62  ;;  %v6312_v13 = vmul.f32 %v12475_v2, %v14082_v54 }
0x2325   :  { %v6371_v16 = vpop.permute.xlu1 %6370  ;;  %v6109_v31 = vpop.permute.xlu0 %6108  ;;  %v6313_v59 = vmul.f32 %v12479_v43, %v14082_v54 }
0x2326   :  { %v6188_v30 = vadd.f32 %v6180_v63, %v6172_v39  ;;  %v6189_v41 = vadd.f32 %v6181_v23, %v6173_v42  ;;  %v12657_v6 = vsel %vm2530_vm3, %v6371_v16, %v12617_v10  ;;  %v6434_v23 = vmul.f32 %v12433_v20, %v14088_v3 }
0x2327   :  { %v6403_v40 = vsel %vm14061_vm7, %v12657_v6, %v12653_v44  ;;  %vm14116_vm7 = vmmov %vm14094_vm2 }
0x2328   :  { %v6288_v7 = vadd.f32 %v6280_v0, %v6188_v30  ;;  %v6289_v47 = vadd.f32 %v6281_v49, %v6189_v41  ;;  %v6419_v56 = vmul.f32 %v6403_v40, %v14087_v18  ;;  %v14090_v30 = vld [vmem:[#allocation22_spill] sm:$0xff]  ;;  %v12711_v40 = vmul.f32 %v12384_v9, %v14088_v3 }
0x2329   :  { %v12672_v36 = vpop.permute.xlu1 %6328  ;;  %v6059_v15 = vpop.permute.xlu0 %6058  ;;  %v12707_v41 = vmul.f32 %v12260_v14, %v14090_v30 }
0x232a   :  { %v6427_v12 = vadd.f32 %v6419_v56, %v6319_v58  ;;  %v6305_v25 = vadd.f32 %v6297_v35, %v6289_v47  ;;  %v6304_v46 = vadd.f32 %v6296_v48, %v6288_v7  ;;  %v12686_v22 = vsel %vm2497_vm4, %v12672_v36, %v6341_v33 }
0x232b   :  { %v12715_v48 = vmul.f32 %v12463_v26, %v14088_v3  ;;  %v12723_v7 = vmul.f32 %v12279_v51, %v14090_v30  ;;  %v14091_v3 = vld [vmem:[#allocation14_spill] sm:$0xff] }
0x232c   :  { %v12676_v62 = vadd.f32 %v6313_v59, %v6305_v25  ;;  %v12678_v63 = vadd.f32 %v6312_v13, %v6304_v46  ;;  %v12680_v29 = vadd.f32 %v6435_v60, %v6427_v12  ;;  %v6167_v60 = vmul.f32 %v12437_v32, %v14091_v3 }
0x232d   :  { %v12682_v39 = vpop.permute.xlu1 %6368  ;;  %v6166_v13 = vmul.f32 %v12521_v24, %v14091_v3 }
0x232e   :  { %v12690_v2 = vsel %vm2530_vm3, %v12682_v39, %v6371_v16  ;;  %v6105_v43 = vpop.permute.xlu0 %6104  ;;  %v12703_v16 = vmul.f32 %v12276_v38, %v14090_v30 }
0x232f   :  { %v6402_v54 = vsel %vm14089_vm11, %v12690_v2, %v12686_v22  ;;  %vm14118_vm11 = vmmov %vm14100_vm14 }
0x2330   :  { %v6418_v58 = vmul.f32 %v6402_v54, %v14087_v18  ;;  %v14095_v54 = vld [vmem:[#allocation10_spill] sm:$0xff] }
0x2331   :  { %v6075_v42 = vpop.permute.xlu1 %6074 }
0x2332   :  { %v6426_v0 = vadd.f32 %v6418_v58, %v6318_v17  ;;  %v6079_v49 = vpop.permute.xlu0 %6078  ;;  %v12719_v17 = vmul.f32 %v12263_v53, %v14090_v30  ;;  %v6083_v47 = vsel %vm2497_vm4, %v6075_v42, %v12639_v55  ;;  %v6095_v56 = vsel %vm2497_vm4, %v6059_v15, %v6075_v42 }
0x2333   :  { %v6084_v32 = vsel %vm2497_vm4, %v12639_v55, %v6079_v49  ;;  %v6085_v24 = vsel %vm2497_vm4, %v6079_v49, %v6059_v15  ;;  %v14099_v55 = vld [vmem:[#allocation16_spill] sm:$0xff] }
0x2334   :  { %v12699_v33 = vadd.f32 %v6434_v23, %v6426_v0 }
0x2335   :  { %v6107_v20 = vpop.permute.xlu1 %6106 }
0x2336   :  { %v6115_v9 = vsel %vm2530_vm3, %v6105_v43, %v6107_v20  ;;  %v6116_v35 = vsel %vm2530_vm3, %v6107_v20, %v6109_v31  ;;  %v6111_v26 = vpop.permute.xlu0 %6110  ;;  %v14096_v20 = vld [vmem:[#allocation51_spill] sm:$0xff] }
0x2337   :  { %v6134_v59 = vsel %vm14092_vm5, %v6115_v9, %v6095_v56  ;;  %v6135_v12 = vsel %vm14093_vm9, %v6116_v35, %v6083_v47  ;;  %v6142_v25 = vsel %vm14094_vm2, %v6095_v56, %v6115_v9  ;;  %v6143_v46 = vsel %vm2246_vm8, %v6083_v47, %v6116_v35  ;;  %vm14120_vm9 = vmmov %vm14111_vm10 }
0x2338   :  { %v6150_v58 = vmul.f32 %v6134_v59, %v14095_v54  ;;  %v6151_v42 = vmul.f32 %v6135_v12, %v14095_v54  ;;  %v6117_v23 = vsel %vm2530_vm3, %v6109_v31, %v6111_v26  ;;  %v6129_v0 = vsel %vm2530_vm3, %v6111_v26, %v6105_v43  ;;  %vm14121_vm2 = vmmov %vm14101_vm15 }
0x2339   :  { %v6345_v30 = vpop.permute.xlu1 %6344  ;;  %v6136_v47 = vsel %vm14097_vm6, %v6117_v23, %v6084_v32  ;;  %v6137_v9 = vsel %vm14098_vm12, %v6129_v0, %v6085_v24  ;;  %v6182_v59 = vmul.f32 %v6142_v25, %v14099_v55  ;;  %v6183_v15 = vmul.f32 %v6143_v46, %v14099_v55 }
0x233a   :  { %v6158_v51 = vadd.f32 %v6150_v58, %v14096_v20  ;;  %v6159_v56 = vadd.f32 %v6151_v42, %v14096_v20  ;;  %v12755_v35 = vpop.permute.xlu0 %6348  ;;  %v6152_v31 = vmul.f32 %v6136_v47, %v14095_v54  ;;  %v6153_v43 = vmul.f32 %v6137_v9, %v14095_v54  ;;  %v14102_v54 = vld [vmem:[#allocation18_spill] sm:$0xff] }
0x233b   :  { %v6144_v12 = vsel %vm14100_vm14, %v6084_v32, %v6117_v23  ;;  %v6145_v58 = vsel %vm14101_vm15, %v6085_v24, %v6129_v0  ;;  %v6168_v42 = vmul.f32 %v12450_v21, %v14091_v3  ;;  %v6169_v25 = vmul.f32 %v12485_v52, %v14091_v3  ;;  %v14103_v3 = vld [vmem:[#allocation21_spill] sm:$0xff] }
0x233c   :  { %v6174_v49 = vadd.f32 %v6166_v13, %v6158_v51  ;;  %v6175_v26 = vadd.f32 %v6167_v60, %v6159_v56  ;;  %v6160_v46 = vadd.f32 %v6152_v31, %v14096_v20  ;;  %v6161_v47 = vadd.f32 %v6153_v43, %v14096_v20  ;;  %v14104_v56 = vld [vmem:[#allocation25_spill] sm:$0xff] }
0x233d   :  { %v6347_v53 = vpop.permute.xlu1 %6346  ;;  %v6282_v51 = vmul.f32 %v12502_v57, %v14102_v54  ;;  %v6283_v60 = vmul.f32 %v12506_v4, %v14102_v54  ;;  %v6184_v0 = vmul.f32 %v6144_v12, %v14099_v55  ;;  %v6185_v52 = vmul.f32 %v6145_v58, %v14099_v55  ;;  %v14105_v58 = vld [vmem:[#allocation62_spill] sm:$0xff] }
0x233e   :  { %v6190_v13 = vadd.f32 %v6182_v59, %v6174_v49  ;;  %v6191_v32 = vadd.f32 %v6183_v15, %v6175_v26  ;;  %v12775_v24 = vpop.permute.xlu0 %6380  ;;  %v6176_v23 = vadd.f32 %v6168_v42, %v6160_v46  ;;  %v6177_v21 = vadd.f32 %v6169_v25, %v6161_v47  ;;  %v14107_v46 = vld [vmem:[#allocation41_spill] sm:$0xff] }
0x233f   :  { %v6315_v20 = vmul.f32 %v12514_v37, %v14103_v3  ;;  %v6439_v9 = vmul.f32 %v12553_v45, %v14104_v56  ;;  %v6284_v4 = vmul.f32 %v12525_v27, %v14102_v54  ;;  %v6285_v59 = vmul.f32 %v12529_v11, %v14102_v54 }
0x2340   :  { %v6290_v57 = vadd.f32 %v6282_v51, %v6190_v13  ;;  %v6291_v31 = vadd.f32 %v6283_v60, %v6191_v32  ;;  %v6192_v15 = vadd.f32 %v6184_v0, %v6176_v23  ;;  %v6193_v43 = vadd.f32 %v6185_v52, %v6177_v21  ;;  %v14108_v51 = vld [vmem:[#allocation26_spill] sm:$0xff] }
0x2341   :  { %v6379_v49 = vpop.permute.xlu1 %6378  ;;  %v6355_v55 = vsel %vm2497_vm4, %v6347_v53, %v12755_v35  ;;  %v6314_v27 = vmul.f32 %v14105_v58, %v14103_v3  ;;  %v6316_v47 = vmul.f32 %v14107_v46, %v14103_v3  ;;  %v6354_v0 = vsel %vm2497_vm4, %v6345_v30, %v12672_v36 }
0x2342   :  { %v6307_v26 = vadd.f32 %v12703_v16, %v6291_v31  ;;  %v6388_v37 = vsel %vm2530_vm3, %v6379_v49, %v12775_v24  ;;  %v6331_v45 = vpop.permute.xlu0 %6330  ;;  %v6306_v12 = vadd.f32 %v12707_v41, %v6290_v57  ;;  %v6292_v42 = vadd.f32 %v6284_v4, %v6192_v15 }
0x2343   :  { %v6293_v25 = vadd.f32 %v6285_v59, %v6193_v43  ;;  %v6407_v11 = vsel %vm14106_vm0, %v6388_v37, %v6355_v55  ;;  %v6411_v16 = vsel %vm2246_vm8, %v12653_v44, %v12657_v6  ;;  %v6353_v41 = vsel %vm2497_vm4, %v12600_v50, %v6345_v30  ;;  %v14113_v43 = vld [vmem:[#allocation48_spill] sm:$0xff] }
0x2344   :  { %v6323_v54 = vadd.f32 %v6315_v20, %v6307_v26  ;;  %v6423_v60 = vmul.f32 %v6407_v11, %v14108_v51  ;;  %v6322_v32 = vadd.f32 %v6314_v27, %v6306_v12  ;;  %v6308_v23 = vadd.f32 %v12719_v17, %v6292_v42  ;;  %v14109_v20 = vld [vmem:[#allocation42_spill] sm:$0xff]  ;;  %v14117_v42 = vld [vmem:[#allocation43_spill] sm:$0xff] }
0x2345   :  { %v6375_v13 = vpop.permute.xlu1 %6374  ;;  %v6309_v21 = vadd.f32 %v12723_v7, %v6293_v25  ;;  %v6317_v50 = vmul.f32 %v14109_v20, %v14103_v3  ;;  %v6415_v31 = vsel %vm2246_vm8, %v6355_v55, %v6388_v37  ;;  %v14112_v7 = vld [vmem:[#allocation27_spill] sm:$0xff]  ;;  %vm14114_vm8 = vmmov %vm14092_vm5  ;;  %v6438_v25 = vmul.f32 %v14117_v42, %v14104_v56 }
0x2346   :  { %v6431_v52 = vadd.f32 %v6423_v60, %v6323_v54  ;;  %v6386_v57 = vsel %vm2530_vm3, %v12617_v10, %v6375_v13  ;;  %v6400_v44 = vsel %vm2530_vm3, %v6375_v13, %v12682_v39  ;;  %v6377_v6 = vpop.permute.xlu0 %6376  ;;  %v6451_v30 = vmul.f32 %v6411_v16, %v14112_v7  ;;  %vm14119_vm5 = vmmov %vm14110_vm1 }
0x2347   :  { %v6404_v17 = vsel %vm14110_vm1, %v6386_v57, %v6353_v41  ;;  %v6405_v36 = vsel %vm14111_vm10, %v6400_v44, %v6354_v0  ;;  %v6367_v10 = vsel %vm2497_vm4, %v6331_v45, %v6347_v53  ;;  %v6387_v59 = vsel %vm2530_vm3, %v6377_v6, %v6379_v49 }
0x2348   :  { %v6420_v4 = vmul.f32 %v6404_v17, %v14087_v18  ;;  %v6421_v39 = vmul.f32 %v6405_v36, %v14087_v18  ;;  %v6324_v3 = vadd.f32 %v6316_v47, %v6308_v23  ;;  %v6325_v15 = vadd.f32 %v6317_v50, %v6309_v21 }
0x2349   :  { %v6447_v8 = vadd.f32 %v6439_v9, %v6431_v52  ;;  %v6455_v55 = vmul.f32 %v6415_v31, %v14113_v43  ;;  %v6406_v12 = vsel %vm14114_vm8, %v6387_v59, %v6367_v10  ;;  %v6410_v53 = vsel %vm14115_vm13, %v12686_v22, %v12690_v2 }
0x234a   :  { %v6428_v26 = vadd.f32 %v6420_v4, %v12678_v63  ;;  %v6429_v37 = vadd.f32 %v6421_v39, %v12676_v62  ;;  %v6351_v58 = vpop.permute.xlu0 %6350  ;;  %v6414_v18 = vsel %vm14116_vm7, %v6367_v10, %v6387_v59  ;;  %v6422_v9 = vmul.f32 %v6406_v12, %v14108_v51 }
0x234b   :  { %v6459_v63 = vadd.f32 %v6451_v30, %v12680_v29  ;;  %v6463_v27 = vadd.f32 %v6455_v55, %v6447_v8  ;;  %v6450_v46 = vmul.f32 %v6410_v53, %v14112_v7  ;;  %v6454_v22 = vmul.f32 %v6414_v18, %v14113_v43  ;;  %v7689_v8 = vld [vmem:[%s13223_s13 + $0x18] sm:$0xff]  }
0x234c   :  { %v6444_v49 = vadd.f32 %v12711_v40, %v6428_v26  ;;  %v6445_v62 = vadd.f32 %v12715_v48, %v6429_v37  ;;  %v6430_v11 = vadd.f32 %v6422_v9, %v6322_v32  ;;  %v6356_v1 = vsel %vm2497_vm4, %v12755_v35, %v6351_v58 }
0x234d   :  { %v6471_v47 = vpack.c.bf16 %v6463_v27, %v6459_v63  ;;  %v6357_v40 = vsel %vm2497_vm4, %v6351_v58, %v6331_v45  ;;  %v6458_v54 = vadd.f32 %v6450_v46, %v12699_v33  ;;  %v6412_v60 = vsel %vm14118_vm11, %v6353_v41, %v6386_v57  ;;  %v14122_v33 = vld [vmem:[#allocation6_spill] sm:$0xff]  ;;  %vm14124_vm4 = vmmov %vm14121_vm2  ;;  %v14125_v57 = vld [vmem:[#allocation4_spill] sm:$0xff] }
0x234e   :  { %v6383_v2 = vpop.permute.xlu0 %6382  ;;  %v6446_v16 = vadd.f32 %v6438_v25, %v6430_v11  ;;  %v6413_v45 = vsel %vm14121_vm2, %v6354_v0, %v6400_v44  ;;  %v6441_v21 = vmul.f32 %v14122_v33, %v14104_v56  ;;  %v6452_v44 = vmul.f32 %v6412_v60, %v14112_v7 }
0x234f   :  { %v6389_v29 = vsel %vm2530_vm3, %v12775_v24, %v6383_v2  ;;  %v6401_v48 = vsel %vm2530_vm3, %v6383_v2, %v6377_v6  ;;  %6476 = vmatprep.subr.bf16.mxu0 %v6471_v47  ;;  %vm14123_vm3 = vmmov %vm14118_vm11  ;;  %v6440_v6 = vmul.f32 %v14125_v57, %v14104_v56  ;;  %v6453_v31 = vmul.f32 %v6413_v45, %v14112_v7  ;;  %v7686_v56 = vld [vmem:[%s13223_s13] sm:$0xff]  }
0x2350   :  { %v6408_v13 = vsel %vm14119_vm5, %v6389_v29, %v6356_v1  ;;  %v6409_v35 = vsel %vm14120_vm9, %v6401_v48, %v6357_v40  ;;  %v6462_v32 = vadd.f32 %v6454_v22, %v6446_v16  ;;  %v6416_v41 = vsel %vm14123_vm3, %v6356_v1, %v6389_v29 }
0x2351   :  { %v6424_v24 = vmul.f32 %v6408_v13, %v14108_v51  ;;  %v6425_v23 = vmul.f32 %v6409_v35, %v14108_v51  ;;  %v6417_v52 = vsel %vm14124_vm4, %v6357_v40, %v6401_v48  ;;  %v6456_v17 = vmul.f32 %v6416_v41, %v14113_v43 }
0x2352   :  { %v6470_v0 = vpack.c.bf16 %v6462_v32, %v6458_v54  ;;  %v6457_v36 = vmul.f32 %v6417_v52, %v14113_v43  ;;  %v6460_v30 = vadd.f32 %v6452_v44, %v6444_v49  ;;  %v6461_v10 = vadd.f32 %v6453_v31, %v6445_v62 }
0x2353   :  { %v6432_v20 = vadd.f32 %v6424_v24, %v6324_v3  ;;  %v6433_v50 = vadd.f32 %v6425_v23, %v6325_v15  ;;  %vm14126_vm6 = vcmask 261120   ;;  %v14127_v7 = vmov 0   ;;  %v7687_v3 = vld [vmem:[%s13223_s13 + $0x8] sm:$0xff]   ;;  %v7688_v15 = vld [vmem:[%s13223_s13 + $0x10] sm:$0xff]  }
0x2354   :  { %6477 = vmatpush1.bf16.msra.mxu0 %v6470_v0  ;;  %vm14128_vm12 = vmmov %vm14126_vm6  ;;  %vm14135_vm13 = vcmask 523264  }
0x2355   :  { %v6448_v51 = vadd.f32 %v6440_v6, %v6432_v20  ;;  %v6449_v28 = vadd.f32 %v6441_v21, %v6433_v50  ;;  %vm14129_vm14 = vmmov %vm14126_vm6 }
0x2356   :  { %vm14130_vm15 = vmmov %vm14126_vm6 }
0x2357   :  { %v6464_v34 = vadd.f32 %v6456_v17, %v6448_v51  ;;  %v6465_v4 = vadd.f32 %v6457_v36, %v6449_v28  ;;  %7215 = vmatmul.mubr.msk.bf16.vlgmr.msra.gmra.mrb[96].mxu0 %vm14126_vm6, %v7686_v56  ;;  %vm14131_vm0 = vmmov %vm14126_vm6 }
0x2358   :  { %6516 = vmatprep.mubr.bf16.mxu0 %v14127_v7  ;;  %vm14132_vm1 = vmmov %vm14131_vm0 }
0x2359   :  { %v6473_v39 = vpack.c.bf16 %v6465_v4, %v6461_v10  ;;  %v6472_v59 = vpack.c.bf16 %v6464_v34, %v6460_v30  ;;  %vm14133_vm10 = vmmov %vm14131_vm0 }
0x235a   :  { %vm14134_vm8 = vmmov %vm14131_vm0 }
0x235b   :  { %6549 = vmatprep.subr.bf16.mxu1 %v6473_v39  ;;  %vm14136_vm7 = vmmov %vm14135_vm13 }
0x235c   :  { %6550 = vmatpush1.bf16.msra.mxu1 %v6472_v59 }
0x235f   :  { %7219 = vmatmul.mubr.msk.bf16.vlgmr.msra.gmra.mrb[80].mxu1 %vm14128_vm12, %v7686_v56  ;;  %7216 = vmatmul.mubr.msk.bf16.gmra.mrb[100].mxu0 %vm14129_vm14, %v7687_v3 }
0x2360   :  { %6589 = vmatprep.mubr.bf16.mxu1 %v14127_v7  ;;  %6526 = vmatprep.mubr.bf16.mxu0 %v14127_v7 }
0x2367   :  { %7220 = vmatmul.mubr.msk.bf16.gmra.mrb[84].mxu1 %vm14130_vm15, %v7687_v3  ;;  %7217 = vmatmul.mubr.msk.bf16.gmra.mrb[104].mxu0 %vm14131_vm0, %v7688_v15 }
0x2368   :  { %6599 = vmatprep.mubr.bf16.mxu1 %v14127_v7  ;;  %6536 = vmatprep.mubr.bf16.mxu0 %v14127_v7 }
0x236f   :  { %7221 = vmatmul.mubr.msk.bf16.gmra.mrb[88].mxu1 %vm14132_vm1, %v7688_v15  ;;  %7218 = vmatmul.mubr.msk.bf16.gmra.mrb[108].mxu0 %vm14133_vm10, %v7689_v8 }
0x2370   :  { %6609 = vmatprep.mubr.bf16.mxu1 %v14127_v7  ;;  %7044 = vmatprep.mubr.bf16.mxu0 %v14127_v7 }
0x2377   :  { %7222 = vmatmul.mubr.msk.bf16.gmra.mrb[92].mxu1 %vm14134_vm8, %v7689_v8 }
0x2378   :  { %7087 = vmatprep.mubr.bf16.mxu1 %v14127_v7 }
0x242a   :  { %v12903_v43 = vpop.f32.mrb[96].mxu0 }
0x242b   :  { %v12905_v55 = vpop.f32.mrb[97].mxu0 }
0x242c   :  { %v6620_v26 = vadd.f32 %v12905_v55, %v12903_v43  ;;  %v12909_v37 = vpop.f32.mrb[98].mxu0 }
0x242d   :  { %v12911_v12 = vpop.f32.mrb[99].mxu0 }
0x242e   :  { %v6625_v58 = vadd.f32 %v12911_v12, %v12909_v37 }
0x2432   :  { %v12915_v53 = vpop.f32.mrb[80].mxu1  ;;  %v12920_v49 = vpop.f32.mrb[100].mxu0 }
0x2433   :  { %v6621_v18 = vadd.f32 %v6620_v26, %v12915_v53  ;;  %v12918_v9 = vpop.f32.mrb[81].mxu1  ;;  %v12924_v27 = vpop.f32.mrb[101].mxu0 }
0x2434   :  { %v12922_v63 = vpop.f32.mrb[82].mxu1  ;;  %v6630_v25 = vadd.f32 %v12924_v27, %v12920_v49  ;;  %v12932_v46 = vpop.f32.mrb[102].mxu0 }
0x2435   :  { %v6622_v62 = vadd.f32 %v6621_v18, %v12918_v9  ;;  %v6626_v42 = vadd.f32 %v6625_v58, %v12922_v63  ;;  %v12930_v11 = vpop.f32.mrb[83].mxu1  ;;  %v12934_v22 = vpop.f32.mrb[103].mxu0 }
0x2436   :  { %v6635_v2 = vadd.f32 %v12934_v22, %v12932_v46 }
0x2437   :  { %v6627_v1 = vadd.f32 %v6626_v42, %v12930_v11  ;;  %6623 = vadd.xlane.f32.xlu1 %v6622_v62 }
0x2439   :  { %6628 = vadd.xlane.f32.xlu0 %v6627_v1 }
0x243a   :  { %v12939_v47 = vpop.f32.mrb[84].mxu1  ;;  %v12944_v29 = vpop.f32.mrb[104].mxu0 }
0x243b   :  { %v6631_v16 = vadd.f32 %v6630_v25, %v12939_v47  ;;  %v12942_v40 = vpop.f32.mrb[85].mxu1  ;;  %v12948_v54 = vpop.f32.mrb[105].mxu0 }
0x243c   :  { %v12946_v48 = vpop.f32.mrb[86].mxu1  ;;  %v6640_v35 = vadd.f32 %v12948_v54, %v12944_v29  ;;  %v12956_v32 = vpop.f32.mrb[106].mxu0 }
0x243d   :  { %v6632_v60 = vadd.f32 %v6631_v16, %v12942_v40  ;;  %v6636_v13 = vadd.f32 %v6635_v2, %v12946_v48  ;;  %v12954_v45 = vpop.f32.mrb[87].mxu1  ;;  %v12958_v24 = vpop.f32.mrb[107].mxu0 }
0x243e   :  { %v6645_v33 = vadd.f32 %v12958_v24, %v12956_v32 }
0x243f   :  { %v6637_v23 = vadd.f32 %v6636_v13, %v12954_v45  ;;  %6633 = vadd.xlane.f32.xlu0 %v6632_v60 }
0x2441   :  { %6638 = vadd.xlane.f32.xlu1 %v6637_v23 }
0x2442   :  { %v12963_v21 = vpop.f32.mrb[88].mxu1  ;;  %v12968_v57 = vpop.f32.mrb[108].mxu0 }
0x2443   :  { %v6641_v41 = vadd.f32 %v6640_v35, %v12963_v21  ;;  %v12966_v52 = vpop.f32.mrb[89].mxu1  ;;  %v12972_v20 = vpop.f32.mrb[109].mxu0 }
0x2444   :  { %v12970_v6 = vpop.f32.mrb[90].mxu1  ;;  %v6650_v44 = vadd.f32 %v12972_v20, %v12968_v57  ;;  %v12980_v51 = vpop.f32.mrb[110].mxu0 }
0x2445   :  { %v6642_v50 = vadd.f32 %v6641_v41, %v12966_v52  ;;  %v6646_v0 = vadd.f32 %v6645_v33, %v12970_v6  ;;  %v12978_v31 = vpop.f32.mrb[91].mxu1  ;;  %v12982_v17 = vpop.f32.mrb[111].mxu0 }
0x2446   :  { %v6655_v28 = vadd.f32 %v12982_v17, %v12980_v51 }
0x2447   :  { %v6647_v36 = vadd.f32 %v6646_v0, %v12978_v31  ;;  %6643 = vadd.xlane.f32.xlu0 %v6642_v50 }
0x2449   :  { %6648 = vadd.xlane.f32.xlu1 %v6647_v36 }
0x244a   :  { %v12987_v30 = vpop.f32.mrb[92].mxu1 }
0x244b   :  { %v6651_v34 = vadd.f32 %v6650_v44, %v12987_v30  ;;  %v12990_v10 = vpop.f32.mrb[93].mxu1 }
0x244c   :  { %v12992_v4 = vpop.f32.mrb[94].mxu1 }
0x244d   :  { %v6652_v56 = vadd.f32 %v6651_v34, %v12990_v10  ;;  %v6656_v39 = vadd.f32 %v6655_v28, %v12992_v4  ;;  %v12996_v59 = vpop.f32.mrb[95].mxu1 }
0x244f   :  { %v6657_v7 = vadd.f32 %v6656_v39, %v12996_v59  ;;  %6653 = vadd.xlane.f32.xlu0 %v6652_v56 }
0x2451   :  { %6658 = vadd.xlane.f32.xlu1 %v6657_v7 }
0x24c4   :  { %v6624_v3 = vpop.xlane.xlu1 %6623 }
0x24c5   :  { %v12999_v15 = vmul.f32 0.001953125, %v6624_v3 }
0x24c6   :  { %v6629_v8 = vpop.xlane.xlu0 %6628 }
0x24c7   :  { %v13001_v26 = vmul.f32 0.001953125, %v6629_v8  ;;  %v6668_v58 = vsub.f32 %v12903_v43, %v12999_v15  ;;  %v6669_v18 = vsub.f32 %v12905_v55, %v12999_v15  ;;  %v6670_v62 = vsub.f32 %v12915_v53, %v12999_v15 }
0x24c8   :  { %v6671_v42 = vsub.f32 %v12918_v9, %v12999_v15 }
0x24c9   :  { %v6700_v25 = vmul.f32 %v6668_v58, %v6668_v58  ;;  %v6701_v1 = vmul.f32 %v6669_v18, %v6669_v18  ;;  %v6672_v2 = vsub.f32 %v12909_v37, %v13001_v26  ;;  %v6673_v16 = vsub.f32 %v12911_v12, %v13001_v26 }
0x24ca   :  { %v6674_v60 = vsub.f32 %v12922_v63, %v13001_v26  ;;  %v6702_v13 = vmul.f32 %v6670_v62, %v6670_v62  ;;  %v6675_v41 = vsub.f32 %v12930_v11, %v13001_v26  ;;  %v6703_v44 = vmul.f32 %v6671_v42, %v6671_v42 }
0x24cb   :  { %v6732_v35 = vadd.f32 %v6701_v1, %v6700_v25  ;;  %v6704_v23 = vmul.f32 %v6672_v2, %v6672_v2  ;;  %v6705_v50 = vmul.f32 %v6673_v16, %v6673_v16 }
0x24cc   :  { %v6634_v33 = vpop.xlane.xlu0 %6633  ;;  %v6706_v34 = vmul.f32 %v6674_v60, %v6674_v60  ;;  %v6707_v58 = vmul.f32 %v6675_v41, %v6675_v41 }
0x24cd   :  { %v13019_v0 = vmul.f32 0.001953125, %v6634_v33  ;;  %v6733_v36 = vadd.f32 %v6732_v35, %v6702_v13  ;;  %v6737_v56 = vadd.f32 %v6705_v50, %v6704_v23 }
0x24ce   :  { %v6639_v28 = vpop.xlane.xlu1 %6638 }
0x24cf   :  { %v13021_v39 = vmul.f32 0.001953125, %v6639_v28  ;;  %v6734_v7 = vadd.f32 %v6733_v36, %v6703_v44  ;;  %v6676_v3 = vsub.f32 %v12920_v49, %v13019_v0  ;;  %v6677_v8 = vsub.f32 %v12924_v27, %v13019_v0 }
0x24d0   :  { %v6738_v18 = vadd.f32 %v6737_v56, %v6706_v34  ;;  %v6678_v62 = vsub.f32 %v12939_v47, %v13019_v0  ;;  %v6679_v42 = vsub.f32 %v12942_v40, %v13019_v0 }
0x24d1   :  { %6735 = vadd.xlane.f32.xlu0 %v6734_v7  ;;  %v6708_v25 = vmul.f32 %v6676_v3, %v6676_v3  ;;  %v6709_v1 = vmul.f32 %v6677_v8, %v6677_v8  ;;  %v6680_v2 = vsub.f32 %v12932_v46, %v13021_v39  ;;  %v6681_v16 = vsub.f32 %v12934_v22, %v13021_v39 }
0x24d2   :  { %v6739_v60 = vadd.f32 %v6738_v18, %v6707_v58  ;;  %v6710_v13 = vmul.f32 %v6678_v62, %v6678_v62  ;;  %v6682_v35 = vsub.f32 %v12946_v48, %v13021_v39  ;;  %v6683_v33 = vsub.f32 %v12954_v45, %v13021_v39 }
0x24d3   :  { %v6742_v23 = vadd.f32 %v6709_v1, %v6708_v25  ;;  %v6712_v41 = vmul.f32 %v6680_v2, %v6680_v2  ;;  %v6713_v50 = vmul.f32 %v6681_v16, %v6681_v16  ;;  %v6711_v36 = vmul.f32 %v6679_v42, %v6679_v42 }
0x24d4   :  { %6740 = vadd.xlane.f32.xlu1 %v6739_v60  ;;  %v6644_v44 = vpop.xlane.xlu0 %6643  ;;  %v6714_v56 = vmul.f32 %v6682_v35, %v6682_v35  ;;  %v6715_v8 = vmul.f32 %v6683_v33, %v6683_v33 }
0x24d5   :  { %v13039_v28 = vmul.f32 0.001953125, %v6644_v44  ;;  %v6743_v34 = vadd.f32 %v6742_v23, %v6710_v13  ;;  %v6747_v7 = vadd.f32 %v6713_v50, %v6712_v41 }
0x24d6   :  { %v6649_v3 = vpop.xlane.xlu1 %6648 }
0x24d7   :  { %v13041_v58 = vmul.f32 0.001953125, %v6649_v3  ;;  %v6744_v18 = vadd.f32 %v6743_v34, %v6711_v36  ;;  %v6748_v62 = vadd.f32 %v6747_v7, %v6714_v56  ;;  %v6684_v25 = vsub.f32 %v12944_v29, %v13039_v28 }
0x24d8   :  { %v6685_v1 = vsub.f32 %v12948_v54, %v13039_v28  ;;  %v6686_v42 = vsub.f32 %v12963_v21, %v13039_v28  ;;  %v6687_v35 = vsub.f32 %v12966_v52, %v13039_v28 }
0x24d9   :  { %6745 = vadd.xlane.f32.xlu0 %v6744_v18  ;;  %v6749_v2 = vadd.f32 %v6748_v62, %v6715_v8  ;;  %v6716_v16 = vmul.f32 %v6684_v25, %v6684_v25  ;;  %v6688_v60 = vsub.f32 %v12956_v32, %v13041_v58  ;;  %v6689_v13 = vsub.f32 %v12958_v24, %v13041_v58 }
0x24da   :  { %v6717_v23 = vmul.f32 %v6685_v1, %v6685_v1  ;;  %v6690_v33 = vsub.f32 %v12970_v6, %v13041_v58  ;;  %v6691_v41 = vsub.f32 %v12978_v31, %v13041_v58  ;;  %v6718_v34 = vmul.f32 %v6686_v42, %v6686_v42 }
0x24db   :  { %6750 = vadd.xlane.f32.xlu1 %v6749_v2  ;;  %v6720_v50 = vmul.f32 %v6688_v60, %v6688_v60  ;;  %v6721_v44 = vmul.f32 %v6689_v13, %v6689_v13  ;;  %v6719_v62 = vmul.f32 %v6687_v35, %v6687_v35 }
0x24dc   :  { %v6654_v36 = vpop.xlane.xlu0 %6653  ;;  %v6752_v56 = vadd.f32 %v6717_v23, %v6716_v16  ;;  %v6722_v3 = vmul.f32 %v6690_v33, %v6690_v33  ;;  %v6723_v1 = vmul.f32 %v6691_v41, %v6691_v41 }
0x24dd   :  { %v13059_v7 = vmul.f32 0.001953125, %v6654_v36  ;;  %v6757_v8 = vadd.f32 %v6721_v44, %v6720_v50 }
0x24de   :  { %v6659_v18 = vpop.xlane.xlu1 %6658  ;;  %v6753_v25 = vadd.f32 %v6752_v56, %v6718_v34 }
0x24df   :  { %v13061_v38 = vmul.f32 0.001953125, %v6659_v18  ;;  %v6758_v61 = vadd.f32 %v6757_v8, %v6722_v3  ;;  %v6692_v2 = vsub.f32 %v12968_v57, %v13059_v7  ;;  %v6693_v60 = vsub.f32 %v12972_v20, %v13059_v7 }
0x24e0   :  { %v6754_v13 = vadd.f32 %v6753_v25, %v6719_v62  ;;  %v6694_v42 = vsub.f32 %v12987_v30, %v13059_v7  ;;  %v6695_v16 = vsub.f32 %v12990_v10, %v13059_v7 }
0x24e1   :  { %v6759_v23 = vadd.f32 %v6758_v61, %v6723_v1  ;;  %v6724_v35 = vmul.f32 %v6692_v2, %v6692_v2  ;;  %v6725_v33 = vmul.f32 %v6693_v60, %v6693_v60  ;;  %v6696_v41 = vsub.f32 %v12980_v51, %v13061_v38 }
0x24e2   :  { %6755 = vadd.xlane.f32.xlu0 %v6754_v13  ;;  %v6697_v50 = vsub.f32 %v12982_v17, %v13061_v38  ;;  %v6698_v44 = vsub.f32 %v12992_v4, %v13061_v38  ;;  %v6726_v36 = vmul.f32 %v6694_v42, %v6694_v42  ;;  %v6699_v3 = vsub.f32 %v12996_v59, %v13061_v38 }
0x24e3   :  { %6760 = vadd.xlane.f32.xlu1 %v6759_v23  ;;  %v6762_v34 = vadd.f32 %v6725_v33, %v6724_v35  ;;  %v6728_v56 = vmul.f32 %v6696_v41, %v6696_v41  ;;  %v6727_v8 = vmul.f32 %v6695_v16, %v6695_v16 }
0x24e4   :  { %v6729_v61 = vmul.f32 %v6697_v50, %v6697_v50  ;;  %v6730_v62 = vmul.f32 %v6698_v44, %v6698_v44  ;;  %v6731_v2 = vmul.f32 %v6699_v3, %v6699_v3  ;;  %v7690_v3 = vld [vmem:[%s13224_s14] sm:$0xff] }
0x24e5   :  { %v6763_v18 = vadd.f32 %v6762_v34, %v6726_v36 }
0x24e6   :  { %v6767_v25 = vadd.f32 %v6729_v61, %v6728_v56 }
0x24e7   :  { %v6764_v1 = vadd.f32 %v6763_v18, %v6727_v8 }
0x24e8   :  { %v6768_v60 = vadd.f32 %v6767_v25, %v6730_v62  ;;  %v7691_v25 = vld [vmem:[%s13224_s14 + $0x8] sm:$0xff] }
0x24e9   :  { %6765 = vadd.xlane.f32.xlu0 %v6764_v1 }
0x24ea   :  { %v6769_v13 = vadd.f32 %v6768_v60, %v6731_v2 }
0x24ec   :  { %6770 = vadd.xlane.f32.xlu1 %v6769_v13 }
0x255e   :  { %v6736_v14 = vpop.xlane.xlu0 %6735 }
0x255f   :  { %v6772_v19 = vmul.f32 0.001953125, %v6736_v14 }
0x2561   :  { %v6780_v23 = vadd.f32 1e-05, %v6772_v19  ;;  %v6741_v42 = vpop.xlane.xlu1 %6740 }
0x2562   :  { %v6773_v35 = vmul.f32 0.001953125, %v6741_v42 }
0x2563   :  { %7607 = vrsqrt.f32 %v6780_v23 }
0x2564   :  { %v6781_v33 = vadd.f32 1e-05, %v6773_v35  ;;  %v7692_v35 = vld [vmem:[%s13225_s15] sm:$0xff] }
0x2566   :  { %7609 = vrsqrt.f32 %v6781_v33  ;;  %v6746_v41 = vpop.xlane.xlu0 %6745 }
0x2567   :  { %v6774_v50 = vmul.f32 0.001953125, %v6746_v41  ;;  %v7693_v41 = vld [vmem:[%s13225_s15 + $0x8] sm:$0xff] }
0x2568   :  { %v6751_v16 = vpop.xlane.xlu1 %6750 }
0x2569   :  { %v6782_v36 = vadd.f32 1e-05, %v6774_v50  ;;  %v6775_v44 = vmul.f32 0.001953125, %v6751_v16 }
0x256b   :  { %7611 = vrsqrt.f32 %v6782_v36  ;;  %v6783_v34 = vadd.f32 1e-05, %v6775_v44 }
0x256d   :  { %v7608_v56 = vpop.eup %7607  ;;  %7613 = vrsqrt.f32 %v6783_v34  ;;  %v7695_v34 = vld [vmem:[%s13224_s14 + $0x18] sm:$0xff] }
0x256e   :  { %v6796_v14 = vmul.f32 %v7690_v3, %v7608_v56 }
0x256f   :  { %v6756_v19 = vpop.xlane.xlu0 %6755 }
0x2570   :  { %v7610_v61 = vpop.eup %7609  ;;  %v6776_v8 = vmul.f32 0.001953125, %v6756_v19  ;;  %6822 = vperm.xlu0 %7483, %v6796_v14   ;;  %v6761_v18 = vpop.xlane.xlu1 %6760  ;;  %v6804_v2 = vmul.f32 %v6796_v14, %v12999_v15  ;;  %v7694_v15 = vld [vmem:[%s13224_s14 + $0x10] sm:$0xff] }
0x2571   :  { %v6777_v62 = vmul.f32 0.001953125, %v6761_v18  ;;  %v6797_v1 = vmul.f32 %v7691_v25, %v7610_v61 }
0x2572   :  { %v6784_v60 = vadd.f32 1e-05, %v6776_v8  ;;  %v6812_v33 = vsub.f32 %v7692_v35, %v6804_v2 }
0x2573   :  { %v6785_v13 = vadd.f32 1e-05, %v6777_v62  ;;  %6827 = vperm.xlu1 %7484, %v6797_v1   ;;  %v6805_v23 = vmul.f32 %v6797_v1, %v13001_v26  ;;  %v7696_v62 = vld [vmem:[%s13225_s15 + $0x18] sm:$0xff]  ;;  %v7697_v1 = vld [vmem:[%s13225_s15 + $0x10] sm:$0xff] }
0x2574   :  { %7615 = vrsqrt.f32 %v6784_v60 }
0x2575   :  { %v7612_v42 = vpop.eup %7611  ;;  %7617 = vrsqrt.f32 %v6785_v13  ;;  %v6813_v50 = vsub.f32 %v7693_v41, %v6805_v23  ;;  %v7699_v23 = vld [vmem:[%s13224_s14 + $0x28] sm:$0xff] }
0x2576   :  { %v6766_v16 = vpop.xlane.xlu0 %6765  ;;  %v6798_v36 = vmul.f32 %v7694_v15, %v7612_v42  ;;  %v7700_v41 = vld [vmem:[%s13225_s15 + $0x28] sm:$0xff]  ;;  %v7701_v15 = vld [vmem:[%s13225_s15 + $0x20] sm:$0xff] }
0x2577   :  { %v7614_v26 = vpop.eup %7613  ;;  %v6778_v44 = vmul.f32 0.001953125, %v6766_v16  ;;  %6894 = vperm.xlu1 %7484, %v6812_v33   ;;  %6899 = vperm.xlu0 %7483, %v6813_v50  }
0x2578   :  { %v6799_v56 = vmul.f32 %v7695_v34, %v7614_v26  ;;  %v6806_v19 = vmul.f32 %v6798_v36, %v13019_v0  ;;  %v7702_v26 = vld [vmem:[%s13224_s14 + $0x30] sm:$0xff] }
0x2579   :  { %v6786_v3 = vadd.f32 1e-05, %v6778_v44  ;;  %v6771_v14 = vpop.xlane.xlu1 %6770  ;;  %v7703_v44 = vld [vmem:[%s13224_s14 + $0x38] sm:$0xff] }
0x257a   :  { %v6779_v61 = vmul.f32 0.001953125, %v6771_v14  ;;  %v6807_v8 = vmul.f32 %v6799_v56, %v13021_v39  ;;  %v6814_v2 = vsub.f32 %v7697_v1, %v6806_v19  ;;  %v7698_v39 = vld [vmem:[%s13224_s14 + $0x20] sm:$0xff]  ;;  %v7704_v14 = vld [vmem:[%s13225_s15 + $0x30] sm:$0xff] }
0x257b   :  { %7619 = vrsqrt.f32 %v6786_v3  ;;  %6832 = vperm.xlu1 %7484, %v6798_v36   ;;  %6837 = vperm.xlu0 %7483, %v6799_v56  }
0x257c   :  { %v6787_v18 = vadd.f32 1e-05, %v6779_v61  ;;  %v6815_v25 = vsub.f32 %v7696_v62, %v6807_v8  ;;  %v7705_v61 = vld [vmem:[%s13225_s15 + $0x38] sm:$0xff] }
0x257e   :  { %v7616_v60 = vpop.eup %7615  ;;  %7621 = vrsqrt.f32 %v6787_v18 }
0x257f   :  { %v7618_v0 = vpop.eup %7617  ;;  %6904 = vperm.xlu1 %7484, %v6814_v2   ;;  %6909 = vperm.xlu0 %7483, %v6815_v25   ;;  %v6800_v13 = vmul.f32 %v7698_v39, %v7616_v60 }
0x2580   :  { %v6801_v42 = vmul.f32 %v7699_v23, %v7618_v0 }
0x2581   :  { %v6808_v35 = vmul.f32 %v6800_v13, %v13039_v28 }
0x2582   :  { %v6809_v33 = vmul.f32 %v6801_v42, %v13041_v58 }
0x2583   :  { %6842 = vperm.xlu1 %7484, %v6800_v13   ;;  %6847 = vperm.xlu0 %7483, %v6801_v42   ;;  %v6816_v36 = vsub.f32 %v7701_v15, %v6808_v35 }
0x2584   :  { %v6817_v50 = vsub.f32 %v7700_v41, %v6809_v33 }
0x2585   :  { %v7620_v16 = vpop.eup %7619 }
0x2586   :  { %v6802_v28 = vmul.f32 %v7702_v26, %v7620_v16 }
0x2587   :  { %6914 = vperm.xlu1 %7484, %v6816_v36   ;;  %6919 = vperm.xlu0 %7483, %v6817_v50  }
0x2588   :  { %v7622_v58 = vpop.eup %7621  ;;  %v6810_v56 = vmul.f32 %v6802_v28, %v13059_v7 }
0x2589   :  { %v6803_v34 = vmul.f32 %v7703_v44, %v7622_v58 }
0x258a   :  { %v6818_v19 = vsub.f32 %v7704_v14, %v6810_v56 }
0x258b   :  { %6852 = vperm.xlu1 %7484, %v6802_v28   ;;  %6857 = vperm.xlu0 %7483, %v6803_v34   ;;  %v6811_v3 = vmul.f32 %v6803_v34, %v13061_v38 }
0x258d   :  { %v6819_v8 = vsub.f32 %v7705_v61, %v6811_v3 }
0x258f   :  { %6924 = vperm.xlu1 %7484, %v6818_v19   ;;  %6929 = vperm.xlu0 %7483, %v6819_v8  }
0x25ef   :  { %v6823_v18 = vpop.permute.xlu0 %6822 }
0x25f0   :  { %v6860_v2 = vmul.f32 %v6823_v18, %v12903_v43  ;;  %v6861_v60 = vmul.f32 %v6823_v18, %v12905_v55  ;;  %v6862_v0 = vmul.f32 %v6823_v18, %v12915_v53  ;;  %v6863_v39 = vmul.f32 %v6823_v18, %v12918_v9 }
0x25f2   :  { %v6828_v62 = vpop.permute.xlu1 %6827 }
0x25f3   :  { %v6864_v7 = vmul.f32 %v6828_v62, %v12909_v37  ;;  %v6865_v25 = vmul.f32 %v6828_v62, %v12911_v12  ;;  %v6866_v38 = vmul.f32 %v6828_v62, %v12922_v63  ;;  %v6867_v1 = vmul.f32 %v6828_v62, %v12930_v11 }
0x25f6   :  { %v6900_v13 = vpop.permute.xlu0 %6899  ;;  %v6895_v23 = vpop.permute.xlu1 %6894 }
0x25f7   :  { %v6936_v42 = vadd.f32 %v6900_v13, %v6864_v7  ;;  %v6937_v35 = vadd.f32 %v6900_v13, %v6865_v25  ;;  %v6938_v33 = vadd.f32 %v6900_v13, %v6866_v38  ;;  %v6939_v37 = vadd.f32 %v6900_v13, %v6867_v1 }
0x25f8   :  { %v6932_v41 = vadd.f32 %v6895_v23, %v6860_v2  ;;  %v6933_v12 = vadd.f32 %v6895_v23, %v6861_v60  ;;  %v6934_v50 = vadd.f32 %v6895_v23, %v6862_v0  ;;  %v6935_v63 = vadd.f32 %v6895_v23, %v6863_v39 }
0x25f9   :  { %v6968_v16 = vmax.f32 %v6936_v42, 0.0  ;;  %v6970_v11 = vmax.f32 %v6938_v33, 0.0  ;;  %v6969_v15 = vmax.f32 %v6937_v35, 0.0  ;;  %v6971_v43 = vmax.f32 %v6939_v37, 0.0 }
0x25fa   :  { %v6964_v36 = vmax.f32 %v6932_v41, 0.0  ;;  %v6966_v55 = vmax.f32 %v6934_v50, 0.0  ;;  %v6838_v26 = vpop.permute.xlu0 %6837  ;;  %v6833_v53 = vpop.permute.xlu1 %6832  ;;  %v6965_v28 = vmax.f32 %v6933_v12, 0.0  ;;  %v6967_v9 = vmax.f32 %v6935_v63, 0.0 }
0x25fb   :  { %v6872_v58 = vmul.f32 %v6838_v26, %v12932_v46  ;;  %v6873_v44 = vmul.f32 %v6838_v26, %v12934_v22  ;;  %v6874_v34 = vmul.f32 %v6838_v26, %v12946_v48  ;;  %v6875_v56 = vmul.f32 %v6838_v26, %v12954_v45 }
0x25fc   :  { %v6997_v3 = vpack.c.bf16 %v6969_v15, %v6965_v28  ;;  %v6999_v14 = vpack.c.bf16 %v6971_v43, %v6967_v9  ;;  %v6996_v19 = vpack.c.bf16 %v6968_v16, %v6964_v36  ;;  %v6998_v61 = vpack.c.bf16 %v6970_v11, %v6966_v55 }
0x25fd   :  { %v6868_v8 = vmul.f32 %v6833_v53, %v12920_v49  ;;  %v6869_v18 = vmul.f32 %v6833_v53, %v12924_v27  ;;  %v6870_v62 = vmul.f32 %v6833_v53, %v12939_v47  ;;  %v6871_v7 = vmul.f32 %v6833_v53, %v12942_v40 }
0x25fe   :  { %v6910_v25 = vpop.permute.xlu0 %6909  ;;  %v6905_v46 = vpop.permute.xlu1 %6904  ;;  %7012 = vmatprep.subr.bf16.mxu0 %v6997_v3  ;;  %7055 = vmatprep.subr.bf16.mxu1 %v6999_v14 }
0x25ff   :  { %v6944_v22 = vadd.f32 %v6910_v25, %v6872_v58  ;;  %v6945_v48 = vadd.f32 %v6910_v25, %v6873_v44  ;;  %v6946_v38 = vadd.f32 %v6910_v25, %v6874_v34  ;;  %v6947_v45 = vadd.f32 %v6910_v25, %v6875_v56  ;;  %7013 = vmatpush1.bf16.msra.mxu0 %v6996_v19 }
0x2600   :  { %7056 = vmatpush1.bf16.msra.mxu1 %v6998_v61  ;;  %v6940_v1 = vadd.f32 %v6905_v46, %v6868_v8  ;;  %v6941_v2 = vadd.f32 %v6905_v46, %v6869_v18  ;;  %v6942_v49 = vadd.f32 %v6905_v46, %v6870_v62  ;;  %v6943_v0 = vadd.f32 %v6905_v46, %v6871_v7 }
0x2601   :  { %v6976_v60 = vmax.f32 %v6944_v22, 0.0  ;;  %v6978_v27 = vmax.f32 %v6946_v38, 0.0  ;;  %v6977_v23 = vmax.f32 %v6945_v48, 0.0  ;;  %v6979_v35 = vmax.f32 %v6947_v45, 0.0 }
0x2602   :  { %v6972_v39 = vmax.f32 %v6940_v1, 0.0  ;;  %v6848_v47 = vpop.permute.xlu0 %6847  ;;  %v6843_v13 = vpop.permute.xlu1 %6842  ;;  %v6973_v40 = vmax.f32 %v6941_v2, 0.0  ;;  %v6974_v42 = vmax.f32 %v6942_v49, 0.0  ;;  %v6975_v16 = vmax.f32 %v6943_v0, 0.0 }
0x2603   :  { %v6880_v33 = vmul.f32 %v6848_v47, %v12956_v32  ;;  %v6881_v37 = vmul.f32 %v6848_v47, %v12958_v24  ;;  %v6882_v41 = vmul.f32 %v6848_v47, %v12970_v6  ;;  %v6883_v12 = vmul.f32 %v6848_v47, %v12978_v31 }
0x2604   :  { %v6876_v50 = vmul.f32 %v6843_v13, %v12944_v29  ;;  %v7001_v63 = vpack.c.bf16 %v6977_v23, %v6973_v40  ;;  %v7000_v11 = vpack.c.bf16 %v6976_v60, %v6972_v39  ;;  %v6877_v15 = vmul.f32 %v6843_v13, %v12948_v54 }
0x2605   :  { %v6878_v43 = vmul.f32 %v6843_v13, %v12963_v21  ;;  %v6879_v36 = vmul.f32 %v6843_v13, %v12966_v52  ;;  %v7002_v26 = vpack.c.bf16 %v6978_v27, %v6974_v42  ;;  %v7003_v24 = vpack.c.bf16 %v6979_v35, %v6975_v16  ;;  %v14137_v16 = vld [vmem:[#allocation44_spill] sm:$0xff] }
0x2606   :  { %v6920_v55 = vpop.permute.xlu0 %6919  ;;  %v6915_v32 = vpop.permute.xlu1 %6914  ;;  %7014 = vmatprep.subr.bf16.mxu0 %v7001_v63  ;;  %v7225_v63 = vld [vmem:[%s13227_s10 + $0x3] ss:$4 sm:$0xf] }
0x2607   :  { %v6952_v53 = vadd.f32 %v6920_v55, %v6880_v33  ;;  %v6953_v6 = vadd.f32 %v6920_v55, %v6881_v37  ;;  %v6954_v28 = vadd.f32 %v6920_v55, %v6882_v41  ;;  %v6955_v31 = vadd.f32 %v6920_v55, %v6883_v12  ;;  %7015 = vmatpush1.bf16.msra.mxu0 %v7000_v11 }
0x2608   :  { %v6948_v29 = vadd.f32 %v6915_v32, %v6876_v50  ;;  %v6949_v9 = vadd.f32 %v6915_v32, %v6877_v15  ;;  %v6950_v58 = vadd.f32 %v6915_v32, %v6878_v43  ;;  %7057 = vmatprep.subr.bf16.mxu1 %v7003_v24  ;;  %v6951_v34 = vadd.f32 %v6915_v32, %v6879_v36  ;;  %v7706_v50 = vld [vmem:[%s13226_s16] sm:$0xff]   ;;  %v14138_v15 = vld [vmem:[#allocation53_spill] sm:$0xff]  ;;  %v14140_v32 = vld [vmem:[#allocation35_spill] sm:$0xff] }
0x2609   :  { %v6984_v44 = vmax.f32 %v6952_v53, 0.0  ;;  %v6986_v54 = vmax.f32 %v6954_v28, 0.0  ;;  %v6985_v21 = vmax.f32 %v6953_v6, 0.0  ;;  %7058 = vmatpush1.bf16.msra.mxu1 %v7002_v26  ;;  %v6987_v61 = vmax.f32 %v6955_v31, 0.0  ;;  %v14139_v36 = vld [vmem:[#allocation45_spill] sm:$0xff] }
0x260a   :  { %v6980_v52 = vmax.f32 %v6948_v29, 0.0  ;;  %v6982_v56 = vmax.f32 %v6950_v58, 0.0  ;;  %v6858_v3 = vpop.permute.xlu0 %6857  ;;  %v6853_v14 = vpop.permute.xlu1 %6852  ;;  %v6981_v19 = vmax.f32 %v6949_v9, 0.0  ;;  %v6983_v8 = vmax.f32 %v6951_v34, 0.0 }
0x260b   :  { %v6888_v62 = vmul.f32 %v6858_v3, %v12980_v51  ;;  %v6889_v22 = vmul.f32 %v6858_v3, %v12982_v17  ;;  %v6890_v48 = vmul.f32 %v6858_v3, %v12992_v4  ;;  %v6891_v38 = vmul.f32 %v6858_v3, %v12996_v59 }
0x260c   :  { %v7005_v18 = vpack.c.bf16 %v6985_v21, %v6981_v19  ;;  %v7004_v7 = vpack.c.bf16 %v6984_v44, %v6980_v52  ;;  %v7006_v25 = vpack.c.bf16 %v6986_v54, %v6982_v56  ;;  %v7007_v46 = vpack.c.bf16 %v6987_v61, %v6983_v8  ;;  %v14141_v21 = vld [vmem:[#allocation52_spill] sm:$0xff]  ;;  %v14143_v8 = vld [vmem:[#allocation37_spill] sm:$0xff] }
0x260d   :  { %v6884_v1 = vmul.f32 %v6853_v14, %v12968_v57  ;;  %v6885_v2 = vmul.f32 %v6853_v14, %v12972_v20  ;;  %v6886_v60 = vmul.f32 %v6853_v14, %v12987_v30  ;;  %v6887_v49 = vmul.f32 %v6853_v14, %v12990_v10  ;;  %v14142_v19 = vld [vmem:[#allocation36_spill] sm:$0xff] }
0x260e   :  { %7016 = vmatprep.subr.bf16.mxu0 %v7005_v18  ;;  %v6930_v45 = vpop.permute.xlu0 %6929  ;;  %v6925_v51 = vpop.permute.xlu1 %6924  ;;  %7059 = vmatprep.subr.bf16.mxu1 %v7007_v46  ;;  %v7104_v11 = vrot.slane %v7225_v63, %v14137_v16  ;;  %v7108_v43 = vrot.slane %v7225_v63, %v14138_v15  ;;  %v7112_v55 = vrot.slane %v7225_v63, %v14139_v36  ;;  %v14145_v46 = vld [vmem:[#allocation5_spill] sm:$0xff] }
0x260f   :  { %v6960_v0 = vadd.f32 %v6930_v45, %v6888_v62  ;;  %v6961_v27 = vadd.f32 %v6930_v45, %v6889_v22  ;;  %v6962_v39 = vadd.f32 %v6930_v45, %v6890_v48  ;;  %v6963_v17 = vadd.f32 %v6930_v45, %v6891_v38  ;;  %7017 = vmatpush1.bf16.msra.mxu0 %v7004_v7  ;;  %v14146_v38 = vld [vmem:[#allocation38_spill] sm:$0xff] }
0x2610   :  { %7060 = vmatpush1.bf16.msra.mxu1 %v7006_v25  ;;  %v6956_v4 = vadd.f32 %v6925_v51, %v6884_v1  ;;  %v6957_v59 = vadd.f32 %v6925_v51, %v6885_v2  ;;  %v6958_v47 = vadd.f32 %v6925_v51, %v6886_v60  ;;  %v6959_v20 = vadd.f32 %v6925_v51, %v6887_v49  ;;  %v14147_v1 = vld [vmem:[#allocation60_spill] sm:$0xff] }
0x2611   :  { %v6992_v13 = vmax.f32 %v6960_v0, 0.0  ;;  %v6993_v40 = vmax.f32 %v6961_v27, 0.0  ;;  %v6994_v57 = vmax.f32 %v6962_v39, 0.0  ;;  %v6995_v23 = vmax.f32 %v6963_v17, 0.0 }
0x2612   :  { %v6988_v42 = vmax.f32 %v6956_v4, 0.0  ;;  %v6989_v30 = vmax.f32 %v6957_v59, 0.0  ;;  %v6990_v35 = vmax.f32 %v6958_v47, 0.0  ;;  %v6991_v10 = vmax.f32 %v6959_v20, 0.0 }
0x2613   :  { %v7116_v24 = vrot.slane %v7225_v63, %v14140_v32 }
0x2614   :  { %v7008_v33 = vpack.c.bf16 %v6992_v13, %v6988_v42  ;;  %v7010_v37 = vpack.c.bf16 %v6994_v57, %v6990_v35  ;;  %v7009_v41 = vpack.c.bf16 %v6993_v40, %v6989_v30  ;;  %v7011_v12 = vpack.c.bf16 %v6995_v23, %v6991_v10 }
0x2616   :  { %7018 = vmatprep.subr.bf16.mxu0 %v7009_v41  ;;  %7061 = vmatprep.subr.bf16.mxu1 %v7011_v12 }
0x2617   :  { %7019 = vmatpush1.bf16.msra.mxu0 %v7008_v33  ;;  %7062 = vmatpush1.bf16.msra.mxu1 %v7010_v37 }
0x261a   :  { %7223 = vmatmul.mubr.msk.bf16.vlgmr.msra.gmra.mrb[112].mxu0 %vm14135_vm13, %v7706_v50  ;;  %7224 = vmatmul.mubr.msk.bf16.vlgmr.msra.gmra.mrb[96].mxu1 %vm14136_vm7, %v7706_v50 }
0x26ed   :  { %v7046_v26 = vpop.f32.mrb[112].mxu0  ;;  %v7089_v28 = vpop.f32.mrb[96].mxu1 }
0x26ee   :  { %v7121_v53 = vmul.f32 %v7104_v11, %v7046_v26  ;;  %v7048_v6 = vpop.f32.mrb[113].mxu0  ;;  %v7123_v58 = vmul.f32 %v7112_v55, %v7089_v28  ;;  %v7091_v44 = vpop.f32.mrb[97].mxu1 }
0x26ef   :  { %v7122_v31 = vmul.f32 %v7108_v43, %v7048_v6  ;;  %v7050_v29 = vpop.f32.mrb[114].mxu0  ;;  %v7124_v56 = vmul.f32 %v7116_v24, %v7091_v44  ;;  %v7093_v3 = vpop.f32.mrb[98].mxu1 }
0x26f0   :  { %v7129_v9 = vadd.f32 %v7121_v53, %v12254_v5  ;;  %v7125_v54 = vmul.f32 %v7104_v11, %v7050_v29  ;;  %v7052_v34 = vpop.f32.mrb[115].mxu0  ;;  %v7131_v61 = vadd.f32 %v7123_v58, %v14142_v19  ;;  %v7127_v62 = vmul.f32 %v7112_v55, %v7093_v3  ;;  %v7095_v7 = vpop.f32.mrb[99].mxu1  ;;  %v14144_v5 = vld [vmem:[#allocation54_spill] sm:$0xff] }
0x26f1   :  { %v7130_v52 = vadd.f32 %v7122_v31, %v14141_v21  ;;  %v7126_v14 = vmul.f32 %v7108_v43, %v7052_v34  ;;  %v7132_v25 = vadd.f32 %v7124_v56, %v14144_v5  ;;  %v7128_v48 = vmul.f32 %v7116_v24, %v7095_v7 }
0x26f2   :  { %7137 = vst [vmem:[%s13228_s17] sm:$0xff] %v7129_v9  ;;  %v7133_v18 = vadd.f32 %v7125_v54, %v14143_v8  ;;  %7139 = vst [vmem:[%s13228_s17 + $0x10] sm:$0xff] %v7131_v61  ;;  %v7135_v45 = vadd.f32 %v7127_v62, %v14146_v38 }
0x26f3   :  { %7138 = vst [vmem:[%s13228_s17 + $0x8] sm:$0xff] %v7130_v52  ;;  %v7134_v22 = vadd.f32 %v7126_v14, %v14145_v46  ;;  %7140 = vst [vmem:[%s13228_s17 + $0x18] sm:$0xff] %v7132_v25  ;;  %v7136_v2 = vadd.f32 %v7128_v48, %v14147_v1 }
0x26f4   :  { %7141 = vst [vmem:[%s13228_s17 + $0x20] sm:$0xff] %v7133_v18  ;;  %7143 = vst [vmem:[%s13228_s17 + $0x30] sm:$0xff] %v7135_v45 }
0x26f5   :  { %7142 = vst [vmem:[%s13228_s17 + $0x28] sm:$0xff] %v7134_v22  ;;  %7144 = vst [vmem:[%s13228_s17 + $0x38] sm:$0xff] %v7136_v2 }

</bundles_post_ra>
